<compile_context>
chip_gen: v6e
topology: v6e:2x2x1
jax: 0.10.0
libtpu: 0.0.40
codegen_flags: <defaults>
</compile_context>

<pallas_src>
import functools

import jax
import jax.numpy as jnp
from jax import lax
from jax.experimental import pallas as pl
from jax.experimental.pallas import tpu as pltpu

BN_EPS = 1e-5  # PyTorch BatchNorm default eps


def _detect_vmem_limit():
    # 64 MiB scoped limit on 128-MiB-VMEM parts (v5e/v6e), 32 MiB on v7x (64 MiB VMEM).
    try:
        info = pltpu.get_tpu_info()
        cap = None
        for name in ("vmem_capacity_bytes", "vmem_size_bytes", "vmem_bytes"):
            v = getattr(info, name, None)
            if v:
                cap = int(v)
                break
        if cap is not None:
            return (64 << 20) if cap >= (128 << 20) else (32 << 20)
    except Exception:
        pass
    return 32 << 20  # safe on every generation


VMEM_LIMIT = _detect_vmem_limit()


def _round_up(x, m):
    return (x + m - 1) // m * m


def _apply_act(x, act):
    if act == "leaky_relu":
        return jnp.where(x > 0, x, 0.2 * x)
    if act == "relu":
        return jnp.maximum(x, 0.0)
    if act == "tanh":
        return jnp.tanh(x)
    return x


# ---------------------------------------------------------------------------
# Kernel 1: tiled bf16 matmul (ConvTranspose2d GEMM).  bf16 in / bf16 out,
# f32 MXU accumulation, lane-dense N (prepadded to 128), M/N 'parallel' grid.
# ---------------------------------------------------------------------------
def _matmul_kernel(x_ref, w_ref, o_ref):
    o_ref[...] = jnp.dot(x_ref[...], w_ref[...],
                         preferred_element_type=jnp.float32).astype(o_ref.dtype)


def pallas_matmul(x, w_packed, *, tm_target=512):
    """(M, K) @ (K, N_pad) -> (M, N_pad) bf16.  N_pad % 128 == 0 (prepacked weight).
    tm chosen so the M axis has >= 2 tiles where possible (feeds both v7x TCs)."""
    M, K = x.shape
    Kw, N_pad = w_packed.shape
    assert K == Kw and N_pad % 128 == 0
    m_pad8 = _round_up(M, 8)
    tm = min(tm_target, max(8, _round_up(pl.cdiv(m_pad8, 2), 8)))
    M_pad = _round_up(M, tm)
    if N_pad <= 512:
        tn = N_pad
    else:
        tn = 512 if N_pad % 512 == 0 else (256 if N_pad % 256 == 0 else 128)

    xb = x if x.dtype == jnp.bfloat16 else x.astype(jnp.bfloat16)
    if M_pad != M:
        xb = jnp.pad(xb, ((0, M_pad - M), (0, 0)))

    out = pl.pallas_call(
        _matmul_kernel,
        out_shape=jax.ShapeDtypeStruct((M_pad, N_pad), jnp.bfloat16),
        grid=(M_pad // tm, N_pad // tn),
        in_specs=[
            pl.BlockSpec((tm, K), lambda i, j: (i, 0)),
            pl.BlockSpec((K, tn), lambda i, j: (0, j)),
        ],
        out_specs=pl.BlockSpec((tm, tn), lambda i, j: (i, j)),
        compiler_params=pltpu.CompilerParams(
            dimension_semantics=("parallel", "parallel"),
            vmem_limit_bytes=VMEM_LIMIT),
    )(xb, w_packed)
    return out[:M] if M_pad != M else out


# ---------------------------------------------------------------------------
# ConvTranspose2d = matmul (Pallas) + col2im overlap-add (single-pass XLA glue).
# ---------------------------------------------------------------------------
def _col2im_s2p1(y, out_dtype=jnp.bfloat16):
    """K=4 / stride=2 / padding=1 overlap-add via the 4-phase decomposition:
    each output element is written once (sum of <= 4 shifted taps)."""
    # TODO(synk): overlapping strided output windows cannot be expressed with BlockSpec
    # block indices, so this overlap-add stays as (now single-pass) XLA glue.
    B, H, W, K, K2, C = y.shape
    assert K == 4 and K2 == 4
    yp = jnp.pad(y.astype(jnp.float32), ((0, 0), (1, 1), (1, 1), (0, 0), (0, 0), (0, 0)))

    def phase(ph, pw):
        return (yp[:, 1:H + 2, 1:W + 2, ph,     pw,     :] +
                yp[:, 0:H + 1, 1:W + 2, ph + 2, pw,     :] +
                yp[:, 1:H + 2, 0:W + 1, ph,     pw + 2, :] +
                yp[:, 0:H + 1, 0:W + 1, ph + 2, pw + 2, :]).astype(out_dtype)

    row0 = jnp.stack([phase(0, 0), phase(0, 1)], axis=3)     # (B, H+1, W+1, 2, C)
    row1 = jnp.stack([phase(1, 0), phase(1, 1)], axis=3)
    full = jnp.stack([row0, row1], axis=2)                   # (B, H+1, 2, W+1, 2, C)
    full = full.reshape(B, 2 * (H + 1), 2 * (W + 1), C)      # (B, 2H+2, 2W+2, C)
    return full[:, 1:2 * H + 1, 1:2 * W + 1, :]               # crop padding=1


def _col2im_add(y, *, stride, padding):
    # Generic fallback (unused for this model's stride-2 layers).
    B, H, W, K, _, C = y.shape
    Hf = (H - 1) * stride + K
    Wf = (W - 1) * stride + K
    out = jnp.zeros((B, Hf, Wf, C), jnp.float32)
    for kh in range(K):
        for kw in range(K):
            out = out.at[:, kh:kh + (H - 1) * stride + 1:stride,
                            kw:kw + (W - 1) * stride + 1:stride, :].add(
                                y[:, :, :, kh, kw, :].astype(jnp.float32))
    return out[:, padding:Hf - padding, padding:Wf - padding, :].astype(y.dtype)


def conv_transpose_pallas(x_nhwc, w_packed, cout, *, stride, padding):
    """ConvTranspose2d (bias=False, K=4) as lane-dense GEMM + phase col2im."""
    B, H, W, Cin = x_nhwc.shape
    K = 4
    n_real = K * K * cout
    y = pallas_matmul(x_nhwc.reshape(B * H * W, Cin), w_packed)
    y = y[:, :n_real].reshape(B, H, W, K, K, cout)
    if stride == 2 and padding == 1:
        return _col2im_s2p1(y)
    return _col2im_add(y, stride=stride, padding=padding)


# ---------------------------------------------------------------------------
# Kernel 2: two-sweep BatchNorm(train) + activation on a lane-dense (B*H, W*C) slab.
#   sweep 0: accumulate per-lane sum / sumsq into VMEM scratch across row tiles
#   sweep 1 (tile 0): fold to per-channel stats once, cache lane_scale / lane_shift
#   sweep 1 (all tiles): normalise, activate, store bf16
# ---------------------------------------------------------------------------
def _bn_act_kernel(x_ref, g_ref, b_ref, fold_ref, unfold_ref, o_ref,
                   s_sum, s_ssq, s_scale, s_shift, *, inv_count, act):
    p = pl.program_id(0)   # sweep: 0 = stats, 1 = normalise + activate
    t = pl.program_id(1)   # row-tile index

    @pl.when(jnp.logical_and(p == 0, t == 0))
    def _():
        s_sum[...] = jnp.zeros_like(s_sum)
        s_ssq[...] = jnp.zeros_like(s_ssq)
        # Harmless defined value for the sweep-0 output block (never otherwise
        # written), so any writeback policy can never flush uninitialized VMEM.
        o_ref[...] = jnp.zeros_like(o_ref)

    @pl.when(p == 0)
    def _():
        x = x_ref[...].astype(jnp.float32)
        s_sum[...] = s_sum[...] + jnp.sum(x, axis=0, keepdims=True)
        s_ssq[...] = s_ssq[...] + jnp.sum(x * x, axis=0, keepdims=True)

    @pl.when(jnp.logical_and(p == 1, t == 0))
    def _():
        # Fold per-lane partials (1, W*C) -> per-channel (1, C) once per call,
        # compute the affine normalisation, broadcast back to the lane layout
        # and cache in scratch (hoisted out of the per-tile body).
        ch_sum = jnp.dot(s_sum[...], fold_ref[...], preferred_element_type=jnp.float32)
        ch_ssq = jnp.dot(s_ssq[...], fold_ref[...], preferred_element_type=jnp.float32)
        mean = ch_sum * inv_count
        var = jnp.maximum(ch_ssq * inv_count - mean * mean, 0.0)
        scale = g_ref[...] * lax.rsqrt(var + BN_EPS)
        shift = b_ref[...] - mean * scale
        s_scale[...] = jnp.dot(scale, unfold_ref[...], preferred_element_type=jnp.float32)
        s_shift[...] = jnp.dot(shift, unfold_ref[...], preferred_element_type=jnp.float32)

    @pl.when(p == 1)
    def _():
        x = x_ref[...].astype(jnp.float32)
        o_ref[...] = _apply_act(x * s_scale[...] + s_shift[...], act).astype(o_ref.dtype)


def bn_act_pallas(x_nhwc, gamma, beta, *, act, tr_cap=2048):
    B, H, W, C = x_nhwc.shape
    R, L = B * H, W * C
    x2 = x_nhwc.reshape(R, L)
    if x2.dtype != jnp.bfloat16:
        x2 = x2.astype(jnp.bfloat16)
    # keep double-buffered in+out tiles well inside the (generation-dependent) budget
    max_tr = max(8, (VMEM_LIMIT // (16 * L)) // 8 * 8)
    tr = min(_round_up(R, 8), tr_cap, max_tr)
    R_pad = _round_up(R, tr)
    if R_pad != R:
        x2 = jnp.pad(x2, ((0, R_pad - R), (0, 0)))           # zero rows: no effect on stats

    lane_ch = jnp.arange(L, dtype=jnp.int32) % C              # channel of each lane
    fold = (lane_ch[:, None] == jnp.arange(C, dtype=jnp.int32)[None, :]).astype(jnp.float32)

    kernel = functools.partial(_bn_act_kernel, inv_count=1.0 / float(B * H * W), act=act)
    out = pl.pallas_call(
        kernel,
        out_shape=jax.ShapeDtypeStruct((R_pad, L), jnp.bfloat16),
        grid=(2, R_pad // tr),                                # sweep axis outer, tiles inner
        in_specs=[
            pl.BlockSpec((tr, L), lambda p, t: (t, 0)),
            pl.BlockSpec((1, C), lambda p, t: (0, 0)),
            pl.BlockSpec((1, C), lambda p, t: (0, 0)),
            pl.BlockSpec((L, C), lambda p, t: (0, 0)),
            pl.BlockSpec((C, L), lambda p, t: (0, 0)),
        ],
        # sweep 0 pins the output block index to 0 (defensively zero-initialised);
        # sweep 1 writes every row tile exactly once.
        out_specs=pl.BlockSpec((tr, L), lambda p, t: (t * p, 0)),
        scratch_shapes=[pltpu.VMEM((1, L), jnp.float32),      # s_sum
                        pltpu.VMEM((1, L), jnp.float32),      # s_ssq
                        pltpu.VMEM((1, L), jnp.float32),      # s_scale
                        pltpu.VMEM((1, L), jnp.float32)],     # s_shift
        compiler_params=pltpu.CompilerParams(
            dimension_semantics=("arbitrary", "arbitrary"),
            vmem_limit_bytes=VMEM_LIMIT),
    )(x2,
      gamma.reshape(1, C).astype(jnp.float32),
      beta.reshape(1, C).astype(jnp.float32),
      fold, fold.T)
    return out[:R].reshape(B, H, W, C)


# ---------------------------------------------------------------------------
# Kernel 3: elementwise activation only (final Tanh layer, no BN), lane-dense, tiled.
# ---------------------------------------------------------------------------
def _act_kernel(x_ref, o_ref, *, act):
    o_ref[...] = _apply_act(x_ref[...].astype(jnp.float32), act).astype(o_ref.dtype)


def act_pallas(x_nhwc, *, act, out_dtype=jnp.float32, tr_cap=2048):
    B, H, W, C = x_nhwc.shape
    R, L = B * H, W * C
    x2 = x_nhwc.reshape(R, L)
    if x2.dtype != jnp.bfloat16:
        x2 = x2.astype(jnp.bfloat16)
    max_tr = max(8, (VMEM_LIMIT // (16 * L)) // 8 * 8)
    tr = min(_round_up(R, 8), tr_cap, max_tr)
    R_pad = _round_up(R, tr)
    if R_pad != R:
        x2 = jnp.pad(x2, ((0, R_pad - R), (0, 0)))
    out = pl.pallas_call(
        functools.partial(_act_kernel, act=act),
        out_shape=jax.ShapeDtypeStruct((R_pad, L), out_dtype),
        grid=(R_pad // tr,),
        in_specs=[pl.BlockSpec((tr, L), lambda t: (t, 0))],
        out_specs=pl.BlockSpec((tr, L), lambda t: (t, 0)),
        compiler_params=pltpu.CompilerParams(
            dimension_semantics=("parallel",),
            vmem_limit_bytes=VMEM_LIMIT),
    )(x2)
    return out[:R].reshape(B, H, W, C)


# ---------------------------------------------------------------------------
# Kernel 4: fused text projection (Linear + BN1d + LeakyReLU) + layer-0 ConvT matmul.
# Layer-0 input is 1x1 spatial, so the ConvTranspose is exactly
#   [noise, enc] @ W0(Cin, 16*Cout) = noise @ W0_top + enc @ W0_bot,
# and the (B, 16*C0) result reshapes directly to the (B, 4, 4, C0) NHWC activation.
# ---------------------------------------------------------------------------
def _proj_layer0_kernel(noise_ref, text_ref, pw_ref, pb_ref, pg_ref, pbt_ref,
                        w0n_ref, w0e_ref, o_ref):
    enc = jnp.dot(text_ref[...], pw_ref[...], preferred_element_type=jnp.float32)
    enc = enc + pb_ref[...]
    mean = jnp.mean(enc, axis=0, keepdims=True)               # BN1d over the full batch
    var = jnp.mean((enc - mean) ** 2, axis=0, keepdims=True)
    enc = (enc - mean) * lax.rsqrt(var + BN_EPS) * pg_ref[...] + pbt_ref[...]
    enc = jnp.where(enc > 0.0, enc, 0.2 * enc)                # LeakyReLU(0.2)
    y = jnp.dot(noise_ref[...], w0n_ref[...], preferred_element_type=jnp.float32)
    y = y + jnp.dot(enc.astype(w0e_ref.dtype), w0e_ref[...],
                    preferred_element_type=jnp.float32)
    o_ref[...] = y.astype(o_ref.dtype)


def proj_layer0_pallas(noise, text, pk, c0):
    B, Z = noise.shape
    E, Rd = pk["proj_w"].shape
    w0n, w0e = pk["conv0_wn"], pk["conv0_we"]
    N0p = w0n.shape[1]
    out = pl.pallas_call(
        _proj_layer0_kernel,
        out_shape=jax.ShapeDtypeStruct((B, N0p), jnp.bfloat16),
        grid=(1,),
        in_specs=[pl.BlockSpec((B, Z), lambda i: (0, 0)),
                  pl.BlockSpec((B, E), lambda i: (0, 0)),
                  pl.BlockSpec((E, Rd), lambda i: (0, 0)),
                  pl.BlockSpec((1, Rd), lambda i: (0, 0)),
                  pl.BlockSpec((1, Rd), lambda i: (0, 0)),
                  pl.BlockSpec((1, Rd), lambda i: (0, 0)),
                  pl.BlockSpec((Z, N0p), lambda i: (0, 0)),
                  pl.BlockSpec((Rd, N0p), lambda i: (0, 0))],
        out_specs=pl.BlockSpec((B, N0p), lambda i: (0, 0)),
        compiler_params=pltpu.CompilerParams(
            dimension_semantics=("arbitrary",),
            vmem_limit_bytes=VMEM_LIMIT),
    )(noise.astype(jnp.bfloat16), text.astype(jnp.float32),
      pk["proj_w"], pk["proj_b"], pk["proj_gamma"], pk["proj_beta"], w0n, w0e)
    n0 = 16 * c0
    return out[:, :n0].reshape(B, 4, 4, c0)


# ---------------------------------------------------------------------------
# Parameters (deterministic synthetic init), one-time weight prepack, forward.
# ---------------------------------------------------------------------------
LAYER_CFG = [
    # (stride, padding, has_bn, activation)
    (1, 0, True, "leaky_relu"),
    (2, 1, True, "relu"),
    (2, 1, True, "relu"),
    (2, 1, True, "relu"),
    (2, 1, True, "relu"),
    (2, 1, False, "tanh"),
]


def init_params(key, noise_size, feature_size, num_channels,
                embedding_size, reduced_dim_size):
    keys = jax.random.split(key, 20)
    f = feature_size
    p = {}
    p["proj_w"] = 0.02 * jax.random.normal(keys[0], (embedding_size, reduced_dim_size), jnp.float32)
    p["proj_b"] = 0.02 * jax.random.normal(keys[1], (reduced_dim_size,), jnp.float32)
    p["proj_gamma"] = 1.0 + 0.1 * jax.random.normal(keys[2], (reduced_dim_size,), jnp.float32)
    p["proj_beta"] = 0.1 * jax.random.normal(keys[3], (reduced_dim_size,), jnp.float32)
    chans = [noise_size + reduced_dim_size, f * 8, f * 4, f * 2, f, f, num_channels]
    for i in range(6):
        cin, cout = chans[i], chans[i + 1]
        p[f"conv{i}_w"] = 0.02 * jax.random.normal(keys[4 + 2 * i], (cin, cout, 4, 4), jnp.float32)
        if LAYER_CFG[i][2]:
            p[f"conv{i}_gamma"] = 1.0 + 0.1 * jax.random.normal(keys[5 + 2 * i], (cout,), jnp.float32)
            p[f"conv{i}_beta"] = jnp.zeros((cout,), jnp.float32)
    return p


def prepack_params(params, *, noise_size):
    """One-time weight transformation (outside the per-call forward): ConvTranspose
    weights -> (Cin, 16*Cout) bf16 matrices zero-padded to a 128-lane multiple, plus
    the layer-0 noise/text split and f32 projection / BN parameters."""
    pk = {}
    Rd = params["proj_w"].shape[1]
    pk["proj_w"] = params["proj_w"].astype(jnp.float32)
    pk["proj_b"] = params["proj_b"].reshape(1, Rd).astype(jnp.float32)
    pk["proj_gamma"] = params["proj_gamma"].reshape(1, Rd).astype(jnp.float32)
    pk["proj_beta"] = params["proj_beta"].reshape(1, Rd).astype(jnp.float32)

    w0 = params["conv0_w"]                                    # (Z+Rd, C0, 4, 4)
    Cin0, C0, K, _ = w0.shape
    w0m = jnp.transpose(w0, (0, 2, 3, 1)).reshape(Cin0, K * K * C0)
    n0p = _round_up(K * K * C0, 128)
    if n0p != K * K * C0:
        w0m = jnp.pad(w0m, ((0, 0), (0, n0p - K * K * C0)))
    w0m = w0m.astype(jnp.bfloat16)
    pk["conv0_wn"] = w0m[:noise_size]
    pk["conv0_we"] = w0m[noise_size:]
    pk["conv0_gamma"] = params["conv0_gamma"]
    pk["conv0_beta"] = params["conv0_beta"]

    couts = [C0]
    for i in range(1, 6):
        w = params[f"conv{i}_w"]                              # (Cin, Cout, 4, 4)
        Cin, Cout, K, _ = w.shape
        wm = jnp.transpose(w, (0, 2, 3, 1)).reshape(Cin, K * K * Cout)
        npad = _round_up(K * K * Cout, 128)
        if npad != K * K * Cout:
            wm = jnp.pad(wm, ((0, 0), (0, npad - K * K * Cout)))
        pk[f"conv{i}_wmat"] = wm.astype(jnp.bfloat16)
        if LAYER_CFG[i][2]:
            pk[f"conv{i}_gamma"] = params[f"conv{i}_gamma"]
            pk[f"conv{i}_beta"] = params[f"conv{i}_beta"]
        couts.append(Cout)
    return pk, tuple(couts)


def dcgan_forward(pk, noise, text_embeddings, *, couts):
    # TODO(synk): full per-layer GEMM + col2im + BN fusion into a single pallas_call
    # (the largest remaining win at this toy size) is skipped: in-kernel 6-D
    # interleave/crop relayouts are a Mosaic lowering risk.
    x = proj_layer0_pallas(noise, text_embeddings, pk, couts[0])       # (B,4,4,C0) bf16
    x = bn_act_pallas(x, pk["conv0_gamma"], pk["conv0_beta"], act="leaky_relu")
    for i in range(1, 6):
        stride, pad, has_bn, act = LAYER_CFG[i]
        x = conv_transpose_pallas(x, pk[f"conv{i}_wmat"], couts[i],
                                  stride=stride, padding=pad)
        if has_bn:
            x = bn_act_pallas(x, pk[f"conv{i}_gamma"], pk[f"conv{i}_beta"], act=act)
        else:
            x = act_pallas(x, act=act, out_dtype=jnp.float32)
    return jnp.transpose(x, (0, 3, 1, 2))                              # PyTorch NCHW


# Pure-JAX reference (independent conv engine, same bf16 operand quantisation).
def dcgan_forward_ref(params, noise, text_embeddings):
    y = text_embeddings @ params["proj_w"] + params["proj_b"]
    mean = jnp.mean(y, axis=0, keepdims=True)
    var = jnp.mean((y - mean) ** 2, axis=0, keepdims=True)
    y = (y - mean) * lax.rsqrt(var + BN_EPS) * params["proj_gamma"] + params["proj_beta"]
    y = jnp.where(y > 0, y, 0.2 * y)
    x = jnp.concatenate([noise, y], axis=1)[:, None, None, :]
    for i, (stride, pad, has_bn, act) in enumerate(LAYER_CFG):
        w = params[f"conv{i}_w"]
        K = w.shape[2]
        wf = jnp.transpose(jnp.flip(w, axis=(2, 3)), (2, 3, 0, 1)).astype(jnp.bfloat16)
        pe = K - 1 - pad
        x = lax.conv_general_dilated(x.astype(jnp.bfloat16), wf, window_strides=(1, 1),
                                     padding=[(pe, pe), (pe, pe)],
                                     lhs_dilation=(stride, stride),
                                     dimension_numbers=("NHWC", "HWIO", "NHWC"),
                                     preferred_element_type=jnp.float32)
        if has_bn:
            mean = jnp.mean(x, axis=(0, 1, 2), keepdims=True)
            var = jnp.mean((x - mean) ** 2, axis=(0, 1, 2), keepdims=True)
            x = (x - mean) * lax.rsqrt(var + BN_EPS) * params[f"conv{i}_gamma"] + params[f"conv{i}_beta"]
        x = _apply_act(x, act)
    return jnp.transpose(x, (0, 3, 1, 2))


if __name__ == "__main__":
    # Small, module-consistent config (scaled-down DCGAN defaults).
    B = 2
    noise_size, feature_size, num_channels = 16, 4, 3
    embedding_size, reduced_dim_size = 32, 16

    key = jax.random.PRNGKey(0)
    kp, kn, kt = jax.random.split(key, 3)
    params = init_params(kp, noise_size, feature_size, num_channels,
                         embedding_size, reduced_dim_size)
    noise = jax.random.normal(kn, (B, noise_size), jnp.float32)
    text_embeddings = jax.random.normal(kt, (B, embedding_size), jnp.float32)

    packed, couts = prepack_params(params, noise_size=noise_size)      # one-time prepack
    fwd = jax.jit(functools.partial(dcgan_forward, couts=couts))
    out = jax.block_until_ready(fwd(packed, noise, text_embeddings))
    assert out.shape == (B, num_channels, 128, 128), out.shape
    assert bool(jnp.all(jnp.isfinite(out)))

    ref = jax.block_until_ready(jax.jit(dcgan_forward_ref)(params, noise, text_embeddings))
    assert float(jnp.max(jnp.abs(out - ref))) < 5e-2

    print("KERNEL_OK")
</pallas_src>

<mosaic_0001>
module attributes {stable_mosaic.version = 11 : i64} {
  func.func @_proj_layer0_kernel(%arg0: i32, %arg1: memref<2x16xbf16, #tpu.memory_space<vmem>>, %arg2: memref<2x32xf32, #tpu.memory_space<vmem>>, %arg3: memref<32x16xf32, #tpu.memory_space<vmem>>, %arg4: memref<1x16xf32, #tpu.memory_space<vmem>>, %arg5: memref<1x16xf32, #tpu.memory_space<vmem>>, %arg6: memref<1x16xf32, #tpu.memory_space<vmem>>, %arg7: memref<16x512xbf16, #tpu.memory_space<vmem>>, %arg8: memref<16x512xbf16, #tpu.memory_space<vmem>>, %arg9: memref<2x512xbf16, #tpu.memory_space<vmem>>) attributes {dimension_semantics = [#tpu.dimension_semantics<arbitrary>], iteration_bounds = array<i64: 1>, scalar_prefetch = 0 : i64, scratch_operands = 0 : i64, tpu.core_type = #tpu.core_type<tc>, window_params = [{pipeline_mode = #tpu.pipeline_mode<synchronous>, transform_indices = @transform_0, window_bounds = array<i64: 2, 16>}, {pipeline_mode = #tpu.pipeline_mode<synchronous>, transform_indices = @transform_1, window_bounds = array<i64: 2, 32>}, {pipeline_mode = #tpu.pipeline_mode<synchronous>, transform_indices = @transform_2, window_bounds = array<i64: 32, 16>}, {pipeline_mode = #tpu.pipeline_mode<synchronous>, transform_indices = @transform_3, window_bounds = array<i64: 1, 16>}, {pipeline_mode = #tpu.pipeline_mode<synchronous>, transform_indices = @transform_4, window_bounds = array<i64: 1, 16>}, {pipeline_mode = #tpu.pipeline_mode<synchronous>, transform_indices = @transform_5, window_bounds = array<i64: 1, 16>}, {pipeline_mode = #tpu.pipeline_mode<synchronous>, transform_indices = @transform_6, window_bounds = array<i64: 16, 512>}, {pipeline_mode = #tpu.pipeline_mode<synchronous>, transform_indices = @transform_7, window_bounds = array<i64: 16, 512>}, {pipeline_mode = #tpu.pipeline_mode<synchronous>, transform_indices = @transform_8, window_bounds = array<i64: 2, 512>}]} {
    %c0 = arith.constant 0 : index
    %c0_0 = arith.constant 0 : index
    %0 = vector.load %arg2[%c0, %c0_0] : memref<2x32xf32, #tpu.memory_space<vmem>>, vector<2x32xf32>
    %c0_1 = arith.constant 0 : index
    %c0_2 = arith.constant 0 : index
    %1 = vector.load %arg3[%c0_1, %c0_2] : memref<32x16xf32, #tpu.memory_space<vmem>>, vector<32x16xf32>
    %cst = arith.constant dense<0.000000e+00> : vector<2x16xf32>
    %2 = tpu.matmul %0, %1, %cst {dimension_numbers = #tpu.dot_dimension_numbers<[1], [0], [0], [1], [0, 0, 1, 1], [], []>} : vector<2x32xf32>, vector<32x16xf32>, vector<2x16xf32> -> vector<2x16xf32>
    %c0_3 = arith.constant 0 : index
    %c0_4 = arith.constant 0 : index
    %3 = vector.load %arg4[%c0_3, %c0_4] : memref<1x16xf32, #tpu.memory_space<vmem>>, vector<1x16xf32>
    %4 = vector.broadcast %3 : vector<1x16xf32> to vector<2x16xf32>
    %5 = arith.addf %2, %4 : vector<2x16xf32>
    %cst_5 = arith.constant dense<0.000000e+00> : vector<16xf32>
    %6 = vector.multi_reduction <add>, %5, %cst_5 [0] : vector<2x16xf32> to vector<16xf32>
    %7 = vector.shape_cast %6 : vector<16xf32> to vector<1x16xf32>
    %cst_6 = arith.constant 2.000000e+00 : f32
    %8 = vector.broadcast %cst_6 : f32 to vector<1x16xf32>
    %9 = arith.divf %7, %8 : vector<1x16xf32>
    %10 = vector.broadcast %9 : vector<1x16xf32> to vector<2x16xf32>
    %11 = arith.subf %5, %10 : vector<2x16xf32>
    %12 = arith.mulf %11, %11 : vector<2x16xf32>
    %cst_7 = arith.constant dense<0.000000e+00> : vector<16xf32>
    %13 = vector.multi_reduction <add>, %12, %cst_7 [0] : vector<2x16xf32> to vector<16xf32>
    %14 = vector.shape_cast %13 : vector<16xf32> to vector<1x16xf32>
    %cst_8 = arith.constant 2.000000e+00 : f32
    %15 = vector.broadcast %cst_8 : f32 to vector<1x16xf32>
    %16 = arith.divf %14, %15 : vector<1x16xf32>
    %17 = vector.broadcast %9 : vector<1x16xf32> to vector<2x16xf32>
    %18 = arith.subf %5, %17 : vector<2x16xf32>
    %cst_9 = arith.constant 9.99999974E-6 : f32
    %19 = vector.broadcast %cst_9 : f32 to vector<1x16xf32>
    %20 = arith.addf %16, %19 : vector<1x16xf32>
    %21 = math.rsqrt %20 : vector<1x16xf32>
    %22 = vector.broadcast %21 : vector<1x16xf32> to vector<2x16xf32>
    %23 = arith.mulf %18, %22 : vector<2x16xf32>
    %c0_10 = arith.constant 0 : index
    %c0_11 = arith.constant 0 : index
    %24 = vector.load %arg5[%c0_10, %c0_11] : memref<1x16xf32, #tpu.memory_space<vmem>>, vector<1x16xf32>
    %25 = vector.broadcast %24 : vector<1x16xf32> to vector<2x16xf32>
    %26 = arith.mulf %23, %25 : vector<2x16xf32>
    %c0_12 = arith.constant 0 : index
    %c0_13 = arith.constant 0 : index
    %27 = vector.load %arg6[%c0_12, %c0_13] : memref<1x16xf32, #tpu.memory_space<vmem>>, vector<1x16xf32>
    %28 = vector.broadcast %27 : vector<1x16xf32> to vector<2x16xf32>
    %29 = arith.addf %26, %28 : vector<2x16xf32>
    %cst_14 = arith.constant 0.000000e+00 : f32
    %30 = vector.broadcast %cst_14 : f32 to vector<2x16xf32>
    %31 = arith.cmpf ogt, %29, %30 : vector<2x16xf32>
    %cst_15 = arith.constant 2.000000e-01 : f32
    %32 = vector.broadcast %cst_15 : f32 to vector<2x16xf32>
    %33 = arith.mulf %32, %29 : vector<2x16xf32>
    %34 = arith.select %31, %29, %33 : vector<2x16xi1>, vector<2x16xf32>
    %c0_16 = arith.constant 0 : index
    %c0_17 = arith.constant 0 : index
    %35 = vector.load %arg1[%c0_16, %c0_17] : memref<2x16xbf16, #tpu.memory_space<vmem>>, vector<2x16xbf16>
    %c0_18 = arith.constant 0 : index
    %c0_19 = arith.constant 0 : index
    %36 = vector.load %arg7[%c0_18, %c0_19] : memref<16x512xbf16, #tpu.memory_space<vmem>>, vector<16x512xbf16>
    %cst_20 = arith.constant dense<0.000000e+00> : vector<2x512xf32>
    %37 = tpu.matmul %35, %36, %cst_20 {dimension_numbers = #tpu.dot_dimension_numbers<[1], [0], [0], [1], [0, 0, 1, 1], [], []>} : vector<2x16xbf16>, vector<16x512xbf16>, vector<2x512xf32> -> vector<2x512xf32>
    %38 = arith.truncf %34 : vector<2x16xf32> to vector<2x16xbf16>
    %c0_21 = arith.constant 0 : index
    %c0_22 = arith.constant 0 : index
    %39 = vector.load %arg8[%c0_21, %c0_22] : memref<16x512xbf16, #tpu.memory_space<vmem>>, vector<16x512xbf16>
    %cst_23 = arith.constant dense<0.000000e+00> : vector<2x512xf32>
    %40 = tpu.matmul %38, %39, %cst_23 {dimension_numbers = #tpu.dot_dimension_numbers<[1], [0], [0], [1], [0, 0, 1, 1], [], []>} : vector<2x16xbf16>, vector<16x512xbf16>, vector<2x512xf32> -> vector<2x512xf32>
    %41 = arith.addf %37, %40 : vector<2x512xf32>
    %42 = arith.truncf %41 : vector<2x512xf32> to vector<2x512xbf16>
    %c0_24 = arith.constant 0 : index
    %c0_25 = arith.constant 0 : index
    %43 = vector.load %arg9[%c0_24, %c0_25] : memref<2x512xbf16, #tpu.memory_space<vmem>>, vector<2x512xbf16>
    tpu.vector_store %arg9[%c0_24, %c0_25], %42 {strides = array<i32>} : memref<2x512xbf16, #tpu.memory_space<vmem>>, vector<2x512xbf16>,
    return
  }
  func.func @transform_0(%arg0: i32) -> (i32, i32) {
    %c0_i32 = arith.constant 0 : i32
    %c0_i32_0 = arith.constant 0 : i32
    %c0_i32_1 = arith.constant 0 : i32
    return %c0_i32, %c0_i32_0 : i32, i32
  }
  func.func @transform_1(%arg0: i32) -> (i32, i32) {
    %c0_i32 = arith.constant 0 : i32
    %c0_i32_0 = arith.constant 0 : i32
    %c0_i32_1 = arith.constant 0 : i32
    return %c0_i32, %c0_i32_0 : i32, i32
  }
  func.func @transform_2(%arg0: i32) -> (i32, i32) {
    %c0_i32 = arith.constant 0 : i32
    %c0_i32_0 = arith.constant 0 : i32
    %c0_i32_1 = arith.constant 0 : i32
    return %c0_i32, %c0_i32_0 : i32, i32
  }
  func.func @transform_3(%arg0: i32) -> (i32, i32) {
    %c0_i32 = arith.constant 0 : i32
    %c0_i32_0 = arith.constant 0 : i32
    %c0_i32_1 = arith.constant 0 : i32
    return %c0_i32, %c0_i32_0 : i32, i32
  }
  func.func @transform_4(%arg0: i32) -> (i32, i32) {
    %c0_i32 = arith.constant 0 : i32
    %c0_i32_0 = arith.constant 0 : i32
    %c0_i32_1 = arith.constant 0 : i32
    return %c0_i32, %c0_i32_0 : i32, i32
  }
  func.func @transform_5(%arg0: i32) -> (i32, i32) {
    %c0_i32 = arith.constant 0 : i32
    %c0_i32_0 = arith.constant 0 : i32
    %c0_i32_1 = arith.constant 0 : i32
    return %c0_i32, %c0_i32_0 : i32, i32
  }
  func.func @transform_6(%arg0: i32) -> (i32, i32) {
    %c0_i32 = arith.constant 0 : i32
    %c0_i32_0 = arith.constant 0 : i32
    %c0_i32_1 = arith.constant 0 : i32
    return %c0_i32, %c0_i32_0 : i32, i32
  }
  func.func @transform_7(%arg0: i32) -> (i32, i32) {
    %c0_i32 = arith.constant 0 : i32
    %c0_i32_0 = arith.constant 0 : i32
    %c0_i32_1 = arith.constant 0 : i32
    return %c0_i32, %c0_i32_0 : i32, i32
  }
  func.func @transform_8(%arg0: i32) -> (i32, i32) {
    %c0_i32 = arith.constant 0 : i32
    %c0_i32_0 = arith.constant 0 : i32
    %c0_i32_1 = arith.constant 0 : i32
    return %c0_i32, %c0_i32_0 : i32, i32
  }
}

module attributes {stable_mosaic.version = 11 : i64} {
  func.func @_matmul_kernel(%arg0: i32, %arg1: i32, %arg2: memref<16x32xbf16, #tpu.memory_space<vmem>>, %arg3: memref<32x256xbf16, #tpu.memory_space<vmem>>, %arg4: memref<16x256xbf16, #tpu.memory_space<vmem>>) attributes {dimension_semantics = [#tpu.dimension_semantics<parallel>, #tpu.dimension_semantics<parallel>], iteration_bounds = array<i64: 2, 1>, scalar_prefetch = 0 : i64, scratch_operands = 0 : i64, tpu.core_type = #tpu.core_type<tc>, window_params = [{transform_indices = @transform_0, window_bounds = array<i64: 16, 32>}, {transform_indices = @transform_1, window_bounds = array<i64: 32, 256>}, {transform_indices = @transform_2, window_bounds = array<i64: 16, 256>}]} {
    %c0 = arith.constant 0 : index
    %c0_0 = arith.constant 0 : index
    %0 = vector.load %arg2[%c0, %c0_0] : memref<16x32xbf16, #tpu.memory_space<vmem>>, vector<16x32xbf16>
    %c0_1 = arith.constant 0 : index
    %c0_2 = arith.constant 0 : index
    %1 = vector.load %arg3[%c0_1, %c0_2] : memref<32x256xbf16, #tpu.memory_space<vmem>>, vector<32x256xbf16>
    %cst = arith.constant dense<0.000000e+00> : vector<16x256xf32>
    %2 = tpu.matmul %0, %1, %cst {dimension_numbers = #tpu.dot_dimension_numbers<[1], [0], [0], [1], [0, 0, 1, 1], [], []>} : vector<16x32xbf16>, vector<32x256xbf16>, vector<16x256xf32> -> vector<16x256xf32>
    %3 = arith.truncf %2 : vector<16x256xf32> to vector<16x256xbf16>
    %c0_3 = arith.constant 0 : index
    %c0_4 = arith.constant 0 : index
    %4 = vector.load %arg4[%c0_3, %c0_4] : memref<16x256xbf16, #tpu.memory_space<vmem>>, vector<16x256xbf16>
    tpu.vector_store %arg4[%c0_3, %c0_4], %3 {strides = array<i32>} : memref<16x256xbf16, #tpu.memory_space<vmem>>, vector<16x256xbf16>,
    return
  }
  func.func @transform_0(%arg0: i32, %arg1: i32) -> (i32, i32) {
    %c0_i32 = arith.constant 0 : i32
    %c0_i32_0 = arith.constant 0 : i32
    return %arg0, %c0_i32 : i32, i32
  }
  func.func @transform_1(%arg0: i32, %arg1: i32) -> (i32, i32) {
    %c0_i32 = arith.constant 0 : i32
    %c0_i32_0 = arith.constant 0 : i32
    return %c0_i32, %arg1 : i32, i32
  }
  func.func @transform_2(%arg0: i32, %arg1: i32) -> (i32, i32) {
    %c0_i32 = arith.constant 0 : i32
    return %arg0, %arg1 : i32, i32
  }
}

module attributes {stable_mosaic.version = 11 : i64} {
  func.func @_bn_act_kernel(%arg0: i32, %arg1: i32, %arg2: memref<8x128xbf16, #tpu.memory_space<vmem>>, %arg3: memref<1x32xf32, #tpu.memory_space<vmem>>, %arg4: memref<1x32xf32, #tpu.memory_space<vmem>>, %arg5: memref<128x32xf32, #tpu.memory_space<vmem>>, %arg6: memref<32x128xf32, #tpu.memory_space<vmem>>, %arg7: memref<8x128xbf16, #tpu.memory_space<vmem>>, %arg8: memref<1x128xf32, #tpu.memory_space<vmem>>, %arg9: memref<1x128xf32, #tpu.memory_space<vmem>>, %arg10: memref<1x128xf32, #tpu.memory_space<vmem>>, %arg11: memref<1x128xf32, #tpu.memory_space<vmem>>) attributes {dimension_semantics = [#tpu.dimension_semantics<arbitrary>, #tpu.dimension_semantics<arbitrary>], iteration_bounds = array<i64: 2, 1>, scalar_prefetch = 0 : i64, scratch_operands = 4 : i64, tpu.core_type = #tpu.core_type<tc>, window_params = [{transform_indices = @transform_0, window_bounds = array<i64: 8, 128>}, {pipeline_mode = #tpu.pipeline_mode<synchronous>, transform_indices = @transform_1, window_bounds = array<i64: 1, 32>}, {pipeline_mode = #tpu.pipeline_mode<synchronous>, transform_indices = @transform_2, window_bounds = array<i64: 1, 32>}, {pipeline_mode = #tpu.pipeline_mode<synchronous>, transform_indices = @transform_3, window_bounds = array<i64: 128, 32>}, {pipeline_mode = #tpu.pipeline_mode<synchronous>, transform_indices = @transform_4, window_bounds = array<i64: 32, 128>}, {transform_indices = @transform_5, window_bounds = array<i64: 8, 128>}]} {
    %c0_i32 = arith.constant 0 : i32
    %0 = arith.cmpi eq, %arg0, %c0_i32 : i32
    %c0_i32_0 = arith.constant 0 : i32
    %1 = arith.cmpi eq, %arg1, %c0_i32_0 : i32
    %2 = arith.andi %0, %1 : i1
    %3 = arith.extui %2 : i1 to i32
    %c0_i32_1 = arith.constant 0 : i32
    %4 = arith.cmpi ne, %3, %c0_i32_1 : i32
    scf.if %4 {
      %cst = arith.constant 0.000000e+00 : f32
      %16 = vector.broadcast %cst : f32 to vector<1x128xf32>
      %c0 = arith.constant 0 : index
      %c0_8 = arith.constant 0 : index
      %17 = vector.load %arg8[%c0, %c0_8] : memref<1x128xf32, #tpu.memory_space<vmem>>, vector<1x128xf32>
      tpu.vector_store %arg8[%c0, %c0_8], %16 {strides = array<i32>} : memref<1x128xf32, #tpu.memory_space<vmem>>, vector<1x128xf32>,
      %cst_9 = arith.constant 0.000000e+00 : f32
      %18 = vector.broadcast %cst_9 : f32 to vector<1x128xf32>
      %c0_10 = arith.constant 0 : index
      %c0_11 = arith.constant 0 : index
      %19 = vector.load %arg9[%c0_10, %c0_11] : memref<1x128xf32, #tpu.memory_space<vmem>>, vector<1x128xf32>
      tpu.vector_store %arg9[%c0_10, %c0_11], %18 {strides = array<i32>} : memref<1x128xf32, #tpu.memory_space<vmem>>, vector<1x128xf32>,
      %cst_12 = arith.constant 0.000000e+00 : bf16
      %20 = vector.broadcast %cst_12 : bf16 to vector<8x128xbf16>
      %c0_13 = arith.constant 0 : index
      %c0_14 = arith.constant 0 : index
      %21 = vector.load %arg7[%c0_13, %c0_14] : memref<8x128xbf16, #tpu.memory_space<vmem>>, vector<8x128xbf16>
      tpu.vector_store %arg7[%c0_13, %c0_14], %20 {strides = array<i32>} : memref<8x128xbf16, #tpu.memory_space<vmem>>, vector<8x128xbf16>,
    } else {
    }
    %c0_i32_2 = arith.constant 0 : i32
    %5 = arith.cmpi eq, %arg0, %c0_i32_2 : i32
    %6 = arith.extui %5 : i1 to i32
    %c0_i32_3 = arith.constant 0 : i32
    %7 = arith.cmpi ne, %6, %c0_i32_3 : i32
    scf.if %7 {
      %c0 = arith.constant 0 : index
      %c0_8 = arith.constant 0 : index
      %16 = vector.load %arg2[%c0, %c0_8] : memref<8x128xbf16, #tpu.memory_space<vmem>>, vector<8x128xbf16>
      %17 = arith.extf %16 : vector<8x128xbf16> to vector<8x128xf32>
      %c0_9 = arith.constant 0 : index
      %c0_10 = arith.constant 0 : index
      %18 = vector.load %arg8[%c0_9, %c0_10] : memref<1x128xf32, #tpu.memory_space<vmem>>, vector<1x128xf32>
      %cst = arith.constant dense<0.000000e+00> : vector<128xf32>
      %19 = vector.multi_reduction <add>, %17, %cst [0] : vector<8x128xf32> to vector<128xf32>
      %20 = vector.shape_cast %19 : vector<128xf32> to vector<1x128xf32>
      %21 = arith.addf %18, %20 : vector<1x128xf32>
      %c0_11 = arith.constant 0 : index
      %c0_12 = arith.constant 0 : index
      %22 = vector.load %arg8[%c0_11, %c0_12] : memref<1x128xf32, #tpu.memory_space<vmem>>, vector<1x128xf32>
      tpu.vector_store %arg8[%c0_11, %c0_12], %21 {strides = array<i32>} : memref<1x128xf32, #tpu.memory_space<vmem>>, vector<1x128xf32>,
      %c0_13 = arith.constant 0 : index
      %c0_14 = arith.constant 0 : index
      %23 = vector.load %arg9[%c0_13, %c0_14] : memref<1x128xf32, #tpu.memory_space<vmem>>, vector<1x128xf32>
      %24 = arith.mulf %17, %17 : vector<8x128xf32>
      %cst_15 = arith.constant dense<0.000000e+00> : vector<128xf32>
      %25 = vector.multi_reduction <add>, %24, %cst_15 [0] : vector<8x128xf32> to vector<128xf32>
      %26 = vector.shape_cast %25 : vector<128xf32> to vector<1x128xf32>
      %27 = arith.addf %23, %26 : vector<1x128xf32>
      %c0_16 = arith.constant 0 : index
      %c0_17 = arith.constant 0 : index
      %28 = vector.load %arg9[%c0_16, %c0_17] : memref<1x128xf32, #tpu.memory_space<vmem>>, vector<1x128xf32>
      tpu.vector_store %arg9[%c0_16, %c0_17], %27 {strides = array<i32>} : memref<1x128xf32, #tpu.memory_space<vmem>>, vector<1x128xf32>,
    } else {
    }
    %c1_i32 = arith.constant 1 : i32
    %8 = arith.cmpi eq, %arg0, %c1_i32 : i32
    %c0_i32_4 = arith.constant 0 : i32
    %9 = arith.cmpi eq, %arg1, %c0_i32_4 : i32
    %10 = arith.andi %8, %9 : i1
    %11 = arith.extui %10 : i1 to i32
    %c0_i32_5 = arith.constant 0 : i32
    %12 = arith.cmpi ne, %11, %c0_i32_5 : i32
    scf.if %12 {
      %c0 = arith.constant 0 : index
      %c0_8 = arith.constant 0 : index
      %16 = vector.load %arg8[%c0, %c0_8] : memref<1x128xf32, #tpu.memory_space<vmem>>, vector<1x128xf32>
      %c0_9 = arith.constant 0 : index
      %c0_10 = arith.constant 0 : index
      %17 = vector.load %arg5[%c0_9, %c0_10] : memref<128x32xf32, #tpu.memory_space<vmem>>, vector<128x32xf32>
      %cst = arith.constant dense<0.000000e+00> : vector<1x32xf32>
      %18 = tpu.matmul %16, %17, %cst {dimension_numbers = #tpu.dot_dimension_numbers<[1], [0], [0], [1], [0, 0, 1, 1], [], []>} : vector<1x128xf32>, vector<128x32xf32>, vector<1x32xf32> -> vector<1x32xf32>
      %c0_11 = arith.constant 0 : index
      %c0_12 = arith.constant 0 : index
      %19 = vector.load %arg9[%c0_11, %c0_12] : memref<1x128xf32, #tpu.memory_space<vmem>>, vector<1x128xf32>
      %c0_13 = arith.constant 0 : index
      %c0_14 = arith.constant 0 : index
      %20 = vector.load %arg5[%c0_13, %c0_14] : memref<128x32xf32, #tpu.memory_space<vmem>>, vector<128x32xf32>
      %cst_15 = arith.constant dense<0.000000e+00> : vector<1x32xf32>
      %21 = tpu.matmul %19, %20, %cst_15 {dimension_numbers = #tpu.dot_dimension_numbers<[1], [0], [0], [1], [0, 0, 1, 1], [], []>} : vector<1x128xf32>, vector<128x32xf32>, vector<1x32xf32> -> vector<1x32xf32>
      %cst_16 = arith.constant 3.125000e-02 : f32
      %22 = vector.broadcast %cst_16 : f32 to vector<1x32xf32>
      %23 = arith.mulf %18, %22 : vector<1x32xf32>
      %cst_17 = arith.constant 3.125000e-02 : f32
      %24 = vector.broadcast %cst_17 : f32 to vector<1x32xf32>
      %25 = arith.mulf %21, %24 : vector<1x32xf32>
      %26 = arith.mulf %23, %23 : vector<1x32xf32>
      %27 = arith.subf %25, %26 : vector<1x32xf32>
      %cst_18 = arith.constant 0.000000e+00 : f32
      %28 = vector.broadcast %cst_18 : f32 to vector<1x32xf32>
      %29 = arith.maximumf %27, %28 : vector<1x32xf32>
      %c0_19 = arith.constant 0 : index
      %c0_20 = arith.constant 0 : index
      %30 = vector.load %arg3[%c0_19, %c0_20] : memref<1x32xf32, #tpu.memory_space<vmem>>, vector<1x32xf32>
      %cst_21 = arith.constant 9.99999974E-6 : f32
      %31 = vector.broadcast %cst_21 : f32 to vector<1x32xf32>
      %32 = arith.addf %29, %31 : vector<1x32xf32>
      %33 = math.rsqrt %32 : vector<1x32xf32>
      %34 = arith.mulf %30, %33 : vector<1x32xf32>
      %c0_22 = arith.constant 0 : index
      %c0_23 = arith.constant 0 : index
      %35 = vector.load %arg4[%c0_22, %c0_23] : memref<1x32xf32, #tpu.memory_space<vmem>>, vector<1x32xf32>
      %36 = arith.mulf %23, %34 : vector<1x32xf32>
      %37 = arith.subf %35, %36 : vector<1x32xf32>
      %c0_24 = arith.constant 0 : index
      %c0_25 = arith.constant 0 : index
      %38 = vector.load %arg6[%c0_24, %c0_25] : memref<32x128xf32, #tpu.memory_space<vmem>>, vector<32x128xf32>
      %cst_26 = arith.constant dense<0.000000e+00> : vector<1x128xf32>
      %39 = tpu.matmul %34, %38, %cst_26 {dimension_numbers = #tpu.dot_dimension_numbers<[1], [0], [0], [1], [0, 0, 1, 1], [], []>} : vector<1x32xf32>, vector<32x128xf32>, vector<1x128xf32> -> vector<1x128xf32>
      %c0_27 = arith.constant 0 : index
      %c0_28 = arith.constant 0 : index
      %40 = vector.load %arg10[%c0_27, %c0_28] : memref<1x128xf32, #tpu.memory_space<vmem>>, vector<1x128xf32>
      tpu.vector_store %arg10[%c0_27, %c0_28], %39 {strides = array<i32>} : memref<1x128xf32, #tpu.memory_space<vmem>>, vector<1x128xf32>,
      %c0_29 = arith.constant 0 : index
      %c0_30 = arith.constant 0 : index
      %41 = vector.load %arg6[%c0_29, %c0_30] : memref<32x128xf32, #tpu.memory_space<vmem>>, vector<32x128xf32>
      %cst_31 = arith.constant dense<0.000000e+00> : vector<1x128xf32>
      %42 = tpu.matmul %37, %41, %cst_31 {dimension_numbers = #tpu.dot_dimension_numbers<[1], [0], [0], [1], [0, 0, 1, 1], [], []>} : vector<1x32xf32>, vector<32x128xf32>, vector<1x128xf32> -> vector<1x128xf32>
      %c0_32 = arith.constant 0 : index
      %c0_33 = arith.constant 0 : index
      %43 = vector.load %arg11[%c0_32, %c0_33] : memref<1x128xf32, #tpu.memory_space<vmem>>, vector<1x128xf32>
      tpu.vector_store %arg11[%c0_32, %c0_33], %42 {strides = array<i32>} : memref<1x128xf32, #tpu.memory_space<vmem>>, vector<1x128xf32>,
    } else {
    }
    %c1_i32_6 = arith.constant 1 : i32
    %13 = arith.cmpi eq, %arg0, %c1_i32_6 : i32
    %14 = arith.extui %13 : i1 to i32
    %c0_i32_7 = arith.constant 0 : i32
    %15 = arith.cmpi ne, %14, %c0_i32_7 : i32
    scf.if %15 {
      %c0 = arith.constant 0 : index
      %c0_8 = arith.constant 0 : index
      %16 = vector.load %arg2[%c0, %c0_8] : memref<8x128xbf16, #tpu.memory_space<vmem>>, vector<8x128xbf16>
      %17 = arith.extf %16 : vector<8x128xbf16> to vector<8x128xf32>
      %c0_9 = arith.constant 0 : index
      %c0_10 = arith.constant 0 : index
      %18 = vector.load %arg10[%c0_9, %c0_10] : memref<1x128xf32, #tpu.memory_space<vmem>>, vector<1x128xf32>
      %19 = vector.broadcast %18 : vector<1x128xf32> to vector<8x128xf32>
      %20 = arith.mulf %17, %19 : vector<8x128xf32>
      %c0_11 = arith.constant 0 : index
      %c0_12 = arith.constant 0 : index
      %21 = vector.load %arg11[%c0_11, %c0_12] : memref<1x128xf32, #tpu.memory_space<vmem>>, vector<1x128xf32>
      %22 = vector.broadcast %21 : vector<1x128xf32> to vector<8x128xf32>
      %23 = arith.addf %20, %22 : vector<8x128xf32>
      %cst = arith.constant 0.000000e+00 : f32
      %24 = vector.broadcast %cst : f32 to vector<8x128xf32>
      %25 = arith.cmpf ogt, %23, %24 : vector<8x128xf32>
      %cst_13 = arith.constant 2.000000e-01 : f32
      %26 = vector.broadcast %cst_13 : f32 to vector<8x128xf32>
      %27 = arith.mulf %26, %23 : vector<8x128xf32>
      %28 = arith.select %25, %23, %27 : vector<8x128xi1>, vector<8x128xf32>
      %29 = arith.truncf %28 : vector<8x128xf32> to vector<8x128xbf16>
      %c0_14 = arith.constant 0 : index
      %c0_15 = arith.constant 0 : index
      %30 = vector.load %arg7[%c0_14, %c0_15] : memref<8x128xbf16, #tpu.memory_space<vmem>>, vector<8x128xbf16>
      tpu.vector_store %arg7[%c0_14, %c0_15], %29 {strides = array<i32>} : memref<8x128xbf16, #tpu.memory_space<vmem>>, vector<8x128xbf16>,
    } else {
    }
    return
  }
  func.func @transform_0(%arg0: i32, %arg1: i32) -> (i32, i32) {
    %c0_i32 = arith.constant 0 : i32
    %c0_i32_0 = arith.constant 0 : i32
    return %arg1, %c0_i32 : i32, i32
  }
  func.func @transform_1(%arg0: i32, %arg1: i32) -> (i32, i32) {
    %c0_i32 = arith.constant 0 : i32
    %c0_i32_0 = arith.constant 0 : i32
    %c0_i32_1 = arith.constant 0 : i32
    return %c0_i32, %c0_i32_0 : i32, i32
  }
  func.func @transform_2(%arg0: i32, %arg1: i32) -> (i32, i32) {
    %c0_i32 = arith.constant 0 : i32
    %c0_i32_0 = arith.constant 0 : i32
    %c0_i32_1 = arith.constant 0 : i32
    return %c0_i32, %c0_i32_0 : i32, i32
  }
  func.func @transform_3(%arg0: i32, %arg1: i32) -> (i32, i32) {
    %c0_i32 = arith.constant 0 : i32
    %c0_i32_0 = arith.constant 0 : i32
    %c0_i32_1 = arith.constant 0 : i32
    return %c0_i32, %c0_i32_0 : i32, i32
  }
  func.func @transform_4(%arg0: i32, %arg1: i32) -> (i32, i32) {
    %c0_i32 = arith.constant 0 : i32
    %c0_i32_0 = arith.constant 0 : i32
    %c0_i32_1 = arith.constant 0 : i32
    return %c0_i32, %c0_i32_0 : i32, i32
  }
  func.func @transform_5(%arg0: i32, %arg1: i32) -> (i32, i32) {
    %0 = arith.muli %arg1, %arg0 : i32
    %c0_i32 = arith.constant 0 : i32
    %c0_i32_0 = arith.constant 0 : i32
    return %0, %c0_i32 : i32, i32
  }
}

module attributes {stable_mosaic.version = 11 : i64} {
  func.func @_bn_act_kernel(%arg0: i32, %arg1: i32, %arg2: memref<16x128xbf16, #tpu.memory_space<vmem>>, %arg3: memref<1x16xf32, #tpu.memory_space<vmem>>, %arg4: memref<1x16xf32, #tpu.memory_space<vmem>>, %arg5: memref<128x16xf32, #tpu.memory_space<vmem>>, %arg6: memref<16x128xf32, #tpu.memory_space<vmem>>, %arg7: memref<16x128xbf16, #tpu.memory_space<vmem>>, %arg8: memref<1x128xf32, #tpu.memory_space<vmem>>, %arg9: memref<1x128xf32, #tpu.memory_space<vmem>>, %arg10: memref<1x128xf32, #tpu.memory_space<vmem>>, %arg11: memref<1x128xf32, #tpu.memory_space<vmem>>) attributes {dimension_semantics = [#tpu.dimension_semantics<arbitrary>, #tpu.dimension_semantics<arbitrary>], iteration_bounds = array<i64: 2, 1>, scalar_prefetch = 0 : i64, scratch_operands = 4 : i64, tpu.core_type = #tpu.core_type<tc>, window_params = [{transform_indices = @transform_0, window_bounds = array<i64: 16, 128>}, {pipeline_mode = #tpu.pipeline_mode<synchronous>, transform_indices = @transform_1, window_bounds = array<i64: 1, 16>}, {pipeline_mode = #tpu.pipeline_mode<synchronous>, transform_indices = @transform_2, window_bounds = array<i64: 1, 16>}, {pipeline_mode = #tpu.pipeline_mode<synchronous>, transform_indices = @transform_3, window_bounds = array<i64: 128, 16>}, {pipeline_mode = #tpu.pipeline_mode<synchronous>, transform_indices = @transform_4, window_bounds = array<i64: 16, 128>}, {transform_indices = @transform_5, window_bounds = array<i64: 16, 128>}]} {
    %c0_i32 = arith.constant 0 : i32
    %0 = arith.cmpi eq, %arg0, %c0_i32 : i32
    %c0_i32_0 = arith.constant 0 : i32
    %1 = arith.cmpi eq, %arg1, %c0_i32_0 : i32
    %2 = arith.andi %0, %1 : i1
    %3 = arith.extui %2 : i1 to i32
    %c0_i32_1 = arith.constant 0 : i32
    %4 = arith.cmpi ne, %3, %c0_i32_1 : i32
    scf.if %4 {
      %cst = arith.constant 0.000000e+00 : f32
      %16 = vector.broadcast %cst : f32 to vector<1x128xf32>
      %c0 = arith.constant 0 : index
      %c0_8 = arith.constant 0 : index
      %17 = vector.load %arg8[%c0, %c0_8] : memref<1x128xf32, #tpu.memory_space<vmem>>, vector<1x128xf32>
      tpu.vector_store %arg8[%c0, %c0_8], %16 {strides = array<i32>} : memref<1x128xf32, #tpu.memory_space<vmem>>, vector<1x128xf32>,
      %cst_9 = arith.constant 0.000000e+00 : f32
      %18 = vector.broadcast %cst_9 : f32 to vector<1x128xf32>
      %c0_10 = arith.constant 0 : index
      %c0_11 = arith.constant 0 : index
      %19 = vector.load %arg9[%c0_10, %c0_11] : memref<1x128xf32, #tpu.memory_space<vmem>>, vector<1x128xf32>
      tpu.vector_store %arg9[%c0_10, %c0_11], %18 {strides = array<i32>} : memref<1x128xf32, #tpu.memory_space<vmem>>, vector<1x128xf32>,
      %cst_12 = arith.constant 0.000000e+00 : bf16
      %20 = vector.broadcast %cst_12 : bf16 to vector<16x128xbf16>
      %c0_13 = arith.constant 0 : index
      %c0_14 = arith.constant 0 : index
      %21 = vector.load %arg7[%c0_13, %c0_14] : memref<16x128xbf16, #tpu.memory_space<vmem>>, vector<16x128xbf16>
      tpu.vector_store %arg7[%c0_13, %c0_14], %20 {strides = array<i32>} : memref<16x128xbf16, #tpu.memory_space<vmem>>, vector<16x128xbf16>,
    } else {
    }
    %c0_i32_2 = arith.constant 0 : i32
    %5 = arith.cmpi eq, %arg0, %c0_i32_2 : i32
    %6 = arith.extui %5 : i1 to i32
    %c0_i32_3 = arith.constant 0 : i32
    %7 = arith.cmpi ne, %6, %c0_i32_3 : i32
    scf.if %7 {
      %c0 = arith.constant 0 : index
      %c0_8 = arith.constant 0 : index
      %16 = vector.load %arg2[%c0, %c0_8] : memref<16x128xbf16, #tpu.memory_space<vmem>>, vector<16x128xbf16>
      %17 = arith.extf %16 : vector<16x128xbf16> to vector<16x128xf32>
      %c0_9 = arith.constant 0 : index
      %c0_10 = arith.constant 0 : index
      %18 = vector.load %arg8[%c0_9, %c0_10] : memref<1x128xf32, #tpu.memory_space<vmem>>, vector<1x128xf32>
      %cst = arith.constant dense<0.000000e+00> : vector<128xf32>
      %19 = vector.multi_reduction <add>, %17, %cst [0] : vector<16x128xf32> to vector<128xf32>
      %20 = vector.shape_cast %19 : vector<128xf32> to vector<1x128xf32>
      %21 = arith.addf %18, %20 : vector<1x128xf32>
      %c0_11 = arith.constant 0 : index
      %c0_12 = arith.constant 0 : index
      %22 = vector.load %arg8[%c0_11, %c0_12] : memref<1x128xf32, #tpu.memory_space<vmem>>, vector<1x128xf32>
      tpu.vector_store %arg8[%c0_11, %c0_12], %21 {strides = array<i32>} : memref<1x128xf32, #tpu.memory_space<vmem>>, vector<1x128xf32>,
      %c0_13 = arith.constant 0 : index
      %c0_14 = arith.constant 0 : index
      %23 = vector.load %arg9[%c0_13, %c0_14] : memref<1x128xf32, #tpu.memory_space<vmem>>, vector<1x128xf32>
      %24 = arith.mulf %17, %17 : vector<16x128xf32>
      %cst_15 = arith.constant dense<0.000000e+00> : vector<128xf32>
      %25 = vector.multi_reduction <add>, %24, %cst_15 [0] : vector<16x128xf32> to vector<128xf32>
      %26 = vector.shape_cast %25 : vector<128xf32> to vector<1x128xf32>
      %27 = arith.addf %23, %26 : vector<1x128xf32>
      %c0_16 = arith.constant 0 : index
      %c0_17 = arith.constant 0 : index
      %28 = vector.load %arg9[%c0_16, %c0_17] : memref<1x128xf32, #tpu.memory_space<vmem>>, vector<1x128xf32>
      tpu.vector_store %arg9[%c0_16, %c0_17], %27 {strides = array<i32>} : memref<1x128xf32, #tpu.memory_space<vmem>>, vector<1x128xf32>,
    } else {
    }
    %c1_i32 = arith.constant 1 : i32
    %8 = arith.cmpi eq, %arg0, %c1_i32 : i32
    %c0_i32_4 = arith.constant 0 : i32
    %9 = arith.cmpi eq, %arg1, %c0_i32_4 : i32
    %10 = arith.andi %8, %9 : i1
    %11 = arith.extui %10 : i1 to i32
    %c0_i32_5 = arith.constant 0 : i32
    %12 = arith.cmpi ne, %11, %c0_i32_5 : i32
    scf.if %12 {
      %c0 = arith.constant 0 : index
      %c0_8 = arith.constant 0 : index
      %16 = vector.load %arg8[%c0, %c0_8] : memref<1x128xf32, #tpu.memory_space<vmem>>, vector<1x128xf32>
      %c0_9 = arith.constant 0 : index
      %c0_10 = arith.constant 0 : index
      %17 = vector.load %arg5[%c0_9, %c0_10] : memref<128x16xf32, #tpu.memory_space<vmem>>, vector<128x16xf32>
      %cst = arith.constant dense<0.000000e+00> : vector<1x16xf32>
      %18 = tpu.matmul %16, %17, %cst {dimension_numbers = #tpu.dot_dimension_numbers<[1], [0], [0], [1], [0, 0, 1, 1], [], []>} : vector<1x128xf32>, vector<128x16xf32>, vector<1x16xf32> -> vector<1x16xf32>
      %c0_11 = arith.constant 0 : index
      %c0_12 = arith.constant 0 : index
      %19 = vector.load %arg9[%c0_11, %c0_12] : memref<1x128xf32, #tpu.memory_space<vmem>>, vector<1x128xf32>
      %c0_13 = arith.constant 0 : index
      %c0_14 = arith.constant 0 : index
      %20 = vector.load %arg5[%c0_13, %c0_14] : memref<128x16xf32, #tpu.memory_space<vmem>>, vector<128x16xf32>
      %cst_15 = arith.constant dense<0.000000e+00> : vector<1x16xf32>
      %21 = tpu.matmul %19, %20, %cst_15 {dimension_numbers = #tpu.dot_dimension_numbers<[1], [0], [0], [1], [0, 0, 1, 1], [], []>} : vector<1x128xf32>, vector<128x16xf32>, vector<1x16xf32> -> vector<1x16xf32>
      %cst_16 = arith.constant 7.812500e-03 : f32
      %22 = vector.broadcast %cst_16 : f32 to vector<1x16xf32>
      %23 = arith.mulf %18, %22 : vector<1x16xf32>
      %cst_17 = arith.constant 7.812500e-03 : f32
      %24 = vector.broadcast %cst_17 : f32 to vector<1x16xf32>
      %25 = arith.mulf %21, %24 : vector<1x16xf32>
      %26 = arith.mulf %23, %23 : vector<1x16xf32>
      %27 = arith.subf %25, %26 : vector<1x16xf32>
      %cst_18 = arith.constant 0.000000e+00 : f32
      %28 = vector.broadcast %cst_18 : f32 to vector<1x16xf32>
      %29 = arith.maximumf %27, %28 : vector<1x16xf32>
      %c0_19 = arith.constant 0 : index
      %c0_20 = arith.constant 0 : index
      %30 = vector.load %arg3[%c0_19, %c0_20] : memref<1x16xf32, #tpu.memory_space<vmem>>, vector<1x16xf32>
      %cst_21 = arith.constant 9.99999974E-6 : f32
      %31 = vector.broadcast %cst_21 : f32 to vector<1x16xf32>
      %32 = arith.addf %29, %31 : vector<1x16xf32>
      %33 = math.rsqrt %32 : vector<1x16xf32>
      %34 = arith.mulf %30, %33 : vector<1x16xf32>
      %c0_22 = arith.constant 0 : index
      %c0_23 = arith.constant 0 : index
      %35 = vector.load %arg4[%c0_22, %c0_23] : memref<1x16xf32, #tpu.memory_space<vmem>>, vector<1x16xf32>
      %36 = arith.mulf %23, %34 : vector<1x16xf32>
      %37 = arith.subf %35, %36 : vector<1x16xf32>
      %c0_24 = arith.constant 0 : index
      %c0_25 = arith.constant 0 : index
      %38 = vector.load %arg6[%c0_24, %c0_25] : memref<16x128xf32, #tpu.memory_space<vmem>>, vector<16x128xf32>
      %cst_26 = arith.constant dense<0.000000e+00> : vector<1x128xf32>
      %39 = tpu.matmul %34, %38, %cst_26 {dimension_numbers = #tpu.dot_dimension_numbers<[1], [0], [0], [1], [0, 0, 1, 1], [], []>} : vector<1x16xf32>, vector<16x128xf32>, vector<1x128xf32> -> vector<1x128xf32>
      %c0_27 = arith.constant 0 : index
      %c0_28 = arith.constant 0 : index
      %40 = vector.load %arg10[%c0_27, %c0_28] : memref<1x128xf32, #tpu.memory_space<vmem>>, vector<1x128xf32>
      tpu.vector_store %arg10[%c0_27, %c0_28], %39 {strides = array<i32>} : memref<1x128xf32, #tpu.memory_space<vmem>>, vector<1x128xf32>,
      %c0_29 = arith.constant 0 : index
      %c0_30 = arith.constant 0 : index
      %41 = vector.load %arg6[%c0_29, %c0_30] : memref<16x128xf32, #tpu.memory_space<vmem>>, vector<16x128xf32>
      %cst_31 = arith.constant dense<0.000000e+00> : vector<1x128xf32>
      %42 = tpu.matmul %37, %41, %cst_31 {dimension_numbers = #tpu.dot_dimension_numbers<[1], [0], [0], [1], [0, 0, 1, 1], [], []>} : vector<1x16xf32>, vector<16x128xf32>, vector<1x128xf32> -> vector<1x128xf32>
      %c0_32 = arith.constant 0 : index
      %c0_33 = arith.constant 0 : index
      %43 = vector.load %arg11[%c0_32, %c0_33] : memref<1x128xf32, #tpu.memory_space<vmem>>, vector<1x128xf32>
      tpu.vector_store %arg11[%c0_32, %c0_33], %42 {strides = array<i32>} : memref<1x128xf32, #tpu.memory_space<vmem>>, vector<1x128xf32>,
    } else {
    }
    %c1_i32_6 = arith.constant 1 : i32
    %13 = arith.cmpi eq, %arg0, %c1_i32_6 : i32
    %14 = arith.extui %13 : i1 to i32
    %c0_i32_7 = arith.constant 0 : i32
    %15 = arith.cmpi ne, %14, %c0_i32_7 : i32
    scf.if %15 {
      %c0 = arith.constant 0 : index
      %c0_8 = arith.constant 0 : index
      %16 = vector.load %arg2[%c0, %c0_8] : memref<16x128xbf16, #tpu.memory_space<vmem>>, vector<16x128xbf16>
      %17 = arith.extf %16 : vector<16x128xbf16> to vector<16x128xf32>
      %c0_9 = arith.constant 0 : index
      %c0_10 = arith.constant 0 : index
      %18 = vector.load %arg10[%c0_9, %c0_10] : memref<1x128xf32, #tpu.memory_space<vmem>>, vector<1x128xf32>
      %19 = vector.broadcast %18 : vector<1x128xf32> to vector<16x128xf32>
      %20 = arith.mulf %17, %19 : vector<16x128xf32>
      %c0_11 = arith.constant 0 : index
      %c0_12 = arith.constant 0 : index
      %21 = vector.load %arg11[%c0_11, %c0_12] : memref<1x128xf32, #tpu.memory_space<vmem>>, vector<1x128xf32>
      %22 = vector.broadcast %21 : vector<1x128xf32> to vector<16x128xf32>
      %23 = arith.addf %20, %22 : vector<16x128xf32>
      %cst = arith.constant 0.000000e+00 : f32
      %24 = vector.broadcast %cst : f32 to vector<16x128xf32>
      %25 = arith.maximumf %23, %24 : vector<16x128xf32>
      %26 = arith.truncf %25 : vector<16x128xf32> to vector<16x128xbf16>
      %c0_13 = arith.constant 0 : index
      %c0_14 = arith.constant 0 : index
      %27 = vector.load %arg7[%c0_13, %c0_14] : memref<16x128xbf16, #tpu.memory_space<vmem>>, vector<16x128xbf16>
      tpu.vector_store %arg7[%c0_13, %c0_14], %26 {strides = array<i32>} : memref<16x128xbf16, #tpu.memory_space<vmem>>, vector<16x128xbf16>,
    } else {
    }
    return
  }
  func.func @transform_0(%arg0: i32, %arg1: i32) -> (i32, i32) {
    %c0_i32 = arith.constant 0 : i32
    %c0_i32_0 = arith.constant 0 : i32
    return %arg1, %c0_i32 : i32, i32
  }
  func.func @transform_1(%arg0: i32, %arg1: i32) -> (i32, i32) {
    %c0_i32 = arith.constant 0 : i32
    %c0_i32_0 = arith.constant 0 : i32
    %c0_i32_1 = arith.constant 0 : i32
    return %c0_i32, %c0_i32_0 : i32, i32
  }
  func.func @transform_2(%arg0: i32, %arg1: i32) -> (i32, i32) {
    %c0_i32 = arith.constant 0 : i32
    %c0_i32_0 = arith.constant 0 : i32
    %c0_i32_1 = arith.constant 0 : i32
    return %c0_i32, %c0_i32_0 : i32, i32
  }
  func.func @transform_3(%arg0: i32, %arg1: i32) -> (i32, i32) {
    %c0_i32 = arith.constant 0 : i32
    %c0_i32_0 = arith.constant 0 : i32
    %c0_i32_1 = arith.constant 0 : i32
    return %c0_i32, %c0_i32_0 : i32, i32
  }
  func.func @transform_4(%arg0: i32, %arg1: i32) -> (i32, i32) {
    %c0_i32 = arith.constant 0 : i32
    %c0_i32_0 = arith.constant 0 : i32
    %c0_i32_1 = arith.constant 0 : i32
    return %c0_i32, %c0_i32_0 : i32, i32
  }
  func.func @transform_5(%arg0: i32, %arg1: i32) -> (i32, i32) {
    %0 = arith.muli %arg1, %arg0 : i32
    %c0_i32 = arith.constant 0 : i32
    %c0_i32_0 = arith.constant 0 : i32
    return %0, %c0_i32 : i32, i32
  }
}

module attributes {stable_mosaic.version = 11 : i64} {
  func.func @_matmul_kernel(%arg0: i32, %arg1: i32, %arg2: memref<64x16xbf16, #tpu.memory_space<vmem>>, %arg3: memref<16x128xbf16, #tpu.memory_space<vmem>>, %arg4: memref<64x128xbf16, #tpu.memory_space<vmem>>) attributes {dimension_semantics = [#tpu.dimension_semantics<parallel>, #tpu.dimension_semantics<parallel>], iteration_bounds = array<i64: 2, 1>, scalar_prefetch = 0 : i64, scratch_operands = 0 : i64, tpu.core_type = #tpu.core_type<tc>, window_params = [{transform_indices = @transform_0, window_bounds = array<i64: 64, 16>}, {transform_indices = @transform_1, window_bounds = array<i64: 16, 128>}, {transform_indices = @transform_2, window_bounds = array<i64: 64, 128>}]} {
    %c0 = arith.constant 0 : index
    %c0_0 = arith.constant 0 : index
    %0 = vector.load %arg2[%c0, %c0_0] : memref<64x16xbf16, #tpu.memory_space<vmem>>, vector<64x16xbf16>
    %c0_1 = arith.constant 0 : index
    %c0_2 = arith.constant 0 : index
    %1 = vector.load %arg3[%c0_1, %c0_2] : memref<16x128xbf16, #tpu.memory_space<vmem>>, vector<16x128xbf16>
    %cst = arith.constant dense<0.000000e+00> : vector<64x128xf32>
    %2 = tpu.matmul %0, %1, %cst {dimension_numbers = #tpu.dot_dimension_numbers<[1], [0], [0], [1], [0, 0, 1, 1], [], []>} : vector<64x16xbf16>, vector<16x128xbf16>, vector<64x128xf32> -> vector<64x128xf32>
    %3 = arith.truncf %2 : vector<64x128xf32> to vector<64x128xbf16>
    %c0_3 = arith.constant 0 : index
    %c0_4 = arith.constant 0 : index
    %4 = vector.load %arg4[%c0_3, %c0_4] : memref<64x128xbf16, #tpu.memory_space<vmem>>, vector<64x128xbf16>
    tpu.vector_store %arg4[%c0_3, %c0_4], %3 {strides = array<i32>} : memref<64x128xbf16, #tpu.memory_space<vmem>>, vector<64x128xbf16>,
    return
  }
  func.func @transform_0(%arg0: i32, %arg1: i32) -> (i32, i32) {
    %c0_i32 = arith.constant 0 : i32
    %c0_i32_0 = arith.constant 0 : i32
    return %arg0, %c0_i32 : i32, i32
  }
  func.func @transform_1(%arg0: i32, %arg1: i32) -> (i32, i32) {
    %c0_i32 = arith.constant 0 : i32
    %c0_i32_0 = arith.constant 0 : i32
    return %c0_i32, %arg1 : i32, i32
  }
  func.func @transform_2(%arg0: i32, %arg1: i32) -> (i32, i32) {
    %c0_i32 = arith.constant 0 : i32
    return %arg0, %arg1 : i32, i32
  }
}

module attributes {stable_mosaic.version = 11 : i64} {
  func.func @_bn_act_kernel(%arg0: i32, %arg1: i32, %arg2: memref<32x128xbf16, #tpu.memory_space<vmem>>, %arg3: memref<1x8xf32, #tpu.memory_space<vmem>>, %arg4: memref<1x8xf32, #tpu.memory_space<vmem>>, %arg5: memref<128x8xf32, #tpu.memory_space<vmem>>, %arg6: memref<8x128xf32, #tpu.memory_space<vmem>>, %arg7: memref<32x128xbf16, #tpu.memory_space<vmem>>, %arg8: memref<1x128xf32, #tpu.memory_space<vmem>>, %arg9: memref<1x128xf32, #tpu.memory_space<vmem>>, %arg10: memref<1x128xf32, #tpu.memory_space<vmem>>, %arg11: memref<1x128xf32, #tpu.memory_space<vmem>>) attributes {dimension_semantics = [#tpu.dimension_semantics<arbitrary>, #tpu.dimension_semantics<arbitrary>], iteration_bounds = array<i64: 2, 1>, scalar_prefetch = 0 : i64, scratch_operands = 4 : i64, tpu.core_type = #tpu.core_type<tc>, window_params = [{transform_indices = @transform_0, window_bounds = array<i64: 32, 128>}, {pipeline_mode = #tpu.pipeline_mode<synchronous>, transform_indices = @transform_1, window_bounds = array<i64: 1, 8>}, {pipeline_mode = #tpu.pipeline_mode<synchronous>, transform_indices = @transform_2, window_bounds = array<i64: 1, 8>}, {pipeline_mode = #tpu.pipeline_mode<synchronous>, transform_indices = @transform_3, window_bounds = array<i64: 128, 8>}, {pipeline_mode = #tpu.pipeline_mode<synchronous>, transform_indices = @transform_4, window_bounds = array<i64: 8, 128>}, {transform_indices = @transform_5, window_bounds = array<i64: 32, 128>}]} {
    %c0_i32 = arith.constant 0 : i32
    %0 = arith.cmpi eq, %arg0, %c0_i32 : i32
    %c0_i32_0 = arith.constant 0 : i32
    %1 = arith.cmpi eq, %arg1, %c0_i32_0 : i32
    %2 = arith.andi %0, %1 : i1
    %3 = arith.extui %2 : i1 to i32
    %c0_i32_1 = arith.constant 0 : i32
    %4 = arith.cmpi ne, %3, %c0_i32_1 : i32
    scf.if %4 {
      %cst = arith.constant 0.000000e+00 : f32
      %16 = vector.broadcast %cst : f32 to vector<1x128xf32>
      %c0 = arith.constant 0 : index
      %c0_8 = arith.constant 0 : index
      %17 = vector.load %arg8[%c0, %c0_8] : memref<1x128xf32, #tpu.memory_space<vmem>>, vector<1x128xf32>
      tpu.vector_store %arg8[%c0, %c0_8], %16 {strides = array<i32>} : memref<1x128xf32, #tpu.memory_space<vmem>>, vector<1x128xf32>,
      %cst_9 = arith.constant 0.000000e+00 : f32
      %18 = vector.broadcast %cst_9 : f32 to vector<1x128xf32>
      %c0_10 = arith.constant 0 : index
      %c0_11 = arith.constant 0 : index
      %19 = vector.load %arg9[%c0_10, %c0_11] : memref<1x128xf32, #tpu.memory_space<vmem>>, vector<1x128xf32>
      tpu.vector_store %arg9[%c0_10, %c0_11], %18 {strides = array<i32>} : memref<1x128xf32, #tpu.memory_space<vmem>>, vector<1x128xf32>,
      %cst_12 = arith.constant 0.000000e+00 : bf16
      %20 = vector.broadcast %cst_12 : bf16 to vector<32x128xbf16>
      %c0_13 = arith.constant 0 : index
      %c0_14 = arith.constant 0 : index
      %21 = vector.load %arg7[%c0_13, %c0_14] : memref<32x128xbf16, #tpu.memory_space<vmem>>, vector<32x128xbf16>
      tpu.vector_store %arg7[%c0_13, %c0_14], %20 {strides = array<i32>} : memref<32x128xbf16, #tpu.memory_space<vmem>>, vector<32x128xbf16>,
    } else {
    }
    %c0_i32_2 = arith.constant 0 : i32
    %5 = arith.cmpi eq, %arg0, %c0_i32_2 : i32
    %6 = arith.extui %5 : i1 to i32
    %c0_i32_3 = arith.constant 0 : i32
    %7 = arith.cmpi ne, %6, %c0_i32_3 : i32
    scf.if %7 {
      %c0 = arith.constant 0 : index
      %c0_8 = arith.constant 0 : index
      %16 = vector.load %arg2[%c0, %c0_8] : memref<32x128xbf16, #tpu.memory_space<vmem>>, vector<32x128xbf16>
      %17 = arith.extf %16 : vector<32x128xbf16> to vector<32x128xf32>
      %c0_9 = arith.constant 0 : index
      %c0_10 = arith.constant 0 : index
      %18 = vector.load %arg8[%c0_9, %c0_10] : memref<1x128xf32, #tpu.memory_space<vmem>>, vector<1x128xf32>
      %cst = arith.constant dense<0.000000e+00> : vector<128xf32>
      %19 = vector.multi_reduction <add>, %17, %cst [0] : vector<32x128xf32> to vector<128xf32>
      %20 = vector.shape_cast %19 : vector<128xf32> to vector<1x128xf32>
      %21 = arith.addf %18, %20 : vector<1x128xf32>
      %c0_11 = arith.constant 0 : index
      %c0_12 = arith.constant 0 : index
      %22 = vector.load %arg8[%c0_11, %c0_12] : memref<1x128xf32, #tpu.memory_space<vmem>>, vector<1x128xf32>
      tpu.vector_store %arg8[%c0_11, %c0_12], %21 {strides = array<i32>} : memref<1x128xf32, #tpu.memory_space<vmem>>, vector<1x128xf32>,
      %c0_13 = arith.constant 0 : index
      %c0_14 = arith.constant 0 : index
      %23 = vector.load %arg9[%c0_13, %c0_14] : memref<1x128xf32, #tpu.memory_space<vmem>>, vector<1x128xf32>
      %24 = arith.mulf %17, %17 : vector<32x128xf32>
      %cst_15 = arith.constant dense<0.000000e+00> : vector<128xf32>
      %25 = vector.multi_reduction <add>, %24, %cst_15 [0] : vector<32x128xf32> to vector<128xf32>
      %26 = vector.shape_cast %25 : vector<128xf32> to vector<1x128xf32>
      %27 = arith.addf %23, %26 : vector<1x128xf32>
      %c0_16 = arith.constant 0 : index
      %c0_17 = arith.constant 0 : index
      %28 = vector.load %arg9[%c0_16, %c0_17] : memref<1x128xf32, #tpu.memory_space<vmem>>, vector<1x128xf32>
      tpu.vector_store %arg9[%c0_16, %c0_17], %27 {strides = array<i32>} : memref<1x128xf32, #tpu.memory_space<vmem>>, vector<1x128xf32>,
    } else {
    }
    %c1_i32 = arith.constant 1 : i32
    %8 = arith.cmpi eq, %arg0, %c1_i32 : i32
    %c0_i32_4 = arith.constant 0 : i32
    %9 = arith.cmpi eq, %arg1, %c0_i32_4 : i32
    %10 = arith.andi %8, %9 : i1
    %11 = arith.extui %10 : i1 to i32
    %c0_i32_5 = arith.constant 0 : i32
    %12 = arith.cmpi ne, %11, %c0_i32_5 : i32
    scf.if %12 {
      %c0 = arith.constant 0 : index
      %c0_8 = arith.constant 0 : index
      %16 = vector.load %arg8[%c0, %c0_8] : memref<1x128xf32, #tpu.memory_space<vmem>>, vector<1x128xf32>
      %c0_9 = arith.constant 0 : index
      %c0_10 = arith.constant 0 : index
      %17 = vector.load %arg5[%c0_9, %c0_10] : memref<128x8xf32, #tpu.memory_space<vmem>>, vector<128x8xf32>
      %cst = arith.constant dense<0.000000e+00> : vector<1x8xf32>
      %18 = tpu.matmul %16, %17, %cst {dimension_numbers = #tpu.dot_dimension_numbers<[1], [0], [0], [1], [0, 0, 1, 1], [], []>} : vector<1x128xf32>, vector<128x8xf32>, vector<1x8xf32> -> vector<1x8xf32>
      %c0_11 = arith.constant 0 : index
      %c0_12 = arith.constant 0 : index
      %19 = vector.load %arg9[%c0_11, %c0_12] : memref<1x128xf32, #tpu.memory_space<vmem>>, vector<1x128xf32>
      %c0_13 = arith.constant 0 : index
      %c0_14 = arith.constant 0 : index
      %20 = vector.load %arg5[%c0_13, %c0_14] : memref<128x8xf32, #tpu.memory_space<vmem>>, vector<128x8xf32>
      %cst_15 = arith.constant dense<0.000000e+00> : vector<1x8xf32>
      %21 = tpu.matmul %19, %20, %cst_15 {dimension_numbers = #tpu.dot_dimension_numbers<[1], [0], [0], [1], [0, 0, 1, 1], [], []>} : vector<1x128xf32>, vector<128x8xf32>, vector<1x8xf32> -> vector<1x8xf32>
      %cst_16 = arith.constant 0.001953125 : f32
      %22 = vector.broadcast %cst_16 : f32 to vector<1x8xf32>
      %23 = arith.mulf %18, %22 : vector<1x8xf32>
      %cst_17 = arith.constant 0.001953125 : f32
      %24 = vector.broadcast %cst_17 : f32 to vector<1x8xf32>
      %25 = arith.mulf %21, %24 : vector<1x8xf32>
      %26 = arith.mulf %23, %23 : vector<1x8xf32>
      %27 = arith.subf %25, %26 : vector<1x8xf32>
      %cst_18 = arith.constant 0.000000e+00 : f32
      %28 = vector.broadcast %cst_18 : f32 to vector<1x8xf32>
      %29 = arith.maximumf %27, %28 : vector<1x8xf32>
      %c0_19 = arith.constant 0 : index
      %c0_20 = arith.constant 0 : index
      %30 = vector.load %arg3[%c0_19, %c0_20] : memref<1x8xf32, #tpu.memory_space<vmem>>, vector<1x8xf32>
      %cst_21 = arith.constant 9.99999974E-6 : f32
      %31 = vector.broadcast %cst_21 : f32 to vector<1x8xf32>
      %32 = arith.addf %29, %31 : vector<1x8xf32>
      %33 = math.rsqrt %32 : vector<1x8xf32>
      %34 = arith.mulf %30, %33 : vector<1x8xf32>
      %c0_22 = arith.constant 0 : index
      %c0_23 = arith.constant 0 : index
      %35 = vector.load %arg4[%c0_22, %c0_23] : memref<1x8xf32, #tpu.memory_space<vmem>>, vector<1x8xf32>
      %36 = arith.mulf %23, %34 : vector<1x8xf32>
      %37 = arith.subf %35, %36 : vector<1x8xf32>
      %c0_24 = arith.constant 0 : index
      %c0_25 = arith.constant 0 : index
      %38 = vector.load %arg6[%c0_24, %c0_25] : memref<8x128xf32, #tpu.memory_space<vmem>>, vector<8x128xf32>
      %cst_26 = arith.constant dense<0.000000e+00> : vector<1x128xf32>
      %39 = tpu.matmul %34, %38, %cst_26 {dimension_numbers = #tpu.dot_dimension_numbers<[1], [0], [0], [1], [0, 0, 1, 1], [], []>} : vector<1x8xf32>, vector<8x128xf32>, vector<1x128xf32> -> vector<1x128xf32>
      %c0_27 = arith.constant 0 : index
      %c0_28 = arith.constant 0 : index
      %40 = vector.load %arg10[%c0_27, %c0_28] : memref<1x128xf32, #tpu.memory_space<vmem>>, vector<1x128xf32>
      tpu.vector_store %arg10[%c0_27, %c0_28], %39 {strides = array<i32>} : memref<1x128xf32, #tpu.memory_space<vmem>>, vector<1x128xf32>,
      %c0_29 = arith.constant 0 : index
      %c0_30 = arith.constant 0 : index
      %41 = vector.load %arg6[%c0_29, %c0_30] : memref<8x128xf32, #tpu.memory_space<vmem>>, vector<8x128xf32>
      %cst_31 = arith.constant dense<0.000000e+00> : vector<1x128xf32>
      %42 = tpu.matmul %37, %41, %cst_31 {dimension_numbers = #tpu.dot_dimension_numbers<[1], [0], [0], [1], [0, 0, 1, 1], [], []>} : vector<1x8xf32>, vector<8x128xf32>, vector<1x128xf32> -> vector<1x128xf32>
      %c0_32 = arith.constant 0 : index
      %c0_33 = arith.constant 0 : index
      %43 = vector.load %arg11[%c0_32, %c0_33] : memref<1x128xf32, #tpu.memory_space<vmem>>, vector<1x128xf32>
      tpu.vector_store %arg11[%c0_32, %c0_33], %42 {strides = array<i32>} : memref<1x128xf32, #tpu.memory_space<vmem>>, vector<1x128xf32>,
    } else {
    }
    %c1_i32_6 = arith.constant 1 : i32
    %13 = arith.cmpi eq, %arg0, %c1_i32_6 : i32
    %14 = arith.extui %13 : i1 to i32
    %c0_i32_7 = arith.constant 0 : i32
    %15 = arith.cmpi ne, %14, %c0_i32_7 : i32
    scf.if %15 {
      %c0 = arith.constant 0 : index
      %c0_8 = arith.constant 0 : index
      %16 = vector.load %arg2[%c0, %c0_8] : memref<32x128xbf16, #tpu.memory_space<vmem>>, vector<32x128xbf16>
      %17 = arith.extf %16 : vector<32x128xbf16> to vector<32x128xf32>
      %c0_9 = arith.constant 0 : index
      %c0_10 = arith.constant 0 : index
      %18 = vector.load %arg10[%c0_9, %c0_10] : memref<1x128xf32, #tpu.memory_space<vmem>>, vector<1x128xf32>
      %19 = vector.broadcast %18 : vector<1x128xf32> to vector<32x128xf32>
      %20 = arith.mulf %17, %19 : vector<32x128xf32>
      %c0_11 = arith.constant 0 : index
      %c0_12 = arith.constant 0 : index
      %21 = vector.load %arg11[%c0_11, %c0_12] : memref<1x128xf32, #tpu.memory_space<vmem>>, vector<1x128xf32>
      %22 = vector.broadcast %21 : vector<1x128xf32> to vector<32x128xf32>
      %23 = arith.addf %20, %22 : vector<32x128xf32>
      %cst = arith.constant 0.000000e+00 : f32
      %24 = vector.broadcast %cst : f32 to vector<32x128xf32>
      %25 = arith.maximumf %23, %24 : vector<32x128xf32>
      %26 = arith.truncf %25 : vector<32x128xf32> to vector<32x128xbf16>
      %c0_13 = arith.constant 0 : index
      %c0_14 = arith.constant 0 : index
      %27 = vector.load %arg7[%c0_13, %c0_14] : memref<32x128xbf16, #tpu.memory_space<vmem>>, vector<32x128xbf16>
      tpu.vector_store %arg7[%c0_13, %c0_14], %26 {strides = array<i32>} : memref<32x128xbf16, #tpu.memory_space<vmem>>, vector<32x128xbf16>,
    } else {
    }
    return
  }
  func.func @transform_0(%arg0: i32, %arg1: i32) -> (i32, i32) {
    %c0_i32 = arith.constant 0 : i32
    %c0_i32_0 = arith.constant 0 : i32
    return %arg1, %c0_i32 : i32, i32
  }
  func.func @transform_1(%arg0: i32, %arg1: i32) -> (i32, i32) {
    %c0_i32 = arith.constant 0 : i32
    %c0_i32_0 = arith.constant 0 : i32
    %c0_i32_1 = arith.constant 0 : i32
    return %c0_i32, %c0_i32_0 : i32, i32
  }
  func.func @transform_2(%arg0: i32, %arg1: i32) -> (i32, i32) {
    %c0_i32 = arith.constant 0 : i32
    %c0_i32_0 = arith.constant 0 : i32
    %c0_i32_1 = arith.constant 0 : i32
    return %c0_i32, %c0_i32_0 : i32, i32
  }
  func.func @transform_3(%arg0: i32, %arg1: i32) -> (i32, i32) {
    %c0_i32 = arith.constant 0 : i32
    %c0_i32_0 = arith.constant 0 : i32
    %c0_i32_1 = arith.constant 0 : i32
    return %c0_i32, %c0_i32_0 : i32, i32
  }
  func.func @transform_4(%arg0: i32, %arg1: i32) -> (i32, i32) {
    %c0_i32 = arith.constant 0 : i32
    %c0_i32_0 = arith.constant 0 : i32
    %c0_i32_1 = arith.constant 0 : i32
    return %c0_i32, %c0_i32_0 : i32, i32
  }
  func.func @transform_5(%arg0: i32, %arg1: i32) -> (i32, i32) {
    %0 = arith.muli %arg1, %arg0 : i32
    %c0_i32 = arith.constant 0 : i32
    %c0_i32_0 = arith.constant 0 : i32
    return %0, %c0_i32 : i32, i32
  }
}

module attributes {stable_mosaic.version = 11 : i64} {
  func.func @_matmul_kernel(%arg0: i32, %arg1: i32, %arg2: memref<256x8xbf16, #tpu.memory_space<vmem>>, %arg3: memref<8x128xbf16, #tpu.memory_space<vmem>>, %arg4: memref<256x128xbf16, #tpu.memory_space<vmem>>) attributes {dimension_semantics = [#tpu.dimension_semantics<parallel>, #tpu.dimension_semantics<parallel>], iteration_bounds = array<i64: 2, 1>, scalar_prefetch = 0 : i64, scratch_operands = 0 : i64, tpu.core_type = #tpu.core_type<tc>, window_params = [{transform_indices = @transform_0, window_bounds = array<i64: 256, 8>}, {transform_indices = @transform_1, window_bounds = array<i64: 8, 128>}, {transform_indices = @transform_2, window_bounds = array<i64: 256, 128>}]} {
    %c0 = arith.constant 0 : index
    %c0_0 = arith.constant 0 : index
    %0 = vector.load %arg2[%c0, %c0_0] : memref<256x8xbf16, #tpu.memory_space<vmem>>, vector<256x8xbf16>
    %c0_1 = arith.constant 0 : index
    %c0_2 = arith.constant 0 : index
    %1 = vector.load %arg3[%c0_1, %c0_2] : memref<8x128xbf16, #tpu.memory_space<vmem>>, vector<8x128xbf16>
    %cst = arith.constant dense<0.000000e+00> : vector<256x128xf32>
    %2 = tpu.matmul %0, %1, %cst {dimension_numbers = #tpu.dot_dimension_numbers<[1], [0], [0], [1], [0, 0, 1, 1], [], []>} : vector<256x8xbf16>, vector<8x128xbf16>, vector<256x128xf32> -> vector<256x128xf32>
    %3 = arith.truncf %2 : vector<256x128xf32> to vector<256x128xbf16>
    %c0_3 = arith.constant 0 : index
    %c0_4 = arith.constant 0 : index
    %4 = vector.load %arg4[%c0_3, %c0_4] : memref<256x128xbf16, #tpu.memory_space<vmem>>, vector<256x128xbf16>
    tpu.vector_store %arg4[%c0_3, %c0_4], %3 {strides = array<i32>} : memref<256x128xbf16, #tpu.memory_space<vmem>>, vector<256x128xbf16>,
    return
  }
  func.func @transform_0(%arg0: i32, %arg1: i32) -> (i32, i32) {
    %c0_i32 = arith.constant 0 : i32
    %c0_i32_0 = arith.constant 0 : i32
    return %arg0, %c0_i32 : i32, i32
  }
  func.func @transform_1(%arg0: i32, %arg1: i32) -> (i32, i32) {
    %c0_i32 = arith.constant 0 : i32
    %c0_i32_0 = arith.constant 0 : i32
    return %c0_i32, %arg1 : i32, i32
  }
  func.func @transform_2(%arg0: i32, %arg1: i32) -> (i32, i32) {
    %c0_i32 = arith.constant 0 : i32
    return %arg0, %arg1 : i32, i32
  }
}

module attributes {stable_mosaic.version = 11 : i64} {
  func.func @_bn_act_kernel(%arg0: i32, %arg1: i32, %arg2: memref<64x128xbf16, #tpu.memory_space<vmem>>, %arg3: memref<1x4xf32, #tpu.memory_space<vmem>>, %arg4: memref<1x4xf32, #tpu.memory_space<vmem>>, %arg5: memref<128x4xf32, #tpu.memory_space<vmem>>, %arg6: memref<4x128xf32, #tpu.memory_space<vmem>>, %arg7: memref<64x128xbf16, #tpu.memory_space<vmem>>, %arg8: memref<1x128xf32, #tpu.memory_space<vmem>>, %arg9: memref<1x128xf32, #tpu.memory_space<vmem>>, %arg10: memref<1x128xf32, #tpu.memory_space<vmem>>, %arg11: memref<1x128xf32, #tpu.memory_space<vmem>>) attributes {dimension_semantics = [#tpu.dimension_semantics<arbitrary>, #tpu.dimension_semantics<arbitrary>], iteration_bounds = array<i64: 2, 1>, scalar_prefetch = 0 : i64, scratch_operands = 4 : i64, tpu.core_type = #tpu.core_type<tc>, window_params = [{transform_indices = @transform_0, window_bounds = array<i64: 64, 128>}, {pipeline_mode = #tpu.pipeline_mode<synchronous>, transform_indices = @transform_1, window_bounds = array<i64: 1, 4>}, {pipeline_mode = #tpu.pipeline_mode<synchronous>, transform_indices = @transform_2, window_bounds = array<i64: 1, 4>}, {pipeline_mode = #tpu.pipeline_mode<synchronous>, transform_indices = @transform_3, window_bounds = array<i64: 128, 4>}, {pipeline_mode = #tpu.pipeline_mode<synchronous>, transform_indices = @transform_4, window_bounds = array<i64: 4, 128>}, {transform_indices = @transform_5, window_bounds = array<i64: 64, 128>}]} {
    %c0_i32 = arith.constant 0 : i32
    %0 = arith.cmpi eq, %arg0, %c0_i32 : i32
    %c0_i32_0 = arith.constant 0 : i32
    %1 = arith.cmpi eq, %arg1, %c0_i32_0 : i32
    %2 = arith.andi %0, %1 : i1
    %3 = arith.extui %2 : i1 to i32
    %c0_i32_1 = arith.constant 0 : i32
    %4 = arith.cmpi ne, %3, %c0_i32_1 : i32
    scf.if %4 {
      %cst = arith.constant 0.000000e+00 : f32
      %16 = vector.broadcast %cst : f32 to vector<1x128xf32>
      %c0 = arith.constant 0 : index
      %c0_8 = arith.constant 0 : index
      %17 = vector.load %arg8[%c0, %c0_8] : memref<1x128xf32, #tpu.memory_space<vmem>>, vector<1x128xf32>
      tpu.vector_store %arg8[%c0, %c0_8], %16 {strides = array<i32>} : memref<1x128xf32, #tpu.memory_space<vmem>>, vector<1x128xf32>,
      %cst_9 = arith.constant 0.000000e+00 : f32
      %18 = vector.broadcast %cst_9 : f32 to vector<1x128xf32>
      %c0_10 = arith.constant 0 : index
      %c0_11 = arith.constant 0 : index
      %19 = vector.load %arg9[%c0_10, %c0_11] : memref<1x128xf32, #tpu.memory_space<vmem>>, vector<1x128xf32>
      tpu.vector_store %arg9[%c0_10, %c0_11], %18 {strides = array<i32>} : memref<1x128xf32, #tpu.memory_space<vmem>>, vector<1x128xf32>,
      %cst_12 = arith.constant 0.000000e+00 : bf16
      %20 = vector.broadcast %cst_12 : bf16 to vector<64x128xbf16>
      %c0_13 = arith.constant 0 : index
      %c0_14 = arith.constant 0 : index
      %21 = vector.load %arg7[%c0_13, %c0_14] : memref<64x128xbf16, #tpu.memory_space<vmem>>, vector<64x128xbf16>
      tpu.vector_store %arg7[%c0_13, %c0_14], %20 {strides = array<i32>} : memref<64x128xbf16, #tpu.memory_space<vmem>>, vector<64x128xbf16>,
    } else {
    }
    %c0_i32_2 = arith.constant 0 : i32
    %5 = arith.cmpi eq, %arg0, %c0_i32_2 : i32
    %6 = arith.extui %5 : i1 to i32
    %c0_i32_3 = arith.constant 0 : i32
    %7 = arith.cmpi ne, %6, %c0_i32_3 : i32
    scf.if %7 {
      %c0 = arith.constant 0 : index
      %c0_8 = arith.constant 0 : index
      %16 = vector.load %arg2[%c0, %c0_8] : memref<64x128xbf16, #tpu.memory_space<vmem>>, vector<64x128xbf16>
      %17 = arith.extf %16 : vector<64x128xbf16> to vector<64x128xf32>
      %c0_9 = arith.constant 0 : index
      %c0_10 = arith.constant 0 : index
      %18 = vector.load %arg8[%c0_9, %c0_10] : memref<1x128xf32, #tpu.memory_space<vmem>>, vector<1x128xf32>
      %cst = arith.constant dense<0.000000e+00> : vector<128xf32>
      %19 = vector.multi_reduction <add>, %17, %cst [0] : vector<64x128xf32> to vector<128xf32>
      %20 = vector.shape_cast %19 : vector<128xf32> to vector<1x128xf32>
      %21 = arith.addf %18, %20 : vector<1x128xf32>
      %c0_11 = arith.constant 0 : index
      %c0_12 = arith.constant 0 : index
      %22 = vector.load %arg8[%c0_11, %c0_12] : memref<1x128xf32, #tpu.memory_space<vmem>>, vector<1x128xf32>
      tpu.vector_store %arg8[%c0_11, %c0_12], %21 {strides = array<i32>} : memref<1x128xf32, #tpu.memory_space<vmem>>, vector<1x128xf32>,
      %c0_13 = arith.constant 0 : index
      %c0_14 = arith.constant 0 : index
      %23 = vector.load %arg9[%c0_13, %c0_14] : memref<1x128xf32, #tpu.memory_space<vmem>>, vector<1x128xf32>
      %24 = arith.mulf %17, %17 : vector<64x128xf32>
      %cst_15 = arith.constant dense<0.000000e+00> : vector<128xf32>
      %25 = vector.multi_reduction <add>, %24, %cst_15 [0] : vector<64x128xf32> to vector<128xf32>
      %26 = vector.shape_cast %25 : vector<128xf32> to vector<1x128xf32>
      %27 = arith.addf %23, %26 : vector<1x128xf32>
      %c0_16 = arith.constant 0 : index
      %c0_17 = arith.constant 0 : index
      %28 = vector.load %arg9[%c0_16, %c0_17] : memref<1x128xf32, #tpu.memory_space<vmem>>, vector<1x128xf32>
      tpu.vector_store %arg9[%c0_16, %c0_17], %27 {strides = array<i32>} : memref<1x128xf32, #tpu.memory_space<vmem>>, vector<1x128xf32>,
    } else {
    }
    %c1_i32 = arith.constant 1 : i32
    %8 = arith.cmpi eq, %arg0, %c1_i32 : i32
    %c0_i32_4 = arith.constant 0 : i32
    %9 = arith.cmpi eq, %arg1, %c0_i32_4 : i32
    %10 = arith.andi %8, %9 : i1
    %11 = arith.extui %10 : i1 to i32
    %c0_i32_5 = arith.constant 0 : i32
    %12 = arith.cmpi ne, %11, %c0_i32_5 : i32
    scf.if %12 {
      %c0 = arith.constant 0 : index
      %c0_8 = arith.constant 0 : index
      %16 = vector.load %arg8[%c0, %c0_8] : memref<1x128xf32, #tpu.memory_space<vmem>>, vector<1x128xf32>
      %c0_9 = arith.constant 0 : index
      %c0_10 = arith.constant 0 : index
      %17 = vector.load %arg5[%c0_9, %c0_10] : memref<128x4xf32, #tpu.memory_space<vmem>>, vector<128x4xf32>
      %cst = arith.constant dense<0.000000e+00> : vector<1x4xf32>
      %18 = tpu.matmul %16, %17, %cst {dimension_numbers = #tpu.dot_dimension_numbers<[1], [0], [0], [1], [0, 0, 1, 1], [], []>} : vector<1x128xf32>, vector<128x4xf32>, vector<1x4xf32> -> vector<1x4xf32>
      %c0_11 = arith.constant 0 : index
      %c0_12 = arith.constant 0 : index
      %19 = vector.load %arg9[%c0_11, %c0_12] : memref<1x128xf32, #tpu.memory_space<vmem>>, vector<1x128xf32>
      %c0_13 = arith.constant 0 : index
      %c0_14 = arith.constant 0 : index
      %20 = vector.load %arg5[%c0_13, %c0_14] : memref<128x4xf32, #tpu.memory_space<vmem>>, vector<128x4xf32>
      %cst_15 = arith.constant dense<0.000000e+00> : vector<1x4xf32>
      %21 = tpu.matmul %19, %20, %cst_15 {dimension_numbers = #tpu.dot_dimension_numbers<[1], [0], [0], [1], [0, 0, 1, 1], [], []>} : vector<1x128xf32>, vector<128x4xf32>, vector<1x4xf32> -> vector<1x4xf32>
      %cst_16 = arith.constant 4.8828125E-4 : f32
      %22 = vector.broadcast %cst_16 : f32 to vector<1x4xf32>
      %23 = arith.mulf %18, %22 : vector<1x4xf32>
      %cst_17 = arith.constant 4.8828125E-4 : f32
      %24 = vector.broadcast %cst_17 : f32 to vector<1x4xf32>
      %25 = arith.mulf %21, %24 : vector<1x4xf32>
      %26 = arith.mulf %23, %23 : vector<1x4xf32>
      %27 = arith.subf %25, %26 : vector<1x4xf32>
      %cst_18 = arith.constant 0.000000e+00 : f32
      %28 = vector.broadcast %cst_18 : f32 to vector<1x4xf32>
      %29 = arith.maximumf %27, %28 : vector<1x4xf32>
      %c0_19 = arith.constant 0 : index
      %c0_20 = arith.constant 0 : index
      %30 = vector.load %arg3[%c0_19, %c0_20] : memref<1x4xf32, #tpu.memory_space<vmem>>, vector<1x4xf32>
      %cst_21 = arith.constant 9.99999974E-6 : f32
      %31 = vector.broadcast %cst_21 : f32 to vector<1x4xf32>
      %32 = arith.addf %29, %31 : vector<1x4xf32>
      %33 = math.rsqrt %32 : vector<1x4xf32>
      %34 = arith.mulf %30, %33 : vector<1x4xf32>
      %c0_22 = arith.constant 0 : index
      %c0_23 = arith.constant 0 : index
      %35 = vector.load %arg4[%c0_22, %c0_23] : memref<1x4xf32, #tpu.memory_space<vmem>>, vector<1x4xf32>
      %36 = arith.mulf %23, %34 : vector<1x4xf32>
      %37 = arith.subf %35, %36 : vector<1x4xf32>
      %c0_24 = arith.constant 0 : index
      %c0_25 = arith.constant 0 : index
      %38 = vector.load %arg6[%c0_24, %c0_25] : memref<4x128xf32, #tpu.memory_space<vmem>>, vector<4x128xf32>
      %cst_26 = arith.constant dense<0.000000e+00> : vector<1x128xf32>
      %39 = tpu.matmul %34, %38, %cst_26 {dimension_numbers = #tpu.dot_dimension_numbers<[1], [0], [0], [1], [0, 0, 1, 1], [], []>} : vector<1x4xf32>, vector<4x128xf32>, vector<1x128xf32> -> vector<1x128xf32>
      %c0_27 = arith.constant 0 : index
      %c0_28 = arith.constant 0 : index
      %40 = vector.load %arg10[%c0_27, %c0_28] : memref<1x128xf32, #tpu.memory_space<vmem>>, vector<1x128xf32>
      tpu.vector_store %arg10[%c0_27, %c0_28], %39 {strides = array<i32>} : memref<1x128xf32, #tpu.memory_space<vmem>>, vector<1x128xf32>,
      %c0_29 = arith.constant 0 : index
      %c0_30 = arith.constant 0 : index
      %41 = vector.load %arg6[%c0_29, %c0_30] : memref<4x128xf32, #tpu.memory_space<vmem>>, vector<4x128xf32>
      %cst_31 = arith.constant dense<0.000000e+00> : vector<1x128xf32>
      %42 = tpu.matmul %37, %41, %cst_31 {dimension_numbers = #tpu.dot_dimension_numbers<[1], [0], [0], [1], [0, 0, 1, 1], [], []>} : vector<1x4xf32>, vector<4x128xf32>, vector<1x128xf32> -> vector<1x128xf32>
      %c0_32 = arith.constant 0 : index
      %c0_33 = arith.constant 0 : index
      %43 = vector.load %arg11[%c0_32, %c0_33] : memref<1x128xf32, #tpu.memory_space<vmem>>, vector<1x128xf32>
      tpu.vector_store %arg11[%c0_32, %c0_33], %42 {strides = array<i32>} : memref<1x128xf32, #tpu.memory_space<vmem>>, vector<1x128xf32>,
    } else {
    }
    %c1_i32_6 = arith.constant 1 : i32
    %13 = arith.cmpi eq, %arg0, %c1_i32_6 : i32
    %14 = arith.extui %13 : i1 to i32
    %c0_i32_7 = arith.constant 0 : i32
    %15 = arith.cmpi ne, %14, %c0_i32_7 : i32
    scf.if %15 {
      %c0 = arith.constant 0 : index
      %c0_8 = arith.constant 0 : index
      %16 = vector.load %arg2[%c0, %c0_8] : memref<64x128xbf16, #tpu.memory_space<vmem>>, vector<64x128xbf16>
      %17 = arith.extf %16 : vector<64x128xbf16> to vector<64x128xf32>
      %c0_9 = arith.constant 0 : index
      %c0_10 = arith.constant 0 : index
      %18 = vector.load %arg10[%c0_9, %c0_10] : memref<1x128xf32, #tpu.memory_space<vmem>>, vector<1x128xf32>
      %19 = vector.broadcast %18 : vector<1x128xf32> to vector<64x128xf32>
      %20 = arith.mulf %17, %19 : vector<64x128xf32>
      %c0_11 = arith.constant 0 : index
      %c0_12 = arith.constant 0 : index
      %21 = vector.load %arg11[%c0_11, %c0_12] : memref<1x128xf32, #tpu.memory_space<vmem>>, vector<1x128xf32>
      %22 = vector.broadcast %21 : vector<1x128xf32> to vector<64x128xf32>
      %23 = arith.addf %20, %22 : vector<64x128xf32>
      %cst = arith.constant 0.000000e+00 : f32
      %24 = vector.broadcast %cst : f32 to vector<64x128xf32>
      %25 = arith.maximumf %23, %24 : vector<64x128xf32>
      %26 = arith.truncf %25 : vector<64x128xf32> to vector<64x128xbf16>
      %c0_13 = arith.constant 0 : index
      %c0_14 = arith.constant 0 : index
      %27 = vector.load %arg7[%c0_13, %c0_14] : memref<64x128xbf16, #tpu.memory_space<vmem>>, vector<64x128xbf16>
      tpu.vector_store %arg7[%c0_13, %c0_14], %26 {strides = array<i32>} : memref<64x128xbf16, #tpu.memory_space<vmem>>, vector<64x128xbf16>,
    } else {
    }
    return
  }
  func.func @transform_0(%arg0: i32, %arg1: i32) -> (i32, i32) {
    %c0_i32 = arith.constant 0 : i32
    %c0_i32_0 = arith.constant 0 : i32
    return %arg1, %c0_i32 : i32, i32
  }
  func.func @transform_1(%arg0: i32, %arg1: i32) -> (i32, i32) {
    %c0_i32 = arith.constant 0 : i32
    %c0_i32_0 = arith.constant 0 : i32
    %c0_i32_1 = arith.constant 0 : i32
    return %c0_i32, %c0_i32_0 : i32, i32
  }
  func.func @transform_2(%arg0: i32, %arg1: i32) -> (i32, i32) {
    %c0_i32 = arith.constant 0 : i32
    %c0_i32_0 = arith.constant 0 : i32
    %c0_i32_1 = arith.constant 0 : i32
    return %c0_i32, %c0_i32_0 : i32, i32
  }
  func.func @transform_3(%arg0: i32, %arg1: i32) -> (i32, i32) {
    %c0_i32 = arith.constant 0 : i32
    %c0_i32_0 = arith.constant 0 : i32
    %c0_i32_1 = arith.constant 0 : i32
    return %c0_i32, %c0_i32_0 : i32, i32
  }
  func.func @transform_4(%arg0: i32, %arg1: i32) -> (i32, i32) {
    %c0_i32 = arith.constant 0 : i32
    %c0_i32_0 = arith.constant 0 : i32
    %c0_i32_1 = arith.constant 0 : i32
    return %c0_i32, %c0_i32_0 : i32, i32
  }
  func.func @transform_5(%arg0: i32, %arg1: i32) -> (i32, i32) {
    %0 = arith.muli %arg1, %arg0 : i32
    %c0_i32 = arith.constant 0 : i32
    %c0_i32_0 = arith.constant 0 : i32
    return %0, %c0_i32 : i32, i32
  }
}

module attributes {stable_mosaic.version = 11 : i64} {
  func.func @_matmul_kernel(%arg0: i32, %arg1: i32, %arg2: memref<512x4xbf16, #tpu.memory_space<vmem>>, %arg3: memref<4x128xbf16, #tpu.memory_space<vmem>>, %arg4: memref<512x128xbf16, #tpu.memory_space<vmem>>) attributes {dimension_semantics = [#tpu.dimension_semantics<parallel>, #tpu.dimension_semantics<parallel>], iteration_bounds = array<i64: 4, 1>, scalar_prefetch = 0 : i64, scratch_operands = 0 : i64, tpu.core_type = #tpu.core_type<tc>, window_params = [{transform_indices = @transform_0, window_bounds = array<i64: 512, 4>}, {transform_indices = @transform_1, window_bounds = array<i64: 4, 128>}, {transform_indices = @transform_2, window_bounds = array<i64: 512, 128>}]} {
    %c0 = arith.constant 0 : index
    %c0_0 = arith.constant 0 : index
    %0 = vector.load %arg2[%c0, %c0_0] : memref<512x4xbf16, #tpu.memory_space<vmem>>, vector<512x4xbf16>
    %c0_1 = arith.constant 0 : index
    %c0_2 = arith.constant 0 : index
    %1 = vector.load %arg3[%c0_1, %c0_2] : memref<4x128xbf16, #tpu.memory_space<vmem>>, vector<4x128xbf16>
    %cst = arith.constant dense<0.000000e+00> : vector<512x128xf32>
    %2 = tpu.matmul %0, %1, %cst {dimension_numbers = #tpu.dot_dimension_numbers<[1], [0], [0], [1], [0, 0, 1, 1], [], []>} : vector<512x4xbf16>, vector<4x128xbf16>, vector<512x128xf32> -> vector<512x128xf32>
    %3 = arith.truncf %2 : vector<512x128xf32> to vector<512x128xbf16>
    %c0_3 = arith.constant 0 : index
    %c0_4 = arith.constant 0 : index
    %4 = vector.load %arg4[%c0_3, %c0_4] : memref<512x128xbf16, #tpu.memory_space<vmem>>, vector<512x128xbf16>
    tpu.vector_store %arg4[%c0_3, %c0_4], %3 {strides = array<i32>} : memref<512x128xbf16, #tpu.memory_space<vmem>>, vector<512x128xbf16>,
    return
  }
  func.func @transform_0(%arg0: i32, %arg1: i32) -> (i32, i32) {
    %c0_i32 = arith.constant 0 : i32
    %c0_i32_0 = arith.constant 0 : i32
    return %arg0, %c0_i32 : i32, i32
  }
  func.func @transform_1(%arg0: i32, %arg1: i32) -> (i32, i32) {
    %c0_i32 = arith.constant 0 : i32
    %c0_i32_0 = arith.constant 0 : i32
    return %c0_i32, %arg1 : i32, i32
  }
  func.func @transform_2(%arg0: i32, %arg1: i32) -> (i32, i32) {
    %c0_i32 = arith.constant 0 : i32
    return %arg0, %arg1 : i32, i32
  }
}

module attributes {stable_mosaic.version = 11 : i64} {
  func.func @_bn_act_kernel(%arg0: i32, %arg1: i32, %arg2: memref<128x256xbf16, #tpu.memory_space<vmem>>, %arg3: memref<1x4xf32, #tpu.memory_space<vmem>>, %arg4: memref<1x4xf32, #tpu.memory_space<vmem>>, %arg5: memref<256x4xf32, #tpu.memory_space<vmem>>, %arg6: memref<4x256xf32, #tpu.memory_space<vmem>>, %arg7: memref<128x256xbf16, #tpu.memory_space<vmem>>, %arg8: memref<1x256xf32, #tpu.memory_space<vmem>>, %arg9: memref<1x256xf32, #tpu.memory_space<vmem>>, %arg10: memref<1x256xf32, #tpu.memory_space<vmem>>, %arg11: memref<1x256xf32, #tpu.memory_space<vmem>>) attributes {dimension_semantics = [#tpu.dimension_semantics<arbitrary>, #tpu.dimension_semantics<arbitrary>], iteration_bounds = array<i64: 2, 1>, scalar_prefetch = 0 : i64, scratch_operands = 4 : i64, tpu.core_type = #tpu.core_type<tc>, window_params = [{transform_indices = @transform_0, window_bounds = array<i64: 128, 256>}, {pipeline_mode = #tpu.pipeline_mode<synchronous>, transform_indices = @transform_1, window_bounds = array<i64: 1, 4>}, {pipeline_mode = #tpu.pipeline_mode<synchronous>, transform_indices = @transform_2, window_bounds = array<i64: 1, 4>}, {pipeline_mode = #tpu.pipeline_mode<synchronous>, transform_indices = @transform_3, window_bounds = array<i64: 256, 4>}, {pipeline_mode = #tpu.pipeline_mode<synchronous>, transform_indices = @transform_4, window_bounds = array<i64: 4, 256>}, {transform_indices = @transform_5, window_bounds = array<i64: 128, 256>}]} {
    %c0_i32 = arith.constant 0 : i32
    %0 = arith.cmpi eq, %arg0, %c0_i32 : i32
    %c0_i32_0 = arith.constant 0 : i32
    %1 = arith.cmpi eq, %arg1, %c0_i32_0 : i32
    %2 = arith.andi %0, %1 : i1
    %3 = arith.extui %2 : i1 to i32
    %c0_i32_1 = arith.constant 0 : i32
    %4 = arith.cmpi ne, %3, %c0_i32_1 : i32
    scf.if %4 {
      %cst = arith.constant 0.000000e+00 : f32
      %16 = vector.broadcast %cst : f32 to vector<1x256xf32>
      %c0 = arith.constant 0 : index
      %c0_8 = arith.constant 0 : index
      %17 = vector.load %arg8[%c0, %c0_8] : memref<1x256xf32, #tpu.memory_space<vmem>>, vector<1x256xf32>
      tpu.vector_store %arg8[%c0, %c0_8], %16 {strides = array<i32>} : memref<1x256xf32, #tpu.memory_space<vmem>>, vector<1x256xf32>,
      %cst_9 = arith.constant 0.000000e+00 : f32
      %18 = vector.broadcast %cst_9 : f32 to vector<1x256xf32>
      %c0_10 = arith.constant 0 : index
      %c0_11 = arith.constant 0 : index
      %19 = vector.load %arg9[%c0_10, %c0_11] : memref<1x256xf32, #tpu.memory_space<vmem>>, vector<1x256xf32>
      tpu.vector_store %arg9[%c0_10, %c0_11], %18 {strides = array<i32>} : memref<1x256xf32, #tpu.memory_space<vmem>>, vector<1x256xf32>,
      %cst_12 = arith.constant 0.000000e+00 : bf16
      %20 = vector.broadcast %cst_12 : bf16 to vector<128x256xbf16>
      %c0_13 = arith.constant 0 : index
      %c0_14 = arith.constant 0 : index
      %21 = vector.load %arg7[%c0_13, %c0_14] : memref<128x256xbf16, #tpu.memory_space<vmem>>, vector<128x256xbf16>
      tpu.vector_store %arg7[%c0_13, %c0_14], %20 {strides = array<i32>} : memref<128x256xbf16, #tpu.memory_space<vmem>>, vector<128x256xbf16>,
    } else {
    }
    %c0_i32_2 = arith.constant 0 : i32
    %5 = arith.cmpi eq, %arg0, %c0_i32_2 : i32
    %6 = arith.extui %5 : i1 to i32
    %c0_i32_3 = arith.constant 0 : i32
    %7 = arith.cmpi ne, %6, %c0_i32_3 : i32
    scf.if %7 {
      %c0 = arith.constant 0 : index
      %c0_8 = arith.constant 0 : index
      %16 = vector.load %arg2[%c0, %c0_8] : memref<128x256xbf16, #tpu.memory_space<vmem>>, vector<128x256xbf16>
      %17 = arith.extf %16 : vector<128x256xbf16> to vector<128x256xf32>
      %c0_9 = arith.constant 0 : index
      %c0_10 = arith.constant 0 : index
      %18 = vector.load %arg8[%c0_9, %c0_10] : memref<1x256xf32, #tpu.memory_space<vmem>>, vector<1x256xf32>
      %cst = arith.constant dense<0.000000e+00> : vector<256xf32>
      %19 = vector.multi_reduction <add>, %17, %cst [0] : vector<128x256xf32> to vector<256xf32>
      %20 = vector.shape_cast %19 : vector<256xf32> to vector<1x256xf32>
      %21 = arith.addf %18, %20 : vector<1x256xf32>
      %c0_11 = arith.constant 0 : index
      %c0_12 = arith.constant 0 : index
      %22 = vector.load %arg8[%c0_11, %c0_12] : memref<1x256xf32, #tpu.memory_space<vmem>>, vector<1x256xf32>
      tpu.vector_store %arg8[%c0_11, %c0_12], %21 {strides = array<i32>} : memref<1x256xf32, #tpu.memory_space<vmem>>, vector<1x256xf32>,
      %c0_13 = arith.constant 0 : index
      %c0_14 = arith.constant 0 : index
      %23 = vector.load %arg9[%c0_13, %c0_14] : memref<1x256xf32, #tpu.memory_space<vmem>>, vector<1x256xf32>
      %24 = arith.mulf %17, %17 : vector<128x256xf32>
      %cst_15 = arith.constant dense<0.000000e+00> : vector<256xf32>
      %25 = vector.multi_reduction <add>, %24, %cst_15 [0] : vector<128x256xf32> to vector<256xf32>
      %26 = vector.shape_cast %25 : vector<256xf32> to vector<1x256xf32>
      %27 = arith.addf %23, %26 : vector<1x256xf32>
      %c0_16 = arith.constant 0 : index
      %c0_17 = arith.constant 0 : index
      %28 = vector.load %arg9[%c0_16, %c0_17] : memref<1x256xf32, #tpu.memory_space<vmem>>, vector<1x256xf32>
      tpu.vector_store %arg9[%c0_16, %c0_17], %27 {strides = array<i32>} : memref<1x256xf32, #tpu.memory_space<vmem>>, vector<1x256xf32>,
    } else {
    }
    %c1_i32 = arith.constant 1 : i32
    %8 = arith.cmpi eq, %arg0, %c1_i32 : i32
    %c0_i32_4 = arith.constant 0 : i32
    %9 = arith.cmpi eq, %arg1, %c0_i32_4 : i32
    %10 = arith.andi %8, %9 : i1
    %11 = arith.extui %10 : i1 to i32
    %c0_i32_5 = arith.constant 0 : i32
    %12 = arith.cmpi ne, %11, %c0_i32_5 : i32
    scf.if %12 {
      %c0 = arith.constant 0 : index
      %c0_8 = arith.constant 0 : index
      %16 = vector.load %arg8[%c0, %c0_8] : memref<1x256xf32, #tpu.memory_space<vmem>>, vector<1x256xf32>
      %c0_9 = arith.constant 0 : index
      %c0_10 = arith.constant 0 : index
      %17 = vector.load %arg5[%c0_9, %c0_10] : memref<256x4xf32, #tpu.memory_space<vmem>>, vector<256x4xf32>
      %cst = arith.constant dense<0.000000e+00> : vector<1x4xf32>
      %18 = tpu.matmul %16, %17, %cst {dimension_numbers = #tpu.dot_dimension_numbers<[1], [0], [0], [1], [0, 0, 1, 1], [], []>} : vector<1x256xf32>, vector<256x4xf32>, vector<1x4xf32> -> vector<1x4xf32>
      %c0_11 = arith.constant 0 : index
      %c0_12 = arith.constant 0 : index
      %19 = vector.load %arg9[%c0_11, %c0_12] : memref<1x256xf32, #tpu.memory_space<vmem>>, vector<1x256xf32>
      %c0_13 = arith.constant 0 : index
      %c0_14 = arith.constant 0 : index
      %20 = vector.load %arg5[%c0_13, %c0_14] : memref<256x4xf32, #tpu.memory_space<vmem>>, vector<256x4xf32>
      %cst_15 = arith.constant dense<0.000000e+00> : vector<1x4xf32>
      %21 = tpu.matmul %19, %20, %cst_15 {dimension_numbers = #tpu.dot_dimension_numbers<[1], [0], [0], [1], [0, 0, 1, 1], [], []>} : vector<1x256xf32>, vector<256x4xf32>, vector<1x4xf32> -> vector<1x4xf32>
      %cst_16 = arith.constant 1.22070313E-4 : f32
      %22 = vector.broadcast %cst_16 : f32 to vector<1x4xf32>
      %23 = arith.mulf %18, %22 : vector<1x4xf32>
      %cst_17 = arith.constant 1.22070313E-4 : f32
      %24 = vector.broadcast %cst_17 : f32 to vector<1x4xf32>
      %25 = arith.mulf %21, %24 : vector<1x4xf32>
      %26 = arith.mulf %23, %23 : vector<1x4xf32>
      %27 = arith.subf %25, %26 : vector<1x4xf32>
      %cst_18 = arith.constant 0.000000e+00 : f32
      %28 = vector.broadcast %cst_18 : f32 to vector<1x4xf32>
      %29 = arith.maximumf %27, %28 : vector<1x4xf32>
      %c0_19 = arith.constant 0 : index
      %c0_20 = arith.constant 0 : index
      %30 = vector.load %arg3[%c0_19, %c0_20] : memref<1x4xf32, #tpu.memory_space<vmem>>, vector<1x4xf32>
      %cst_21 = arith.constant 9.99999974E-6 : f32
      %31 = vector.broadcast %cst_21 : f32 to vector<1x4xf32>
      %32 = arith.addf %29, %31 : vector<1x4xf32>
      %33 = math.rsqrt %32 : vector<1x4xf32>
      %34 = arith.mulf %30, %33 : vector<1x4xf32>
      %c0_22 = arith.constant 0 : index
      %c0_23 = arith.constant 0 : index
      %35 = vector.load %arg4[%c0_22, %c0_23] : memref<1x4xf32, #tpu.memory_space<vmem>>, vector<1x4xf32>
      %36 = arith.mulf %23, %34 : vector<1x4xf32>
      %37 = arith.subf %35, %36 : vector<1x4xf32>
      %c0_24 = arith.constant 0 : index
      %c0_25 = arith.constant 0 : index
      %38 = vector.load %arg6[%c0_24, %c0_25] : memref<4x256xf32, #tpu.memory_space<vmem>>, vector<4x256xf32>
      %cst_26 = arith.constant dense<0.000000e+00> : vector<1x256xf32>
      %39 = tpu.matmul %34, %38, %cst_26 {dimension_numbers = #tpu.dot_dimension_numbers<[1], [0], [0], [1], [0, 0, 1, 1], [], []>} : vector<1x4xf32>, vector<4x256xf32>, vector<1x256xf32> -> vector<1x256xf32>
      %c0_27 = arith.constant 0 : index
      %c0_28 = arith.constant 0 : index
      %40 = vector.load %arg10[%c0_27, %c0_28] : memref<1x256xf32, #tpu.memory_space<vmem>>, vector<1x256xf32>
      tpu.vector_store %arg10[%c0_27, %c0_28], %39 {strides = array<i32>} : memref<1x256xf32, #tpu.memory_space<vmem>>, vector<1x256xf32>,
      %c0_29 = arith.constant 0 : index
      %c0_30 = arith.constant 0 : index
      %41 = vector.load %arg6[%c0_29, %c0_30] : memref<4x256xf32, #tpu.memory_space<vmem>>, vector<4x256xf32>
      %cst_31 = arith.constant dense<0.000000e+00> : vector<1x256xf32>
      %42 = tpu.matmul %37, %41, %cst_31 {dimension_numbers = #tpu.dot_dimension_numbers<[1], [0], [0], [1], [0, 0, 1, 1], [], []>} : vector<1x4xf32>, vector<4x256xf32>, vector<1x256xf32> -> vector<1x256xf32>
      %c0_32 = arith.constant 0 : index
      %c0_33 = arith.constant 0 : index
      %43 = vector.load %arg11[%c0_32, %c0_33] : memref<1x256xf32, #tpu.memory_space<vmem>>, vector<1x256xf32>
      tpu.vector_store %arg11[%c0_32, %c0_33], %42 {strides = array<i32>} : memref<1x256xf32, #tpu.memory_space<vmem>>, vector<1x256xf32>,
    } else {
    }
    %c1_i32_6 = arith.constant 1 : i32
    %13 = arith.cmpi eq, %arg0, %c1_i32_6 : i32
    %14 = arith.extui %13 : i1 to i32
    %c0_i32_7 = arith.constant 0 : i32
    %15 = arith.cmpi ne, %14, %c0_i32_7 : i32
    scf.if %15 {
      %c0 = arith.constant 0 : index
      %c0_8 = arith.constant 0 : index
      %16 = vector.load %arg2[%c0, %c0_8] : memref<128x256xbf16, #tpu.memory_space<vmem>>, vector<128x256xbf16>
      %17 = arith.extf %16 : vector<128x256xbf16> to vector<128x256xf32>
      %c0_9 = arith.constant 0 : index
      %c0_10 = arith.constant 0 : index
      %18 = vector.load %arg10[%c0_9, %c0_10] : memref<1x256xf32, #tpu.memory_space<vmem>>, vector<1x256xf32>
      %19 = vector.broadcast %18 : vector<1x256xf32> to vector<128x256xf32>
      %20 = arith.mulf %17, %19 : vector<128x256xf32>
      %c0_11 = arith.constant 0 : index
      %c0_12 = arith.constant 0 : index
      %21 = vector.load %arg11[%c0_11, %c0_12] : memref<1x256xf32, #tpu.memory_space<vmem>>, vector<1x256xf32>
      %22 = vector.broadcast %21 : vector<1x256xf32> to vector<128x256xf32>
      %23 = arith.addf %20, %22 : vector<128x256xf32>
      %cst = arith.constant 0.000000e+00 : f32
      %24 = vector.broadcast %cst : f32 to vector<128x256xf32>
      %25 = arith.maximumf %23, %24 : vector<128x256xf32>
      %26 = arith.truncf %25 : vector<128x256xf32> to vector<128x256xbf16>
      %c0_13 = arith.constant 0 : index
      %c0_14 = arith.constant 0 : index
      %27 = vector.load %arg7[%c0_13, %c0_14] : memref<128x256xbf16, #tpu.memory_space<vmem>>, vector<128x256xbf16>
      tpu.vector_store %arg7[%c0_13, %c0_14], %26 {strides = array<i32>} : memref<128x256xbf16, #tpu.memory_space<vmem>>, vector<128x256xbf16>,
    } else {
    }
    return
  }
  func.func @transform_0(%arg0: i32, %arg1: i32) -> (i32, i32) {
    %c0_i32 = arith.constant 0 : i32
    %c0_i32_0 = arith.constant 0 : i32
    return %arg1, %c0_i32 : i32, i32
  }
  func.func @transform_1(%arg0: i32, %arg1: i32) -> (i32, i32) {
    %c0_i32 = arith.constant 0 : i32
    %c0_i32_0 = arith.constant 0 : i32
    %c0_i32_1 = arith.constant 0 : i32
    return %c0_i32, %c0_i32_0 : i32, i32
  }
  func.func @transform_2(%arg0: i32, %arg1: i32) -> (i32, i32) {
    %c0_i32 = arith.constant 0 : i32
    %c0_i32_0 = arith.constant 0 : i32
    %c0_i32_1 = arith.constant 0 : i32
    return %c0_i32, %c0_i32_0 : i32, i32
  }
  func.func @transform_3(%arg0: i32, %arg1: i32) -> (i32, i32) {
    %c0_i32 = arith.constant 0 : i32
    %c0_i32_0 = arith.constant 0 : i32
    %c0_i32_1 = arith.constant 0 : i32
    return %c0_i32, %c0_i32_0 : i32, i32
  }
  func.func @transform_4(%arg0: i32, %arg1: i32) -> (i32, i32) {
    %c0_i32 = arith.constant 0 : i32
    %c0_i32_0 = arith.constant 0 : i32
    %c0_i32_1 = arith.constant 0 : i32
    return %c0_i32, %c0_i32_0 : i32, i32
  }
  func.func @transform_5(%arg0: i32, %arg1: i32) -> (i32, i32) {
    %0 = arith.muli %arg1, %arg0 : i32
    %c0_i32 = arith.constant 0 : i32
    %c0_i32_0 = arith.constant 0 : i32
    return %0, %c0_i32 : i32, i32
  }
}

module attributes {stable_mosaic.version = 11 : i64} {
  func.func @_matmul_kernel(%arg0: i32, %arg1: i32, %arg2: memref<512x4xbf16, #tpu.memory_space<vmem>>, %arg3: memref<4x128xbf16, #tpu.memory_space<vmem>>, %arg4: memref<512x128xbf16, #tpu.memory_space<vmem>>) attributes {dimension_semantics = [#tpu.dimension_semantics<parallel>, #tpu.dimension_semantics<parallel>], iteration_bounds = array<i64: 16, 1>, scalar_prefetch = 0 : i64, scratch_operands = 0 : i64, tpu.core_type = #tpu.core_type<tc>, window_params = [{transform_indices = @transform_0, window_bounds = array<i64: 512, 4>}, {transform_indices = @transform_1, window_bounds = array<i64: 4, 128>}, {transform_indices = @transform_2, window_bounds = array<i64: 512, 128>}]} {
    %c0 = arith.constant 0 : index
    %c0_0 = arith.constant 0 : index
    %0 = vector.load %arg2[%c0, %c0_0] : memref<512x4xbf16, #tpu.memory_space<vmem>>, vector<512x4xbf16>
    %c0_1 = arith.constant 0 : index
    %c0_2 = arith.constant 0 : index
    %1 = vector.load %arg3[%c0_1, %c0_2] : memref<4x128xbf16, #tpu.memory_space<vmem>>, vector<4x128xbf16>
    %cst = arith.constant dense<0.000000e+00> : vector<512x128xf32>
    %2 = tpu.matmul %0, %1, %cst {dimension_numbers = #tpu.dot_dimension_numbers<[1], [0], [0], [1], [0, 0, 1, 1], [], []>} : vector<512x4xbf16>, vector<4x128xbf16>, vector<512x128xf32> -> vector<512x128xf32>
    %3 = arith.truncf %2 : vector<512x128xf32> to vector<512x128xbf16>
    %c0_3 = arith.constant 0 : index
    %c0_4 = arith.constant 0 : index
    %4 = vector.load %arg4[%c0_3, %c0_4] : memref<512x128xbf16, #tpu.memory_space<vmem>>, vector<512x128xbf16>
    tpu.vector_store %arg4[%c0_3, %c0_4], %3 {strides = array<i32>} : memref<512x128xbf16, #tpu.memory_space<vmem>>, vector<512x128xbf16>,
    return
  }
  func.func @transform_0(%arg0: i32, %arg1: i32) -> (i32, i32) {
    %c0_i32 = arith.constant 0 : i32
    %c0_i32_0 = arith.constant 0 : i32
    return %arg0, %c0_i32 : i32, i32
  }
  func.func @transform_1(%arg0: i32, %arg1: i32) -> (i32, i32) {
    %c0_i32 = arith.constant 0 : i32
    %c0_i32_0 = arith.constant 0 : i32
    return %c0_i32, %arg1 : i32, i32
  }
  func.func @transform_2(%arg0: i32, %arg1: i32) -> (i32, i32) {
    %c0_i32 = arith.constant 0 : i32
    return %arg0, %arg1 : i32, i32
  }
}

module attributes {stable_mosaic.version = 11 : i64} {
  func.func @_act_kernel(%arg0: i32, %arg1: memref<256x384xbf16, #tpu.memory_space<vmem>>, %arg2: memref<256x384xf32, #tpu.memory_space<vmem>>) attributes {dimension_semantics = [#tpu.dimension_semantics<parallel>], iteration_bounds = array<i64: 1>, scalar_prefetch = 0 : i64, scratch_operands = 0 : i64, tpu.core_type = #tpu.core_type<tc>, window_params = [{transform_indices = @transform_0, window_bounds = array<i64: 256, 384>}, {transform_indices = @transform_1, window_bounds = array<i64: 256, 384>}]} {
    %c0 = arith.constant 0 : index
    %c0_0 = arith.constant 0 : index
    %0 = vector.load %arg1[%c0, %c0_0] : memref<256x384xbf16, #tpu.memory_space<vmem>>, vector<256x384xbf16>
    %1 = arith.extf %0 : vector<256x384xbf16> to vector<256x384xf32>
    %2 = math.tanh %1 : vector<256x384xf32>
    %c0_1 = arith.constant 0 : index
    %c0_2 = arith.constant 0 : index
    %3 = vector.load %arg2[%c0_1, %c0_2] : memref<256x384xf32, #tpu.memory_space<vmem>>, vector<256x384xf32>
    tpu.vector_store %arg2[%c0_1, %c0_2], %2 {strides = array<i32>} : memref<256x384xf32, #tpu.memory_space<vmem>>, vector<256x384xf32>,
    return
  }
  func.func @transform_0(%arg0: i32) -> (i32, i32) {
    %c0_i32 = arith.constant 0 : i32
    %c0_i32_0 = arith.constant 0 : i32
    return %arg0, %c0_i32 : i32, i32
  }
  func.func @transform_1(%arg0: i32) -> (i32, i32) {
    %c0_i32 = arith.constant 0 : i32
    %c0_i32_0 = arith.constant 0 : i32
    return %arg0, %c0_i32 : i32, i32
  }
}

</mosaic_0001>

<bundles_post_ra>
// kernel: dcgan_forward.14
= control target key start
LH: loop header
LB: loop body
LE: loop exit
PB: predicated region body
PF: predicated region fallthrough
CT: control target
= control target key end

     0   :  { %7 = vsyncpa [#allocation3], 0  ;;  %s530_s9 = smov 0   ;;  %s532_s10 = smov 0   ;;  %s588_s0 = inlined_call_operand.vmem [shape: bf16[32,32], index: 0, kind: input, shape index: {}]   ;;  %s589_s1 = inlined_call_operand.hbm [shape: bf16[32,256], index: 1, kind: input, shape index: {}]   ;;  %s590_s2 = inlined_call_operand.vmem [shape: bf16[32,256], index: 2, kind: output, shape index: {}]  }
   0x1   :  { %s534_s11 = smov 0  }
   0x2 LB: > { %s387_s12 = sadd.s32 4294967295, %s509_s11   ;;  %s25_s13 = sadd.s32 1, %s505_s10  ;;  %s509_s11 = sphi %s534_s11, %s13_s11   ;;  %s505_s10 = sphi %s532_s10, %s594_s10   ;;  %s501_s9 = sphi %s530_s9, %s593_s9  }
   0x3   : > { %p27_p0 = scmp.ge.s32.totalorder %s25_s13, 2  ;;  %p389_p1 = scmp.ge.s32.totalorder %s509_s11, 1 }
   0x4   : > { %p110_p2 = scmp.lt.s32.totalorder %s509_s11, 3  ;;  %p555_p4 = scmp.eq.s32.totalorder %s387_s12, 0 }
   0x5   : > { %s596_s13 = smov (%p27_p0, %s25_s13), 0  ;;  %s511_s16 = smov [#allocation2]  }
   0x6   : > { %p551_p3 = pnand %p389_p1, %p110_p2  ;;  %s125_s17 = sshll.u32 %s511_s16, 4  ;;  %s126_s17 = int_to_ptr.vmem [resolvable:$true] %s125_s17 }
   0x7   : > { %s468_s18 = scalar_lea.vmem %s126_s17, 512  ;;  %p476_p11 = scmp.lt.s32.totalorder %s126_s17, %s126_s17 }
   0x8   : > { %p416_p5 = pneg %p551_p3  ;;  %p469_p8 = scmp.ne.s32.totalorder %s126_s17, %s468_s18 }
   0x9   : > { %p477_p12 = scmp.lt.s32.totalorder %s468_s18, %s468_s18 }
   0xa   : > { %p417_p6 = pnand %p555_p4, %p416_p5 }
   0xb   : > { %p478_p13 = por %p477_p12, %p476_p11 }
   0xc   : > { %p459_p7 = pneg %p417_p6 }
   0xe   : > { %p471_p9 = pnand %p469_p8, %p459_p7 }
  0x10   : > { %p472_p10 = pneg %p471_p9 }
  0x12   : > { %p479_p0 = pnand %p478_p13, %p472_p10 }
  0x14   : > { %482 = shalt.err (!%p479_p0)
}
  0x15   : > { %s512_s19 = smov 128   ;;  %s513_s20 = smov 8  }
  0x16   : > { %419 = dma.hbm_to_vmem [thread:$0]  (!%p417_p6), %s589_s1, 512, %s126_s17, [#allocation3], %s512_s19, %s512_s19, %s513_s20  }
  0x17   : > { %150 = sbr.rel (%p551_p3) target bundleno = 240 (0xf0), region = 28 }
  0x1c   : > { %496 = dma.done.wait (%p555_p4), [#allocation3], 512  }
  0x1d   : > { %498 = vsyncadd (%p555_p4), [#allocation3], 4294966784  ;;  %s394_s23 = sshll.u32 %s501_s9, 1  ;;  %v514_v0 = vmov 0   ;;  %v450_v1 = vld [vmem:[#allocation2 + $0x14] ss:$8 sps:$4 sm:$0xff]  }
  0x1e   : > { %264 = vmatprep.mubr.bf16.mxu0 %v514_v0  ;;  %p178_p1 = scmp.lt.s32.totalorder %s394_s23, 3  ;;  %v452_v2 = vld [vmem:[#allocation2 + $0x10] ss:$8 sps:$4 sm:$0xff]   ;;  %244 = vmatprep.subr.bf16.mxu0 %v450_v1  ;;  %v453_v3 = vld [vmem:[#allocation2 + $0x4] ss:$8 sps:$4 sm:$0xff]   ;;  %vm228_vm0 = vcmask 261120  }
  0x1f   : > { %245 = vmatpush1.bf16.msra.mxu0 %v452_v2  ;;  %v455_v4 = vld [vmem:[#allocation2] ss:$8 sps:$4 sm:$0xff]  }
  0x20   : > { %s598_s23 = smov (!%p178_p1, %s394_s23), 3  ;;  %246 = vmatprep.subr.bf16.mxu0 %v453_v3 }
  0x21   : > { %s395_s24 = sshll.u32 %s598_s23, 2  ;;  %s409_s28 = sshll.u32 %s598_s23, 3 }
  0x22   : > { %s181_s27 = scalar_lea.vmem %s588_s0, %s395_s24  ;;  %s193_s3 = scalar_lea.vmem %s590_s2, %s409_s28 }
  0x23   : > { %v456_v5 = vld [vmem:[%s181_s27] sm:$0xff]   ;;  %247 = vmatpush1.bf16.msra.mxu0 %v455_v4 }
  0x26   : > { %404 = vmatmul.mubr.msk.bf16.vlgmr.msra.gmra.mxu0 %vm228_vm0, %v456_v5 }
  0xe6   : > { %v266_v6 = vpop.f32.mrf.mxu0 }
  0xe8   : > { %v268_v7 = vpop.f32.mrf.mxu0 }
  0xe9   : > { %v410_v8 = vpack.c.bf16 %v268_v7, %v266_v6 }
  0xea   : > { %v270_v9 = vpop.f32.mrf.mxu0 }
  0xeb   : > { %287 = vst [vmem:[%s193_s3] sm:$0xff] %v410_v8 }
  0xec   : > { %v272_v10 = vpop.f32.mrf.mxu0 }
  0xed   : > { %v411_v11 = vpack.c.bf16 %v272_v10, %v270_v9 }
  0xef   : > { %288 = vst [vmem:[%s193_s3 + $0x8] sm:$0xff] %v411_v11 }
  0xf0 PF: > { %s13_s11 = sadd.s32 1, %s509_s11   ;;  %s593_s9 = smov %s505_s10 }
  0xf1   : > { %p10_p2 = scmp.ge.s32.totalorder %s13_s11, 4   ;;  %s594_s10 = smov %s596_s13 }
  0xf3   :  { %12 = sbr.rel (!%p10_p2) target bundleno = 2 (0x2), region = 64 }
  0xf8   :  { %322 = vsyncpa [#allocation3], 1 }
  0xf9   :  { %324 = vsyncpa [#allocation3 + $0x1], 1 }

// kernel: dcgan_forward.13
= control target key start
LH: loop header
LB: loop body
LE: loop exit
PB: predicated region body
PF: predicated region fallthrough
CT: control target
= control target key end

     0   :  { %10 = vsyncpa [#allocation7], 0  ;;  %s1269_s0 = inlined_call_operand.vmem [shape: bf16[8,128], index: 0, kind: input, shape index: {}]   ;;  %s1270_s1 = inlined_call_operand.hbm [shape: f32[1,32], index: 1, kind: input, shape index: {}]   ;;  %s1271_s2 = inlined_call_operand.hbm [shape: f32[1,32], index: 2, kind: input, shape index: {}]   ;;  %s1272_s3 = inlined_call_operand.vmem [shape: f32[128,32], index: 3, kind: input, shape index: {}]   ;;  %s1273_s4 = inlined_call_operand.vmem [shape: f32[32,128], index: 4, kind: input, shape index: {}]   ;;  %s1274_s5 = inlined_call_operand.vmem [shape: bf16[8,128], index: 5, kind: output, shape index: {}]  }
   0x1   :  { %11 = vsyncpa [#allocation9], 0  ;;  %s1075_s18 = smov 0   ;;  %s1077_s19 = smov 0  }
   0x2   :  { %s1079_s20 = smov 0  }
   0x3 LB: > { %s745_s21 = sadd.s32 4294967295, %s1037_s20   ;;  %s29_s22 = sadd.s32 1, %s1033_s19  ;;  %s1037_s20 = sphi %s1079_s20, %s17_s20   ;;  %s1033_s19 = sphi %s1077_s19, %s1282_s19   ;;  %s1029_s18 = sphi %s1075_s18, %s1281_s18  }
   0x4   : > { %p31_p0 = scmp.ge.s32.totalorder %s29_s22, 2  ;;  %p747_p1 = scmp.ge.s32.totalorder %s1037_s20, 1 }
   0x5   : > { %p172_p2 = scmp.lt.s32.totalorder %s1037_s20, 3  ;;  %p1100_p4 = scmp.eq.s32.totalorder %s745_s21, 0 }
   0x6   : > { %s1284_s22 = smov (%p31_p0, %s29_s22), 0  ;;  %s1039_s25 = smov [#allocation6]  }
   0x7   : > { %p1096_p3 = pnand %p747_p1, %p172_p2  ;;  %s192_s26 = sshll.u32 %s1039_s25, 4  ;;  %s193_s26 = int_to_ptr.vmem [resolvable:$true] %s192_s26 }
   0x8   : > { %s1278_s24 = scalar_select %p1100_p4, 1, 0 }
   0x9   : > { %p912_p5 = pneg %p1096_p3  ;;  %s1040_s27 = smov [#allocation8]  }
   0xa   : > { %s203_s28 = sshll.u32 %s1040_s27, 4  ;;  %s966_s30 = scalar_lea.vmem %s193_s26, 16  ;;  %s204_s28 = int_to_ptr.vmem [resolvable:$true] %s203_s28 }
   0xb   : > { %p1108_p6 = pnand %p1100_p4, %p912_p5  ;;  %p967_p8 = scmp.ne.s32.totalorder %s193_s26, %s966_s30 }
   0xc   : > { %s973_s6 = scalar_lea.vmem %s193_s26, 32  ;;  %p974_p11 = scmp.lt.s32.totalorder %s193_s26, %s193_s26 }
   0xd   : > { %p957_p7 = pneg %p1108_p6  ;;  %p975_p12 = scmp.lt.s32.totalorder %s973_s6, %s966_s30 }
   0xf   : > { %p969_p9 = pnand %p967_p8, %p957_p7  ;;  %p976_p13 = por %p975_p12, %p974_p11 }
  0x11   : > { %p970_p10 = pneg %p969_p9 }
  0x13   : > { %p977_p0 = pnand %p976_p13, %p970_p10 }
  0x15   : > { %980 = shalt.err (!%p977_p0)
}
  0x16   : > { %915 = dma.hbm_to_vmem [thread:$0]  (!%p1108_p6), %s1270_s1, 16, %s193_s26, [#allocation7]  }
  0x17   : > { %s992_s9 = scalar_lea.vmem %s204_s28, 16  ;;  %s999_s10 = scalar_lea.vmem %s204_s28, 32 }
  0x18   : > { %p993_p1 = scmp.ne.s32.totalorder %s204_s28, %s992_s9  ;;  %p1000_p8 = scmp.lt.s32.totalorder %s204_s28, %s204_s28 }
  0x19   : > { %p1001_p9 = scmp.lt.s32.totalorder %s999_s10, %s992_s9 }
  0x1a   : > { %p995_p2 = pnand %p993_p1, %p957_p7 }
  0x1b   : > { %p1002_p4 = por %p1001_p9, %p1000_p8 }
  0x1c   : > { %p996_p5 = pneg %p995_p2 }
  0x1e   : > { %p1003_p11 = pnand %p1002_p4, %p996_p5 }
  0x20   : > { %1006 = shalt.err (!%p1003_p11)
}
  0x21   : > { %918 = dma.hbm_to_vmem [thread:$0]  (!%p1108_p6), %s1271_s2, 16, %s204_s28, [#allocation9]  }
  0x22   : > { %222 = sbr.rel (%p1096_p3) target bundleno = 549 (0x225), region = 40  ;;  %p1280_p10 = scmp.ne.s32.totalorder (!%p1096_p3), %s1278_s24, 0 }
  0x27   : > { %1020 = dma.done.wait (%p1280_p10), [#allocation7], 16  }
  0x28   : > { %1022 = vsyncadd (%p1280_p10), [#allocation7], 4294967280 }
  0x29   : > { %1024 = dma.done.wait (%p1280_p10), [#allocation9], 16  }
  0x2a   : > { %1026 = vsyncadd (%p1280_p10), [#allocation9], 4294967280  ;;  %p264_p4 = scmp.eq.s32.totalorder %s1029_s18, 0 }
  0x2b   : > { %v1041_v0 = vmov (%p264_p4), 0.0   ;;  %v1042_v1 = vmov (%p264_p4), 0  }
  0x2c   : > { %269 = sbr.rel (!%p264_p4) target bundleno = 49 (0x31), region = 52  ;;  %270 = vst [vmem:[#allocation2] sm:$0x1] (%p264_p4), %v1041_v0  ;;  %271 = vst [vmem:[#allocation3] sm:$0x1] (%p264_p4), %v1041_v0 }
  0x2d   : > { %272 = vst [vmem:[%s1274_s5] sm:$0xf] (%p264_p4), %v1042_v1 }
  0x31 PF: > { %p755_p3 = scmp.ne.s32.totalorder %s1029_s18, 0 }
  0x33   : > { %275 = sbr.rel (%p755_p3) target bundleno = 76 (0x4c), region = 56 }
  0x38   : > { %v276_v2 = vld [vmem:[%s1269_s0] sm:$0xf] }
  0x39   : > { %v277_v3 = vunpack.c.l.bf16 %v276_v2  ;;  %v278_v14 = vld [vmem:[#allocation2] sm:$0x1]  ;;  %v287_v17 = vld [vmem:[#allocation3] sm:$0x1] }
  0x3b   : > { %v279_v4 = vrot.slane %v277_v3, 4  ;;  %v288_v5 = vmul.f32 %v277_v3, %v277_v3 }
  0x3d   : > { %v280_v6 = vadd.f32 %v279_v4, %v277_v3  ;;  %v289_v7 = vrot.slane %v288_v5, 4 }
  0x3f   : > { %v281_v8 = vrot.slane %v280_v6, 2  ;;  %v290_v9 = vadd.f32 %v289_v7, %v288_v5 }
  0x41   : > { %v282_v10 = vadd.f32 %v281_v8, %v280_v6  ;;  %v291_v11 = vrot.slane %v290_v9, 2 }
  0x43   : > { %v283_v12 = vrot.slane %v282_v10, 1  ;;  %v292_v13 = vadd.f32 %v291_v11, %v290_v9 }
  0x45   : > { %v284_v15 = vadd.f32 %v283_v12, %v282_v10  ;;  %v293_v16 = vrot.slane %v292_v13, 1 }
  0x47   : > { %v285_v18 = vadd.f32 %v284_v15, %v278_v14  ;;  %v294_v19 = vadd.f32 %v293_v16, %v292_v13 }
  0x49   : > { %286 = vst [vmem:[#allocation2] sm:$0x1] %v285_v18  ;;  %v295_v20 = vadd.f32 %v294_v19, %v287_v17 }
  0x4b   : > { %296 = vst [vmem:[#allocation3] sm:$0x1] %v295_v20 }
  0x4c PF: > { %p297_p6 = scmp.eq.s32.totalorder %s1029_s18, 1 }
  0x4d   : > { %v318_v21 = vld [vmem:[%s1272_s3 + $0x78] sm:$0xff] (%p297_p6)  ;;  %v1043_v22 = vmov (%p297_p6), 0.0   ;;  %v317_v23 = vld [vmem:[%s1272_s3 + $0x70] sm:$0xff] (%p297_p6)  ;;  %v316_v24 = vld [vmem:[%s1272_s3 + $0x68] sm:$0xff] (%p297_p6)  ;;  %vm1044_vm0 = vmmov (%p297_p6), 0   ;;  %vm476_vm1 = vcmask (%p297_p6), 261120  }
  0x4e   : > { %301 = sbr.rel (!%p297_p6) target bundleno = 529 (0x211), region = 60  ;;  %812 = vmatprep.subr.mxu0 (%p297_p6), %v1043_v22  ;;  %847 = vmatprep.subr.mxu1 (%p297_p6), %v1043_v22  ;;  %v315_v25 = vld [vmem:[%s1272_s3 + $0x60] sm:$0xff] (%p297_p6)  ;;  %v314_v26 = vld [vmem:[%s1272_s3 + $0x58] sm:$0xff] (%p297_p6)  ;;  %v313_v27 = vld [vmem:[%s1272_s3 + $0x50] sm:$0xff] (%p297_p6) }
  0x4f   : > { %813 = vmatpush3.msra.mxu0 (%p297_p6), %v318_v21  ;;  %848 = vmatpush3.msra.mxu1 (%p297_p6), %v318_v21  ;;  %v312_v28 = vld [vmem:[%s1272_s3 + $0x48] sm:$0xff] (%p297_p6)  ;;  %v311_v29 = vld [vmem:[%s1272_s3 + $0x40] sm:$0xff] (%p297_p6)  ;;  %v310_v30 = vld [vmem:[%s1272_s3 + $0x38] sm:$0xff] (%p297_p6) }
  0x50   : > { %814 = vmatprep.subr.mxu0 (%p297_p6), %v1043_v22  ;;  %849 = vmatprep.subr.mxu1 (%p297_p6), %v1043_v22  ;;  %v309_v31 = vld [vmem:[%s1272_s3 + $0x30] sm:$0xff] (%p297_p6)  ;;  %v308_v32 = vld [vmem:[%s1272_s3 + $0x28] sm:$0xff] (%p297_p6)  ;;  %v307_v33 = vld [vmem:[%s1272_s3 + $0x20] sm:$0xff] (%p297_p6) }
  0x51   : > { %815 = vmatpush3.msra.mxu0 (%p297_p6), %v317_v23  ;;  %850 = vmatpush3.msra.mxu1 (%p297_p6), %v317_v23  ;;  %v306_v34 = vld [vmem:[%s1272_s3 + $0x18] sm:$0xff] (%p297_p6)  ;;  %v305_v35 = vld [vmem:[%s1272_s3 + $0x10] sm:$0xff] (%p297_p6)  ;;  %v304_v36 = vld [vmem:[%s1272_s3 + $0x8] sm:$0xff] (%p297_p6) }
  0x52   : > { %816 = vmatprep.subr.mxu0 (%p297_p6), %v1043_v22  ;;  %851 = vmatprep.subr.mxu1 (%p297_p6), %v1043_v22  ;;  %v303_v37 = vld [vmem:[%s1272_s3] sm:$0xff] (%p297_p6)  ;;  %v475_v40 = vld [vmem:[%s1273_s4 + $0x18] sm:$0xff] (%p297_p6)  ;;  %v474_v41 = vld [vmem:[%s1273_s4 + $0x10] sm:$0xff] (%p297_p6) }
  0x53   : > { %817 = vmatpush3.msra.mxu0 %v316_v24  ;;  %852 = vmatpush3.msra.mxu1 %v316_v24  ;;  %v302_v38 = vld [vmem:[#allocation2] sm:$0x1]  ;;  %v389_v39 = vld [vmem:[#allocation3] sm:$0x1]  ;;  %v473_v42 = vld [vmem:[%s1273_s4 + $0x8] sm:$0xff] }
  0x54   : > { %818 = vmatprep.subr.mxu0 %v1043_v22  ;;  %853 = vmatprep.subr.mxu1 %v1043_v22  ;;  %v472_v43 = vld [vmem:[%s1273_s4] sm:$0xff] }
  0x55   : > { %819 = vmatpush3.msra.mxu0 %v315_v25  ;;  %854 = vmatpush3.msra.mxu1 %v315_v25  ;;  %v465_v54 = vld [vmem:[#allocation6] sm:$0x1]  ;;  %v469_v57 = vld [vmem:[#allocation8] sm:$0x1] }
  0x56   : > { %820 = vmatprep.subr.mxu0 %v1043_v22  ;;  %855 = vmatprep.subr.mxu1 %v1043_v22 }
  0x57   : > { %821 = vmatpush3.msra.mxu0 %v314_v26  ;;  %856 = vmatpush3.msra.mxu1 %v314_v26 }
  0x58   : > { %822 = vmatprep.subr.mxu0 %v1043_v22  ;;  %857 = vmatprep.subr.mxu1 %v1043_v22 }
  0x59   : > { %823 = vmatpush3.msra.mxu0 %v313_v27  ;;  %858 = vmatpush3.msra.mxu1 %v313_v27 }
  0x5a   : > { %824 = vmatprep.subr.mxu0 %v1043_v22  ;;  %859 = vmatprep.subr.mxu1 %v1043_v22 }
  0x5b   : > { %825 = vmatpush3.msra.mxu0 %v312_v28  ;;  %860 = vmatpush3.msra.mxu1 %v312_v28 }
  0x5c   : > { %826 = vmatprep.subr.mxu0 %v1043_v22  ;;  %861 = vmatprep.subr.mxu1 %v1043_v22 }
  0x5d   : > { %827 = vmatpush3.msra.mxu0 %v311_v29  ;;  %862 = vmatpush3.msra.mxu1 %v311_v29 }
  0x5e   : > { %828 = vmatprep.subr.mxu0 %v1043_v22  ;;  %863 = vmatprep.subr.mxu1 %v1043_v22 }
  0x5f   : > { %829 = vmatpush3.msra.mxu0 %v310_v30  ;;  %864 = vmatpush3.msra.mxu1 %v310_v30 }
  0x60   : > { %830 = vmatprep.subr.mxu0 %v1043_v22  ;;  %865 = vmatprep.subr.mxu1 %v1043_v22 }
  0x61   : > { %831 = vmatpush3.msra.mxu0 %v309_v31  ;;  %866 = vmatpush3.msra.mxu1 %v309_v31 }
  0x62   : > { %832 = vmatprep.subr.mxu0 %v1043_v22  ;;  %867 = vmatprep.subr.mxu1 %v1043_v22 }
  0x63   : > { %833 = vmatpush3.msra.mxu0 %v308_v32  ;;  %868 = vmatpush3.msra.mxu1 %v308_v32 }
  0x64   : > { %834 = vmatprep.subr.mxu0 %v1043_v22  ;;  %869 = vmatprep.subr.mxu1 %v1043_v22 }
  0x65   : > { %835 = vmatpush3.msra.mxu0 %v307_v33  ;;  %870 = vmatpush3.msra.mxu1 %v307_v33 }
  0x66   : > { %836 = vmatprep.subr.mxu0 %v1043_v22  ;;  %871 = vmatprep.subr.mxu1 %v1043_v22 }
  0x67   : > { %837 = vmatpush3.msra.mxu0 %v306_v34  ;;  %872 = vmatpush3.msra.mxu1 %v306_v34 }
  0x68   : > { %838 = vmatprep.subr.mxu0 %v1043_v22  ;;  %873 = vmatprep.subr.mxu1 %v1043_v22 }
  0x69   : > { %839 = vmatpush3.msra.mxu0 %v305_v35  ;;  %874 = vmatpush3.msra.mxu1 %v305_v35 }
  0x6a   : > { %840 = vmatprep.subr.mxu0 %v1043_v22  ;;  %875 = vmatprep.subr.mxu1 %v1043_v22 }
  0x6b   : > { %841 = vmatpush3.msra.mxu0 %v304_v36  ;;  %876 = vmatpush3.msra.mxu1 %v304_v36 }
  0x6c   : > { %842 = vmatprep.subr.mxu0 %v1043_v22  ;;  %877 = vmatprep.subr.mxu1 %v1043_v22 }
  0x6d   : > { %843 = vmatpush3.msra.mxu0 %v303_v37  ;;  %844 = vmatprep.mubr.msk.f32.mxu0 %vm1044_vm0, %v1043_v22 }
  0x6e   : > { %878 = vmatpush3.msra.mxu1 %v303_v37  ;;  %879 = vmatprep.mubr.msk.f32.mxu1 %vm1044_vm0, %v1043_v22 }
  0x6f   : > { %845 = vmatmul.mubr.f32.vlgmr.msra.gmra.mxu0 %v302_v38  ;;  %880 = vmatmul.mubr.f32.vlgmr.msra.gmra.mxu1 %v389_v39 }
  0x70   : > { %882 = vmatprep.subr.mxu0 %v1043_v22  ;;  %893 = vmatprep.subr.mxu1 %v1043_v22 }
  0x71   : > { %890 = vmatprep.mubr.msk.f32.mxu0 %vm1044_vm0, %v1043_v22  ;;  %901 = vmatprep.mubr.msk.f32.mxu1 %vm1044_vm0, %v1043_v22 }
  0x72   : > { %883 = vmatpush3.msra.mxu0 %v475_v40  ;;  %894 = vmatpush3.msra.mxu1 %v475_v40 }
  0x73   : > { %884 = vmatprep.subr.mxu0 %v1043_v22  ;;  %895 = vmatprep.subr.mxu1 %v1043_v22 }
  0x74   : > { %885 = vmatpush3.msra.mxu0 %v474_v41  ;;  %896 = vmatpush3.msra.mxu1 %v474_v41 }
  0x75   : > { %886 = vmatprep.subr.mxu0 %v1043_v22  ;;  %897 = vmatprep.subr.mxu1 %v1043_v22 }
  0x76   : > { %887 = vmatpush3.msra.mxu0 %v473_v42  ;;  %898 = vmatpush3.msra.mxu1 %v473_v42 }
  0x77   : > { %888 = vmatprep.subr.mxu0 %v1043_v22  ;;  %899 = vmatprep.subr.mxu1 %v1043_v22 }
  0x78   : > { %889 = vmatpush3.msra.mxu0 %v472_v43  ;;  %900 = vmatpush3.msra.mxu1 %v472_v43 }
 0x12f   : > { %v385_v44 = vpop.f32.mrf.mxu0  ;;  %v456_v45 = vpop.f32.mrf.mxu1 }
 0x130   : > { %v460_v46 = vmul.f32 0.03125, %v385_v44  ;;  %v461_v47 = vmul.f32 0.03125, %v456_v45 }
 0x131   : > { %v846_v48 = vpop.f32.mrf.mxu0  ;;  %v881_v49 = vpop.f32.mrf.mxu1 }
 0x132   : > { %v462_v50 = vmul.f32 %v460_v46, %v460_v46 }
 0x134   : > { %v463_v51 = vsub.f32 %v461_v47, %v462_v50 }
 0x136   : > { %v464_v52 = vmax.f32 %v463_v51, 0.0 }
 0x138   : > { %v466_v53 = vadd.f32 1e-05, %v464_v52 }
 0x13a   : > { %953 = vrsqrt.f32 %v466_v53 }
 0x147   : > { %v954_v55 = vpop.eup %953 }
 0x148   : > { %v468_v56 = vmul.f32 %v954_v55, %v465_v54 }
 0x14a   : > { %891 = vmatmul.mubr.msk.f32.vlgmr.msra.gmra.mxu0 %vm476_vm1, %v468_v56  ;;  %v470_v58 = vmul.f32 %v468_v56, %v460_v46 }
 0x14c   : > { %v471_v59 = vsub.f32 %v469_v57, %v470_v58 }
 0x14e   : > { %902 = vmatmul.mubr.msk.f32.vlgmr.msra.gmra.mxu1 %vm476_vm1, %v471_v59 }
 0x20a   : > { %v546_v60 = vpop.f32.mrf.mxu0 }
 0x20b   : > { %550 = vst [vmem:[#allocation4] sm:$0x1] %v546_v60 }
 0x20c   : > { %v892_v61 = vpop.f32.mrf.mxu0 }
 0x20e   : > { %v624_v62 = vpop.f32.mrf.mxu1 }
 0x20f   : > { %628 = vst [vmem:[#allocation5] sm:$0x1] %v624_v62 }
 0x210   : > { %v903_v63 = vpop.f32.mrf.mxu1 }
 0x211 PF: > { %p759_p7 = scmp.ne.s32.totalorder %s1029_s18, 1 }
 0x213   : > { %631 = sbr.rel (%p759_p7) target bundleno = 549 (0x225), region = 64 }
 0x218   : > { %v632_v0 = vld [vmem:[%s1269_s0] sm:$0xf] }
 0x219   : > { %v760_v1 = vld [vmem:[#allocation4] ss:$0 sm:$0xff]  ;;  %v633_v2 = vunpack.c.l.bf16 %v632_v0  ;;  %v761_v3 = vld [vmem:[#allocation5] ss:$0 sm:$0xff] }
 0x21b   : > { %v641_v4 = vmul.f32 %v760_v1, %v633_v2 }
 0x21d   : > { %v649_v5 = vadd.f32 %v761_v3, %v641_v4 }
 0x21f   : > { %vm650_vm2 = vcmp.gt.f32.partialorder %v649_v5, 0.0  ;;  %v651_v6 = vmul.f32 0.2, %v649_v5 }
 0x221   : > { %v652_v7 = vsel %vm650_vm2, %v649_v5, %v651_v6 }
 0x222   : > { %v653_v8 = vpack.c.bf16 %v652_v7, %v652_v7 }
 0x224   : > { %654 = vst [vmem:[%s1274_s5] sm:$0xf] %v653_v8 }
 0x225 PF: > { %s17_s20 = sadd.s32 1, %s1037_s20   ;;  %s1281_s18 = smov %s1033_s19 }
 0x226   : > { %p14_p12 = scmp.ge.s32.totalorder %s17_s20, 4   ;;  %s1282_s19 = smov %s1284_s22 }
 0x228   :  { %16 = sbr.rel (!%p14_p12) target bundleno = 3 (0x3), region = 95 }
 0x22d   :  { %677 = vsyncpa [#allocation7], 1 }
 0x22e   :  { %679 = vsyncpa [#allocation7 + $0x1], 1 }
 0x22f   :  { %680 = vsyncpa [#allocation9], 1 }

// kernel: dcgan_forward.12
= control target key start
LH: loop header
LB: loop body
LE: loop exit
PB: predicated region body
PF: predicated region fallthrough
CT: control target
= control target key end

     0   :  { %13 = vsyncpa [#allocation3], 0  ;;  %s777_s0 = inlined_call_operand.vmem [shape: bf16[2,16], index: 0, kind: input, shape index: {}]   ;;  %s778_s1 = inlined_call_operand.hbm [shape: f32[2,32], index: 1, kind: input, shape index: {}]   ;;  %s779_s2 = inlined_call_operand.vmem [shape: f32[32,16], index: 2, kind: input, shape index: {}]   ;;  %s780_s3 = inlined_call_operand.hbm [shape: f32[1,16], index: 3, kind: input, shape index: {}]   ;;  %s781_s4 = inlined_call_operand.hbm [shape: f32[1,16], index: 4, kind: input, shape index: {}]   ;;  %s782_s5 = inlined_call_operand.hbm [shape: f32[1,16], index: 5, kind: input, shape index: {}]   ;;  %s783_s6 = inlined_call_operand.hbm [shape: bf16[16,512], index: 6, kind: input, shape index: {}]   ;;  %s784_s7 = inlined_call_operand.hbm [shape: bf16[16,512], index: 7, kind: input, shape index: {}]   ;;  %s785_s8 = inlined_call_operand.vmem [shape: bf16[2,512], index: 8, kind: output, shape index: {}]  }
   0x1   :  { %14 = vsyncpa [#allocation5], 0 }
   0x2   :  { %15 = vsyncpa [#allocation8], 0 }
   0x3   :  { %16 = vsyncpa [#allocation11], 0  ;;  %s684_s27 = smov [#allocation4]   ;;  %s685_s29 = smov [#allocation7]  }
   0x4   :  { %s37_s28 = sshll.u32 %s684_s27, 4  ;;  %s57_s30 = sshll.u32 %s685_s29, 4  ;;  %s38_s28 = int_to_ptr.vmem [resolvable:$true] %s37_s28  ;;  %s58_s30 = int_to_ptr.vmem [resolvable:$true] %s57_s30 }
   0x5   :  { %s564_s9 = scalar_lea.vmem %s38_s28, 16  ;;  %s568_s10 = scalar_lea.vmem %s38_s28, 32 }
   0x6   :  { %p565_p0 = scmp.ne.s32.totalorder %s38_s28, %s564_s9  ;;  %p569_p1 = scmp.lt.s32.totalorder %s38_s28, %s38_s28 }
   0x7   :  { %p570_p2 = scmp.lt.s32.totalorder %s568_s10, %s564_s9 }
   0x9   :  { %p571_p3 = por %p570_p2, %p569_p1 }
   0xb   :  { %p572_p4 = pnand %p571_p3, %p565_p0 }
   0xd   :  { %575 = shalt.err (!%p572_p4)
}
   0xe   :  { %40 = dma.hbm_to_vmem [thread:$0]  %s780_s3, 16, %s38_s28, [#allocation5]  }
   0xf   :  { %s584_s13 = scalar_lea.vmem %s58_s30, 16  ;;  %s588_s14 = scalar_lea.vmem %s58_s30, 32 }
  0x10   :  { %p585_p5 = scmp.ne.s32.totalorder %s58_s30, %s584_s13  ;;  %p589_p6 = scmp.lt.s32.totalorder %s58_s30, %s58_s30 }
  0x11   :  { %p590_p7 = scmp.lt.s32.totalorder %s588_s14, %s584_s13 }
  0x13   :  { %p591_p8 = por %p590_p7, %p589_p6 }
  0x15   :  { %p592_p9 = pnand %p591_p8, %p585_p5 }
  0x17   :  { %595 = shalt.err (!%p592_p9)
}
  0x18   :  { %60 = dma.hbm_to_vmem [thread:$0]  %s782_s5, 16, %s58_s30, [#allocation8]  }
  0x19   :  { %s686_s17 = smov [#allocation2]   ;;  %s687_s19 = smov [#allocation6]  }
  0x1a   :  { %s25_s18 = sshll.u32 %s686_s17, 4  ;;  %s47_s20 = sshll.u32 %s687_s19, 4  ;;  %s26_s18 = int_to_ptr.vmem [resolvable:$true] %s25_s18  ;;  %s48_s20 = int_to_ptr.vmem [resolvable:$true] %s47_s20 }
  0x1b   :  { %s604_s21 = scalar_lea.vmem %s26_s18, 32  ;;  %p609_p11 = scmp.lt.s32.totalorder %s26_s18, %s26_s18 }
  0x1c   :  { %p605_p10 = scmp.ne.s32.totalorder %s26_s18, %s604_s21  ;;  %p610_p12 = scmp.lt.s32.totalorder %s604_s21, %s604_s21 }
  0x1e   :  { %p611_p13 = por %p610_p12, %p609_p11 }
  0x20   :  { %p612_p0 = pnand %p611_p13, %p605_p10 }
  0x22   :  { %615 = shalt.err (!%p612_p0)
}
  0x23   :  { %28 = dma.hbm_to_vmem [thread:$0]  %s778_s1, 32, %s26_s18, [#allocation3]  }
  0x24   :  { %s624_s23 = scalar_lea.vmem %s48_s20, 16  ;;  %s628_s5 = scalar_lea.vmem %s48_s20, 32 }
  0x25   :  { %p625_p1 = scmp.ne.s32.totalorder %s48_s20, %s624_s23  ;;  %p629_p2 = scmp.lt.s32.totalorder %s48_s20, %s48_s20 }
  0x26   :  { %p630_p3 = scmp.lt.s32.totalorder %s628_s5, %s624_s23 }
  0x28   :  { %p631_p4 = por %p630_p3, %p629_p2 }
  0x2a   :  { %p632_p5 = pnand %p631_p4, %p625_p1 }
  0x2c   :  { %635 = shalt.err (!%p632_p5)
}
  0x2d   :  { %50 = dma.hbm_to_vmem [thread:$0]  %s781_s4, 16, %s48_s20, [#allocation5]  }
  0x2e   :  { %s688_s26 = smov [#allocation9]  }
  0x2f   :  { %s66_s27 = sshll.u32 %s688_s26, 4  ;;  %s67_s27 = int_to_ptr.vmem [resolvable:$true] %s66_s27 }
  0x30   :  { %s644_s28 = scalar_lea.vmem %s67_s27, 512  ;;  %p649_p7 = scmp.lt.s32.totalorder %s67_s27, %s67_s27 }
  0x31   :  { %p645_p6 = scmp.ne.s32.totalorder %s67_s27, %s644_s28  ;;  %p650_p8 = scmp.lt.s32.totalorder %s644_s28, %s644_s28 }
  0x33   :  { %p651_p9 = por %p650_p8, %p649_p7 }
  0x35   :  { %p652_p10 = pnand %p651_p9, %p645_p6 }
  0x37   :  { %655 = shalt.err (!%p652_p10)
}
  0x38   :  { %s689_s1 = smov 256   ;;  %s690_s29 = smov 16  }
  0x39   :  { %72 = dma.hbm_to_vmem [thread:$0]  %s783_s6, 512, %s67_s27, [#allocation8], %s689_s1, %s689_s1, %s690_s29  }
  0x3a   :  { %s691_s10 = smov [#allocation10]  }
  0x3b   :  { %s78_s11 = sshll.u32 %s691_s10, 4  ;;  %s79_s11 = int_to_ptr.vmem [resolvable:$true] %s78_s11 }
  0x3c   :  { %s664_s4 = scalar_lea.vmem %s79_s11, 512  ;;  %p669_p12 = scmp.lt.s32.totalorder %s79_s11, %s79_s11 }
  0x3d   :  { %p665_p11 = scmp.ne.s32.totalorder %s79_s11, %s664_s4  ;;  %p670_p13 = scmp.lt.s32.totalorder %s664_s4, %s664_s4 }
  0x3f   :  { %p671_p0 = por %p670_p13, %p669_p12 }
  0x41   :  { %p672_p1 = pnand %p671_p0, %p665_p11 }
  0x43   :  { %675 = shalt.err (!%p672_p1)
}
  0x44   :  { %84 = dma.hbm_to_vmem [thread:$0]  %s784_s7, 512, %s79_s11, [#allocation11], %s689_s1, %s689_s1, %s690_s29  }
  0x45   :  { %676 = dma.done.wait [#allocation3], 32  }
  0x46   :  { %677 = vsyncadd [#allocation3], 4294967264 }
  0x47   :  { %678 = dma.done.wait [#allocation5], 32  }
  0x48   :  { %679 = vsyncadd [#allocation5], 4294967264 }
  0x49   :  { %680 = dma.done.wait [#allocation8], 528  }
  0x4a   :  { %681 = vsyncadd [#allocation8], 4294966768 }
  0x4b   :  { %682 = dma.done.wait [#allocation11], 512  }
  0x4c   :  { %683 = vsyncadd [#allocation11], 4294966784  ;;  %v692_v0 = vmov 0.0   ;;  %vm693_vm0 = vmmov 0   ;;  %v108_v1 = vld [vmem:[%s779_s2 + $0x18] sm:$0xff]  ;;  %v107_v2 = vld [vmem:[%s779_s2 + $0x10] sm:$0xff]  ;;  %v466_v54 = vlaneseq }
  0x4d   :  { %519 = vmatprep.subr.mxu0 %v692_v0  ;;  %527 = vmatprep.mubr.msk.f32.mxu0 %vm693_vm0, %v692_v0  ;;  %v106_v3 = vld [vmem:[%s779_s2 + $0x8] sm:$0xff]  ;;  %v105_v4 = vld [vmem:[%s779_s2] sm:$0xff]  ;;  %vm116_vm1 = vcmask 261120   ;;  %v694_v12 = vmov 0   ;;  %vm190_vm2 = vcmask 123904   ;;  %vm262_vm4 = vcmask 130048  }
  0x4e   :  { %520 = vmatpush3.msra.mxu0 %v108_v1  ;;  %v104_v5 = vld [vmem:[#allocation2] sm:$0x3]  ;;  %v542_v6 = vld [vmem:[#allocation10 + $0x4] ss:$16 sps:$4 sm:$0xff]   ;;  %v546_v8 = vld [vmem:[#allocation10 + $0xc] ss:$16 sps:$4 sm:$0xff]   ;;  %298 = vmatprep.mubr.bf16.mxu1 %v694_v12 }
  0x4f   :  { %521 = vmatprep.subr.mxu0 %v692_v0  ;;  %v544_v7 = vld [vmem:[#allocation10 + $0x8] ss:$16 sps:$4 sm:$0xff]   ;;  %v547_v9 = vld [vmem:[#allocation10] ss:$16 sps:$4 sm:$0xff]   ;;  %280 = vmatprep.subr.bf16.mxu1 %v542_v6  ;;  %v550_v10 = vld [vmem:[#allocation9 + $0x4] ss:$16 sps:$4 sm:$0xff]  }
  0x50   :  { %522 = vmatpush3.msra.mxu0 %v107_v2  ;;  %v553_v11 = vld [vmem:[#allocation9 + $0xc] ss:$16 sps:$4 sm:$0xff]   ;;  %281 = vmatpush1.bf16.msra.mxu1 %v547_v9  ;;  %v495_v13 = vld [vmem:[#allocation4] ss:$0 sm:$0xff]  ;;  %v548_v43 = vld [vmem:[#allocation9] ss:$16 sps:$4 sm:$0xff]  }
  0x51   :  { %523 = vmatprep.subr.mxu0 %v692_v0  ;;  %385 = vmatprep.subr.bf16.mxu1 %v550_v10  ;;  %v497_v37 = vld [vmem:[#allocation6] ss:$0 sm:$0xff]  ;;  %v498_v39 = vld [vmem:[#allocation7] ss:$0 sm:$0xff]  ;;  %v551_v44 = vld [vmem:[#allocation9 + $0x8] ss:$16 sps:$4 sm:$0xff]  }
  0x52   :  { %524 = vmatpush3.msra.mxu0 %v106_v3  ;;  %v232_v47 = vld [vmem:[%s777_s0] sm:$0x1]  ;;  %v695_v52 = vmov 1966171168   ;;  %v467_v60 = vshrl.u32 %v466_v54, 7 }
  0x53   :  { %525 = vmatprep.subr.mxu0 %v692_v0  ;;  %v464_v53 = vunpack.c.l.s4 %v695_v52 }
  0x54   :  { %526 = vmatpush3.msra.mxu0 %v105_v4 }
  0x55   :  { %528 = vmatmul.mubr.msk.f32.vlgmr.msra.gmra.mxu0 %vm116_vm1, %v104_v5  ;;  %321 = vmatprep.subr.bf16.mxu0 %v546_v8  ;;  %v465_v59 = vunpack.c.0.s8 %v464_v53 }
  0x56   :  { %322 = vmatpush1.bf16.msra.mxu0 %v544_v7  ;;  %339 = vmatprep.mubr.bf16.mxu0 %v694_v12 }
  0x57   :  { %426 = vmatprep.subr.bf16.mxu0 %v553_v11  ;;  %v468_v0 = vsub.s32 %v465_v59, %v467_v60 }
 0x115   :  { %v186_v14 = vpop.f32.mrf.mxu0 }
 0x116   :  { %v187_v15 = vadd.f32 %v495_v13, %v186_v14 }
 0x117   :  { %v529_v16 = vpop.f32.mrf.mxu0 }
 0x118   :  { %v191_v17 = vsel %vm190_vm2, %v187_v15, 0.0 }
 0x119   :  { %v192_v18 = vrot.slane %v191_v17, 4 }
 0x11b   :  { %v193_v19 = vadd.f32 %v192_v18, %v191_v17 }
 0x11d   :  { %v194_v20 = vrot.slane %v193_v19, 2 }
 0x11f   :  { %v195_v21 = vadd.f32 %v194_v20, %v193_v19 }
 0x121   :  { %v196_v22 = vrot.slane %v195_v21, 1 }
 0x123   :  { %v197_v23 = vadd.f32 %v196_v22, %v195_v21 }
 0x125   :  { %v199_v24 = vmul.f32 0.5, %v197_v23 }
 0x127   :  { %v200_v25 = vsub.f32 %v187_v15, %v199_v24 }
 0x129   :  { %v201_v26 = vmul.f32 %v200_v25, %v200_v25 }
 0x12b   :  { %v202_v27 = vsel %vm190_vm2, %v201_v26, 0.0 }
 0x12c   :  { %v203_v28 = vrot.slane %v202_v27, 4 }
 0x12e   :  { %v204_v29 = vadd.f32 %v203_v28, %v202_v27 }
 0x130   :  { %v205_v30 = vrot.slane %v204_v29, 2 }
 0x132   :  { %v206_v31 = vadd.f32 %v205_v30, %v204_v29 }
 0x134   :  { %v207_v32 = vrot.slane %v206_v31, 1 }
 0x136   :  { %v208_v33 = vadd.f32 %v207_v32, %v206_v31 }
 0x138   :  { %v209_v34 = vmul.f32 0.5, %v208_v33 }
 0x13a   :  { %v210_v35 = vadd.f32 1e-05, %v209_v34 }
 0x13c   :  { %554 = vrsqrt.f32 %v210_v35 }
 0x149   :  { %v555_v36 = vpop.eup %554 }
 0x14a   :  { %v212_v38 = vmul.f32 %v555_v36, %v200_v25 }
 0x14c   :  { %v220_v40 = vmul.f32 %v497_v37, %v212_v38 }
 0x14e   :  { %v228_v41 = vadd.f32 %v498_v39, %v220_v40 }
 0x150   :  { %vm229_vm3 = vcmp.gt.f32.partialorder %v228_v41, 0.0  ;;  %v230_v42 = vmul.f32 0.2, %v228_v41 }
 0x152   :  { %v231_v45 = vsel %vm229_vm3, %v228_v41, %v230_v42 }
 0x153   :  { %v237_v46 = vpack.c.bf16 %v231_v45, %v231_v45 }
 0x155   :  { %503 = vmatmul.mubr.msk.bf16.vlgmr.msra.gmra.mxu1 %vm262_vm4, %v237_v46  ;;  %504 = vmatmul.mubr.msk.bf16.vlgmr.msra.gmra.mxu0 %vm262_vm4, %v237_v46 }
 0x156   :  { %386 = vmatpush1.bf16.msra.mxu1 %v548_v43  ;;  %427 = vmatpush1.bf16.msra.mxu0 %v551_v44 }
 0x157   :  { %403 = vmatprep.mubr.bf16.mxu1 %v694_v12  ;;  %444 = vmatprep.mubr.bf16.mxu0 %v694_v12 }
 0x15d   :  { %509 = vmatmul.mubr.msk.bf16.vlgmr.msra.gmra.mxu1 %vm262_vm4, %v232_v47  ;;  %510 = vmatmul.mubr.msk.bf16.vlgmr.msra.gmra.mxu0 %vm262_vm4, %v232_v47 }
 0x215   :  { %v300_v48 = vpop.f32.mrf.mxu1  ;;  %v341_v49 = vpop.f32.mrf.mxu0 }
 0x217   :  { %v302_v50 = vpop.f32.mrf.mxu1  ;;  %v343_v51 = vpop.f32.mrf.mxu0 }
 0x219   :  { %v304_v55 = vpop.f32.mrf.mxu1  ;;  %v345_v56 = vpop.f32.mrf.mxu0 }
 0x21b   :  { %v305_v57 = vpop.f32.mrf.mxu1  ;;  %v346_v58 = vpop.f32.mrf.mxu0 }
 0x21d   :  { %v405_v61 = vpop.f32.mrf.mxu1  ;;  %v446_v62 = vpop.f32.mrf.mxu0 }
 0x21e   :  { %v406_v2 = vadd.f32 %v405_v61, %v300_v48  ;;  %v447_v3 = vadd.f32 %v446_v62, %v341_v49 }
 0x21f   :  { %v407_v63 = vpop.f32.mrf.mxu1  ;;  %v448_v1 = vpop.f32.mrf.mxu0 }
 0x220   :  { %v408_v4 = vadd.f32 %v407_v63, %v302_v50  ;;  %v449_v5 = vadd.f32 %v448_v1, %v343_v51 }
 0x221   :  { %v409_v6 = vpop.f32.mrf.mxu1  ;;  %v450_v7 = vpop.f32.mrf.mxu0 }
 0x222   :  { %v511_v8 = vpack.c.bf16 %v408_v4, %v406_v2  ;;  %v512_v9 = vpack.c.bf16 %v449_v5, %v447_v3 }
 0x223   :  { %v410_v10 = vpop.f32.mrf.mxu1  ;;  %v451_v11 = vpop.f32.mrf.mxu0 }
 0x224   :  { %v469_v12 = vrot.slane %v511_v8, %v468_v0  ;;  %v476_v13 = vrot.slane %v512_v9, %v468_v0 }
 0x226   :  { %v477_v14 = vcombine.low %v469_v12, %v476_v13 }
 0x228   :  { %513 = vst.sshfl [vmem:[%s785_s8] sm:$0x55 pattern:$0x73625140] %v477_v14 }
 0x229   :  { %491 = vsyncpa [#allocation3], 1 }
 0x22a   :  { %492 = vsyncpa [#allocation5], 1 }
 0x22b   :  { %493 = vsyncpa [#allocation8], 1 }
 0x22c   :  { %494 = vsyncpa [#allocation11], 1 }

// kernel: dcgan_forward.16
= control target key start
LH: loop header
LB: loop body
LE: loop exit
PB: predicated region body
PF: predicated region fallthrough
CT: control target
= control target key end

     0   :  { %7 = vsyncpa [#allocation3], 0  ;;  %s625_s9 = smov 0   ;;  %s627_s10 = smov 0   ;;  %s683_s0 = inlined_call_operand.vmem [shape: bf16[128,16], index: 0, kind: input, shape index: {}]   ;;  %s684_s1 = inlined_call_operand.hbm [shape: bf16[16,128], index: 1, kind: input, shape index: {}]   ;;  %s685_s2 = inlined_call_operand.vmem [shape: bf16[128,128], index: 2, kind: output, shape index: {}]  }
   0x1   :  { %s629_s11 = smov 0  }
   0x2 LB: > { %s433_s12 = sadd.s32 4294967295, %s605_s11   ;;  %s25_s13 = sadd.s32 1, %s601_s10  ;;  %s605_s11 = sphi %s629_s11, %s13_s11   ;;  %s601_s10 = sphi %s627_s10, %s689_s10   ;;  %s597_s9 = sphi %s625_s9, %s688_s9  }
   0x3   : > { %p27_p0 = scmp.ge.s32.totalorder %s25_s13, 2  ;;  %p435_p1 = scmp.ge.s32.totalorder %s605_s11, 1 }
   0x4   : > { %p110_p2 = scmp.lt.s32.totalorder %s605_s11, 3  ;;  %p650_p4 = scmp.eq.s32.totalorder %s433_s12, 0 }
   0x5   : > { %s691_s13 = smov (%p27_p0, %s25_s13), 0  ;;  %s607_s16 = smov [#allocation2]  }
   0x6   : > { %p646_p3 = pnand %p435_p1, %p110_p2  ;;  %s124_s17 = sshll.u32 %s607_s16, 4  ;;  %s125_s17 = int_to_ptr.vmem [resolvable:$true] %s124_s17 }
   0x7   : > { %s564_s18 = scalar_lea.vmem %s125_s17, 128  ;;  %p572_p11 = scmp.lt.s32.totalorder %s125_s17, %s125_s17 }
   0x8   : > { %p515_p5 = pneg %p646_p3  ;;  %p565_p8 = scmp.ne.s32.totalorder %s125_s17, %s564_s18 }
   0x9   : > { %p573_p12 = scmp.lt.s32.totalorder %s564_s18, %s564_s18 }
   0xa   : > { %p516_p6 = pnand %p650_p4, %p515_p5 }
   0xb   : > { %p574_p13 = por %p573_p12, %p572_p11 }
   0xc   : > { %p555_p7 = pneg %p516_p6 }
   0xe   : > { %p567_p9 = pnand %p565_p8, %p555_p7 }
  0x10   : > { %p568_p10 = pneg %p567_p9 }
  0x12   : > { %p575_p0 = pnand %p574_p13, %p568_p10 }
  0x14   : > { %578 = shalt.err (!%p575_p0)
}
  0x15   : > { %s608_s19 = smov 64   ;;  %s609_s20 = smov 4  }
  0x16   : > { %518 = dma.hbm_to_vmem [thread:$0]  (!%p516_p6), %s684_s1, 128, %s125_s17, [#allocation3], %s608_s19, %s608_s19, %s609_s20  }
  0x17   : > { %149 = sbr.rel (%p646_p3) target bundleno = 239 (0xef), region = 28 }
  0x1c   : > { %592 = dma.done.wait (%p650_p4), [#allocation3], 128  }
  0x1d   : > { %594 = vsyncadd (%p650_p4), [#allocation3], 4294967168  ;;  %s440_s23 = sshll.u32 %s597_s9, 3  ;;  %v548_v0 = vld [vmem:[#allocation2] sm:$0xff]   ;;  %vm226_vm0 = vcmask 130048  }
  0x1e   : > { %p175_p1 = scmp.lt.s32.totalorder %s440_s23, 15  ;;  %499 = vmatprep.subr.bf16.mxu0 %v548_v0  ;;  %509 = vmatprep.subr.bf16.mxu1 %v548_v0 }
  0x1f   : > { %500 = vmatpush3.bf16.msra.mxu0 %v548_v0  ;;  %510 = vmatpush3.bf16.msra.mxu1 %v548_v0 }
  0x20   : > { %s693_s23 = smov (!%p175_p1, %s440_s23), 15 }
  0x21   : > { %s441_s24 = sshll.u32 %s693_s23, 2 }
  0x22   : > { %s178_s27 = scalar_lea.vmem %s683_s0, %s441_s24  ;;  %s187_s30 = scalar_lea.vmem %s685_s2, %s441_s24 }
  0x23   : > { %v549_v1 = vld [vmem:[%s178_s27] sm:$0xff]   ;;  %v550_v2 = vld [vmem:[%s178_s27 + $0x10] sm:$0xff]   ;;  %v551_v3 = vld [vmem:[%s178_s27 + $0x8] sm:$0xff]  }
  0x24   : > { %501 = vmatprep.mubr.msk.bf16.mxu0 %vm226_vm0, %v549_v1  ;;  %505 = vmatprep.mubr.msk.bf16.mxu1 %vm226_vm0, %v550_v2  ;;  %v552_v4 = vld [vmem:[%s178_s27 + $0x18] sm:$0xff]  }
  0x25   : > { %502 = vmatmul.mubr.msk.bf16.vlgmr.msra.gmra.mxu0 %vm226_vm0, %v551_v3  ;;  %506 = vmatmul.mubr.msk.bf16.vlgmr.msra.gmra.mxu1 %vm226_vm0, %v552_v4 }
  0xe5   : > { %v503_v5 = vpop.f32.mrf.mxu0  ;;  %v507_v6 = vpop.f32.mrf.mxu1 }
  0xe7   : > { %v273_v7 = vpop.f32.mrf.mxu0  ;;  %v289_v8 = vpop.f32.mrf.mxu1 }
  0xe9   : > { %v504_v9 = vpop.f32.mrf.mxu0  ;;  %v508_v10 = vpop.f32.mrf.mxu1 }
  0xea   : > { %v479_v11 = vpack.c.bf16 %v504_v9, %v503_v5  ;;  %v489_v12 = vpack.c.bf16 %v508_v10, %v507_v6 }
  0xeb   : > { %v276_v13 = vpop.f32.mrf.mxu0  ;;  %v292_v14 = vpop.f32.mrf.mxu1 }
  0xec   : > { %491 = vst [vmem:[%s187_s30 + $0x8] sm:$0xff] %v479_v11   ;;  %493 = vst [vmem:[%s187_s30 + $0x18] sm:$0xff] %v489_v12   ;;  %v474_v15 = vpack.c.bf16 %v276_v13, %v273_v7  ;;  %v484_v16 = vpack.c.bf16 %v292_v14, %v289_v8 }
  0xee   : > { %475 = vst [vmem:[%s187_s30] sm:$0xff] %v474_v15   ;;  %492 = vst [vmem:[%s187_s30 + $0x10] sm:$0xff] %v484_v16  }
  0xef PF: > { %s13_s11 = sadd.s32 1, %s605_s11   ;;  %s688_s9 = smov %s601_s10 }
  0xf0   : > { %p10_p2 = scmp.ge.s32.totalorder %s13_s11, 4   ;;  %s689_s10 = smov %s691_s13 }
  0xf2   :  { %12 = sbr.rel (!%p10_p2) target bundleno = 2 (0x2), region = 64 }
  0xf7   :  { %372 = vsyncpa [#allocation3], 1 }
  0xf8   :  { %374 = vsyncpa [#allocation3 + $0x1], 1 }

// kernel: dcgan_forward.15
= control target key start
LH: loop header
LB: loop body
LE: loop exit
PB: predicated region body
PF: predicated region fallthrough
CT: control target
= control target key end

     0   :  { %10 = vsyncpa [#allocation7], 0  ;;  %s1291_s0 = inlined_call_operand.vmem [shape: bf16[16,128], index: 0, kind: input, shape index: {}]   ;;  %s1292_s1 = inlined_call_operand.hbm [shape: f32[1,16], index: 1, kind: input, shape index: {}]   ;;  %s1293_s2 = inlined_call_operand.hbm [shape: f32[1,16], index: 2, kind: input, shape index: {}]   ;;  %s1294_s3 = inlined_call_operand.vmem [shape: f32[128,16], index: 3, kind: input, shape index: {}]   ;;  %s1295_s4 = inlined_call_operand.vmem [shape: f32[16,128], index: 4, kind: input, shape index: {}]   ;;  %s1296_s5 = inlined_call_operand.vmem [shape: bf16[16,128], index: 5, kind: output, shape index: {}]  }
   0x1   :  { %11 = vsyncpa [#allocation9], 0  ;;  %s1104_s18 = smov 0   ;;  %s1106_s19 = smov 0  }
   0x2   :  { %s1108_s20 = smov 0  }
   0x3 LB: > { %s769_s21 = sadd.s32 4294967295, %s1066_s20   ;;  %s29_s22 = sadd.s32 1, %s1062_s19  ;;  %s1066_s20 = sphi %s1108_s20, %s17_s20   ;;  %s1062_s19 = sphi %s1106_s19, %s1304_s19   ;;  %s1058_s18 = sphi %s1104_s18, %s1303_s18  }
   0x4   : > { %p31_p0 = scmp.ge.s32.totalorder %s29_s22, 2  ;;  %p771_p1 = scmp.ge.s32.totalorder %s1066_s20, 1 }
   0x5   : > { %p172_p2 = scmp.lt.s32.totalorder %s1066_s20, 3  ;;  %p1129_p4 = scmp.eq.s32.totalorder %s769_s21, 0 }
   0x6   : > { %s1306_s22 = smov (%p31_p0, %s29_s22), 0  ;;  %s1068_s25 = smov [#allocation6]  }
   0x7   : > { %p1125_p3 = pnand %p771_p1, %p172_p2  ;;  %s194_s26 = sshll.u32 %s1068_s25, 4  ;;  %s195_s26 = int_to_ptr.vmem [resolvable:$true] %s194_s26 }
   0x8   : > { %s1300_s24 = scalar_select %p1129_p4, 1, 0 }
   0x9   : > { %p941_p5 = pneg %p1125_p3  ;;  %s1069_s27 = smov [#allocation8]  }
   0xa   : > { %s205_s28 = sshll.u32 %s1069_s27, 4  ;;  %s995_s30 = scalar_lea.vmem %s195_s26, 16  ;;  %s206_s28 = int_to_ptr.vmem [resolvable:$true] %s205_s28 }
   0xb   : > { %p1137_p6 = pnand %p1129_p4, %p941_p5  ;;  %p996_p8 = scmp.ne.s32.totalorder %s195_s26, %s995_s30 }
   0xc   : > { %s1002_s6 = scalar_lea.vmem %s195_s26, 32  ;;  %p1003_p11 = scmp.lt.s32.totalorder %s195_s26, %s195_s26 }
   0xd   : > { %p986_p7 = pneg %p1137_p6  ;;  %p1004_p12 = scmp.lt.s32.totalorder %s1002_s6, %s995_s30 }
   0xf   : > { %p998_p9 = pnand %p996_p8, %p986_p7  ;;  %p1005_p13 = por %p1004_p12, %p1003_p11 }
  0x11   : > { %p999_p10 = pneg %p998_p9 }
  0x13   : > { %p1006_p0 = pnand %p1005_p13, %p999_p10 }
  0x15   : > { %1009 = shalt.err (!%p1006_p0)
}
  0x16   : > { %944 = dma.hbm_to_vmem [thread:$0]  (!%p1137_p6), %s1292_s1, 16, %s195_s26, [#allocation7]  }
  0x17   : > { %s1021_s9 = scalar_lea.vmem %s206_s28, 16  ;;  %s1028_s10 = scalar_lea.vmem %s206_s28, 32 }
  0x18   : > { %p1022_p1 = scmp.ne.s32.totalorder %s206_s28, %s1021_s9  ;;  %p1029_p8 = scmp.lt.s32.totalorder %s206_s28, %s206_s28 }
  0x19   : > { %p1030_p9 = scmp.lt.s32.totalorder %s1028_s10, %s1021_s9 }
  0x1a   : > { %p1024_p2 = pnand %p1022_p1, %p986_p7 }
  0x1b   : > { %p1031_p4 = por %p1030_p9, %p1029_p8 }
  0x1c   : > { %p1025_p5 = pneg %p1024_p2 }
  0x1e   : > { %p1032_p11 = pnand %p1031_p4, %p1025_p5 }
  0x20   : > { %1035 = shalt.err (!%p1032_p11)
}
  0x21   : > { %947 = dma.hbm_to_vmem [thread:$0]  (!%p1137_p6), %s1293_s2, 16, %s206_s28, [#allocation9]  }
  0x22   : > { %224 = sbr.rel (%p1125_p3) target bundleno = 550 (0x226), region = 40  ;;  %p1302_p10 = scmp.ne.s32.totalorder (!%p1125_p3), %s1300_s24, 0 }
  0x27   : > { %1049 = dma.done.wait (%p1302_p10), [#allocation7], 16  }
  0x28   : > { %1051 = vsyncadd (%p1302_p10), [#allocation7], 4294967280 }
  0x29   : > { %1053 = dma.done.wait (%p1302_p10), [#allocation9], 16  }
  0x2a   : > { %1055 = vsyncadd (%p1302_p10), [#allocation9], 4294967280  ;;  %p272_p4 = scmp.eq.s32.totalorder %s1058_s18, 0 }
  0x2b   : > { %v1070_v0 = vmov (%p272_p4), 0.0   ;;  %v1071_v1 = vmov (%p272_p4), 0  }
  0x2c   : > { %277 = sbr.rel (!%p272_p4) target bundleno = 49 (0x31), region = 52  ;;  %278 = vst [vmem:[#allocation2] sm:$0x1] (%p272_p4), %v1070_v0  ;;  %279 = vst [vmem:[#allocation3] sm:$0x1] (%p272_p4), %v1070_v0 }
  0x2d   : > { %280 = vst [vmem:[%s1296_s5] sm:$0xf] (%p272_p4), %v1071_v1  ;;  %281 = vst [vmem:[%s1296_s5 + $0x4] sm:$0xf] (%p272_p4), %v1071_v1 }
  0x31 PF: > { %p779_p3 = scmp.ne.s32.totalorder %s1058_s18, 0 }
  0x33   : > { %284 = sbr.rel (%p779_p3) target bundleno = 78 (0x4e), region = 56 }
  0x38   : > { %v797_v2 = vld [vmem:[%s1291_s0] sm:$0xff]  }
  0x39   : > { %v798_v3 = vunpack.c.l.bf16 %v797_v2  ;;  %v799_v4 = vunpack.c.h.bf16 %v797_v2  ;;  %v289_v18 = vld [vmem:[#allocation2] sm:$0x1]  ;;  %v299_v21 = vld [vmem:[#allocation3] sm:$0x1] }
  0x3b   : > { %v290_v5 = vadd.f32 %v799_v4, %v798_v3  ;;  %v300_v6 = vmul.f32 %v798_v3, %v798_v3  ;;  %v301_v7 = vmul.f32 %v799_v4, %v799_v4 }
  0x3d   : > { %v291_v8 = vrot.slane %v290_v5, 4  ;;  %v302_v9 = vadd.f32 %v301_v7, %v300_v6 }
  0x3f   : > { %v292_v10 = vadd.f32 %v291_v8, %v290_v5  ;;  %v303_v11 = vrot.slane %v302_v9, 4 }
  0x41   : > { %v293_v12 = vrot.slane %v292_v10, 2  ;;  %v304_v13 = vadd.f32 %v303_v11, %v302_v9 }
  0x43   : > { %v294_v14 = vadd.f32 %v293_v12, %v292_v10  ;;  %v305_v15 = vrot.slane %v304_v13, 2 }
  0x45   : > { %v295_v16 = vrot.slane %v294_v14, 1  ;;  %v306_v17 = vadd.f32 %v305_v15, %v304_v13 }
  0x47   : > { %v296_v19 = vadd.f32 %v295_v16, %v294_v14  ;;  %v307_v20 = vrot.slane %v306_v17, 1 }
  0x49   : > { %v297_v22 = vadd.f32 %v296_v19, %v289_v18  ;;  %v308_v23 = vadd.f32 %v307_v20, %v306_v17 }
  0x4b   : > { %298 = vst [vmem:[#allocation2] sm:$0x1] %v297_v22  ;;  %v309_v24 = vadd.f32 %v308_v23, %v299_v21 }
  0x4d   : > { %310 = vst [vmem:[#allocation3] sm:$0x1] %v309_v24 }
  0x4e PF: > { %p311_p6 = scmp.eq.s32.totalorder %s1058_s18, 1 }
  0x4f   : > { %v332_v25 = vld [vmem:[%s1294_s3 + $0x78] sm:$0xff] (%p311_p6)  ;;  %v1072_v26 = vmov (%p311_p6), 0.0   ;;  %v331_v27 = vld [vmem:[%s1294_s3 + $0x70] sm:$0xff] (%p311_p6)  ;;  %v330_v28 = vld [vmem:[%s1294_s3 + $0x68] sm:$0xff] (%p311_p6)  ;;  %vm1073_vm0 = vmmov (%p311_p6), 0   ;;  %vm488_vm1 = vcmask (%p311_p6), 130048  }
  0x50   : > { %315 = sbr.rel (!%p311_p6) target bundleno = 531 (0x213), region = 60  ;;  %849 = vmatprep.subr.mxu0 (%p311_p6), %v1072_v26  ;;  %884 = vmatprep.subr.mxu1 (%p311_p6), %v1072_v26  ;;  %v329_v29 = vld [vmem:[%s1294_s3 + $0x60] sm:$0xff] (%p311_p6)  ;;  %v328_v30 = vld [vmem:[%s1294_s3 + $0x58] sm:$0xff] (%p311_p6)  ;;  %v327_v31 = vld [vmem:[%s1294_s3 + $0x50] sm:$0xff] (%p311_p6) }
  0x51   : > { %850 = vmatpush3.msra.mxu0 (%p311_p6), %v332_v25  ;;  %885 = vmatpush3.msra.mxu1 (%p311_p6), %v332_v25  ;;  %v326_v32 = vld [vmem:[%s1294_s3 + $0x48] sm:$0xff] (%p311_p6)  ;;  %v325_v33 = vld [vmem:[%s1294_s3 + $0x40] sm:$0xff] (%p311_p6)  ;;  %v324_v34 = vld [vmem:[%s1294_s3 + $0x38] sm:$0xff] (%p311_p6) }
  0x52   : > { %851 = vmatprep.subr.mxu0 (%p311_p6), %v1072_v26  ;;  %886 = vmatprep.subr.mxu1 (%p311_p6), %v1072_v26  ;;  %v323_v35 = vld [vmem:[%s1294_s3 + $0x30] sm:$0xff] (%p311_p6)  ;;  %v322_v36 = vld [vmem:[%s1294_s3 + $0x28] sm:$0xff] (%p311_p6)  ;;  %v321_v37 = vld [vmem:[%s1294_s3 + $0x20] sm:$0xff] (%p311_p6) }
  0x53   : > { %852 = vmatpush3.msra.mxu0 (%p311_p6), %v331_v27  ;;  %887 = vmatpush3.msra.mxu1 (%p311_p6), %v331_v27  ;;  %v320_v38 = vld [vmem:[%s1294_s3 + $0x18] sm:$0xff] (%p311_p6)  ;;  %v319_v39 = vld [vmem:[%s1294_s3 + $0x10] sm:$0xff] (%p311_p6)  ;;  %v318_v40 = vld [vmem:[%s1294_s3 + $0x8] sm:$0xff] (%p311_p6) }
  0x54   : > { %853 = vmatprep.subr.mxu0 (%p311_p6), %v1072_v26  ;;  %888 = vmatprep.subr.mxu1 (%p311_p6), %v1072_v26  ;;  %v317_v41 = vld [vmem:[%s1294_s3] sm:$0xff] (%p311_p6)  ;;  %v487_v44 = vld [vmem:[%s1295_s4 + $0x8] sm:$0xff] (%p311_p6) }
  0x55   : > { %854 = vmatpush3.msra.mxu0 %v330_v28  ;;  %889 = vmatpush3.msra.mxu1 %v330_v28  ;;  %v316_v42 = vld [vmem:[#allocation2] sm:$0x1]  ;;  %v403_v43 = vld [vmem:[#allocation3] sm:$0x1]  ;;  %v479_v56 = vld [vmem:[#allocation6] sm:$0x1] }
  0x56   : > { %855 = vmatprep.subr.mxu0 %v1072_v26  ;;  %890 = vmatprep.subr.mxu1 %v1072_v26  ;;  %v486_v45 = vld [vmem:[%s1295_s4] sm:$0xff] }
  0x57   : > { %856 = vmatpush3.msra.mxu0 %v329_v29  ;;  %891 = vmatpush3.msra.mxu1 %v329_v29  ;;  %v483_v59 = vld [vmem:[#allocation8] sm:$0x1] }
  0x58   : > { %857 = vmatprep.subr.mxu0 %v1072_v26  ;;  %892 = vmatprep.subr.mxu1 %v1072_v26 }
  0x59   : > { %858 = vmatpush3.msra.mxu0 %v328_v30  ;;  %893 = vmatpush3.msra.mxu1 %v328_v30 }
  0x5a   : > { %859 = vmatprep.subr.mxu0 %v1072_v26  ;;  %894 = vmatprep.subr.mxu1 %v1072_v26 }
  0x5b   : > { %860 = vmatpush3.msra.mxu0 %v327_v31  ;;  %895 = vmatpush3.msra.mxu1 %v327_v31 }
  0x5c   : > { %861 = vmatprep.subr.mxu0 %v1072_v26  ;;  %896 = vmatprep.subr.mxu1 %v1072_v26 }
  0x5d   : > { %862 = vmatpush3.msra.mxu0 %v326_v32  ;;  %897 = vmatpush3.msra.mxu1 %v326_v32 }
  0x5e   : > { %863 = vmatprep.subr.mxu0 %v1072_v26  ;;  %898 = vmatprep.subr.mxu1 %v1072_v26 }
  0x5f   : > { %864 = vmatpush3.msra.mxu0 %v325_v33  ;;  %899 = vmatpush3.msra.mxu1 %v325_v33 }
  0x60   : > { %865 = vmatprep.subr.mxu0 %v1072_v26  ;;  %900 = vmatprep.subr.mxu1 %v1072_v26 }
  0x61   : > { %866 = vmatpush3.msra.mxu0 %v324_v34  ;;  %901 = vmatpush3.msra.mxu1 %v324_v34 }
  0x62   : > { %867 = vmatprep.subr.mxu0 %v1072_v26  ;;  %902 = vmatprep.subr.mxu1 %v1072_v26 }
  0x63   : > { %868 = vmatpush3.msra.mxu0 %v323_v35  ;;  %903 = vmatpush3.msra.mxu1 %v323_v35 }
  0x64   : > { %869 = vmatprep.subr.mxu0 %v1072_v26  ;;  %904 = vmatprep.subr.mxu1 %v1072_v26 }
  0x65   : > { %870 = vmatpush3.msra.mxu0 %v322_v36  ;;  %905 = vmatpush3.msra.mxu1 %v322_v36 }
  0x66   : > { %871 = vmatprep.subr.mxu0 %v1072_v26  ;;  %906 = vmatprep.subr.mxu1 %v1072_v26 }
  0x67   : > { %872 = vmatpush3.msra.mxu0 %v321_v37  ;;  %907 = vmatpush3.msra.mxu1 %v321_v37 }
  0x68   : > { %873 = vmatprep.subr.mxu0 %v1072_v26  ;;  %908 = vmatprep.subr.mxu1 %v1072_v26 }
  0x69   : > { %874 = vmatpush3.msra.mxu0 %v320_v38  ;;  %909 = vmatpush3.msra.mxu1 %v320_v38 }
  0x6a   : > { %875 = vmatprep.subr.mxu0 %v1072_v26  ;;  %910 = vmatprep.subr.mxu1 %v1072_v26 }
  0x6b   : > { %876 = vmatpush3.msra.mxu0 %v319_v39  ;;  %911 = vmatpush3.msra.mxu1 %v319_v39 }
  0x6c   : > { %877 = vmatprep.subr.mxu0 %v1072_v26  ;;  %912 = vmatprep.subr.mxu1 %v1072_v26 }
  0x6d   : > { %878 = vmatpush3.msra.mxu0 %v318_v40  ;;  %913 = vmatpush3.msra.mxu1 %v318_v40 }
  0x6e   : > { %879 = vmatprep.subr.mxu0 %v1072_v26  ;;  %914 = vmatprep.subr.mxu1 %v1072_v26 }
  0x6f   : > { %880 = vmatpush3.msra.mxu0 %v317_v41  ;;  %881 = vmatprep.mubr.msk.f32.mxu0 %vm1073_vm0, %v1072_v26 }
  0x70   : > { %915 = vmatpush3.msra.mxu1 %v317_v41  ;;  %916 = vmatprep.mubr.msk.f32.mxu1 %vm1073_vm0, %v1072_v26 }
  0x71   : > { %882 = vmatmul.mubr.f32.vlgmr.msra.gmra.mxu0 %v316_v42  ;;  %917 = vmatmul.mubr.f32.vlgmr.msra.gmra.mxu1 %v403_v43 }
  0x72   : > { %919 = vmatprep.subr.mxu0 %v1072_v26  ;;  %923 = vmatprep.mubr.msk.f32.mxu0 %vm1073_vm0, %v1072_v26 }
  0x73   : > { %926 = vmatprep.subr.mxu1 %v1072_v26  ;;  %930 = vmatprep.mubr.msk.f32.mxu1 %vm1073_vm0, %v1072_v26 }
  0x74   : > { %920 = vmatpush3.msra.mxu0 %v487_v44  ;;  %927 = vmatpush3.msra.mxu1 %v487_v44 }
  0x75   : > { %921 = vmatprep.subr.mxu0 %v1072_v26  ;;  %928 = vmatprep.subr.mxu1 %v1072_v26 }
  0x76   : > { %922 = vmatpush3.msra.mxu0 %v486_v45  ;;  %929 = vmatpush3.msra.mxu1 %v486_v45 }
 0x131   : > { %v399_v46 = vpop.f32.mrf.mxu0  ;;  %v470_v47 = vpop.f32.mrf.mxu1 }
 0x132   : > { %v474_v48 = vmul.f32 0.0078125, %v399_v46  ;;  %v475_v49 = vmul.f32 0.0078125, %v470_v47 }
 0x133   : > { %v883_v50 = vpop.f32.mrf.mxu0  ;;  %v918_v51 = vpop.f32.mrf.mxu1 }
 0x134   : > { %v476_v52 = vmul.f32 %v474_v48, %v474_v48 }
 0x136   : > { %v477_v53 = vsub.f32 %v475_v49, %v476_v52 }
 0x138   : > { %v478_v54 = vmax.f32 %v477_v53, 0.0 }
 0x13a   : > { %v480_v55 = vadd.f32 1e-05, %v478_v54 }
 0x13c   : > { %982 = vrsqrt.f32 %v480_v55 }
 0x149   : > { %v983_v57 = vpop.eup %982 }
 0x14a   : > { %v482_v58 = vmul.f32 %v983_v57, %v479_v56 }
 0x14c   : > { %924 = vmatmul.mubr.msk.f32.vlgmr.msra.gmra.mxu0 %vm488_vm1, %v482_v58  ;;  %v484_v60 = vmul.f32 %v482_v58, %v474_v48 }
 0x14e   : > { %v485_v61 = vsub.f32 %v483_v59, %v484_v60 }
 0x150   : > { %931 = vmatmul.mubr.msk.f32.vlgmr.msra.gmra.mxu1 %vm488_vm1, %v485_v61 }
 0x20c   : > { %v558_v62 = vpop.f32.mrf.mxu0 }
 0x20d   : > { %562 = vst [vmem:[#allocation4] sm:$0x1] %v558_v62 }
 0x20e   : > { %v925_v63 = vpop.f32.mrf.mxu0 }
 0x210   : > { %v634_v0 = vpop.f32.mrf.mxu1 }
 0x211   : > { %638 = vst [vmem:[#allocation5] sm:$0x1] %v634_v0 }
 0x212   : > { %v932_v1 = vpop.f32.mrf.mxu1 }
 0x213 PF: > { %p783_p7 = scmp.ne.s32.totalorder %s1058_s18, 1 }
 0x215   : > { %641 = sbr.rel (%p783_p7) target bundleno = 550 (0x226), region = 64 }
 0x21a   : > { %v801_v2 = vld [vmem:[%s1291_s0] sm:$0xff]  }
 0x21b   : > { %v784_v3 = vld [vmem:[#allocation4] ss:$0 sm:$0xff]  ;;  %v802_v4 = vunpack.c.l.bf16 %v801_v2  ;;  %v803_v5 = vunpack.c.h.bf16 %v801_v2  ;;  %v785_v6 = vld [vmem:[#allocation5] ss:$0 sm:$0xff] }
 0x21d   : > { %v653_v7 = vmul.f32 %v802_v4, %v784_v3  ;;  %v654_v8 = vmul.f32 %v803_v5, %v784_v3 }
 0x21f   : > { %v662_v9 = vadd.f32 %v785_v6, %v653_v7  ;;  %v663_v10 = vadd.f32 %v785_v6, %v654_v8 }
 0x221   : > { %v664_v11 = vmax.f32 %v662_v9, 0.0  ;;  %v665_v12 = vmax.f32 %v663_v10, 0.0 }
 0x223   : > { %v807_v13 = vpack.c.bf16 %v665_v12, %v664_v11 }
 0x225   : > { %808 = vst [vmem:[%s1296_s5] sm:$0xff] %v807_v13  }
 0x226 PF: > { %s17_s20 = sadd.s32 1, %s1066_s20   ;;  %s1303_s18 = smov %s1062_s19 }
 0x227   : > { %p14_p12 = scmp.ge.s32.totalorder %s17_s20, 4   ;;  %s1304_s19 = smov %s1306_s22 }
 0x229   :  { %16 = sbr.rel (!%p14_p12) target bundleno = 3 (0x3), region = 95 }
 0x22e   :  { %701 = vsyncpa [#allocation7], 1 }
 0x22f   :  { %703 = vsyncpa [#allocation7 + $0x1], 1 }
 0x230   :  { %704 = vsyncpa [#allocation9], 1 }

// kernel: dcgan_forward.17
= control target key start
LH: loop header
LB: loop body
LE: loop exit
PB: predicated region body
PF: predicated region fallthrough
CT: control target
= control target key end

     0   :  { %s1013_s18 = smov 0   ;;  %s1015_s19 = smov 0   ;;  %s1171_s0 = inlined_call_operand.vmem [shape: bf16[32,128], index: 0, kind: input, shape index: {}]   ;;  %s1172_s1 = inlined_call_operand.vmem [shape: f32[1,8], index: 1, kind: input, shape index: {}]   ;;  %s1173_s2 = inlined_call_operand.vmem [shape: f32[1,8], index: 2, kind: input, shape index: {}]   ;;  %s1174_s3 = inlined_call_operand.vmem [shape: f32[128,8], index: 3, kind: input, shape index: {}]   ;;  %s1175_s4 = inlined_call_operand.vmem [shape: f32[8,128], index: 4, kind: input, shape index: {}]   ;;  %s1176_s5 = inlined_call_operand.vmem [shape: bf16[32,128], index: 5, kind: output, shape index: {}]  }
   0x1   :  { %s1017_s20 = smov 0  }
   0x2 LB: > { %s27_s21 = sadd.s32 1, %s973_s19  ;;  %p755_p0 = scmp.ge.s32.totalorder %s977_s20, 1  ;;  %s977_s20 = sphi %s1017_s20, %s15_s20   ;;  %s973_s19 = sphi %s1015_s19, %s1178_s19   ;;  %s969_s18 = sphi %s1013_s18, %s1177_s18  }
   0x3   : > { %p29_p1 = scmp.ge.s32.totalorder %s27_s21, 2  ;;  %p202_p2 = scmp.lt.s32.totalorder %s977_s20, 3 }
   0x5   : > { %s1180_s21 = smov (%p29_p1, %s27_s21), 0  ;;  %p203_p3 = pnand %p755_p0, %p202_p2 }
   0x6   : > { %p246_p4 = scmp.eq.s32.totalorder (!%p203_p3), %s969_s18, 0 }
   0x7   : > { %206 = sbr.rel (%p203_p3) target bundleno = 522 (0x20a), region = 40 }
   0xc   : > { %251 = sbr.rel (!%p246_p4) target bundleno = 17 (0x11), region = 44  ;;  %v979_v0 = vmov (%p246_p4), 0.0   ;;  %v980_v1 = vmov (%p246_p4), 0  }
   0xd   : > { %252 = vst [vmem:[#allocation2] sm:$0x1] (%p246_p4), %v979_v0  ;;  %253 = vst [vmem:[#allocation3] sm:$0x1] (%p246_p4), %v979_v0 }
   0xe   : > { %254 = vst [vmem:[%s1176_s5] sm:$0xf] (%p246_p4), %v980_v1  ;;  %255 = vst [vmem:[%s1176_s5 + $0x4] sm:$0xf] (%p246_p4), %v980_v1 }
   0xf   : > { %256 = vst [vmem:[%s1176_s5 + $0x8] sm:$0xf] (%p246_p4), %v980_v1  ;;  %257 = vst [vmem:[%s1176_s5 + $0xc] sm:$0xf] (%p246_p4), %v980_v1 }
  0x11 PF: > { %p757_p5 = scmp.ne.s32.totalorder %s969_s18, 0 }
  0x13   : > { %260 = sbr.rel (%p757_p5) target bundleno = 50 (0x32), region = 48 }
  0x18   : > { %v779_v2 = vld [vmem:[%s1171_s0] sm:$0xff]   ;;  %v804_v3 = vld [vmem:[%s1171_s0 + $0x8] sm:$0xff]  }
  0x19   : > { %v780_v4 = vunpack.c.l.bf16 %v779_v2  ;;  %v781_v5 = vunpack.c.h.bf16 %v779_v2  ;;  %v784_v6 = vunpack.c.l.bf16 %v804_v3  ;;  %v785_v7 = vunpack.c.h.bf16 %v804_v3  ;;  %v269_v27 = vld [vmem:[#allocation2] sm:$0x1]  ;;  %v281_v30 = vld [vmem:[#allocation3] sm:$0x1] }
  0x1b   : > { %v270_v8 = vadd.f32 %v781_v5, %v780_v4  ;;  %v282_v9 = vmul.f32 %v780_v4, %v780_v4  ;;  %v283_v10 = vmul.f32 %v781_v5, %v781_v5  ;;  %v284_v11 = vmul.f32 %v784_v6, %v784_v6 }
  0x1c   : > { %v285_v13 = vmul.f32 %v785_v7, %v785_v7 }
  0x1d   : > { %v271_v12 = vadd.f32 %v784_v6, %v270_v8  ;;  %v286_v14 = vadd.f32 %v283_v10, %v282_v9 }
  0x1f   : > { %v272_v15 = vadd.f32 %v785_v7, %v271_v12  ;;  %v287_v16 = vadd.f32 %v286_v14, %v284_v11 }
  0x21   : > { %v273_v17 = vrot.slane %v272_v15, 4  ;;  %v288_v18 = vadd.f32 %v287_v16, %v285_v13 }
  0x23   : > { %v274_v19 = vadd.f32 %v273_v17, %v272_v15  ;;  %v289_v20 = vrot.slane %v288_v18, 4 }
  0x25   : > { %v275_v21 = vrot.slane %v274_v19, 2  ;;  %v290_v22 = vadd.f32 %v289_v20, %v288_v18 }
  0x27   : > { %v276_v23 = vadd.f32 %v275_v21, %v274_v19  ;;  %v291_v24 = vrot.slane %v290_v22, 2 }
  0x29   : > { %v277_v25 = vrot.slane %v276_v23, 1  ;;  %v292_v26 = vadd.f32 %v291_v24, %v290_v22 }
  0x2b   : > { %v278_v28 = vadd.f32 %v277_v25, %v276_v23  ;;  %v293_v29 = vrot.slane %v292_v26, 1 }
  0x2d   : > { %v279_v31 = vadd.f32 %v278_v28, %v269_v27  ;;  %v294_v32 = vadd.f32 %v293_v29, %v292_v26 }
  0x2f   : > { %280 = vst [vmem:[#allocation2] sm:$0x1] %v279_v31  ;;  %v295_v33 = vadd.f32 %v294_v32, %v281_v30 }
  0x31   : > { %296 = vst [vmem:[#allocation3] sm:$0x1] %v295_v33 }
  0x32 PF: > { %p297_p6 = scmp.eq.s32.totalorder %s969_s18, 1 }
  0x33   : > { %v318_v34 = vld [vmem:[%s1174_s3 + $0x78] sm:$0xff] (%p297_p6)  ;;  %v981_v35 = vmov (%p297_p6), 0.0   ;;  %v317_v36 = vld [vmem:[%s1174_s3 + $0x70] sm:$0xff] (%p297_p6)  ;;  %v316_v37 = vld [vmem:[%s1174_s3 + $0x68] sm:$0xff] (%p297_p6)  ;;  %vm982_vm0 = vmmov (%p297_p6), 0   ;;  %vm473_vm1 = vcmask (%p297_p6), 64512  }
  0x34   : > { %301 = sbr.rel (!%p297_p6) target bundleno = 503 (0x1f7), region = 52  ;;  %845 = vmatprep.subr.mxu0 (%p297_p6), %v981_v35  ;;  %880 = vmatprep.subr.mxu1 (%p297_p6), %v981_v35  ;;  %v315_v38 = vld [vmem:[%s1174_s3 + $0x60] sm:$0xff] (%p297_p6)  ;;  %v314_v39 = vld [vmem:[%s1174_s3 + $0x58] sm:$0xff] (%p297_p6)  ;;  %v313_v40 = vld [vmem:[%s1174_s3 + $0x50] sm:$0xff] (%p297_p6) }
  0x35   : > { %846 = vmatpush3.msra.mxu0 (%p297_p6), %v318_v34  ;;  %881 = vmatpush3.msra.mxu1 (%p297_p6), %v318_v34  ;;  %v312_v41 = vld [vmem:[%s1174_s3 + $0x48] sm:$0xff] (%p297_p6)  ;;  %v311_v42 = vld [vmem:[%s1174_s3 + $0x40] sm:$0xff] (%p297_p6)  ;;  %v310_v43 = vld [vmem:[%s1174_s3 + $0x38] sm:$0xff] (%p297_p6) }
  0x36   : > { %847 = vmatprep.subr.mxu0 (%p297_p6), %v981_v35  ;;  %882 = vmatprep.subr.mxu1 (%p297_p6), %v981_v35  ;;  %v309_v44 = vld [vmem:[%s1174_s3 + $0x30] sm:$0xff] (%p297_p6)  ;;  %v308_v45 = vld [vmem:[%s1174_s3 + $0x28] sm:$0xff] (%p297_p6)  ;;  %v307_v46 = vld [vmem:[%s1174_s3 + $0x20] sm:$0xff] (%p297_p6) }
  0x37   : > { %848 = vmatpush3.msra.mxu0 (%p297_p6), %v317_v36  ;;  %883 = vmatpush3.msra.mxu1 (%p297_p6), %v317_v36  ;;  %v306_v47 = vld [vmem:[%s1174_s3 + $0x18] sm:$0xff] (%p297_p6)  ;;  %v305_v48 = vld [vmem:[%s1174_s3 + $0x10] sm:$0xff] (%p297_p6)  ;;  %v304_v49 = vld [vmem:[%s1174_s3 + $0x8] sm:$0xff] (%p297_p6) }
  0x38   : > { %849 = vmatprep.subr.mxu0 (%p297_p6), %v981_v35  ;;  %884 = vmatprep.subr.mxu1 (%p297_p6), %v981_v35  ;;  %v303_v50 = vld [vmem:[%s1174_s3] sm:$0xff] (%p297_p6) }
  0x39   : > { %850 = vmatpush3.msra.mxu0 %v316_v37  ;;  %885 = vmatpush3.msra.mxu1 %v316_v37  ;;  %v302_v51 = vld [vmem:[#allocation2] sm:$0x1]  ;;  %v389_v52 = vld [vmem:[#allocation3] sm:$0x1] }
  0x3a   : > { %851 = vmatprep.subr.mxu0 %v981_v35  ;;  %886 = vmatprep.subr.mxu1 %v981_v35  ;;  %v472_v53 = vld [vmem:[%s1175_s4] sm:$0xff] }
  0x3b   : > { %852 = vmatpush3.msra.mxu0 %v315_v38  ;;  %887 = vmatpush3.msra.mxu1 %v315_v38  ;;  %v465_v0 = vld [vmem:[%s1172_s1] sm:$0x1] }
  0x3c   : > { %853 = vmatprep.subr.mxu0 %v981_v35  ;;  %888 = vmatprep.subr.mxu1 %v981_v35  ;;  %v469_v3 = vld [vmem:[%s1173_s2] sm:$0x1] }
  0x3d   : > { %854 = vmatpush3.msra.mxu0 %v314_v39  ;;  %889 = vmatpush3.msra.mxu1 %v314_v39 }
  0x3e   : > { %855 = vmatprep.subr.mxu0 %v981_v35  ;;  %890 = vmatprep.subr.mxu1 %v981_v35 }
  0x3f   : > { %856 = vmatpush3.msra.mxu0 %v313_v40  ;;  %891 = vmatpush3.msra.mxu1 %v313_v40 }
  0x40   : > { %857 = vmatprep.subr.mxu0 %v981_v35  ;;  %892 = vmatprep.subr.mxu1 %v981_v35 }
  0x41   : > { %858 = vmatpush3.msra.mxu0 %v312_v41  ;;  %893 = vmatpush3.msra.mxu1 %v312_v41 }
  0x42   : > { %859 = vmatprep.subr.mxu0 %v981_v35  ;;  %894 = vmatprep.subr.mxu1 %v981_v35 }
  0x43   : > { %860 = vmatpush3.msra.mxu0 %v311_v42  ;;  %895 = vmatpush3.msra.mxu1 %v311_v42 }
  0x44   : > { %861 = vmatprep.subr.mxu0 %v981_v35  ;;  %896 = vmatprep.subr.mxu1 %v981_v35 }
  0x45   : > { %862 = vmatpush3.msra.mxu0 %v310_v43  ;;  %897 = vmatpush3.msra.mxu1 %v310_v43 }
  0x46   : > { %863 = vmatprep.subr.mxu0 %v981_v35  ;;  %898 = vmatprep.subr.mxu1 %v981_v35 }
  0x47   : > { %864 = vmatpush3.msra.mxu0 %v309_v44  ;;  %899 = vmatpush3.msra.mxu1 %v309_v44 }
  0x48   : > { %865 = vmatprep.subr.mxu0 %v981_v35  ;;  %900 = vmatprep.subr.mxu1 %v981_v35 }
  0x49   : > { %866 = vmatpush3.msra.mxu0 %v308_v45  ;;  %901 = vmatpush3.msra.mxu1 %v308_v45 }
  0x4a   : > { %867 = vmatprep.subr.mxu0 %v981_v35  ;;  %902 = vmatprep.subr.mxu1 %v981_v35 }
  0x4b   : > { %868 = vmatpush3.msra.mxu0 %v307_v46  ;;  %903 = vmatpush3.msra.mxu1 %v307_v46 }
  0x4c   : > { %869 = vmatprep.subr.mxu0 %v981_v35  ;;  %904 = vmatprep.subr.mxu1 %v981_v35 }
  0x4d   : > { %870 = vmatpush3.msra.mxu0 %v306_v47  ;;  %905 = vmatpush3.msra.mxu1 %v306_v47 }
  0x4e   : > { %871 = vmatprep.subr.mxu0 %v981_v35  ;;  %906 = vmatprep.subr.mxu1 %v981_v35 }
  0x4f   : > { %872 = vmatpush3.msra.mxu0 %v305_v48  ;;  %907 = vmatpush3.msra.mxu1 %v305_v48 }
  0x50   : > { %873 = vmatprep.subr.mxu0 %v981_v35  ;;  %908 = vmatprep.subr.mxu1 %v981_v35 }
  0x51   : > { %874 = vmatpush3.msra.mxu0 %v304_v49  ;;  %909 = vmatpush3.msra.mxu1 %v304_v49 }
  0x52   : > { %875 = vmatprep.subr.mxu0 %v981_v35  ;;  %910 = vmatprep.subr.mxu1 %v981_v35 }
  0x53   : > { %876 = vmatpush3.msra.mxu0 %v303_v50  ;;  %877 = vmatprep.mubr.msk.f32.mxu0 %vm982_vm0, %v981_v35 }
  0x54   : > { %911 = vmatpush3.msra.mxu1 %v303_v50  ;;  %912 = vmatprep.mubr.msk.f32.mxu1 %vm982_vm0, %v981_v35 }
  0x55   : > { %878 = vmatmul.mubr.f32.vlgmr.msra.gmra.mxu0 %v302_v51  ;;  %913 = vmatmul.mubr.f32.vlgmr.msra.gmra.mxu1 %v389_v52 }
  0x56   : > { %915 = vmatprep.subr.mxu0 %v981_v35  ;;  %917 = vmatprep.mubr.msk.f32.mxu0 %vm982_vm0, %v981_v35 }
  0x57   : > { %920 = vmatprep.subr.mxu1 %v981_v35  ;;  %922 = vmatprep.mubr.msk.f32.mxu1 %vm982_vm0, %v981_v35 }
  0x58   : > { %916 = vmatpush3.msra.mxu0 %v472_v53  ;;  %921 = vmatpush3.msra.mxu1 %v472_v53 }
 0x115   : > { %v385_v54 = vpop.f32.mrf.mxu0  ;;  %v456_v55 = vpop.f32.mrf.mxu1 }
 0x116   : > { %v460_v56 = vmul.f32 0.001953125, %v385_v54  ;;  %v461_v57 = vmul.f32 0.001953125, %v456_v55 }
 0x117   : > { %v879_v58 = vpop.f32.mrf.mxu0  ;;  %v914_v59 = vpop.f32.mrf.mxu1 }
 0x118   : > { %v462_v60 = vmul.f32 %v460_v56, %v460_v56 }
 0x11a   : > { %v463_v61 = vsub.f32 %v461_v57, %v462_v60 }
 0x11c   : > { %v464_v62 = vmax.f32 %v463_v61, 0.0 }
 0x11e   : > { %v466_v63 = vadd.f32 1e-05, %v464_v62 }
 0x120   : > { %953 = vrsqrt.f32 %v466_v63 }
 0x12d   : > { %v954_v1 = vpop.eup %953 }
 0x12e   : > { %v468_v2 = vmul.f32 %v954_v1, %v465_v0 }
 0x130   : > { %918 = vmatmul.mubr.msk.f32.vlgmr.msra.gmra.mxu0 %vm473_vm1, %v468_v2  ;;  %v470_v4 = vmul.f32 %v468_v2, %v460_v56 }
 0x132   : > { %v471_v5 = vsub.f32 %v469_v3, %v470_v4 }
 0x134   : > { %923 = vmatmul.mubr.msk.f32.vlgmr.msra.gmra.mxu1 %vm473_vm1, %v471_v5 }
 0x1f0   : > { %v543_v6 = vpop.f32.mrf.mxu0 }
 0x1f1   : > { %547 = vst [vmem:[#allocation4] sm:$0x1] %v543_v6 }
 0x1f2   : > { %v919_v7 = vpop.f32.mrf.mxu0 }
 0x1f4   : > { %v618_v8 = vpop.f32.mrf.mxu1 }
 0x1f5   : > { %622 = vst [vmem:[#allocation5] sm:$0x1] %v618_v8 }
 0x1f6   : > { %v924_v9 = vpop.f32.mrf.mxu1 }
 0x1f7 PF: > { %p761_p7 = scmp.ne.s32.totalorder %s969_s18, 1 }
 0x1f9   : > { %625 = sbr.rel (%p761_p7) target bundleno = 522 (0x20a), region = 56 }
 0x1fe   : > { %v787_v10 = vld [vmem:[%s1171_s0] sm:$0xff]   ;;  %v805_v14 = vld [vmem:[%s1171_s0 + $0x8] sm:$0xff]  }
 0x1ff   : > { %v762_v11 = vld [vmem:[#allocation4] ss:$0 sm:$0xff]  ;;  %v788_v12 = vunpack.c.l.bf16 %v787_v10  ;;  %v789_v13 = vunpack.c.h.bf16 %v787_v10  ;;  %v763_v15 = vld [vmem:[#allocation5] ss:$0 sm:$0xff]  ;;  %v792_v16 = vunpack.c.l.bf16 %v805_v14  ;;  %v793_v17 = vunpack.c.h.bf16 %v805_v14 }
 0x201   : > { %v641_v18 = vmul.f32 %v788_v12, %v762_v11  ;;  %v642_v19 = vmul.f32 %v789_v13, %v762_v11  ;;  %v643_v20 = vmul.f32 %v792_v16, %v762_v11  ;;  %v644_v21 = vmul.f32 %v793_v17, %v762_v11 }
 0x203   : > { %v652_v22 = vadd.f32 %v763_v15, %v641_v18  ;;  %v653_v23 = vadd.f32 %v763_v15, %v642_v19  ;;  %v654_v24 = vadd.f32 %v763_v15, %v643_v20  ;;  %v655_v25 = vadd.f32 %v763_v15, %v644_v21 }
 0x205   : > { %v656_v26 = vmax.f32 %v652_v22, 0.0  ;;  %v657_v27 = vmax.f32 %v653_v23, 0.0  ;;  %v658_v28 = vmax.f32 %v654_v24, 0.0  ;;  %v659_v29 = vmax.f32 %v655_v25, 0.0 }
 0x207   : > { %v797_v30 = vpack.c.bf16 %v657_v27, %v656_v26  ;;  %v802_v31 = vpack.c.bf16 %v659_v29, %v658_v28 }
 0x209   : > { %798 = vst [vmem:[%s1176_s5] sm:$0xff] %v797_v30   ;;  %806 = vst [vmem:[%s1176_s5 + $0x8] sm:$0xff] %v802_v31  }
 0x20a PF: > { %s15_s20 = sadd.s32 1, %s977_s20   ;;  %s1177_s18 = smov %s973_s19 }
 0x20b   : > { %p12_p8 = scmp.ge.s32.totalorder %s15_s20, 4   ;;  %s1178_s19 = smov %s1180_s21 }
 0x20d   :  { %14 = sbr.rel (!%p12_p8) target bundleno = 2 (0x2), region = 86 }

// kernel: dcgan_forward.18
= control target key start
LH: loop header
LB: loop body
LE: loop exit
PB: predicated region body
PF: predicated region fallthrough
CT: control target
= control target key end

     0   :  { %s1099_s9 = smov 0   ;;  %s1101_s10 = smov 0   ;;  %s1194_s0 = inlined_call_operand.vmem [shape: bf16[512,8], index: 0, kind: input, shape index: {}]   ;;  %s1195_s1 = inlined_call_operand.vmem [shape: bf16[8,128], index: 1, kind: input, shape index: {}]   ;;  %s1196_s2 = inlined_call_operand.vmem [shape: bf16[512,128], index: 2, kind: output, shape index: {}]  }
   0x1   :  { %s1103_s11 = smov 0  }
   0x2 LB: > { %s24_s12 = sadd.s32 1, %s1078_s10  ;;  %p767_p0 = scmp.ge.s32.totalorder %s1082_s11, 1  ;;  %s1082_s11 = sphi %s1103_s11, %s12_s11   ;;  %s1078_s10 = sphi %s1101_s10, %s1198_s10   ;;  %s1074_s9 = sphi %s1099_s9, %s1197_s9  }
   0x3   : > { %p26_p1 = scmp.ge.s32.totalorder %s24_s12, 2  ;;  %p136_p2 = scmp.lt.s32.totalorder %s1082_s11, 3 }
   0x5   : > { %s1200_s12 = smov (%p26_p1, %s24_s12), 0  ;;  %p137_p3 = pnand %p767_p0, %p136_p2 }
   0x6   : > { %s768_s15 = sshll.u32 (!%p137_p3), %s1074_s9, 5 }
   0x7   : > { %140 = sbr.rel (%p137_p3) target bundleno = 244 (0xf4), region = 28  ;;  %p166_p4 = scmp.lt.s32.totalorder (!%p137_p3), %s768_s15, 63 }
   0xc   : > { %v217_v0 = vld [vmem:[%s1195_s1] sm:$0xf]  ;;  %vm347_vm0 = vcmask 1043456   ;;  %s1202_s15 = smov (!%p166_p4, %s768_s15), 63  ;;  %vm298_vm1 = vcmask 64512  }
   0xd   : > { %1018 = vmatprep.subr.msk.bf16.mxu0 %vm347_vm0, %v217_v0  ;;  %1019 = vmatprep.subr.msk.bf16.mxu1 %vm347_vm0, %v217_v0  ;;  %v349_v1 = vsel %vm347_vm0, %v217_v0, 0  ;;  %s769_s16 = sshll.u32 %s1202_s15, 2 }
   0xe   : > { %983 = vmatpush3.bf16.msra.mxu0 %v349_v1  ;;  %1017 = vmatpush3.bf16.msra.mxu1 %v349_v1  ;;  %s1128_s19 = scalar_lea.vmem %s1194_s0, %s769_s16  ;;  %s1167_s22 = scalar_lea.vmem %s1196_s2, %s769_s16 }
   0xf   : > { %v1044_v2 = vld [vmem:[%s1128_s19] sm:$0xff]   ;;  %v1046_v4 = vld [vmem:[%s1128_s19 + $0x8] sm:$0xff]   ;;  %v1048_v6 = vld [vmem:[%s1128_s19 + $0x10] sm:$0xff]  }
  0x10   : > { %v1045_v3 = vld [vmem:[%s1128_s19 + $0x40] sm:$0xff]   ;;  %984 = vmatprep.mubr.msk.bf16.mxu0 %vm298_vm1, %v1044_v2  ;;  %v1047_v5 = vld [vmem:[%s1128_s19 + $0x48] sm:$0xff]   ;;  %v1049_v7 = vld [vmem:[%s1128_s19 + $0x50] sm:$0xff]  }
  0x11   : > { %1000 = vmatprep.mubr.msk.bf16.mxu1 %vm298_vm1, %v1045_v3  ;;  %985 = vmatmul.mubr.msk.bf16.vlgmr.msra.gmra.mxu0 %vm298_vm1, %v1046_v4  ;;  %v1050_v8 = vld [vmem:[%s1128_s19 + $0x18] sm:$0xff]   ;;  %v1052_v10 = vld [vmem:[%s1128_s19 + $0x20] sm:$0xff]   ;;  %v1054_v12 = vld [vmem:[%s1128_s19 + $0x28] sm:$0xff]  }
  0x12   : > { %1001 = vmatmul.mubr.msk.bf16.vlgmr.msra.gmra.mxu1 %vm298_vm1, %v1047_v5  ;;  %988 = vmatprep.mubr.msk.bf16.mxu0 %vm298_vm1, %v1048_v6  ;;  %v1051_v9 = vld [vmem:[%s1128_s19 + $0x58] sm:$0xff]   ;;  %v1053_v11 = vld [vmem:[%s1128_s19 + $0x60] sm:$0xff]   ;;  %v1055_v13 = vld [vmem:[%s1128_s19 + $0x68] sm:$0xff]  }
  0x13   : > { %1004 = vmatprep.mubr.msk.bf16.mxu1 %vm298_vm1, %v1049_v7  ;;  %v1056_v14 = vld [vmem:[%s1128_s19 + $0x30] sm:$0xff]   ;;  %v1058_v16 = vld [vmem:[%s1128_s19 + $0x38] sm:$0xff]  }
  0x14   : > { %v1057_v15 = vld [vmem:[%s1128_s19 + $0x70] sm:$0xff]   ;;  %v1059_v17 = vld [vmem:[%s1128_s19 + $0x78] sm:$0xff]  }
  0x19   : > { %989 = vmatmul.mubr.msk.bf16.gmra.mxu0 %vm298_vm1, %v1050_v8 }
  0x1a   : > { %1005 = vmatmul.mubr.msk.bf16.gmra.mxu1 %vm298_vm1, %v1051_v9  ;;  %992 = vmatprep.mubr.msk.bf16.mxu0 %vm298_vm1, %v1052_v10 }
  0x1b   : > { %1008 = vmatprep.mubr.msk.bf16.mxu1 %vm298_vm1, %v1053_v11 }
  0x21   : > { %993 = vmatmul.mubr.msk.bf16.gmra.mxu0 %vm298_vm1, %v1054_v12 }
  0x22   : > { %1009 = vmatmul.mubr.msk.bf16.gmra.mxu1 %vm298_vm1, %v1055_v13  ;;  %996 = vmatprep.mubr.msk.bf16.mxu0 %vm298_vm1, %v1056_v14 }
  0x23   : > { %1012 = vmatprep.mubr.msk.bf16.mxu1 %vm298_vm1, %v1057_v15 }
  0x29   : > { %997 = vmatmul.mubr.msk.bf16.gmra.mxu0 %vm298_vm1, %v1058_v16 }
  0x2a   : > { %1013 = vmatmul.mubr.msk.bf16.gmra.mxu1 %vm298_vm1, %v1059_v17 }
  0xd1   : > { %v986_v18 = vpop.f32.mrf.mxu0 }
  0xd2   : > { %v1002_v19 = vpop.f32.mrf.mxu1 }
  0xd3   : > { %v385_v20 = vpop.f32.mrf.mxu0 }
  0xd4   : > { %v449_v21 = vpop.f32.mrf.mxu1 }
  0xd5   : > { %v987_v22 = vpop.f32.mrf.mxu0 }
  0xd6   : > { %v878_v23 = vpack.c.bf16 %v987_v22, %v986_v18  ;;  %v1003_v24 = vpop.f32.mrf.mxu1 }
  0xd7   : > { %v918_v25 = vpack.c.bf16 %v1003_v24, %v1002_v19  ;;  %v388_v26 = vpop.f32.mrf.mxu0 }
  0xd8   : > { %950 = vst [vmem:[%s1167_s22 + $0x8] sm:$0xff] %v878_v23   ;;  %v873_v27 = vpack.c.bf16 %v388_v26, %v385_v20  ;;  %v452_v28 = vpop.f32.mrf.mxu1 }
  0xd9   : > { %958 = vst [vmem:[%s1167_s22 + $0x48] sm:$0xff] %v918_v25   ;;  %v913_v29 = vpack.c.bf16 %v452_v28, %v449_v21  ;;  %v990_v30 = vpop.f32.mrf.mxu0 }
  0xda   : > { %874 = vst [vmem:[%s1167_s22] sm:$0xff] %v873_v27   ;;  %v1006_v31 = vpop.f32.mrf.mxu1 }
  0xdb   : > { %957 = vst [vmem:[%s1167_s22 + $0x40] sm:$0xff] %v913_v29   ;;  %v401_v32 = vpop.f32.mrf.mxu0 }
  0xdc   : > { %v465_v33 = vpop.f32.mrf.mxu1 }
  0xdd   : > { %v991_v34 = vpop.f32.mrf.mxu0 }
  0xde   : > { %v888_v35 = vpack.c.bf16 %v991_v34, %v990_v30  ;;  %v1007_v36 = vpop.f32.mrf.mxu1 }
  0xdf   : > { %v928_v37 = vpack.c.bf16 %v1007_v36, %v1006_v31  ;;  %v404_v38 = vpop.f32.mrf.mxu0 }
  0xe0   : > { %952 = vst [vmem:[%s1167_s22 + $0x18] sm:$0xff] %v888_v35   ;;  %v883_v39 = vpack.c.bf16 %v404_v38, %v401_v32  ;;  %v468_v40 = vpop.f32.mrf.mxu1 }
  0xe1   : > { %960 = vst [vmem:[%s1167_s22 + $0x58] sm:$0xff] %v928_v37   ;;  %v923_v41 = vpack.c.bf16 %v468_v40, %v465_v33  ;;  %v994_v42 = vpop.f32.mrf.mxu0 }
  0xe2   : > { %951 = vst [vmem:[%s1167_s22 + $0x10] sm:$0xff] %v883_v39   ;;  %v1010_v43 = vpop.f32.mrf.mxu1 }
  0xe3   : > { %959 = vst [vmem:[%s1167_s22 + $0x50] sm:$0xff] %v923_v41   ;;  %v417_v44 = vpop.f32.mrf.mxu0 }
  0xe4   : > { %v481_v45 = vpop.f32.mrf.mxu1 }
  0xe5   : > { %v995_v46 = vpop.f32.mrf.mxu0 }
  0xe6   : > { %v898_v47 = vpack.c.bf16 %v995_v46, %v994_v42  ;;  %v1011_v48 = vpop.f32.mrf.mxu1 }
  0xe7   : > { %v938_v49 = vpack.c.bf16 %v1011_v48, %v1010_v43  ;;  %v420_v50 = vpop.f32.mrf.mxu0 }
  0xe8   : > { %954 = vst [vmem:[%s1167_s22 + $0x28] sm:$0xff] %v898_v47   ;;  %v893_v51 = vpack.c.bf16 %v420_v50, %v417_v44  ;;  %v484_v52 = vpop.f32.mrf.mxu1 }
  0xe9   : > { %962 = vst [vmem:[%s1167_s22 + $0x68] sm:$0xff] %v938_v49   ;;  %v933_v53 = vpack.c.bf16 %v484_v52, %v481_v45  ;;  %v998_v54 = vpop.f32.mrf.mxu0 }
  0xea   : > { %953 = vst [vmem:[%s1167_s22 + $0x20] sm:$0xff] %v893_v51   ;;  %v1014_v55 = vpop.f32.mrf.mxu1 }
  0xeb   : > { %961 = vst [vmem:[%s1167_s22 + $0x60] sm:$0xff] %v933_v53   ;;  %v433_v56 = vpop.f32.mrf.mxu0 }
  0xec   : > { %v497_v57 = vpop.f32.mrf.mxu1 }
  0xed   : > { %v999_v58 = vpop.f32.mrf.mxu0 }
  0xee   : > { %v908_v59 = vpack.c.bf16 %v999_v58, %v998_v54  ;;  %v1015_v60 = vpop.f32.mrf.mxu1 }
  0xef   : > { %v948_v61 = vpack.c.bf16 %v1015_v60, %v1014_v55  ;;  %v436_v62 = vpop.f32.mrf.mxu0 }
  0xf0   : > { %956 = vst [vmem:[%s1167_s22 + $0x38] sm:$0xff] %v908_v59   ;;  %v903_v63 = vpack.c.bf16 %v436_v62, %v433_v56  ;;  %v500_v0 = vpop.f32.mrf.mxu1 }
  0xf1   : > { %964 = vst [vmem:[%s1167_s22 + $0x78] sm:$0xff] %v948_v61   ;;  %v943_v1 = vpack.c.bf16 %v500_v0, %v497_v57 }
  0xf2   : > { %955 = vst [vmem:[%s1167_s22 + $0x30] sm:$0xff] %v903_v63  }
  0xf3   : > { %963 = vst [vmem:[%s1167_s22 + $0x70] sm:$0xff] %v943_v1  }
  0xf4 PF: > { %s12_s11 = sadd.s32 1, %s1082_s11   ;;  %s1197_s9 = smov %s1078_s10 }
  0xf5   : > { %p9_p5 = scmp.ge.s32.totalorder %s12_s11, 4   ;;  %s1198_s10 = smov %s1200_s12 }
  0xf7   :  { %11 = sbr.rel (!%p9_p5) target bundleno = 2 (0x2), region = 61 }

// kernel: dcgan_forward.19
= control target key start
LH: loop header
LB: loop body
LE: loop exit
PB: predicated region body
PF: predicated region fallthrough
CT: control target
= control target key end

     0   :  { %s1126_s18 = smov 0   ;;  %s1128_s19 = smov 0   ;;  %s1317_s0 = inlined_call_operand.vmem [shape: bf16[64,128], index: 0, kind: input, shape index: {}]   ;;  %s1318_s1 = inlined_call_operand.vmem [shape: f32[1,4], index: 1, kind: input, shape index: {}]   ;;  %s1319_s2 = inlined_call_operand.vmem [shape: f32[1,4], index: 2, kind: input, shape index: {}]   ;;  %s1320_s3 = inlined_call_operand.vmem [shape: f32[128,4], index: 3, kind: input, shape index: {}]   ;;  %s1321_s4 = inlined_call_operand.vmem [shape: f32[4,128], index: 4, kind: input, shape index: {}]   ;;  %s1322_s5 = inlined_call_operand.vmem [shape: bf16[64,128], index: 5, kind: output, shape index: {}]  }
   0x1   :  { %s1130_s20 = smov 0  }
   0x2 LB: > { %s27_s21 = sadd.s32 1, %s1086_s19  ;;  %p826_p0 = scmp.ge.s32.totalorder %s1090_s20, 1  ;;  %s1090_s20 = sphi %s1130_s20, %s15_s20   ;;  %s1086_s19 = sphi %s1128_s19, %s1324_s19   ;;  %s1082_s18 = sphi %s1126_s18, %s1323_s18  }
   0x3   : > { %p29_p1 = scmp.ge.s32.totalorder %s27_s21, 2  ;;  %p202_p2 = scmp.lt.s32.totalorder %s1090_s20, 3 }
   0x5   : > { %s1326_s21 = smov (%p29_p1, %s27_s21), 0  ;;  %p203_p3 = pnand %p826_p0, %p202_p2 }
   0x6   : > { %p246_p4 = scmp.eq.s32.totalorder (!%p203_p3), %s1082_s18, 0 }
   0x7   : > { %206 = sbr.rel (%p203_p3) target bundleno = 532 (0x214), region = 40 }
   0xc   : > { %251 = sbr.rel (!%p246_p4) target bundleno = 18 (0x12), region = 44  ;;  %v1092_v0 = vmov (%p246_p4), 0.0   ;;  %v1093_v1 = vmov (%p246_p4), 0  }
   0xd   : > { %252 = vst [vmem:[#allocation2] sm:$0x1] (%p246_p4), %v1092_v0  ;;  %253 = vst [vmem:[#allocation3] sm:$0x1] (%p246_p4), %v1092_v0 }
   0xe   : > { %254 = vst [vmem:[%s1322_s5] sm:$0xf] (%p246_p4), %v1093_v1  ;;  %255 = vst [vmem:[%s1322_s5 + $0x4] sm:$0xf] (%p246_p4), %v1093_v1 }
   0xf   : > { %256 = vst [vmem:[%s1322_s5 + $0x8] sm:$0xf] (%p246_p4), %v1093_v1  ;;  %257 = vst [vmem:[%s1322_s5 + $0xc] sm:$0xf] (%p246_p4), %v1093_v1 }
  0x10   : > { %258 = vst [vmem:[%s1322_s5 + $0x10] sm:$0xf] (%p246_p4), %v1093_v1  ;;  %259 = vst [vmem:[%s1322_s5 + $0x14] sm:$0xf] (%p246_p4), %v1093_v1 }
  0x11   : > { %260 = vst [vmem:[%s1322_s5 + $0x18] sm:$0xf] %v1093_v1  ;;  %261 = vst [vmem:[%s1322_s5 + $0x1c] sm:$0xf] %v1093_v1 }
  0x12 PF: > { %p828_p5 = scmp.ne.s32.totalorder %s1082_s18, 0 }
  0x14   : > { %264 = sbr.rel (%p828_p5) target bundleno = 59 (0x3b), region = 48 }
  0x19   : > { %v860_v2 = vld [vmem:[%s1317_s0] sm:$0xff]   ;;  %v911_v3 = vld [vmem:[%s1317_s0 + $0x8] sm:$0xff]   ;;  %v912_v4 = vld [vmem:[%s1317_s0 + $0x10] sm:$0xff]  }
  0x1a   : > { %v861_v5 = vunpack.c.l.bf16 %v860_v2  ;;  %v862_v6 = vunpack.c.h.bf16 %v860_v2  ;;  %v865_v7 = vunpack.c.l.bf16 %v911_v3  ;;  %v866_v8 = vunpack.c.h.bf16 %v911_v3  ;;  %v913_v14 = vld [vmem:[%s1317_s0 + $0x18] sm:$0xff]   ;;  %v281_v45 = vld [vmem:[#allocation2] sm:$0x1]  ;;  %v297_v48 = vld [vmem:[#allocation3] sm:$0x1] }
  0x1b   : > { %v869_v9 = vunpack.c.l.bf16 %v912_v4  ;;  %v870_v15 = vunpack.c.h.bf16 %v912_v4  ;;  %v873_v19 = vunpack.c.l.bf16 %v913_v14  ;;  %v874_v23 = vunpack.c.h.bf16 %v913_v14 }
  0x1c   : > { %v282_v10 = vadd.f32 %v862_v6, %v861_v5  ;;  %v298_v11 = vmul.f32 %v861_v5, %v861_v5  ;;  %v299_v12 = vmul.f32 %v862_v6, %v862_v6  ;;  %v300_v13 = vmul.f32 %v865_v7, %v865_v7 }
  0x1d   : > { %v301_v17 = vmul.f32 %v866_v8, %v866_v8  ;;  %v302_v21 = vmul.f32 %v869_v9, %v869_v9  ;;  %v303_v25 = vmul.f32 %v870_v15, %v870_v15  ;;  %v304_v28 = vmul.f32 %v873_v19, %v873_v19 }
  0x1e   : > { %v283_v16 = vadd.f32 %v865_v7, %v282_v10  ;;  %v306_v18 = vadd.f32 %v299_v12, %v298_v11  ;;  %v305_v31 = vmul.f32 %v874_v23, %v874_v23 }
  0x20   : > { %v284_v20 = vadd.f32 %v866_v8, %v283_v16  ;;  %v307_v22 = vadd.f32 %v306_v18, %v300_v13 }
  0x22   : > { %v285_v24 = vadd.f32 %v869_v9, %v284_v20  ;;  %v308_v26 = vadd.f32 %v307_v22, %v301_v17 }
  0x24   : > { %v286_v27 = vadd.f32 %v870_v15, %v285_v24  ;;  %v309_v29 = vadd.f32 %v308_v26, %v302_v21 }
  0x26   : > { %v287_v30 = vadd.f32 %v873_v19, %v286_v27  ;;  %v310_v32 = vadd.f32 %v309_v29, %v303_v25 }
  0x28   : > { %v288_v33 = vadd.f32 %v874_v23, %v287_v30  ;;  %v311_v34 = vadd.f32 %v310_v32, %v304_v28 }
  0x2a   : > { %v289_v35 = vrot.slane %v288_v33, 4  ;;  %v312_v36 = vadd.f32 %v311_v34, %v305_v31 }
  0x2c   : > { %v290_v37 = vadd.f32 %v289_v35, %v288_v33  ;;  %v313_v38 = vrot.slane %v312_v36, 4 }
  0x2e   : > { %v291_v39 = vrot.slane %v290_v37, 2  ;;  %v314_v40 = vadd.f32 %v313_v38, %v312_v36 }
  0x30   : > { %v292_v41 = vadd.f32 %v291_v39, %v290_v37  ;;  %v315_v42 = vrot.slane %v314_v40, 2 }
  0x32   : > { %v293_v43 = vrot.slane %v292_v41, 1  ;;  %v316_v44 = vadd.f32 %v315_v42, %v314_v40 }
  0x34   : > { %v294_v46 = vadd.f32 %v293_v43, %v292_v41  ;;  %v317_v47 = vrot.slane %v316_v44, 1 }
  0x36   : > { %v295_v49 = vadd.f32 %v294_v46, %v281_v45  ;;  %v318_v50 = vadd.f32 %v317_v47, %v316_v44 }
  0x38   : > { %296 = vst [vmem:[#allocation2] sm:$0x1] %v295_v49  ;;  %v319_v51 = vadd.f32 %v318_v50, %v297_v48 }
  0x3a   : > { %320 = vst [vmem:[#allocation3] sm:$0x1] %v319_v51 }
  0x3b PF: > { %p321_p6 = scmp.eq.s32.totalorder %s1082_s18, 1 }
  0x3c   : > { %v342_v52 = vld [vmem:[%s1320_s3 + $0x78] sm:$0xff] (%p321_p6)  ;;  %v1094_v53 = vmov (%p321_p6), 0.0   ;;  %v341_v54 = vld [vmem:[%s1320_s3 + $0x70] sm:$0xff] (%p321_p6)  ;;  %v340_v55 = vld [vmem:[%s1320_s3 + $0x68] sm:$0xff] (%p321_p6)  ;;  %vm1095_vm0 = vmmov (%p321_p6), 0   ;;  %vm501_vm1 = vcmask (%p321_p6), 1043456  }
  0x3d   : > { %325 = sbr.rel (!%p321_p6) target bundleno = 512 (0x200), region = 52  ;;  %958 = vmatprep.subr.mxu0 (%p321_p6), %v1094_v53  ;;  %993 = vmatprep.subr.mxu1 (%p321_p6), %v1094_v53  ;;  %v339_v56 = vld [vmem:[%s1320_s3 + $0x60] sm:$0xff] (%p321_p6)  ;;  %v338_v57 = vld [vmem:[%s1320_s3 + $0x58] sm:$0xff] (%p321_p6)  ;;  %v337_v58 = vld [vmem:[%s1320_s3 + $0x50] sm:$0xff] (%p321_p6)  ;;  %vm497_vm2 = vcmask (%p321_p6), 31744  }
  0x3e   : > { %959 = vmatpush3.msra.mxu0 (%p321_p6), %v342_v52  ;;  %994 = vmatpush3.msra.mxu1 (%p321_p6), %v342_v52  ;;  %v336_v59 = vld [vmem:[%s1320_s3 + $0x48] sm:$0xff] (%p321_p6)  ;;  %v335_v60 = vld [vmem:[%s1320_s3 + $0x40] sm:$0xff] (%p321_p6)  ;;  %v334_v61 = vld [vmem:[%s1320_s3 + $0x38] sm:$0xff] (%p321_p6) }
  0x3f   : > { %960 = vmatprep.subr.mxu0 (%p321_p6), %v1094_v53  ;;  %995 = vmatprep.subr.mxu1 (%p321_p6), %v1094_v53  ;;  %v333_v62 = vld [vmem:[%s1320_s3 + $0x30] sm:$0xff] (%p321_p6)  ;;  %v332_v63 = vld [vmem:[%s1320_s3 + $0x28] sm:$0xff] (%p321_p6)  ;;  %v331_v0 = vld [vmem:[%s1320_s3 + $0x20] sm:$0xff] (%p321_p6) }
  0x40   : > { %961 = vmatpush3.msra.mxu0 (%p321_p6), %v341_v54  ;;  %996 = vmatpush3.msra.mxu1 (%p321_p6), %v341_v54  ;;  %v330_v1 = vld [vmem:[%s1320_s3 + $0x18] sm:$0xff] (%p321_p6)  ;;  %v329_v2 = vld [vmem:[%s1320_s3 + $0x10] sm:$0xff] (%p321_p6)  ;;  %v328_v3 = vld [vmem:[%s1320_s3 + $0x8] sm:$0xff] (%p321_p6) }
  0x41   : > { %962 = vmatprep.subr.mxu0 (%p321_p6), %v1094_v53  ;;  %997 = vmatprep.subr.mxu1 (%p321_p6), %v1094_v53  ;;  %v327_v4 = vld [vmem:[%s1320_s3] sm:$0xff] (%p321_p6) }
  0x42   : > { %963 = vmatpush3.msra.mxu0 %v340_v55  ;;  %998 = vmatpush3.msra.mxu1 %v340_v55  ;;  %v326_v5 = vld [vmem:[#allocation2] sm:$0x1]  ;;  %v413_v6 = vld [vmem:[#allocation3] sm:$0x1] }
  0x43   : > { %964 = vmatprep.subr.mxu0 %v1094_v53  ;;  %999 = vmatprep.subr.mxu1 %v1094_v53  ;;  %v496_v7 = vld [vmem:[%s1321_s4] sm:$0xf] }
  0x44   : > { %965 = vmatpush3.msra.mxu0 %v339_v56  ;;  %1000 = vmatpush3.msra.mxu1 %v339_v56  ;;  %v576_v8 = vld [vmem:[%s1321_s4] sm:$0xf] }
  0x45   : > { %966 = vmatprep.subr.mxu0 %v1094_v53  ;;  %1001 = vmatprep.subr.mxu1 %v1094_v53  ;;  %v489_v19 = vld [vmem:[%s1318_s1] sm:$0x1] }
  0x46   : > { %967 = vmatpush3.msra.mxu0 %v338_v57  ;;  %1002 = vmatpush3.msra.mxu1 %v338_v57  ;;  %v493_v22 = vld [vmem:[%s1319_s2] sm:$0x1] }
  0x47   : > { %968 = vmatprep.subr.mxu0 %v1094_v53  ;;  %1003 = vmatprep.subr.mxu1 %v1094_v53 }
  0x48   : > { %969 = vmatpush3.msra.mxu0 %v337_v58  ;;  %1004 = vmatpush3.msra.mxu1 %v337_v58 }
  0x49   : > { %970 = vmatprep.subr.mxu0 %v1094_v53  ;;  %1005 = vmatprep.subr.mxu1 %v1094_v53 }
  0x4a   : > { %971 = vmatpush3.msra.mxu0 %v336_v59  ;;  %1006 = vmatpush3.msra.mxu1 %v336_v59 }
  0x4b   : > { %972 = vmatprep.subr.mxu0 %v1094_v53  ;;  %1007 = vmatprep.subr.mxu1 %v1094_v53 }
  0x4c   : > { %973 = vmatpush3.msra.mxu0 %v335_v60  ;;  %1008 = vmatpush3.msra.mxu1 %v335_v60 }
  0x4d   : > { %974 = vmatprep.subr.mxu0 %v1094_v53  ;;  %1009 = vmatprep.subr.mxu1 %v1094_v53 }
  0x4e   : > { %975 = vmatpush3.msra.mxu0 %v334_v61  ;;  %1010 = vmatpush3.msra.mxu1 %v334_v61 }
  0x4f   : > { %976 = vmatprep.subr.mxu0 %v1094_v53  ;;  %1011 = vmatprep.subr.mxu1 %v1094_v53 }
  0x50   : > { %977 = vmatpush3.msra.mxu0 %v333_v62  ;;  %1012 = vmatpush3.msra.mxu1 %v333_v62 }
  0x51   : > { %978 = vmatprep.subr.mxu0 %v1094_v53  ;;  %1013 = vmatprep.subr.mxu1 %v1094_v53 }
  0x52   : > { %979 = vmatpush3.msra.mxu0 %v332_v63  ;;  %1014 = vmatpush3.msra.mxu1 %v332_v63 }
  0x53   : > { %980 = vmatprep.subr.mxu0 %v1094_v53  ;;  %1015 = vmatprep.subr.mxu1 %v1094_v53 }
  0x54   : > { %981 = vmatpush3.msra.mxu0 %v331_v0  ;;  %1016 = vmatpush3.msra.mxu1 %v331_v0 }
  0x55   : > { %982 = vmatprep.subr.mxu0 %v1094_v53  ;;  %1017 = vmatprep.subr.mxu1 %v1094_v53 }
  0x56   : > { %983 = vmatpush3.msra.mxu0 %v330_v1  ;;  %1018 = vmatpush3.msra.mxu1 %v330_v1 }
  0x57   : > { %984 = vmatprep.subr.mxu0 %v1094_v53  ;;  %1019 = vmatprep.subr.mxu1 %v1094_v53 }
  0x58   : > { %985 = vmatpush3.msra.mxu0 %v329_v2  ;;  %1020 = vmatpush3.msra.mxu1 %v329_v2 }
  0x59   : > { %986 = vmatprep.subr.mxu0 %v1094_v53  ;;  %1021 = vmatprep.subr.mxu1 %v1094_v53 }
  0x5a   : > { %987 = vmatpush3.msra.mxu0 %v328_v3  ;;  %1022 = vmatpush3.msra.mxu1 %v328_v3 }
  0x5b   : > { %988 = vmatprep.subr.mxu0 %v1094_v53  ;;  %1023 = vmatprep.subr.mxu1 %v1094_v53 }
  0x5c   : > { %989 = vmatpush3.msra.mxu0 %v327_v4  ;;  %990 = vmatprep.mubr.msk.f32.mxu0 %vm1095_vm0, %v1094_v53 }
  0x5d   : > { %1024 = vmatpush3.msra.mxu1 %v327_v4  ;;  %1025 = vmatprep.mubr.msk.f32.mxu1 %vm1095_vm0, %v1094_v53 }
  0x5e   : > { %991 = vmatmul.mubr.f32.vlgmr.msra.gmra.mxu0 %v326_v5  ;;  %1026 = vmatmul.mubr.f32.vlgmr.msra.gmra.mxu1 %v413_v6 }
  0x5f   : > { %1028 = vmatprep.subr.mxu0 %v1094_v53  ;;  %1030 = vmatprep.mubr.msk.f32.mxu0 %vm1095_vm0, %v1094_v53 }
  0x60   : > { %1033 = vmatprep.subr.mxu1 %v1094_v53  ;;  %1035 = vmatprep.mubr.msk.f32.mxu1 %vm1095_vm0, %v1094_v53 }
  0x61   : > { %1029 = vmatpush3.msk.msra.mxu0 %vm501_vm1, %v496_v7  ;;  %1034 = vmatpush3.msk.msra.mxu1 %vm501_vm1, %v576_v8 }
 0x11e   : > { %v409_v9 = vpop.f32.mrf.mxu0  ;;  %v480_v10 = vpop.f32.mrf.mxu1 }
 0x11f   : > { %v484_v11 = vmul.f32 0.00048828125, %v409_v9  ;;  %v485_v12 = vmul.f32 0.00048828125, %v480_v10 }
 0x120   : > { %v992_v13 = vpop.f32.mrf.mxu0  ;;  %v1027_v14 = vpop.f32.mrf.mxu1 }
 0x121   : > { %v486_v15 = vmul.f32 %v484_v11, %v484_v11 }
 0x123   : > { %v487_v16 = vsub.f32 %v485_v12, %v486_v15 }
 0x125   : > { %v488_v17 = vmax.f32 %v487_v16, 0.0 }
 0x127   : > { %v490_v18 = vadd.f32 1e-05, %v488_v17 }
 0x129   : > { %1066 = vrsqrt.f32 %v490_v18 }
 0x136   : > { %v1067_v20 = vpop.eup %1066 }
 0x137   : > { %v492_v21 = vmul.f32 %v1067_v20, %v489_v19 }
 0x139   : > { %1031 = vmatmul.mubr.msk.f32.vlgmr.msra.gmra.mxu0 %vm497_vm2, %v492_v21  ;;  %v494_v23 = vmul.f32 %v492_v21, %v484_v11 }
 0x13b   : > { %v495_v24 = vsub.f32 %v493_v22, %v494_v23 }
 0x13d   : > { %1036 = vmatmul.mubr.msk.f32.vlgmr.msra.gmra.mxu1 %vm497_vm2, %v495_v24 }
 0x1f9   : > { %v571_v25 = vpop.f32.mrf.mxu0 }
 0x1fa   : > { %575 = vst [vmem:[#allocation4] sm:$0x1] %v571_v25 }
 0x1fb   : > { %v1032_v26 = vpop.f32.mrf.mxu0 }
 0x1fd   : > { %v649_v27 = vpop.f32.mrf.mxu1 }
 0x1fe   : > { %653 = vst [vmem:[#allocation5] sm:$0x1] %v649_v27 }
 0x1ff   : > { %v1037_v28 = vpop.f32.mrf.mxu1 }
 0x200 PF: > { %p834_p7 = scmp.ne.s32.totalorder %s1082_s18, 1 }
 0x202   : > { %656 = sbr.rel (%p834_p7) target bundleno = 532 (0x214), region = 56 }
 0x207   : > { %v876_v29 = vld [vmem:[%s1317_s0] sm:$0xff]   ;;  %v914_v33 = vld [vmem:[%s1317_s0 + $0x8] sm:$0xff]   ;;  %v915_v34 = vld [vmem:[%s1317_s0 + $0x10] sm:$0xff]  }
 0x208   : > { %v835_v30 = vld [vmem:[#allocation4] ss:$0 sm:$0xff]  ;;  %v877_v31 = vunpack.c.l.bf16 %v876_v29  ;;  %v878_v32 = vunpack.c.h.bf16 %v876_v29  ;;  %v916_v35 = vld [vmem:[%s1317_s0 + $0x18] sm:$0xff]   ;;  %v836_v36 = vld [vmem:[#allocation5] ss:$0 sm:$0xff]  ;;  %v881_v37 = vunpack.c.l.bf16 %v914_v33  ;;  %v882_v38 = vunpack.c.h.bf16 %v914_v33 }
 0x209   : > { %v885_v39 = vunpack.c.l.bf16 %v915_v34  ;;  %v886_v40 = vunpack.c.h.bf16 %v915_v34  ;;  %v889_v43 = vunpack.c.l.bf16 %v916_v35  ;;  %v890_v44 = vunpack.c.h.bf16 %v916_v35 }
 0x20a   : > { %v680_v41 = vmul.f32 %v877_v31, %v835_v30  ;;  %v681_v42 = vmul.f32 %v878_v32, %v835_v30  ;;  %v682_v45 = vmul.f32 %v881_v37, %v835_v30  ;;  %v683_v46 = vmul.f32 %v882_v38, %v835_v30 }
 0x20b   : > { %v684_v47 = vmul.f32 %v885_v39, %v835_v30  ;;  %v685_v48 = vmul.f32 %v886_v40, %v835_v30  ;;  %v686_v51 = vmul.f32 %v889_v43, %v835_v30  ;;  %v687_v52 = vmul.f32 %v890_v44, %v835_v30 }
 0x20c   : > { %v695_v49 = vadd.f32 %v836_v36, %v680_v41  ;;  %v696_v50 = vadd.f32 %v836_v36, %v681_v42  ;;  %v697_v53 = vadd.f32 %v836_v36, %v682_v45  ;;  %v698_v54 = vadd.f32 %v836_v36, %v683_v46 }
 0x20d   : > { %v699_v55 = vadd.f32 %v836_v36, %v684_v47  ;;  %v700_v56 = vadd.f32 %v836_v36, %v685_v48  ;;  %v701_v59 = vadd.f32 %v836_v36, %v686_v51  ;;  %v702_v60 = vadd.f32 %v836_v36, %v687_v52 }
 0x20e   : > { %v703_v57 = vmax.f32 %v695_v49, 0.0  ;;  %v704_v58 = vmax.f32 %v696_v50, 0.0  ;;  %v705_v61 = vmax.f32 %v697_v53, 0.0  ;;  %v706_v62 = vmax.f32 %v698_v54, 0.0 }
 0x20f   : > { %v707_v63 = vmax.f32 %v699_v55, 0.0  ;;  %v708_v0 = vmax.f32 %v700_v56, 0.0  ;;  %v709_v2 = vmax.f32 %v701_v59, 0.0  ;;  %v710_v3 = vmax.f32 %v702_v60, 0.0 }
 0x210   : > { %v894_v1 = vpack.c.bf16 %v704_v58, %v703_v57  ;;  %v899_v4 = vpack.c.bf16 %v706_v62, %v705_v61 }
 0x211   : > { %v904_v5 = vpack.c.bf16 %v708_v0, %v707_v63  ;;  %v909_v6 = vpack.c.bf16 %v710_v3, %v709_v2 }
 0x212   : > { %895 = vst [vmem:[%s1322_s5] sm:$0xff] %v894_v1   ;;  %917 = vst [vmem:[%s1322_s5 + $0x8] sm:$0xff] %v899_v4  }
 0x213   : > { %918 = vst [vmem:[%s1322_s5 + $0x10] sm:$0xff] %v904_v5   ;;  %919 = vst [vmem:[%s1322_s5 + $0x18] sm:$0xff] %v909_v6  }
 0x214 PF: > { %s15_s20 = sadd.s32 1, %s1090_s20   ;;  %s1323_s18 = smov %s1086_s19 }
 0x215   : > { %p12_p8 = scmp.ge.s32.totalorder %s15_s20, 4   ;;  %s1324_s19 = smov %s1326_s21 }
 0x217   :  { %14 = sbr.rel (!%p12_p8) target bundleno = 2 (0x2), region = 86 }

// kernel: dcgan_forward.20
= control target key start
LH: loop header
LB: loop body
LE: loop exit
PB: predicated region body
PF: predicated region fallthrough
CT: control target
= control target key end

     0   :  { %s1803_s9 = smov 0   ;;  %s1805_s10 = smov 0   ;;  %s1946_s0 = inlined_call_operand.vmem [shape: bf16[2048,4], index: 0, kind: input, shape index: {}]   ;;  %s1947_s1 = inlined_call_operand.vmem [shape: bf16[4,128], index: 1, kind: input, shape index: {}]   ;;  %s1948_s2 = inlined_call_operand.vmem [shape: bf16[2048,128], index: 2, kind: output, shape index: {}]  }
   0x1   :  { %s1807_s11 = smov 0  }
   0x2 LB: > { %s24_s12 = sadd.s32 1, %s1782_s10  ;;  %p1215_p0 = scmp.ge.s32.totalorder %s1786_s11, 1  ;;  %s1786_s11 = sphi %s1807_s11, %s12_s11   ;;  %s1782_s10 = sphi %s1805_s10, %s1950_s10   ;;  %s1778_s9 = sphi %s1803_s9, %s1949_s9  }
   0x3   : > { %p26_p1 = scmp.ge.s32.totalorder %s24_s12, 4  ;;  %p136_p2 = scmp.lt.s32.totalorder %s1786_s11, 5 }
   0x5   : > { %s1952_s12 = smov (%p26_p1, %s24_s12), 0  ;;  %p137_p3 = pnand %p1215_p0, %p136_p2 }
   0x6   : > { %s1216_s15 = sshll.u32 (!%p137_p3), %s1778_s9, 6 }
   0x7   : > { %140 = sbr.rel (%p137_p3) target bundleno = 276 (0x114), region = 28  ;;  %p166_p4 = scmp.lt.s32.totalorder (!%p137_p3), %s1216_s15, 255 }
   0xc   : > { %v249_v0 = vld [vmem:[%s1947_s1] sm:$0x3]  ;;  %vm507_vm0 = vcmask 1041408   ;;  %s1954_s15 = smov (!%p166_p4, %s1216_s15), 255  ;;  %vm410_vm1 = vcmask 31744  }
   0xd   : > { %1706 = vmatprep.subr.msk.bf16.mxu0 %vm507_vm0, %v249_v0  ;;  %1707 = vmatprep.subr.msk.bf16.mxu1 %vm507_vm0, %v249_v0  ;;  %v509_v1 = vsel %vm507_vm0, %v249_v0, 0  ;;  %s1217_s16 = sshll.u32 %s1954_s15, 2 }
   0xe   : > { %1639 = vmatpush3.bf16.msra.mxu0 %v509_v1  ;;  %1705 = vmatpush3.bf16.msra.mxu1 %v509_v1  ;;  %s1832_s19 = scalar_lea.vmem %s1946_s0, %s1217_s16  ;;  %s1903_s22 = scalar_lea.vmem %s1948_s2, %s1217_s16 }
   0xf   : > { %v1732_v2 = vld [vmem:[%s1832_s19] sm:$0xff]   ;;  %v1734_v4 = vld [vmem:[%s1832_s19 + $0x8] sm:$0xff]   ;;  %v1736_v6 = vld [vmem:[%s1832_s19 + $0x10] sm:$0xff]  }
  0x10   : > { %v1733_v3 = vld [vmem:[%s1832_s19 + $0x80] sm:$0xff]   ;;  %1640 = vmatprep.mubr.msk.bf16.mxu0 %vm410_vm1, %v1732_v2  ;;  %v1735_v5 = vld [vmem:[%s1832_s19 + $0x88] sm:$0xff]   ;;  %v1737_v7 = vld [vmem:[%s1832_s19 + $0x90] sm:$0xff]  }
  0x11   : > { %1672 = vmatprep.mubr.msk.bf16.mxu1 %vm410_vm1, %v1733_v3  ;;  %1641 = vmatmul.mubr.msk.bf16.vlgmr.msra.gmra.mxu0 %vm410_vm1, %v1734_v4  ;;  %v1738_v8 = vld [vmem:[%s1832_s19 + $0x18] sm:$0xff]   ;;  %v1740_v10 = vld [vmem:[%s1832_s19 + $0x20] sm:$0xff]   ;;  %v1742_v12 = vld [vmem:[%s1832_s19 + $0x28] sm:$0xff]  }
  0x12   : > { %1673 = vmatmul.mubr.msk.bf16.vlgmr.msra.gmra.mxu1 %vm410_vm1, %v1735_v5  ;;  %1644 = vmatprep.mubr.msk.bf16.mxu0 %vm410_vm1, %v1736_v6  ;;  %v1739_v9 = vld [vmem:[%s1832_s19 + $0x98] sm:$0xff]   ;;  %v1741_v11 = vld [vmem:[%s1832_s19 + $0xa0] sm:$0xff]   ;;  %v1743_v13 = vld [vmem:[%s1832_s19 + $0xa8] sm:$0xff]  }
  0x13   : > { %1676 = vmatprep.mubr.msk.bf16.mxu1 %vm410_vm1, %v1737_v7  ;;  %v1744_v14 = vld [vmem:[%s1832_s19 + $0x30] sm:$0xff]   ;;  %v1746_v16 = vld [vmem:[%s1832_s19 + $0x38] sm:$0xff]   ;;  %v1748_v18 = vld [vmem:[%s1832_s19 + $0x40] sm:$0xff]  }
  0x14   : > { %v1745_v15 = vld [vmem:[%s1832_s19 + $0xb0] sm:$0xff]   ;;  %v1747_v17 = vld [vmem:[%s1832_s19 + $0xb8] sm:$0xff]   ;;  %v1749_v19 = vld [vmem:[%s1832_s19 + $0xc0] sm:$0xff]  }
  0x15   : > { %v1750_v20 = vld [vmem:[%s1832_s19 + $0x48] sm:$0xff]   ;;  %v1752_v22 = vld [vmem:[%s1832_s19 + $0x50] sm:$0xff]   ;;  %v1754_v24 = vld [vmem:[%s1832_s19 + $0x58] sm:$0xff]  }
  0x16   : > { %v1751_v21 = vld [vmem:[%s1832_s19 + $0xc8] sm:$0xff]   ;;  %v1753_v23 = vld [vmem:[%s1832_s19 + $0xd0] sm:$0xff]   ;;  %v1755_v25 = vld [vmem:[%s1832_s19 + $0xd8] sm:$0xff]  }
  0x17   : > { %v1756_v26 = vld [vmem:[%s1832_s19 + $0x60] sm:$0xff]   ;;  %v1758_v28 = vld [vmem:[%s1832_s19 + $0x68] sm:$0xff]   ;;  %v1760_v30 = vld [vmem:[%s1832_s19 + $0x70] sm:$0xff]  }
  0x18   : > { %v1757_v27 = vld [vmem:[%s1832_s19 + $0xe0] sm:$0xff]   ;;  %v1759_v29 = vld [vmem:[%s1832_s19 + $0xe8] sm:$0xff]   ;;  %v1761_v31 = vld [vmem:[%s1832_s19 + $0xf0] sm:$0xff]  }
  0x19   : > { %1645 = vmatmul.mubr.msk.bf16.gmra.mxu0 %vm410_vm1, %v1738_v8  ;;  %v1762_v32 = vld [vmem:[%s1832_s19 + $0x78] sm:$0xff]  }
  0x1a   : > { %1677 = vmatmul.mubr.msk.bf16.gmra.mxu1 %vm410_vm1, %v1739_v9  ;;  %1648 = vmatprep.mubr.msk.bf16.mxu0 %vm410_vm1, %v1740_v10  ;;  %v1763_v33 = vld [vmem:[%s1832_s19 + $0xf8] sm:$0xff]  }
  0x1b   : > { %1680 = vmatprep.mubr.msk.bf16.mxu1 %vm410_vm1, %v1741_v11 }
  0x21   : > { %1649 = vmatmul.mubr.msk.bf16.gmra.mxu0 %vm410_vm1, %v1742_v12 }
  0x22   : > { %1681 = vmatmul.mubr.msk.bf16.gmra.mxu1 %vm410_vm1, %v1743_v13  ;;  %1652 = vmatprep.mubr.msk.bf16.mxu0 %vm410_vm1, %v1744_v14 }
  0x23   : > { %1684 = vmatprep.mubr.msk.bf16.mxu1 %vm410_vm1, %v1745_v15 }
  0x29   : > { %1653 = vmatmul.mubr.msk.bf16.gmra.mxu0 %vm410_vm1, %v1746_v16 }
  0x2a   : > { %1685 = vmatmul.mubr.msk.bf16.gmra.mxu1 %vm410_vm1, %v1747_v17  ;;  %1656 = vmatprep.mubr.msk.bf16.mxu0 %vm410_vm1, %v1748_v18 }
  0x2b   : > { %1688 = vmatprep.mubr.msk.bf16.mxu1 %vm410_vm1, %v1749_v19 }
  0x31   : > { %1657 = vmatmul.mubr.msk.bf16.gmra.mxu0 %vm410_vm1, %v1750_v20 }
  0x32   : > { %1689 = vmatmul.mubr.msk.bf16.gmra.mxu1 %vm410_vm1, %v1751_v21  ;;  %1660 = vmatprep.mubr.msk.bf16.mxu0 %vm410_vm1, %v1752_v22 }
  0x33   : > { %1692 = vmatprep.mubr.msk.bf16.mxu1 %vm410_vm1, %v1753_v23 }
  0x39   : > { %1661 = vmatmul.mubr.msk.bf16.gmra.mxu0 %vm410_vm1, %v1754_v24 }
  0x3a   : > { %1693 = vmatmul.mubr.msk.bf16.gmra.mxu1 %vm410_vm1, %v1755_v25  ;;  %1664 = vmatprep.mubr.msk.bf16.mxu0 %vm410_vm1, %v1756_v26 }
  0x3b   : > { %1696 = vmatprep.mubr.msk.bf16.mxu1 %vm410_vm1, %v1757_v27 }
  0x41   : > { %1665 = vmatmul.mubr.msk.bf16.gmra.mxu0 %vm410_vm1, %v1758_v28 }
  0x42   : > { %1697 = vmatmul.mubr.msk.bf16.gmra.mxu1 %vm410_vm1, %v1759_v29  ;;  %1668 = vmatprep.mubr.msk.bf16.mxu0 %vm410_vm1, %v1760_v30 }
  0x43   : > { %1700 = vmatprep.mubr.msk.bf16.mxu1 %vm410_vm1, %v1761_v31 }
  0x49   : > { %1669 = vmatmul.mubr.msk.bf16.gmra.mxu0 %vm410_vm1, %v1762_v32 }
  0x4a   : > { %1701 = vmatmul.mubr.msk.bf16.gmra.mxu1 %vm410_vm1, %v1763_v33 }
  0xd1   : > { %v1642_v34 = vpop.f32.mrf.mxu0 }
  0xd2   : > { %v1674_v35 = vpop.f32.mrf.mxu1 }
  0xd3   : > { %v545_v36 = vpop.f32.mrf.mxu0 }
  0xd4   : > { %v673_v37 = vpop.f32.mrf.mxu1 }
  0xd5   : > { %v1643_v38 = vpop.f32.mrf.mxu0 }
  0xd6   : > { %v1422_v39 = vpack.c.bf16 %v1643_v38, %v1642_v34  ;;  %v1675_v40 = vpop.f32.mrf.mxu1 }
  0xd7   : > { %v1502_v41 = vpack.c.bf16 %v1675_v40, %v1674_v35  ;;  %v548_v42 = vpop.f32.mrf.mxu0 }
  0xd8   : > { %1574 = vst [vmem:[%s1903_s22 + $0x8] sm:$0xff] %v1422_v39   ;;  %v1417_v43 = vpack.c.bf16 %v548_v42, %v545_v36  ;;  %v676_v44 = vpop.f32.mrf.mxu1 }
  0xd9   : > { %1590 = vst [vmem:[%s1903_s22 + $0x88] sm:$0xff] %v1502_v41   ;;  %v1497_v45 = vpack.c.bf16 %v676_v44, %v673_v37  ;;  %v1646_v46 = vpop.f32.mrf.mxu0 }
  0xda   : > { %1418 = vst [vmem:[%s1903_s22] sm:$0xff] %v1417_v43   ;;  %v1678_v47 = vpop.f32.mrf.mxu1 }
  0xdb   : > { %1589 = vst [vmem:[%s1903_s22 + $0x80] sm:$0xff] %v1497_v45   ;;  %v561_v48 = vpop.f32.mrf.mxu0 }
  0xdc   : > { %v689_v49 = vpop.f32.mrf.mxu1 }
  0xdd   : > { %v1647_v50 = vpop.f32.mrf.mxu0 }
  0xde   : > { %v1432_v51 = vpack.c.bf16 %v1647_v50, %v1646_v46  ;;  %v1679_v52 = vpop.f32.mrf.mxu1 }
  0xdf   : > { %v1512_v53 = vpack.c.bf16 %v1679_v52, %v1678_v47  ;;  %v564_v54 = vpop.f32.mrf.mxu0 }
  0xe0   : > { %1576 = vst [vmem:[%s1903_s22 + $0x18] sm:$0xff] %v1432_v51   ;;  %v1427_v55 = vpack.c.bf16 %v564_v54, %v561_v48  ;;  %v692_v56 = vpop.f32.mrf.mxu1 }
  0xe1   : > { %1592 = vst [vmem:[%s1903_s22 + $0x98] sm:$0xff] %v1512_v53   ;;  %v1507_v57 = vpack.c.bf16 %v692_v56, %v689_v49  ;;  %v1650_v58 = vpop.f32.mrf.mxu0 }
  0xe2   : > { %1575 = vst [vmem:[%s1903_s22 + $0x10] sm:$0xff] %v1427_v55   ;;  %v1682_v59 = vpop.f32.mrf.mxu1 }
  0xe3   : > { %1591 = vst [vmem:[%s1903_s22 + $0x90] sm:$0xff] %v1507_v57   ;;  %v577_v60 = vpop.f32.mrf.mxu0 }
  0xe4   : > { %v705_v61 = vpop.f32.mrf.mxu1 }
  0xe5   : > { %v1651_v62 = vpop.f32.mrf.mxu0 }
  0xe6   : > { %v1442_v63 = vpack.c.bf16 %v1651_v62, %v1650_v58  ;;  %v1683_v0 = vpop.f32.mrf.mxu1 }
  0xe7   : > { %v1522_v1 = vpack.c.bf16 %v1683_v0, %v1682_v59  ;;  %v580_v2 = vpop.f32.mrf.mxu0 }
  0xe8   : > { %1578 = vst [vmem:[%s1903_s22 + $0x28] sm:$0xff] %v1442_v63   ;;  %v1437_v3 = vpack.c.bf16 %v580_v2, %v577_v60  ;;  %v708_v4 = vpop.f32.mrf.mxu1 }
  0xe9   : > { %1594 = vst [vmem:[%s1903_s22 + $0xa8] sm:$0xff] %v1522_v1   ;;  %v1517_v5 = vpack.c.bf16 %v708_v4, %v705_v61  ;;  %v1654_v6 = vpop.f32.mrf.mxu0 }
  0xea   : > { %1577 = vst [vmem:[%s1903_s22 + $0x20] sm:$0xff] %v1437_v3   ;;  %v1686_v7 = vpop.f32.mrf.mxu1 }
  0xeb   : > { %1593 = vst [vmem:[%s1903_s22 + $0xa0] sm:$0xff] %v1517_v5   ;;  %v593_v8 = vpop.f32.mrf.mxu0 }
  0xec   : > { %v721_v9 = vpop.f32.mrf.mxu1 }
  0xed   : > { %v1655_v10 = vpop.f32.mrf.mxu0 }
  0xee   : > { %v1452_v11 = vpack.c.bf16 %v1655_v10, %v1654_v6  ;;  %v1687_v12 = vpop.f32.mrf.mxu1 }
  0xef   : > { %v1532_v13 = vpack.c.bf16 %v1687_v12, %v1686_v7  ;;  %v596_v14 = vpop.f32.mrf.mxu0 }
  0xf0   : > { %1580 = vst [vmem:[%s1903_s22 + $0x38] sm:$0xff] %v1452_v11   ;;  %v1447_v15 = vpack.c.bf16 %v596_v14, %v593_v8  ;;  %v724_v16 = vpop.f32.mrf.mxu1 }
  0xf1   : > { %1596 = vst [vmem:[%s1903_s22 + $0xb8] sm:$0xff] %v1532_v13   ;;  %v1527_v17 = vpack.c.bf16 %v724_v16, %v721_v9  ;;  %v1658_v18 = vpop.f32.mrf.mxu0 }
  0xf2   : > { %1579 = vst [vmem:[%s1903_s22 + $0x30] sm:$0xff] %v1447_v15   ;;  %v1690_v19 = vpop.f32.mrf.mxu1 }
  0xf3   : > { %1595 = vst [vmem:[%s1903_s22 + $0xb0] sm:$0xff] %v1527_v17   ;;  %v609_v20 = vpop.f32.mrf.mxu0 }
  0xf4   : > { %v737_v21 = vpop.f32.mrf.mxu1 }
  0xf5   : > { %v1659_v22 = vpop.f32.mrf.mxu0 }
  0xf6   : > { %v1462_v23 = vpack.c.bf16 %v1659_v22, %v1658_v18  ;;  %v1691_v24 = vpop.f32.mrf.mxu1 }
  0xf7   : > { %v1542_v25 = vpack.c.bf16 %v1691_v24, %v1690_v19  ;;  %v612_v26 = vpop.f32.mrf.mxu0 }
  0xf8   : > { %1582 = vst [vmem:[%s1903_s22 + $0x48] sm:$0xff] %v1462_v23   ;;  %v1457_v27 = vpack.c.bf16 %v612_v26, %v609_v20  ;;  %v740_v28 = vpop.f32.mrf.mxu1 }
  0xf9   : > { %1598 = vst [vmem:[%s1903_s22 + $0xc8] sm:$0xff] %v1542_v25   ;;  %v1537_v29 = vpack.c.bf16 %v740_v28, %v737_v21  ;;  %v1662_v30 = vpop.f32.mrf.mxu0 }
  0xfa   : > { %1581 = vst [vmem:[%s1903_s22 + $0x40] sm:$0xff] %v1457_v27   ;;  %v1694_v31 = vpop.f32.mrf.mxu1 }
  0xfb   : > { %1597 = vst [vmem:[%s1903_s22 + $0xc0] sm:$0xff] %v1537_v29   ;;  %v625_v32 = vpop.f32.mrf.mxu0 }
  0xfc   : > { %v753_v33 = vpop.f32.mrf.mxu1 }
  0xfd   : > { %v1663_v34 = vpop.f32.mrf.mxu0 }
  0xfe   : > { %v1472_v35 = vpack.c.bf16 %v1663_v34, %v1662_v30  ;;  %v1695_v36 = vpop.f32.mrf.mxu1 }
  0xff   : > { %v1552_v37 = vpack.c.bf16 %v1695_v36, %v1694_v31  ;;  %v628_v38 = vpop.f32.mrf.mxu0 }
 0x100   : > { %1584 = vst [vmem:[%s1903_s22 + $0x58] sm:$0xff] %v1472_v35   ;;  %v1467_v39 = vpack.c.bf16 %v628_v38, %v625_v32  ;;  %v756_v40 = vpop.f32.mrf.mxu1 }
 0x101   : > { %1600 = vst [vmem:[%s1903_s22 + $0xd8] sm:$0xff] %v1552_v37   ;;  %v1547_v41 = vpack.c.bf16 %v756_v40, %v753_v33  ;;  %v1666_v42 = vpop.f32.mrf.mxu0 }
 0x102   : > { %1583 = vst [vmem:[%s1903_s22 + $0x50] sm:$0xff] %v1467_v39   ;;  %v1698_v43 = vpop.f32.mrf.mxu1 }
 0x103   : > { %1599 = vst [vmem:[%s1903_s22 + $0xd0] sm:$0xff] %v1547_v41   ;;  %v641_v44 = vpop.f32.mrf.mxu0 }
 0x104   : > { %v769_v45 = vpop.f32.mrf.mxu1 }
 0x105   : > { %v1667_v46 = vpop.f32.mrf.mxu0 }
 0x106   : > { %v1482_v47 = vpack.c.bf16 %v1667_v46, %v1666_v42  ;;  %v1699_v48 = vpop.f32.mrf.mxu1 }
 0x107   : > { %v1562_v49 = vpack.c.bf16 %v1699_v48, %v1698_v43  ;;  %v644_v50 = vpop.f32.mrf.mxu0 }
 0x108   : > { %1586 = vst [vmem:[%s1903_s22 + $0x68] sm:$0xff] %v1482_v47   ;;  %v1477_v51 = vpack.c.bf16 %v644_v50, %v641_v44  ;;  %v772_v52 = vpop.f32.mrf.mxu1 }
 0x109   : > { %1602 = vst [vmem:[%s1903_s22 + $0xe8] sm:$0xff] %v1562_v49   ;;  %v1557_v53 = vpack.c.bf16 %v772_v52, %v769_v45  ;;  %v1670_v54 = vpop.f32.mrf.mxu0 }
 0x10a   : > { %1585 = vst [vmem:[%s1903_s22 + $0x60] sm:$0xff] %v1477_v51   ;;  %v1702_v55 = vpop.f32.mrf.mxu1 }
 0x10b   : > { %1601 = vst [vmem:[%s1903_s22 + $0xe0] sm:$0xff] %v1557_v53   ;;  %v657_v56 = vpop.f32.mrf.mxu0 }
 0x10c   : > { %v785_v57 = vpop.f32.mrf.mxu1 }
 0x10d   : > { %v1671_v58 = vpop.f32.mrf.mxu0 }
 0x10e   : > { %v1492_v59 = vpack.c.bf16 %v1671_v58, %v1670_v54  ;;  %v1703_v60 = vpop.f32.mrf.mxu1 }
 0x10f   : > { %v1572_v61 = vpack.c.bf16 %v1703_v60, %v1702_v55  ;;  %v660_v62 = vpop.f32.mrf.mxu0 }
 0x110   : > { %1588 = vst [vmem:[%s1903_s22 + $0x78] sm:$0xff] %v1492_v59   ;;  %v1487_v63 = vpack.c.bf16 %v660_v62, %v657_v56  ;;  %v788_v0 = vpop.f32.mrf.mxu1 }
 0x111   : > { %1604 = vst [vmem:[%s1903_s22 + $0xf8] sm:$0xff] %v1572_v61   ;;  %v1567_v1 = vpack.c.bf16 %v788_v0, %v785_v57 }
 0x112   : > { %1587 = vst [vmem:[%s1903_s22 + $0x70] sm:$0xff] %v1487_v63  }
 0x113   : > { %1603 = vst [vmem:[%s1903_s22 + $0xf0] sm:$0xff] %v1567_v1  }
 0x114 PF: > { %s12_s11 = sadd.s32 1, %s1786_s11   ;;  %s1949_s9 = smov %s1782_s10 }
 0x115   : > { %p9_p5 = scmp.ge.s32.totalorder %s12_s11, 6   ;;  %s1950_s10 = smov %s1952_s12 }
 0x117   :  { %11 = sbr.rel (!%p9_p5) target bundleno = 2 (0x2), region = 61 }

// kernel: dcgan_forward.21
= control target key start
LH: loop header
LB: loop body
LE: loop exit
PB: predicated region body
PF: predicated region fallthrough
CT: control target
= control target key end

     0   :  { %s1514_s18 = smov 0   ;;  %s1516_s19 = smov 0   ;;  %s1941_s0 = inlined_call_operand.vmem [shape: bf16[128,256], index: 0, kind: input, shape index: {}]   ;;  %s1942_s1 = inlined_call_operand.vmem [shape: f32[1,4], index: 1, kind: input, shape index: {}]   ;;  %s1943_s2 = inlined_call_operand.vmem [shape: f32[1,4], index: 2, kind: input, shape index: {}]   ;;  %s1944_s3 = inlined_call_operand.vmem [shape: f32[256,4], index: 3, kind: input, shape index: {}]   ;;  %s1945_s4 = inlined_call_operand.vmem [shape: f32[4,256], index: 4, kind: input, shape index: {}]   ;;  %s1946_s5 = inlined_call_operand.vmem [shape: bf16[128,256], index: 5, kind: output, shape index: {}]  }
   0x1   :  { %s1518_s20 = smov 0  }
   0x2 LB: > { %s27_s21 = sadd.s32 1, %s1472_s19  ;;  %p1271_p0 = scmp.ge.s32.totalorder %s1476_s20, 1  ;;  %s1476_s20 = sphi %s1518_s20, %s15_s20   ;;  %s1472_s19 = sphi %s1516_s19, %s1948_s19   ;;  %s1468_s18 = sphi %s1514_s18, %s1947_s18  }
   0x3   : > { %p29_p1 = scmp.ge.s32.totalorder %s27_s21, 2  ;;  %p203_p2 = scmp.lt.s32.totalorder %s1476_s20, 3 }
   0x5   : > { %s1950_s21 = smov (%p29_p1, %s27_s21), 0  ;;  %p204_p3 = pnand %p1271_p0, %p203_p2 }
   0x6   : > { %p251_p4 = scmp.eq.s32.totalorder (!%p204_p3), %s1468_s18, 0 }
   0x7   : > { %207 = sbr.rel (%p204_p3) target bundleno = 599 (0x257), region = 40 }
   0xc   : > { %256 = sbr.rel (!%p251_p4) target bundleno = 22 (0x16), region = 44  ;;  %v257_v0 = vlaneseq (%p251_p4)  ;;  %v1478_v1 = vmov (%p251_p4), 0   ;;  %v1479_v2 = vmov (%p251_p4), 0.0  }
   0xd   : > { %263 = vst [vmem:[%s1946_s5] sm:$0xff] (%p251_p4), %v1478_v1  ;;  %264 = vst [vmem:[%s1946_s5 + $0x8] sm:$0xff] (%p251_p4), %v1478_v1 }
   0xe   : > { %265 = vst [vmem:[%s1946_s5 + $0x10] sm:$0xff] (%p251_p4), %v1478_v1  ;;  %266 = vst [vmem:[%s1946_s5 + $0x18] sm:$0xff] (%p251_p4), %v1478_v1  ;;  %vm259_vm0 = vcmp.lt.s32.totalorder (%p251_p4), %v257_v0, 256 }
   0xf   : > { %267 = vst [vmem:[%s1946_s5 + $0x20] sm:$0xff] (%p251_p4), %v1478_v1  ;;  %268 = vst [vmem:[%s1946_s5 + $0x28] sm:$0xff] (%p251_p4), %v1478_v1 }
  0x10   : > { %269 = vst [vmem:[%s1946_s5 + $0x30] sm:$0xff] (%p251_p4), %v1478_v1  ;;  %270 = vst [vmem:[%s1946_s5 + $0x38] sm:$0xff] (%p251_p4), %v1478_v1 }
  0x11   : > { %271 = vst [vmem:[%s1946_s5 + $0x40] sm:$0xff] %v1478_v1  ;;  %272 = vst [vmem:[%s1946_s5 + $0x48] sm:$0xff] %v1478_v1 }
  0x12   : > { %273 = vst [vmem:[%s1946_s5 + $0x50] sm:$0xff] %v1478_v1  ;;  %274 = vst [vmem:[%s1946_s5 + $0x58] sm:$0xff] %v1478_v1 }
  0x13   : > { %275 = vst [vmem:[%s1946_s5 + $0x60] sm:$0xff] %v1478_v1  ;;  %276 = vst [vmem:[%s1946_s5 + $0x68] sm:$0xff] %v1478_v1 }
  0x14   : > { %277 = vst [vmem:[%s1946_s5 + $0x70] sm:$0xff] %v1478_v1  ;;  %278 = vst [vmem:[%s1946_s5 + $0x78] sm:$0xff] %v1478_v1 }
  0x15   : > { %261 = vst.msk [vmem:[#allocation2] sm:$0x3] %vm259_vm0, %v1479_v2  ;;  %262 = vst.msk [vmem:[#allocation3] sm:$0x3] %vm259_vm0, %v1479_v2 }
  0x16 PF: > { %p1273_p5 = scmp.ne.s32.totalorder %s1468_s18, 0 }
  0x18   : > { %281 = sbr.rel (%p1273_p5) target bundleno = 83 (0x53), region = 48 }
  0x1d   : > { %v282_v3 = vld [vmem:[%s1941_s0] sm:$0xff]  ;;  %v283_v4 = vld [vmem:[%s1941_s0 + $0x8] sm:$0xff]  ;;  %v284_v5 = vld [vmem:[%s1941_s0 + $0x10] sm:$0xff] }
  0x1e   : > { %v298_v6 = vunpack.c.l.bf16 %v282_v3  ;;  %v299_v7 = vunpack.c.h.bf16 %v282_v3  ;;  %v300_v8 = vunpack.c.l.bf16 %v283_v4  ;;  %v301_v9 = vunpack.c.h.bf16 %v283_v4  ;;  %v285_v10 = vld [vmem:[%s1941_s0 + $0x18] sm:$0xff]  ;;  %v286_v15 = vld [vmem:[%s1941_s0 + $0x20] sm:$0xff]  ;;  %v287_v20 = vld [vmem:[%s1941_s0 + $0x28] sm:$0xff] }
  0x1f   : > { %v302_v11 = vunpack.c.l.bf16 %v284_v5  ;;  %v303_v12 = vunpack.c.h.bf16 %v284_v5  ;;  %v304_v16 = vunpack.c.l.bf16 %v285_v10  ;;  %v305_v17 = vunpack.c.h.bf16 %v285_v10  ;;  %v288_v21 = vld [vmem:[%s1941_s0 + $0x30] sm:$0xff]  ;;  %v289_v26 = vld [vmem:[%s1941_s0 + $0x38] sm:$0xff]  ;;  %v290_v33 = vld [vmem:[%s1941_s0 + $0x40] sm:$0xff] }
  0x20   : > { %v331_v13 = vadd.f32 %v300_v8, %v298_v6  ;;  %v352_v14 = vadd.f32 %v301_v9, %v299_v7  ;;  %v306_v22 = vunpack.c.l.bf16 %v286_v15  ;;  %v307_v23 = vunpack.c.h.bf16 %v286_v15  ;;  %v291_v37 = vld [vmem:[%s1941_s0 + $0x48] sm:$0xff]  ;;  %v292_v43 = vld [vmem:[%s1941_s0 + $0x50] sm:$0xff]  ;;  %v293_v48 = vld [vmem:[%s1941_s0 + $0x58] sm:$0xff] }
  0x21   : > { %v308_v27 = vunpack.c.l.bf16 %v287_v20  ;;  %v309_v28 = vunpack.c.h.bf16 %v287_v20  ;;  %v310_v31 = vunpack.c.l.bf16 %v288_v21  ;;  %v311_v32 = vunpack.c.h.bf16 %v288_v21  ;;  %v294_v53 = vld [vmem:[%s1941_s0 + $0x60] sm:$0xff]  ;;  %v295_v58 = vld [vmem:[%s1941_s0 + $0x68] sm:$0xff]  ;;  %v296_v63 = vld [vmem:[%s1941_s0 + $0x70] sm:$0xff] }
  0x22   : > { %v332_v18 = vadd.f32 %v331_v13, %v302_v11  ;;  %v353_v19 = vadd.f32 %v352_v14, %v303_v12  ;;  %v312_v36 = vunpack.c.l.bf16 %v289_v26  ;;  %v313_v38 = vunpack.c.h.bf16 %v289_v26 }
  0x23   : > { %v314_v41 = vunpack.c.l.bf16 %v290_v33  ;;  %v315_v42 = vunpack.c.h.bf16 %v290_v33  ;;  %1434 = vmul.bf16.f32.vacc0 %v282_v3, %v282_v3  ;;  %v316_v46 = vunpack.c.l.bf16 %v291_v37 }
  0x24   : > { %v333_v24 = vadd.f32 %v332_v18, %v304_v16  ;;  %v354_v25 = vadd.f32 %v353_v19, %v305_v17  ;;  %1435 = vmac.bf16.f32.vacc0 %v283_v4, %v283_v4  ;;  %v317_v47 = vunpack.c.h.bf16 %v291_v37  ;;  %v297_v4 = vld [vmem:[%s1941_s0 + $0x78] sm:$0xff] }
  0x25   : > { %1436 = vmac.bf16.f32.vacc0 %v284_v5, %v284_v5  ;;  %v318_v51 = vunpack.c.l.bf16 %v292_v43  ;;  %v319_v52 = vunpack.c.h.bf16 %v292_v43  ;;  %v320_v56 = vunpack.c.l.bf16 %v293_v48 }
  0x26   : > { %v334_v29 = vadd.f32 %v333_v24, %v306_v22  ;;  %v355_v30 = vadd.f32 %v354_v25, %v307_v23  ;;  %1437 = vmac.bf16.f32.vacc0 %v285_v10, %v285_v10  ;;  %v321_v57 = vunpack.c.h.bf16 %v293_v48 }
  0x27   : > { %1438 = vmac.bf16.f32.vacc0 %v286_v15, %v286_v15  ;;  %v322_v61 = vunpack.c.l.bf16 %v294_v53  ;;  %v323_v62 = vunpack.c.h.bf16 %v294_v53  ;;  %v324_v2 = vunpack.c.l.bf16 %v295_v58 }
  0x28   : > { %v335_v34 = vadd.f32 %v334_v29, %v308_v27  ;;  %v356_v35 = vadd.f32 %v355_v30, %v309_v28  ;;  %1439 = vmac.bf16.f32.vacc0 %v287_v20, %v287_v20  ;;  %v325_v3 = vunpack.c.h.bf16 %v295_v58 }
  0x29   : > { %1440 = vmac.bf16.f32.vacc0 %v288_v21, %v288_v21  ;;  %v326_v7 = vunpack.c.l.bf16 %v296_v63  ;;  %v327_v8 = vunpack.c.h.bf16 %v296_v63  ;;  %v328_v11 = vunpack.c.l.bf16 %v297_v4 }
  0x2a   : > { %v336_v39 = vadd.f32 %v335_v34, %v310_v31  ;;  %v357_v40 = vadd.f32 %v356_v35, %v311_v32  ;;  %1441 = vmac.bf16.f32.vacc0 %v289_v26, %v289_v26  ;;  %v329_v12 = vunpack.c.h.bf16 %v297_v4 }
  0x2b   : > { %1442 = vmac.bf16.f32.vacc0 %v290_v33, %v290_v33  ;;  %v1480_v19 = vmov 1966171168   ;;  %v379_v22 = vlaneseq }
  0x2c   : > { %v337_v44 = vadd.f32 %v336_v39, %v312_v36  ;;  %v358_v45 = vadd.f32 %v357_v40, %v313_v38  ;;  %1443 = vmac.bf16.f32.vacc0 %v291_v37, %v291_v37  ;;  %v377_v20 = vunpack.c.l.s4 %v1480_v19 }
  0x2d   : > { %1444 = vmac.bf16.f32.vacc0 %v292_v43, %v292_v43  ;;  %v380_v27 = vshrl.u32 %v379_v22, 7  ;;  %v1481_v39 = vmov 1935823168   ;;  %vm394_vm1 = vcmp.lt.s32.totalorder %v379_v22, 256 }
  0x2e   : > { %v338_v49 = vadd.f32 %v337_v44, %v314_v41  ;;  %v359_v50 = vadd.f32 %v358_v45, %v315_v42  ;;  %1445 = vmac.bf16.f32.vacc0 %v293_v48, %v293_v48  ;;  %v378_v26 = vunpack.c.0.s8 %v377_v20 }
  0x2f   : > { %1446 = vmac.bf16.f32.vacc0 %v294_v53, %v294_v53  ;;  %v1454_v40 = vunpack.c.l.s4 %v1481_v39 }
  0x30   : > { %v339_v54 = vadd.f32 %v338_v49, %v316_v46  ;;  %v360_v55 = vadd.f32 %v359_v50, %v317_v47  ;;  %1447 = vmac.bf16.f32.vacc0 %v295_v58, %v295_v58  ;;  %v381_v34 = vsub.s32 %v378_v26, %v380_v27  ;;  %v330_v50 = vld [vmem:[#allocation2] sm:$0x3] }
  0x31   : > { %1448 = vmac.bf16.f32.vacc0 %v296_v63, %v296_v63  ;;  %v1455_v41 = vunpack.c.0.s8 %v1454_v40 }
  0x32   : > { %v340_v59 = vadd.f32 %v339_v54, %v318_v51  ;;  %v361_v60 = vadd.f32 %v360_v55, %v319_v52  ;;  %1449 = vmac.bf16.f32.vacc0 %v297_v4, %v297_v4 }
  0x33   : > { %v1458_v42 = vsub.s32 %v1455_v41, %v380_v27 }
  0x34   : > { %v341_v0 = vadd.f32 %v340_v59, %v320_v56  ;;  %v362_v1 = vadd.f32 %v361_v60, %v321_v57  ;;  %v1450_v35 = vmovacc.add.low.vacc0 }
  0x35   : > { %v1451_v36 = vmovacc.add.high.vacc0 }
  0x36   : > { %v342_v5 = vadd.f32 %v341_v0, %v322_v61  ;;  %v363_v6 = vadd.f32 %v362_v1, %v323_v62  ;;  %v397_v0 = vld [vmem:[#allocation3] sm:$0x3] }
  0x37   : > { %v1452_v37 = vcombine.low %v1450_v35, %v1451_v36  ;;  %v1453_v38 = vcombine.high %v1450_v35, %v1451_v36 }
  0x38   : > { %v343_v9 = vadd.f32 %v342_v5, %v324_v2  ;;  %v364_v10 = vadd.f32 %v363_v6, %v325_v3 }
  0x39   : > { %v1459_v43 = vrot.slane %v1452_v37, %v1458_v42  ;;  %v1465_v44 = vrot.slane %v1453_v38, %v1458_v42 }
  0x3a   : > { %v344_v13 = vadd.f32 %v343_v9, %v326_v7  ;;  %v365_v14 = vadd.f32 %v364_v10, %v327_v8 }
  0x3b   : > { %v445_v46 = vrot.slane %v1459_v43, 4  ;;  %v466_v47 = vrot.slane %v1465_v44, 4 }
  0x3c   : > { %v345_v15 = vadd.f32 %v344_v13, %v328_v11  ;;  %v366_v16 = vadd.f32 %v365_v14, %v329_v12 }
  0x3d   : > { %v446_v49 = vadd.f32 %v1459_v43, %v445_v46  ;;  %v467_v51 = vadd.f32 %v1465_v44, %v466_v47 }
  0x3e   : > { %v346_v17 = vrot.slane %v345_v15, 4  ;;  %v367_v18 = vrot.slane %v366_v16, 4 }
  0x3f   : > { %v447_v53 = vrot.slane %v446_v49, 2  ;;  %v468_v54 = vrot.slane %v467_v51, 2 }
  0x40   : > { %v347_v21 = vadd.f32 %v346_v17, %v345_v15  ;;  %v368_v23 = vadd.f32 %v367_v18, %v366_v16 }
  0x41   : > { %v448_v56 = vadd.f32 %v447_v53, %v446_v49  ;;  %v469_v57 = vadd.f32 %v468_v54, %v467_v51 }
  0x42   : > { %v348_v24 = vrot.slane %v347_v21, 2  ;;  %v369_v25 = vrot.slane %v368_v23, 2 }
  0x43   : > { %v449_v58 = vrot.slane %v448_v56, 1  ;;  %v470_v59 = vrot.slane %v469_v57, 1 }
  0x44   : > { %v349_v28 = vadd.f32 %v348_v24, %v347_v21  ;;  %v370_v29 = vadd.f32 %v369_v25, %v368_v23 }
  0x45   : > { %v450_v60 = vadd.f32 %v449_v58, %v448_v56  ;;  %v471_v61 = vadd.f32 %v470_v59, %v469_v57 }
  0x46   : > { %v350_v30 = vrot.slane %v349_v28, 1  ;;  %v371_v31 = vrot.slane %v370_v29, 1 }
  0x47   : > { %v474_v62 = vcombine.low %v450_v60, %v471_v61 }
  0x48   : > { %v351_v32 = vadd.f32 %v350_v30, %v349_v28  ;;  %v372_v33 = vadd.f32 %v371_v31, %v370_v29 }
  0x49   : > { %v481_v63 = vrot.slane %v474_v62, %v381_v34 }
  0x4a   : > { %v375_v45 = vcombine.low %v351_v32, %v372_v33 }
  0x4b   : > { %v488_v1 = vrot.slane %v481_v63, %v381_v34 }
  0x4c   : > { %v382_v48 = vrot.slane %v375_v45, %v381_v34 }
  0x4d   : > { %v490_v2 = vadd.f32 %v488_v1, %v397_v0 }
  0x4e   : > { %v389_v52 = vrot.slane %v382_v48, %v381_v34 }
  0x4f   : > { %491 = vst.msk [vmem:[#allocation3] sm:$0x3] %vm394_vm1, %v490_v2 }
  0x50   : > { %v391_v55 = vadd.f32 %v389_v52, %v330_v50 }
  0x52   : > { %396 = vst.msk [vmem:[#allocation2] sm:$0x3] %vm394_vm1, %v391_v55 }
  0x53 PF: > { %p492_p6 = scmp.eq.s32.totalorder %s1468_s18, 1 }
  0x54   : > { %v529_v3 = vld [vmem:[%s1944_s3 + $0xf8] sm:$0xff] (%p492_p6)  ;;  %v528_v5 = vld [vmem:[%s1944_s3 + $0xf0] sm:$0xff] (%p492_p6)  ;;  %v527_v7 = vld [vmem:[%s1944_s3 + $0xe8] sm:$0xff] (%p492_p6)  ;;  %v531_v21 = vlaneseq (%p492_p6)  ;;  %vm712_vm2 = vcmask (%p492_p6), 1043456   ;;  %v1482_v47 = vmov (%p492_p6), 0.0   ;;  %vm708_vm3 = vcmask (%p492_p6), 31744  }
  0x55   : > { %496 = sbr.rel (!%p492_p6) target bundleno = 547 (0x223), region = 52  ;;  %v513_v4 = vld [vmem:[%s1944_s3 + $0x78] sm:$0xff] (%p492_p6)  ;;  %1320 = vmatprep.subr.mxu0 (%p492_p6), %v529_v3  ;;  %1355 = vmatprep.subr.mxu1 (%p492_p6), %v529_v3  ;;  %v512_v6 = vld [vmem:[%s1944_s3 + $0x70] sm:$0xff] (%p492_p6)  ;;  %v511_v8 = vld [vmem:[%s1944_s3 + $0x68] sm:$0xff] (%p492_p6)  ;;  %v1483_v2 = vmov (%p492_p6), 1966171168  }
  0x56   : > { %1321 = vmatpush3.msra.mxu0 (%p492_p6), %v513_v4  ;;  %1356 = vmatpush3.msra.mxu1 (%p492_p6), %v513_v4  ;;  %v526_v9 = vld [vmem:[%s1944_s3 + $0xe0] sm:$0xff] (%p492_p6)  ;;  %v525_v11 = vld [vmem:[%s1944_s3 + $0xd8] sm:$0xff] (%p492_p6)  ;;  %v524_v13 = vld [vmem:[%s1944_s3 + $0xd0] sm:$0xff] (%p492_p6)  ;;  %v1703_v27 = vshrl.u32 (%p492_p6), %v531_v21, 7  ;;  %v792_v3 = vunpack.c.l.s4 (%p492_p6), %v1483_v2  ;;  %vm808_vm4 = vcmp.lt.s32.totalorder (%p492_p6), %v531_v21, 256 }
  0x57   : > { %1322 = vmatprep.subr.mxu0 (%p492_p6), %v528_v5  ;;  %1357 = vmatprep.subr.mxu1 (%p492_p6), %v528_v5  ;;  %v510_v10 = vld [vmem:[%s1944_s3 + $0x60] sm:$0xff] (%p492_p6)  ;;  %v509_v12 = vld [vmem:[%s1944_s3 + $0x58] sm:$0xff] (%p492_p6)  ;;  %v508_v14 = vld [vmem:[%s1944_s3 + $0x50] sm:$0xff] (%p492_p6) }
  0x58   : > { %1323 = vmatpush3.msra.mxu0 (%p492_p6), %v512_v6  ;;  %1358 = vmatpush3.msra.mxu1 (%p492_p6), %v512_v6  ;;  %v523_v15 = vld [vmem:[%s1944_s3 + $0xc8] sm:$0xff] (%p492_p6)  ;;  %v522_v17 = vld [vmem:[%s1944_s3 + $0xc0] sm:$0xff] (%p492_p6)  ;;  %v521_v19 = vld [vmem:[%s1944_s3 + $0xb8] sm:$0xff] (%p492_p6)  ;;  %v537_v32 = vsub.s32 (%p492_p6), 1, %v1703_v27  ;;  %v533_v36 = vsub.s32 (%p492_p6), 0, %v1703_v27  ;;  %v793_v4 = vunpack.c.0.s8 (%p492_p6), %v792_v3 }
  0x59   : > { %1324 = vmatprep.subr.mxu0 (%p492_p6), %v527_v7  ;;  %1359 = vmatprep.subr.mxu1 (%p492_p6), %v527_v7  ;;  %v507_v16 = vld [vmem:[%s1944_s3 + $0x48] sm:$0xff] (%p492_p6)  ;;  %v506_v18 = vld [vmem:[%s1944_s3 + $0x40] sm:$0xff] (%p492_p6)  ;;  %v505_v20 = vld [vmem:[%s1944_s3 + $0x38] sm:$0xff] (%p492_p6) }
  0x5a   : > { %1325 = vmatpush3.msra.mxu0 %v511_v8  ;;  %1360 = vmatpush3.msra.mxu1 %v511_v8  ;;  %v520_v22 = vld [vmem:[%s1944_s3 + $0xb0] sm:$0xff]  ;;  %v519_v24 = vld [vmem:[%s1944_s3 + $0xa8] sm:$0xff]  ;;  %v518_v26 = vld [vmem:[%s1944_s3 + $0xa0] sm:$0xff]  ;;  %v796_v6 = vsub.s32 %v793_v4, %v1703_v27 }
  0x5b   : > { %1326 = vmatprep.subr.mxu0 %v526_v9  ;;  %1361 = vmatprep.subr.mxu1 %v526_v9  ;;  %v504_v23 = vld [vmem:[%s1944_s3 + $0x30] sm:$0xff]  ;;  %v503_v25 = vld [vmem:[%s1944_s3 + $0x28] sm:$0xff]  ;;  %v502_v28 = vld [vmem:[%s1944_s3 + $0x20] sm:$0xff] }
  0x5c   : > { %1327 = vmatpush3.msra.mxu0 %v510_v10  ;;  %1362 = vmatpush3.msra.mxu1 %v510_v10  ;;  %v517_v29 = vld [vmem:[%s1944_s3 + $0x98] sm:$0xff]  ;;  %v516_v31 = vld [vmem:[%s1944_s3 + $0x90] sm:$0xff]  ;;  %v497_v34 = vld [vmem:[#allocation2] sm:$0x3] }
  0x5d   : > { %1328 = vmatprep.subr.mxu0 %v525_v11  ;;  %1363 = vmatprep.subr.mxu1 %v525_v11  ;;  %v501_v30 = vld [vmem:[%s1944_s3 + $0x18] sm:$0xff]  ;;  %v500_v33 = vld [vmem:[%s1944_s3 + $0x10] sm:$0xff]  ;;  %v515_v35 = vld [vmem:[%s1944_s3 + $0x88] sm:$0xff]  ;;  %v538_v40 = vrot.slane %v497_v34, %v537_v32  ;;  %v534_v43 = vrot.slane %v497_v34, %v533_v36 }
  0x5e   : > { %1329 = vmatpush3.msra.mxu0 %v509_v12  ;;  %1364 = vmatpush3.msra.mxu1 %v509_v12  ;;  %v611_v37 = vld [vmem:[#allocation3] sm:$0x3]  ;;  %v499_v38 = vld [vmem:[%s1944_s3 + $0x8] sm:$0xff]  ;;  %v698_v60 = vld [vmem:[%s1942_s1] sm:$0x1] }
  0x5f   : > { %1330 = vmatprep.subr.mxu0 %v524_v13  ;;  %1365 = vmatprep.subr.mxu1 %v524_v13  ;;  %v514_v39 = vld [vmem:[%s1944_s3 + $0x80] sm:$0xff]  ;;  %v620_v42 = vrot.slane %v611_v37, %v537_v32  ;;  %v616_v44 = vrot.slane %v611_v37, %v533_v36 }
  0x60   : > { %1331 = vmatpush3.msra.mxu0 %v508_v14  ;;  %1366 = vmatpush3.msra.mxu1 %v508_v14  ;;  %v498_v41 = vld [vmem:[%s1944_s3] sm:$0xff] }
  0x61   : > { %1332 = vmatprep.subr.mxu0 %v523_v15  ;;  %1367 = vmatprep.subr.mxu1 %v523_v15  ;;  %v705_v45 = vld [vmem:[%s1945_s4] sm:$0xff] }
  0x62   : > { %1333 = vmatpush3.msra.mxu0 %v507_v16  ;;  %1368 = vmatpush3.msra.mxu1 %v507_v16  ;;  %v707_v46 = vcombine.high %v705_v45, %v705_v45  ;;  %v702_v63 = vld [vmem:[%s1943_s2] sm:$0x1] }
  0x63   : > { %1334 = vmatprep.subr.mxu0 %v522_v17  ;;  %1369 = vmatprep.subr.mxu1 %v522_v17 }
  0x64   : > { %1335 = vmatpush3.msra.mxu0 %v506_v18  ;;  %1370 = vmatpush3.msra.mxu1 %v506_v18 }
  0x65   : > { %1336 = vmatprep.subr.mxu0 %v521_v19  ;;  %1371 = vmatprep.subr.mxu1 %v521_v19 }
  0x66   : > { %1337 = vmatpush3.msra.mxu0 %v505_v20  ;;  %1372 = vmatpush3.msra.mxu1 %v505_v20 }
  0x67   : > { %1338 = vmatprep.subr.mxu0 %v520_v22  ;;  %1373 = vmatprep.subr.mxu1 %v520_v22 }
  0x68   : > { %1339 = vmatpush3.msra.mxu0 %v504_v23  ;;  %1374 = vmatpush3.msra.mxu1 %v504_v23 }
  0x69   : > { %1340 = vmatprep.subr.mxu0 %v519_v24  ;;  %1375 = vmatprep.subr.mxu1 %v519_v24 }
  0x6a   : > { %1341 = vmatpush3.msra.mxu0 %v503_v25  ;;  %1376 = vmatpush3.msra.mxu1 %v503_v25 }
  0x6b   : > { %1342 = vmatprep.subr.mxu0 %v518_v26  ;;  %1377 = vmatprep.subr.mxu1 %v518_v26 }
  0x6c   : > { %1343 = vmatpush3.msra.mxu0 %v502_v28  ;;  %1378 = vmatpush3.msra.mxu1 %v502_v28 }
  0x6d   : > { %1344 = vmatprep.subr.mxu0 %v517_v29  ;;  %1379 = vmatprep.subr.mxu1 %v517_v29 }
  0x6e   : > { %1345 = vmatpush3.msra.mxu0 %v501_v30  ;;  %1380 = vmatpush3.msra.mxu1 %v501_v30 }
  0x6f   : > { %1346 = vmatprep.subr.mxu0 %v516_v31  ;;  %1381 = vmatprep.subr.mxu1 %v516_v31 }
  0x70   : > { %1347 = vmatpush3.msra.mxu0 %v500_v33  ;;  %1382 = vmatpush3.msra.mxu1 %v500_v33 }
  0x71   : > { %1348 = vmatprep.subr.mxu0 %v515_v35  ;;  %1383 = vmatprep.subr.mxu1 %v515_v35 }
  0x72   : > { %1349 = vmatpush3.msra.mxu0 %v499_v38  ;;  %1384 = vmatpush3.msra.mxu1 %v499_v38 }
  0x73   : > { %1350 = vmatprep.subr.mxu0 %v514_v39  ;;  %1385 = vmatprep.subr.mxu1 %v514_v39 }
  0x74   : > { %1351 = vmatpush3.msra.mxu0 %v498_v41  ;;  %605 = vmatprep.mubr.f32.mxu0 %v538_v40 }
  0x75   : > { %1386 = vmatpush3.msra.mxu1 %v498_v41  ;;  %687 = vmatprep.mubr.f32.mxu1 %v620_v42 }
  0x76   : > { %606 = vmatmul.mubr.f32.vlgmr.msra.gmra.mxu0 %v534_v43  ;;  %688 = vmatmul.mubr.f32.vlgmr.msra.gmra.mxu1 %v616_v44 }
  0x77   : > { %781 = vmatprep.mubr.f32.mxu0 %v1482_v47  ;;  %885 = vmatprep.mubr.f32.mxu1 %v1482_v47 }
  0x78   : > { %1275 = vmatprep.subr.msk.mxu0 %vm712_vm2, %v707_v46  ;;  %1278 = vmatprep.subr.msk.mxu1 %vm712_vm2, %v707_v46 }
  0x79   : > { %1276 = vmatpush1.msk.msra.mxu0 %vm712_vm2, %v705_v45  ;;  %1279 = vmatpush1.msk.msra.mxu1 %vm712_vm2, %v705_v45 }
 0x136   : > { %v1352_v48 = vpop.f32.mrf.mxu0  ;;  %v1387_v49 = vpop.f32.mrf.mxu1 }
 0x138   : > { %v1353_v50 = vpop.f32.mrf.mxu0  ;;  %v1388_v51 = vpop.f32.mrf.mxu1 }
 0x139   : > { %v1354_v52 = vadd.f32 %v1353_v50, %v1352_v48  ;;  %v1389_v53 = vadd.f32 %v1388_v51, %v1387_v49 }
 0x13b   : > { %v693_v54 = vmul.f32 0.00012207031, %v1354_v52  ;;  %v694_v56 = vmul.f32 0.00012207031, %v1389_v53 }
 0x13d   : > { %v695_v55 = vmul.f32 %v693_v54, %v693_v54 }
 0x13f   : > { %v696_v57 = vsub.f32 %v694_v56, %v695_v55 }
 0x141   : > { %v697_v58 = vmax.f32 %v696_v57, 0.0 }
 0x143   : > { %v699_v59 = vadd.f32 1e-05, %v697_v58 }
 0x145   : > { %1420 = vrsqrt.f32 %v699_v59 }
 0x152   : > { %v1421_v61 = vpop.eup %1420 }
 0x153   : > { %v701_v62 = vmul.f32 %v1421_v61, %v698_v60 }
 0x155   : > { %1277 = vmatmul.mubr.msk.f32.vlgmr.msra.gmra.mxu0 %vm708_vm3, %v701_v62  ;;  %v703_v0 = vmul.f32 %v701_v62, %v693_v54 }
 0x157   : > { %v704_v1 = vsub.f32 %v702_v63, %v703_v0 }
 0x159   : > { %1280 = vmatmul.mubr.msk.f32.vlgmr.msra.gmra.mxu1 %vm708_vm3, %v704_v1 }
 0x215   : > { %v783_v5 = vpop.f32.mrf.mxu0 }
 0x217   : > { %v785_v7 = vpop.f32.mrf.mxu0 }
 0x218   : > { %v790_v8 = vcombine.low %v783_v5, %v785_v7 }
 0x219   : > { %v887_v9 = vpop.f32.mrf.mxu1 }
 0x21a   : > { %v797_v10 = vrot.slane %v790_v8, %v796_v6 }
 0x21b   : > { %v889_v11 = vpop.f32.mrf.mxu1 }
 0x21c   : > { %v804_v12 = vrot.slane %v797_v10, %v796_v6  ;;  %v894_v13 = vcombine.low %v887_v9, %v889_v11 }
 0x21e   : > { %810 = vst.msk [vmem:[#allocation4] sm:$0x3] %vm808_vm4, %v804_v12  ;;  %v901_v14 = vrot.slane %v894_v13, %v796_v6 }
 0x220   : > { %v908_v15 = vrot.slane %v901_v14, %v796_v6 }
 0x222   : > { %910 = vst.msk [vmem:[#allocation5] sm:$0x3] %vm808_vm4, %v908_v15 }
 0x223 PF: > { %p1281_p7 = scmp.ne.s32.totalorder %s1468_s18, 1 }
 0x225   : > { %913 = sbr.rel (%p1281_p7) target bundleno = 599 (0x257), region = 56 }
 0x22a   : > { %v914_v16 = vld [vmem:[%s1941_s0] sm:$0xff]  ;;  %v964_v17 = vlaneseq  ;;  %v915_v20 = vld [vmem:[%s1941_s0 + $0x8] sm:$0xff]  ;;  %v916_v22 = vld [vmem:[%s1941_s0 + $0x10] sm:$0xff] }
 0x22b   : > { %v930_v18 = vunpack.c.l.bf16 %v914_v16  ;;  %v931_v19 = vunpack.c.h.bf16 %v914_v16  ;;  %v917_v21 = vld [vmem:[%s1941_s0 + $0x18] sm:$0xff]  ;;  %v932_v24 = vunpack.c.l.bf16 %v915_v20  ;;  %v933_v25 = vunpack.c.h.bf16 %v915_v20  ;;  %v918_v27 = vld [vmem:[%s1941_s0 + $0x20] sm:$0xff]  ;;  %v919_v28 = vld [vmem:[%s1941_s0 + $0x28] sm:$0xff] }
 0x22c   : > { %v965_v23 = vshrl.u32 %v964_v17, 7  ;;  %v934_v26 = vunpack.c.l.bf16 %v916_v22  ;;  %v1767_v29 = vld [vmem:[%s1941_s0 + $0x30] sm:$0xff]  ;;  %v962_v30 = vld [vmem:[#allocation4] sm:$0x3]  ;;  %v1006_v31 = vld [vmem:[#allocation5] sm:$0x3]  ;;  %v935_v32 = vunpack.c.h.bf16 %v916_v22  ;;  %v936_v33 = vunpack.c.l.bf16 %v917_v21 }
 0x22d   : > { %v937_v34 = vunpack.c.h.bf16 %v917_v21  ;;  %v938_v35 = vunpack.c.l.bf16 %v918_v27  ;;  %v1772_v36 = vld [vmem:[%s1941_s0 + $0x38] sm:$0xff]  ;;  %v939_v39 = vunpack.c.h.bf16 %v918_v27  ;;  %v940_v40 = vunpack.c.l.bf16 %v919_v28  ;;  %v1777_v41 = vld [vmem:[%s1941_s0 + $0x40] sm:$0xff]  ;;  %v1782_v42 = vld [vmem:[%s1941_s0 + $0x48] sm:$0xff] }
 0x22e   : > { %v966_v37 = vsub.s32 0, %v965_v23  ;;  %v970_v38 = vsub.s32 1, %v965_v23  ;;  %v941_v43 = vunpack.c.h.bf16 %v919_v28  ;;  %v942_v44 = vunpack.c.l.bf16 %v1767_v29 }
 0x22f   : > { %v943_v45 = vunpack.c.h.bf16 %v1767_v29  ;;  %v944_v46 = vunpack.c.l.bf16 %v1772_v36  ;;  %v945_v51 = vunpack.c.h.bf16 %v1772_v36  ;;  %v946_v52 = vunpack.c.l.bf16 %v1777_v41 }
 0x230   : > { %v1787_v47 = vrot.slane %v962_v30, %v966_v37  ;;  %v1789_v48 = vrot.slane %v962_v30, %v970_v38  ;;  %v1791_v49 = vrot.slane %v1006_v31, %v966_v37  ;;  %v1793_v50 = vrot.slane %v1006_v31, %v970_v38 }
 0x231   : > { %v947_v53 = vunpack.c.h.bf16 %v1777_v41  ;;  %v948_v54 = vunpack.c.l.bf16 %v1782_v42 }
 0x232   : > { %v974_v55 = vmul.f32 %v1787_v47, %v930_v18  ;;  %v975_v56 = vmul.f32 %v1789_v48, %v931_v19  ;;  %v976_v57 = vmul.f32 %v1787_v47, %v932_v24  ;;  %v977_v58 = vmul.f32 %v1789_v48, %v933_v25 }
 0x233   : > { %v978_v59 = vmul.f32 %v1787_v47, %v934_v26  ;;  %v979_v60 = vmul.f32 %v1789_v48, %v935_v32  ;;  %v980_v61 = vmul.f32 %v1787_v47, %v936_v33  ;;  %v981_v62 = vmul.f32 %v1789_v48, %v937_v34 }
 0x234   : > { %v1018_v63 = vadd.f32 %v1791_v49, %v974_v55  ;;  %v1019_v0 = vadd.f32 %v1793_v50, %v975_v56  ;;  %v1020_v1 = vadd.f32 %v1791_v49, %v976_v57  ;;  %v1021_v2 = vadd.f32 %v1793_v50, %v977_v58  ;;  %v925_v56 = vld [vmem:[%s1941_s0 + $0x58] sm:$0xff] }
 0x235   : > { %v1022_v3 = vadd.f32 %v1791_v49, %v978_v59  ;;  %v1023_v4 = vadd.f32 %v1793_v50, %v979_v60  ;;  %v1024_v5 = vadd.f32 %v1791_v49, %v980_v61  ;;  %v1025_v6 = vadd.f32 %v1793_v50, %v981_v62 }
 0x236   : > { %v1050_v7 = vmax.f32 %v1018_v63, 0.0  ;;  %v1051_v8 = vmax.f32 %v1019_v0, 0.0  ;;  %v1052_v9 = vmax.f32 %v1020_v1, 0.0  ;;  %v1053_v10 = vmax.f32 %v1021_v2, 0.0  ;;  %v926_v63 = vld [vmem:[%s1941_s0 + $0x60] sm:$0xff] }
 0x237   : > { %v1054_v11 = vmax.f32 %v1022_v3, 0.0  ;;  %v1055_v12 = vmax.f32 %v1023_v4, 0.0  ;;  %v1056_v13 = vmax.f32 %v1024_v5, 0.0  ;;  %v1057_v14 = vmax.f32 %v1025_v6, 0.0 }
 0x238   : > { %v1304_v15 = vpack.c.bf16 %v1051_v8, %v1050_v7  ;;  %v1305_v16 = vpack.c.bf16 %v1053_v10, %v1052_v9  ;;  %v982_v17 = vmul.f32 %v1787_v47, %v938_v35  ;;  %v983_v18 = vmul.f32 %v1789_v48, %v939_v39  ;;  %v927_v10 = vld [vmem:[%s1941_s0 + $0x68] sm:$0xff] }
 0x239   : > { %v1306_v19 = vpack.c.bf16 %v1055_v12, %v1054_v11  ;;  %v1307_v20 = vpack.c.bf16 %v1057_v14, %v1056_v13  ;;  %v984_v22 = vmul.f32 %v1787_v47, %v940_v40  ;;  %v985_v21 = vmul.f32 %v1789_v48, %v941_v43 }
 0x23a   : > { %1178 = vst [vmem:[%s1946_s5] sm:$0xff] %v1304_v15  ;;  %1179 = vst [vmem:[%s1946_s5 + $0x8] sm:$0xff] %v1305_v16  ;;  %v1026_v23 = vadd.f32 %v1791_v49, %v982_v17  ;;  %v1027_v24 = vadd.f32 %v1793_v50, %v983_v18  ;;  %v986_v25 = vmul.f32 %v1787_v47, %v942_v44  ;;  %v924_v44 = vld [vmem:[%s1941_s0 + $0x50] sm:$0xff]  ;;  %v949_v58 = vunpack.c.h.bf16 %v1782_v42 }
 0x23b   : > { %v987_v26 = vmul.f32 %v1789_v48, %v943_v45  ;;  %1180 = vst [vmem:[%s1946_s5 + $0x10] sm:$0xff] %v1306_v19  ;;  %1181 = vst [vmem:[%s1946_s5 + $0x18] sm:$0xff] %v1307_v20  ;;  %v1028_v27 = vadd.f32 %v1791_v49, %v984_v22  ;;  %v1029_v28 = vadd.f32 %v1793_v50, %v985_v21  ;;  %v950_v61 = vunpack.c.l.bf16 %v924_v44 }
 0x23c   : > { %v988_v29 = vmul.f32 %v1787_v47, %v944_v46  ;;  %v989_v30 = vmul.f32 %v1789_v48, %v945_v51  ;;  %v1058_v31 = vmax.f32 %v1026_v23, 0.0  ;;  %v1059_v32 = vmax.f32 %v1027_v24, 0.0  ;;  %v928_v23 = vld [vmem:[%s1941_s0 + $0x70] sm:$0xff] }
 0x23d   : > { %v1030_v33 = vadd.f32 %v1791_v49, %v986_v25  ;;  %v1031_v34 = vadd.f32 %v1793_v50, %v987_v26  ;;  %v1060_v35 = vmax.f32 %v1028_v27, 0.0  ;;  %v1061_v36 = vmax.f32 %v1029_v28, 0.0  ;;  %v929_v28 = vld [vmem:[%s1941_s0 + $0x78] sm:$0xff] }
 0x23e   : > { %v1032_v37 = vadd.f32 %v1791_v49, %v988_v29  ;;  %v1033_v38 = vadd.f32 %v1793_v50, %v989_v30  ;;  %v1308_v39 = vpack.c.bf16 %v1059_v32, %v1058_v31  ;;  %v990_v43 = vmul.f32 %v1787_v47, %v946_v52 }
 0x23f   : > { %v1062_v40 = vmax.f32 %v1030_v33, 0.0  ;;  %v1063_v41 = vmax.f32 %v1031_v34, 0.0  ;;  %v1309_v45 = vpack.c.bf16 %v1061_v36, %v1060_v35  ;;  %v991_v55 = vmul.f32 %v1789_v48, %v947_v53 }
 0x240   : > { %v1064_v46 = vmax.f32 %v1032_v37, 0.0  ;;  %v1065_v51 = vmax.f32 %v1033_v38, 0.0  ;;  %1182 = vst [vmem:[%s1946_s5 + $0x20] sm:$0xff] %v1308_v39  ;;  %v1034_v52 = vadd.f32 %v1791_v49, %v990_v43  ;;  %v992_v59 = vmul.f32 %v1787_v47, %v948_v54 }
 0x241   : > { %v1310_v57 = vpack.c.bf16 %v1063_v41, %v1062_v40  ;;  %1183 = vst [vmem:[%s1946_s5 + $0x28] sm:$0xff] %v1309_v45  ;;  %v1035_v60 = vadd.f32 %v1793_v50, %v991_v55  ;;  %v951_v62 = vunpack.c.h.bf16 %v924_v44  ;;  %v993_v54 = vmul.f32 %v1789_v48, %v949_v58 }
 0x242   : > { %v1311_v53 = vpack.c.bf16 %v1065_v51, %v1064_v46  ;;  %v1066_v42 = vmax.f32 %v1034_v52, 0.0  ;;  %v1036_v0 = vadd.f32 %v1791_v49, %v992_v59  ;;  %v952_v1 = vunpack.c.l.bf16 %v925_v56 }
 0x243   : > { %1184 = vst [vmem:[%s1946_s5 + $0x30] sm:$0xff] %v1310_v57  ;;  %v1067_v2 = vmax.f32 %v1035_v60, 0.0  ;;  %v994_v3 = vmul.f32 %v1787_v47, %v950_v61  ;;  %v995_v4 = vmul.f32 %v1789_v48, %v951_v62  ;;  %v953_v5 = vunpack.c.h.bf16 %v925_v56 }
 0x244   : > { %1185 = vst [vmem:[%s1946_s5 + $0x38] sm:$0xff] %v1311_v53  ;;  %v1037_v6 = vadd.f32 %v1793_v50, %v993_v54  ;;  %v1068_v7 = vmax.f32 %v1036_v0, 0.0  ;;  %v996_v8 = vmul.f32 %v1787_v47, %v952_v1  ;;  %v954_v9 = vunpack.c.l.bf16 %v926_v63 }
 0x245   : > { %v1312_v11 = vpack.c.bf16 %v1067_v2, %v1066_v42  ;;  %v1038_v12 = vadd.f32 %v1791_v49, %v994_v3  ;;  %v1039_v13 = vadd.f32 %v1793_v50, %v995_v4  ;;  %v997_v14 = vmul.f32 %v1789_v48, %v953_v5 }
 0x246   : > { %v1069_v15 = vmax.f32 %v1037_v6, 0.0  ;;  %v1040_v16 = vadd.f32 %v1791_v49, %v996_v8  ;;  %v955_v17 = vunpack.c.h.bf16 %v926_v63  ;;  %v998_v18 = vmul.f32 %v1787_v47, %v954_v9 }
 0x247   : > { %1186 = vst [vmem:[%s1946_s5 + $0x40] sm:$0xff] %v1312_v11  ;;  %v1070_v19 = vmax.f32 %v1038_v12, 0.0  ;;  %v1071_v20 = vmax.f32 %v1039_v13, 0.0  ;;  %v1041_v22 = vadd.f32 %v1793_v50, %v997_v14  ;;  %v956_v21 = vunpack.c.l.bf16 %v927_v10 }
 0x248   : > { %v1313_v24 = vpack.c.bf16 %v1069_v15, %v1068_v7  ;;  %v1072_v25 = vmax.f32 %v1040_v16, 0.0  ;;  %v999_v26 = vmul.f32 %v1789_v48, %v955_v17  ;;  %v1042_v27 = vadd.f32 %v1791_v49, %v998_v18 }
 0x249   : > { %v1314_v29 = vpack.c.bf16 %v1071_v20, %v1070_v19  ;;  %v1073_v30 = vmax.f32 %v1041_v22, 0.0  ;;  %v957_v31 = vunpack.c.h.bf16 %v927_v10  ;;  %v1000_v32 = vmul.f32 %v1787_v47, %v956_v21 }
 0x24a   : > { %1187 = vst [vmem:[%s1946_s5 + $0x48] sm:$0xff] %v1313_v24  ;;  %v1043_v33 = vadd.f32 %v1793_v50, %v999_v26  ;;  %v1074_v34 = vmax.f32 %v1042_v27, 0.0  ;;  %v958_v35 = vunpack.c.l.bf16 %v928_v23  ;;  %v959_v36 = vunpack.c.h.bf16 %v928_v23 }
 0x24b   : > { %1188 = vst [vmem:[%s1946_s5 + $0x50] sm:$0xff] %v1314_v29  ;;  %v1315_v37 = vpack.c.bf16 %v1073_v30, %v1072_v25  ;;  %v1001_v38 = vmul.f32 %v1789_v48, %v957_v31  ;;  %v1044_v39 = vadd.f32 %v1791_v49, %v1000_v32  ;;  %v960_v40 = vunpack.c.l.bf16 %v929_v28 }
 0x24c   : > { %v1075_v41 = vmax.f32 %v1043_v33, 0.0  ;;  %v1002_v43 = vmul.f32 %v1787_v47, %v958_v35  ;;  %v1003_v44 = vmul.f32 %v1789_v48, %v959_v36  ;;  %v961_v45 = vunpack.c.h.bf16 %v929_v28 }
 0x24d   : > { %1189 = vst [vmem:[%s1946_s5 + $0x58] sm:$0xff] %v1315_v37  ;;  %v1045_v46 = vadd.f32 %v1793_v50, %v1001_v38  ;;  %v1076_v51 = vmax.f32 %v1044_v39, 0.0  ;;  %v1004_v55 = vmul.f32 %v1787_v47, %v960_v40 }
 0x24e   : > { %v1316_v56 = vpack.c.bf16 %v1075_v41, %v1074_v34  ;;  %v1046_v57 = vadd.f32 %v1791_v49, %v1002_v43  ;;  %v1047_v52 = vadd.f32 %v1793_v50, %v1003_v44  ;;  %v1005_v58 = vmul.f32 %v1789_v48, %v961_v45 }
 0x24f   : > { %v1077_v59 = vmax.f32 %v1045_v46, 0.0  ;;  %v1048_v53 = vadd.f32 %v1791_v49, %v1004_v55 }
 0x250   : > { %1190 = vst [vmem:[%s1946_s5 + $0x60] sm:$0xff] %v1316_v56  ;;  %v1078_v60 = vmax.f32 %v1046_v57, 0.0  ;;  %v1079_v61 = vmax.f32 %v1047_v52, 0.0  ;;  %v1049_v62 = vadd.f32 %v1793_v50, %v1005_v58 }
 0x251   : > { %v1317_v63 = vpack.c.bf16 %v1077_v59, %v1076_v51  ;;  %v1080_v47 = vmax.f32 %v1048_v53, 0.0 }
 0x252   : > { %v1318_v42 = vpack.c.bf16 %v1079_v61, %v1078_v60  ;;  %v1081_v54 = vmax.f32 %v1049_v62, 0.0 }
 0x253   : > { %1191 = vst [vmem:[%s1946_s5 + $0x68] sm:$0xff] %v1317_v63 }
 0x254   : > { %1192 = vst [vmem:[%s1946_s5 + $0x70] sm:$0xff] %v1318_v42  ;;  %v1319_v48 = vpack.c.bf16 %v1081_v54, %v1080_v47 }
 0x256   : > { %1193 = vst [vmem:[%s1946_s5 + $0x78] sm:$0xff] %v1319_v48 }
 0x257 PF: > { %s15_s20 = sadd.s32 1, %s1476_s20   ;;  %s1947_s18 = smov %s1472_s19 }
 0x258   : > { %p12_p8 = scmp.ge.s32.totalorder %s15_s20, 4   ;;  %s1948_s19 = smov %s1950_s21 }
 0x25a   :  { %14 = sbr.rel (!%p12_p8) target bundleno = 2 (0x2), region = 86 }

// kernel: dcgan_forward.22
= control target key start
LH: loop header
LB: loop body
LE: loop exit
PB: predicated region body
PF: predicated region fallthrough
CT: control target
= control target key end

     0   :  { %s1803_s9 = smov 0   ;;  %s1805_s10 = smov 0   ;;  %s1946_s0 = inlined_call_operand.vmem [shape: bf16[8192,4], index: 0, kind: input, shape index: {}]   ;;  %s1947_s1 = inlined_call_operand.vmem [shape: bf16[4,128], index: 1, kind: input, shape index: {}]   ;;  %s1948_s2 = inlined_call_operand.vmem [shape: bf16[8192,128], index: 2, kind: output, shape index: {}]  }
   0x1   :  { %s1807_s11 = smov 0  }
   0x2 LB: > { %s24_s12 = sadd.s32 1, %s1782_s10  ;;  %p1215_p0 = scmp.ge.s32.totalorder %s1786_s11, 1  ;;  %s1786_s11 = sphi %s1807_s11, %s12_s11   ;;  %s1782_s10 = sphi %s1805_s10, %s1950_s10   ;;  %s1778_s9 = sphi %s1803_s9, %s1949_s9  }
   0x3   : > { %p26_p1 = scmp.ge.s32.totalorder %s24_s12, 16  ;;  %p136_p2 = scmp.lt.s32.totalorder %s1786_s11, 17 }
   0x5   : > { %s1952_s12 = smov (%p26_p1, %s24_s12), 0  ;;  %p137_p3 = pnand %p1215_p0, %p136_p2 }
   0x6   : > { %s1216_s15 = sshll.u32 (!%p137_p3), %s1778_s9, 6 }
   0x7   : > { %140 = sbr.rel (%p137_p3) target bundleno = 276 (0x114), region = 28  ;;  %p166_p4 = scmp.lt.s32.totalorder (!%p137_p3), %s1216_s15, 1023 }
   0xc   : > { %v249_v0 = vld [vmem:[%s1947_s1] sm:$0x3]  ;;  %vm507_vm0 = vcmask 1041408   ;;  %s1954_s15 = smov (!%p166_p4, %s1216_s15), 1023  ;;  %vm410_vm1 = vcmask 31744  }
   0xd   : > { %1706 = vmatprep.subr.msk.bf16.mxu0 %vm507_vm0, %v249_v0  ;;  %1707 = vmatprep.subr.msk.bf16.mxu1 %vm507_vm0, %v249_v0  ;;  %v509_v1 = vsel %vm507_vm0, %v249_v0, 0  ;;  %s1217_s16 = sshll.u32 %s1954_s15, 2 }
   0xe   : > { %1639 = vmatpush3.bf16.msra.mxu0 %v509_v1  ;;  %1705 = vmatpush3.bf16.msra.mxu1 %v509_v1  ;;  %s1832_s19 = scalar_lea.vmem %s1946_s0, %s1217_s16  ;;  %s1903_s22 = scalar_lea.vmem %s1948_s2, %s1217_s16 }
   0xf   : > { %v1732_v2 = vld [vmem:[%s1832_s19] sm:$0xff]   ;;  %v1734_v4 = vld [vmem:[%s1832_s19 + $0x8] sm:$0xff]   ;;  %v1736_v6 = vld [vmem:[%s1832_s19 + $0x10] sm:$0xff]  }
  0x10   : > { %v1733_v3 = vld [vmem:[%s1832_s19 + $0x80] sm:$0xff]   ;;  %1640 = vmatprep.mubr.msk.bf16.mxu0 %vm410_vm1, %v1732_v2  ;;  %v1735_v5 = vld [vmem:[%s1832_s19 + $0x88] sm:$0xff]   ;;  %v1737_v7 = vld [vmem:[%s1832_s19 + $0x90] sm:$0xff]  }
  0x11   : > { %1672 = vmatprep.mubr.msk.bf16.mxu1 %vm410_vm1, %v1733_v3  ;;  %1641 = vmatmul.mubr.msk.bf16.vlgmr.msra.gmra.mxu0 %vm410_vm1, %v1734_v4  ;;  %v1738_v8 = vld [vmem:[%s1832_s19 + $0x18] sm:$0xff]   ;;  %v1740_v10 = vld [vmem:[%s1832_s19 + $0x20] sm:$0xff]   ;;  %v1742_v12 = vld [vmem:[%s1832_s19 + $0x28] sm:$0xff]  }
  0x12   : > { %1673 = vmatmul.mubr.msk.bf16.vlgmr.msra.gmra.mxu1 %vm410_vm1, %v1735_v5  ;;  %1644 = vmatprep.mubr.msk.bf16.mxu0 %vm410_vm1, %v1736_v6  ;;  %v1739_v9 = vld [vmem:[%s1832_s19 + $0x98] sm:$0xff]   ;;  %v1741_v11 = vld [vmem:[%s1832_s19 + $0xa0] sm:$0xff]   ;;  %v1743_v13 = vld [vmem:[%s1832_s19 + $0xa8] sm:$0xff]  }
  0x13   : > { %1676 = vmatprep.mubr.msk.bf16.mxu1 %vm410_vm1, %v1737_v7  ;;  %v1744_v14 = vld [vmem:[%s1832_s19 + $0x30] sm:$0xff]   ;;  %v1746_v16 = vld [vmem:[%s1832_s19 + $0x38] sm:$0xff]   ;;  %v1748_v18 = vld [vmem:[%s1832_s19 + $0x40] sm:$0xff]  }
  0x14   : > { %v1745_v15 = vld [vmem:[%s1832_s19 + $0xb0] sm:$0xff]   ;;  %v1747_v17 = vld [vmem:[%s1832_s19 + $0xb8] sm:$0xff]   ;;  %v1749_v19 = vld [vmem:[%s1832_s19 + $0xc0] sm:$0xff]  }
  0x15   : > { %v1750_v20 = vld [vmem:[%s1832_s19 + $0x48] sm:$0xff]   ;;  %v1752_v22 = vld [vmem:[%s1832_s19 + $0x50] sm:$0xff]   ;;  %v1754_v24 = vld [vmem:[%s1832_s19 + $0x58] sm:$0xff]  }
  0x16   : > { %v1751_v21 = vld [vmem:[%s1832_s19 + $0xc8] sm:$0xff]   ;;  %v1753_v23 = vld [vmem:[%s1832_s19 + $0xd0] sm:$0xff]   ;;  %v1755_v25 = vld [vmem:[%s1832_s19 + $0xd8] sm:$0xff]  }
  0x17   : > { %v1756_v26 = vld [vmem:[%s1832_s19 + $0x60] sm:$0xff]   ;;  %v1758_v28 = vld [vmem:[%s1832_s19 + $0x68] sm:$0xff]   ;;  %v1760_v30 = vld [vmem:[%s1832_s19 + $0x70] sm:$0xff]  }
  0x18   : > { %v1757_v27 = vld [vmem:[%s1832_s19 + $0xe0] sm:$0xff]   ;;  %v1759_v29 = vld [vmem:[%s1832_s19 + $0xe8] sm:$0xff]   ;;  %v1761_v31 = vld [vmem:[%s1832_s19 + $0xf0] sm:$0xff]  }
  0x19   : > { %1645 = vmatmul.mubr.msk.bf16.gmra.mxu0 %vm410_vm1, %v1738_v8  ;;  %v1762_v32 = vld [vmem:[%s1832_s19 + $0x78] sm:$0xff]  }
  0x1a   : > { %1677 = vmatmul.mubr.msk.bf16.gmra.mxu1 %vm410_vm1, %v1739_v9  ;;  %1648 = vmatprep.mubr.msk.bf16.mxu0 %vm410_vm1, %v1740_v10  ;;  %v1763_v33 = vld [vmem:[%s1832_s19 + $0xf8] sm:$0xff]  }
  0x1b   : > { %1680 = vmatprep.mubr.msk.bf16.mxu1 %vm410_vm1, %v1741_v11 }
  0x21   : > { %1649 = vmatmul.mubr.msk.bf16.gmra.mxu0 %vm410_vm1, %v1742_v12 }
  0x22   : > { %1681 = vmatmul.mubr.msk.bf16.gmra.mxu1 %vm410_vm1, %v1743_v13  ;;  %1652 = vmatprep.mubr.msk.bf16.mxu0 %vm410_vm1, %v1744_v14 }
  0x23   : > { %1684 = vmatprep.mubr.msk.bf16.mxu1 %vm410_vm1, %v1745_v15 }
  0x29   : > { %1653 = vmatmul.mubr.msk.bf16.gmra.mxu0 %vm410_vm1, %v1746_v16 }
  0x2a   : > { %1685 = vmatmul.mubr.msk.bf16.gmra.mxu1 %vm410_vm1, %v1747_v17  ;;  %1656 = vmatprep.mubr.msk.bf16.mxu0 %vm410_vm1, %v1748_v18 }
  0x2b   : > { %1688 = vmatprep.mubr.msk.bf16.mxu1 %vm410_vm1, %v1749_v19 }
  0x31   : > { %1657 = vmatmul.mubr.msk.bf16.gmra.mxu0 %vm410_vm1, %v1750_v20 }
  0x32   : > { %1689 = vmatmul.mubr.msk.bf16.gmra.mxu1 %vm410_vm1, %v1751_v21  ;;  %1660 = vmatprep.mubr.msk.bf16.mxu0 %vm410_vm1, %v1752_v22 }
  0x33   : > { %1692 = vmatprep.mubr.msk.bf16.mxu1 %vm410_vm1, %v1753_v23 }
  0x39   : > { %1661 = vmatmul.mubr.msk.bf16.gmra.mxu0 %vm410_vm1, %v1754_v24 }
  0x3a   : > { %1693 = vmatmul.mubr.msk.bf16.gmra.mxu1 %vm410_vm1, %v1755_v25  ;;  %1664 = vmatprep.mubr.msk.bf16.mxu0 %vm410_vm1, %v1756_v26 }
  0x3b   : > { %1696 = vmatprep.mubr.msk.bf16.mxu1 %vm410_vm1, %v1757_v27 }
  0x41   : > { %1665 = vmatmul.mubr.msk.bf16.gmra.mxu0 %vm410_vm1, %v1758_v28 }
  0x42   : > { %1697 = vmatmul.mubr.msk.bf16.gmra.mxu1 %vm410_vm1, %v1759_v29  ;;  %1668 = vmatprep.mubr.msk.bf16.mxu0 %vm410_vm1, %v1760_v30 }
  0x43   : > { %1700 = vmatprep.mubr.msk.bf16.mxu1 %vm410_vm1, %v1761_v31 }
  0x49   : > { %1669 = vmatmul.mubr.msk.bf16.gmra.mxu0 %vm410_vm1, %v1762_v32 }
  0x4a   : > { %1701 = vmatmul.mubr.msk.bf16.gmra.mxu1 %vm410_vm1, %v1763_v33 }
  0xd1   : > { %v1642_v34 = vpop.f32.mrf.mxu0 }
  0xd2   : > { %v1674_v35 = vpop.f32.mrf.mxu1 }
  0xd3   : > { %v545_v36 = vpop.f32.mrf.mxu0 }
  0xd4   : > { %v673_v37 = vpop.f32.mrf.mxu1 }
  0xd5   : > { %v1643_v38 = vpop.f32.mrf.mxu0 }
  0xd6   : > { %v1422_v39 = vpack.c.bf16 %v1643_v38, %v1642_v34  ;;  %v1675_v40 = vpop.f32.mrf.mxu1 }
  0xd7   : > { %v1502_v41 = vpack.c.bf16 %v1675_v40, %v1674_v35  ;;  %v548_v42 = vpop.f32.mrf.mxu0 }
  0xd8   : > { %1574 = vst [vmem:[%s1903_s22 + $0x8] sm:$0xff] %v1422_v39   ;;  %v1417_v43 = vpack.c.bf16 %v548_v42, %v545_v36  ;;  %v676_v44 = vpop.f32.mrf.mxu1 }
  0xd9   : > { %1590 = vst [vmem:[%s1903_s22 + $0x88] sm:$0xff] %v1502_v41   ;;  %v1497_v45 = vpack.c.bf16 %v676_v44, %v673_v37  ;;  %v1646_v46 = vpop.f32.mrf.mxu0 }
  0xda   : > { %1418 = vst [vmem:[%s1903_s22] sm:$0xff] %v1417_v43   ;;  %v1678_v47 = vpop.f32.mrf.mxu1 }
  0xdb   : > { %1589 = vst [vmem:[%s1903_s22 + $0x80] sm:$0xff] %v1497_v45   ;;  %v561_v48 = vpop.f32.mrf.mxu0 }
  0xdc   : > { %v689_v49 = vpop.f32.mrf.mxu1 }
  0xdd   : > { %v1647_v50 = vpop.f32.mrf.mxu0 }
  0xde   : > { %v1432_v51 = vpack.c.bf16 %v1647_v50, %v1646_v46  ;;  %v1679_v52 = vpop.f32.mrf.mxu1 }
  0xdf   : > { %v1512_v53 = vpack.c.bf16 %v1679_v52, %v1678_v47  ;;  %v564_v54 = vpop.f32.mrf.mxu0 }
  0xe0   : > { %1576 = vst [vmem:[%s1903_s22 + $0x18] sm:$0xff] %v1432_v51   ;;  %v1427_v55 = vpack.c.bf16 %v564_v54, %v561_v48  ;;  %v692_v56 = vpop.f32.mrf.mxu1 }
  0xe1   : > { %1592 = vst [vmem:[%s1903_s22 + $0x98] sm:$0xff] %v1512_v53   ;;  %v1507_v57 = vpack.c.bf16 %v692_v56, %v689_v49  ;;  %v1650_v58 = vpop.f32.mrf.mxu0 }
  0xe2   : > { %1575 = vst [vmem:[%s1903_s22 + $0x10] sm:$0xff] %v1427_v55   ;;  %v1682_v59 = vpop.f32.mrf.mxu1 }
  0xe3   : > { %1591 = vst [vmem:[%s1903_s22 + $0x90] sm:$0xff] %v1507_v57   ;;  %v577_v60 = vpop.f32.mrf.mxu0 }
  0xe4   : > { %v705_v61 = vpop.f32.mrf.mxu1 }
  0xe5   : > { %v1651_v62 = vpop.f32.mrf.mxu0 }
  0xe6   : > { %v1442_v63 = vpack.c.bf16 %v1651_v62, %v1650_v58  ;;  %v1683_v0 = vpop.f32.mrf.mxu1 }
  0xe7   : > { %v1522_v1 = vpack.c.bf16 %v1683_v0, %v1682_v59  ;;  %v580_v2 = vpop.f32.mrf.mxu0 }
  0xe8   : > { %1578 = vst [vmem:[%s1903_s22 + $0x28] sm:$0xff] %v1442_v63   ;;  %v1437_v3 = vpack.c.bf16 %v580_v2, %v577_v60  ;;  %v708_v4 = vpop.f32.mrf.mxu1 }
  0xe9   : > { %1594 = vst [vmem:[%s1903_s22 + $0xa8] sm:$0xff] %v1522_v1   ;;  %v1517_v5 = vpack.c.bf16 %v708_v4, %v705_v61  ;;  %v1654_v6 = vpop.f32.mrf.mxu0 }
  0xea   : > { %1577 = vst [vmem:[%s1903_s22 + $0x20] sm:$0xff] %v1437_v3   ;;  %v1686_v7 = vpop.f32.mrf.mxu1 }
  0xeb   : > { %1593 = vst [vmem:[%s1903_s22 + $0xa0] sm:$0xff] %v1517_v5   ;;  %v593_v8 = vpop.f32.mrf.mxu0 }
  0xec   : > { %v721_v9 = vpop.f32.mrf.mxu1 }
  0xed   : > { %v1655_v10 = vpop.f32.mrf.mxu0 }
  0xee   : > { %v1452_v11 = vpack.c.bf16 %v1655_v10, %v1654_v6  ;;  %v1687_v12 = vpop.f32.mrf.mxu1 }
  0xef   : > { %v1532_v13 = vpack.c.bf16 %v1687_v12, %v1686_v7  ;;  %v596_v14 = vpop.f32.mrf.mxu0 }
  0xf0   : > { %1580 = vst [vmem:[%s1903_s22 + $0x38] sm:$0xff] %v1452_v11   ;;  %v1447_v15 = vpack.c.bf16 %v596_v14, %v593_v8  ;;  %v724_v16 = vpop.f32.mrf.mxu1 }
  0xf1   : > { %1596 = vst [vmem:[%s1903_s22 + $0xb8] sm:$0xff] %v1532_v13   ;;  %v1527_v17 = vpack.c.bf16 %v724_v16, %v721_v9  ;;  %v1658_v18 = vpop.f32.mrf.mxu0 }
  0xf2   : > { %1579 = vst [vmem:[%s1903_s22 + $0x30] sm:$0xff] %v1447_v15   ;;  %v1690_v19 = vpop.f32.mrf.mxu1 }
  0xf3   : > { %1595 = vst [vmem:[%s1903_s22 + $0xb0] sm:$0xff] %v1527_v17   ;;  %v609_v20 = vpop.f32.mrf.mxu0 }
  0xf4   : > { %v737_v21 = vpop.f32.mrf.mxu1 }
  0xf5   : > { %v1659_v22 = vpop.f32.mrf.mxu0 }
  0xf6   : > { %v1462_v23 = vpack.c.bf16 %v1659_v22, %v1658_v18  ;;  %v1691_v24 = vpop.f32.mrf.mxu1 }
  0xf7   : > { %v1542_v25 = vpack.c.bf16 %v1691_v24, %v1690_v19  ;;  %v612_v26 = vpop.f32.mrf.mxu0 }
  0xf8   : > { %1582 = vst [vmem:[%s1903_s22 + $0x48] sm:$0xff] %v1462_v23   ;;  %v1457_v27 = vpack.c.bf16 %v612_v26, %v609_v20  ;;  %v740_v28 = vpop.f32.mrf.mxu1 }
  0xf9   : > { %1598 = vst [vmem:[%s1903_s22 + $0xc8] sm:$0xff] %v1542_v25   ;;  %v1537_v29 = vpack.c.bf16 %v740_v28, %v737_v21  ;;  %v1662_v30 = vpop.f32.mrf.mxu0 }
  0xfa   : > { %1581 = vst [vmem:[%s1903_s22 + $0x40] sm:$0xff] %v1457_v27   ;;  %v1694_v31 = vpop.f32.mrf.mxu1 }
  0xfb   : > { %1597 = vst [vmem:[%s1903_s22 + $0xc0] sm:$0xff] %v1537_v29   ;;  %v625_v32 = vpop.f32.mrf.mxu0 }
  0xfc   : > { %v753_v33 = vpop.f32.mrf.mxu1 }
  0xfd   : > { %v1663_v34 = vpop.f32.mrf.mxu0 }
  0xfe   : > { %v1472_v35 = vpack.c.bf16 %v1663_v34, %v1662_v30  ;;  %v1695_v36 = vpop.f32.mrf.mxu1 }
  0xff   : > { %v1552_v37 = vpack.c.bf16 %v1695_v36, %v1694_v31  ;;  %v628_v38 = vpop.f32.mrf.mxu0 }
 0x100   : > { %1584 = vst [vmem:[%s1903_s22 + $0x58] sm:$0xff] %v1472_v35   ;;  %v1467_v39 = vpack.c.bf16 %v628_v38, %v625_v32  ;;  %v756_v40 = vpop.f32.mrf.mxu1 }
 0x101   : > { %1600 = vst [vmem:[%s1903_s22 + $0xd8] sm:$0xff] %v1552_v37   ;;  %v1547_v41 = vpack.c.bf16 %v756_v40, %v753_v33  ;;  %v1666_v42 = vpop.f32.mrf.mxu0 }
 0x102   : > { %1583 = vst [vmem:[%s1903_s22 + $0x50] sm:$0xff] %v1467_v39   ;;  %v1698_v43 = vpop.f32.mrf.mxu1 }
 0x103   : > { %1599 = vst [vmem:[%s1903_s22 + $0xd0] sm:$0xff] %v1547_v41   ;;  %v641_v44 = vpop.f32.mrf.mxu0 }
 0x104   : > { %v769_v45 = vpop.f32.mrf.mxu1 }
 0x105   : > { %v1667_v46 = vpop.f32.mrf.mxu0 }
 0x106   : > { %v1482_v47 = vpack.c.bf16 %v1667_v46, %v1666_v42  ;;  %v1699_v48 = vpop.f32.mrf.mxu1 }
 0x107   : > { %v1562_v49 = vpack.c.bf16 %v1699_v48, %v1698_v43  ;;  %v644_v50 = vpop.f32.mrf.mxu0 }
 0x108   : > { %1586 = vst [vmem:[%s1903_s22 + $0x68] sm:$0xff] %v1482_v47   ;;  %v1477_v51 = vpack.c.bf16 %v644_v50, %v641_v44  ;;  %v772_v52 = vpop.f32.mrf.mxu1 }
 0x109   : > { %1602 = vst [vmem:[%s1903_s22 + $0xe8] sm:$0xff] %v1562_v49   ;;  %v1557_v53 = vpack.c.bf16 %v772_v52, %v769_v45  ;;  %v1670_v54 = vpop.f32.mrf.mxu0 }
 0x10a   : > { %1585 = vst [vmem:[%s1903_s22 + $0x60] sm:$0xff] %v1477_v51   ;;  %v1702_v55 = vpop.f32.mrf.mxu1 }
 0x10b   : > { %1601 = vst [vmem:[%s1903_s22 + $0xe0] sm:$0xff] %v1557_v53   ;;  %v657_v56 = vpop.f32.mrf.mxu0 }
 0x10c   : > { %v785_v57 = vpop.f32.mrf.mxu1 }
 0x10d   : > { %v1671_v58 = vpop.f32.mrf.mxu0 }
 0x10e   : > { %v1492_v59 = vpack.c.bf16 %v1671_v58, %v1670_v54  ;;  %v1703_v60 = vpop.f32.mrf.mxu1 }
 0x10f   : > { %v1572_v61 = vpack.c.bf16 %v1703_v60, %v1702_v55  ;;  %v660_v62 = vpop.f32.mrf.mxu0 }
 0x110   : > { %1588 = vst [vmem:[%s1903_s22 + $0x78] sm:$0xff] %v1492_v59   ;;  %v1487_v63 = vpack.c.bf16 %v660_v62, %v657_v56  ;;  %v788_v0 = vpop.f32.mrf.mxu1 }
 0x111   : > { %1604 = vst [vmem:[%s1903_s22 + $0xf8] sm:$0xff] %v1572_v61   ;;  %v1567_v1 = vpack.c.bf16 %v788_v0, %v785_v57 }
 0x112   : > { %1587 = vst [vmem:[%s1903_s22 + $0x70] sm:$0xff] %v1487_v63  }
 0x113   : > { %1603 = vst [vmem:[%s1903_s22 + $0xf0] sm:$0xff] %v1567_v1  }
 0x114 PF: > { %s12_s11 = sadd.s32 1, %s1786_s11   ;;  %s1949_s9 = smov %s1782_s10 }
 0x115   : > { %p9_p5 = scmp.ge.s32.totalorder %s12_s11, 18   ;;  %s1950_s10 = smov %s1952_s12 }
 0x117   :  { %11 = sbr.rel (!%p9_p5) target bundleno = 2 (0x2), region = 61 }

// kernel: dcgan_forward.23
= control target key start
LH: loop header
LB: loop body
LE: loop exit
PB: predicated region body
PF: predicated region fallthrough
CT: control target
= control target key end

     0   :  { %s998_s0 = inlined_call_operand.vmem [shape: bf16[256,384], index: 0, kind: input, shape index: {}]   ;;  %s999_s1 = inlined_call_operand.vmem [shape: f32[256,384], index: 1, kind: output, shape index: {}]  }
   0x1   :  { %v8_v0 = vld [vmem:[%s998_s0] sm:$0xff]  ;;  %v9_v1 = vld [vmem:[%s998_s0 + $0x8] ss:$12 sps:$4 sm:$0xff]   ;;  %v10_v2 = vld [vmem:[%s998_s0 + $0xc] sm:$0xff] }
   0x2   :  { %v72_v3 = vunpack.c.l.bf16 %v8_v0  ;;  %v73_v4 = vunpack.c.h.bf16 %v8_v0  ;;  %v74_v5 = vunpack.c.l.bf16 %v9_v1  ;;  %v75_v6 = vunpack.c.l.bf16 %v10_v2  ;;  %v12_v7 = vld [vmem:[%s998_s0 + $0x18] sm:$0xff]  ;;  %v13_v10 = vld [vmem:[%s998_s0 + $0x20] ss:$12 sps:$4 sm:$0xff]   ;;  %v14_v12 = vld [vmem:[%s998_s0 + $0x24] sm:$0xff] }
   0x3   :  { %v76_v8 = vunpack.c.h.bf16 %v10_v2  ;;  %v77_v9 = vunpack.c.h.bf16 %v9_v1  ;;  %v78_v11 = vunpack.c.l.bf16 %v12_v7  ;;  %v79_v13 = vunpack.c.h.bf16 %v12_v7  ;;  %v16_v16 = vld [vmem:[%s998_s0 + $0x30] sm:$0xff]  ;;  %v17_v19 = vld [vmem:[%s998_s0 + $0x38] ss:$12 sps:$4 sm:$0xff]   ;;  %v18_v21 = vld [vmem:[%s998_s0 + $0x3c] sm:$0xff] }
   0x4   :  { %364 = vtanh.f32 %v72_v3  ;;  %v80_v14 = vunpack.c.l.bf16 %v13_v10  ;;  %v81_v15 = vunpack.c.l.bf16 %v14_v12  ;;  %v82_v17 = vunpack.c.h.bf16 %v14_v12  ;;  %v20_v25 = vld [vmem:[%s998_s0 + $0x48] sm:$0xff]  ;;  %v21_v29 = vld [vmem:[%s998_s0 + $0x50] ss:$12 sps:$4 sm:$0xff]   ;;  %v22_v32 = vld [vmem:[%s998_s0 + $0x54] sm:$0xff] }
   0x5   :  { %366 = vtanh.f32 %v73_v4  ;;  %v83_v18 = vunpack.c.h.bf16 %v13_v10  ;;  %v84_v20 = vunpack.c.l.bf16 %v16_v16  ;;  %v85_v22 = vunpack.c.h.bf16 %v16_v16  ;;  %v24_v39 = vld [vmem:[%s998_s0 + $0x60] sm:$0xff]  ;;  %v25_v44 = vld [vmem:[%s998_s0 + $0x68] ss:$12 sps:$4 sm:$0xff]   ;;  %v26_v47 = vld [vmem:[%s998_s0 + $0x6c] sm:$0xff] }
   0x6   :  { %368 = vtanh.f32 %v74_v5  ;;  %v86_v23 = vunpack.c.l.bf16 %v17_v19  ;;  %v87_v24 = vunpack.c.l.bf16 %v18_v21  ;;  %v88_v26 = vunpack.c.h.bf16 %v18_v21  ;;  %v28_v54 = vld [vmem:[%s998_s0 + $0x78] sm:$0xff]  ;;  %v29_v59 = vld [vmem:[%s998_s0 + $0x80] ss:$12 sps:$4 sm:$0xff]   ;;  %v30_v62 = vld [vmem:[%s998_s0 + $0x84] sm:$0xff] }
   0x7   :  { %370 = vtanh.f32 %v75_v6  ;;  %v89_v28 = vunpack.c.h.bf16 %v17_v19  ;;  %v90_v31 = vunpack.c.l.bf16 %v20_v25  ;;  %v91_v34 = vunpack.c.h.bf16 %v20_v25  ;;  %v32_v5 = vld [vmem:[%s998_s0 + $0x90] sm:$0xff]  ;;  %v33_v10 = vld [vmem:[%s998_s0 + $0x98] ss:$12 sps:$4 sm:$0xff]  }
   0x8   :  { %372 = vtanh.f32 %v76_v8  ;;  %v92_v36 = vunpack.c.l.bf16 %v21_v29  ;;  %v93_v38 = vunpack.c.l.bf16 %v22_v32  ;;  %v94_v41 = vunpack.c.h.bf16 %v22_v32  ;;  %v37_v25 = vld [vmem:[%s998_s0 + $0xb0] ss:$12 sps:$4 sm:$0xff]  }
   0x9   :  { %374 = vtanh.f32 %v77_v9  ;;  %v95_v43 = vunpack.c.h.bf16 %v21_v29  ;;  %v96_v46 = vunpack.c.l.bf16 %v24_v39  ;;  %v97_v49 = vunpack.c.h.bf16 %v24_v39 }
   0xa   :  { %376 = vtanh.f32 %v78_v11  ;;  %v98_v51 = vunpack.c.l.bf16 %v25_v44  ;;  %v99_v53 = vunpack.c.l.bf16 %v26_v47  ;;  %v100_v56 = vunpack.c.h.bf16 %v26_v47 }
   0xb   :  { %378 = vtanh.f32 %v79_v13  ;;  %v101_v58 = vunpack.c.h.bf16 %v25_v44  ;;  %v102_v61 = vunpack.c.l.bf16 %v28_v54  ;;  %v103_v0 = vunpack.c.h.bf16 %v28_v54  ;;  %v34_v13 = vld [vmem:[%s998_s0 + $0x9c] sm:$0xff] }
   0xc   :  { %380 = vtanh.f32 %v80_v14  ;;  %v104_v2 = vunpack.c.l.bf16 %v29_v59  ;;  %v105_v4 = vunpack.c.l.bf16 %v30_v62  ;;  %v106_v7 = vunpack.c.h.bf16 %v30_v62 }
   0xd   :  { %382 = vtanh.f32 %v81_v15  ;;  %v107_v9 = vunpack.c.h.bf16 %v29_v59  ;;  %v108_v12 = vunpack.c.l.bf16 %v32_v5  ;;  %v109_v15 = vunpack.c.h.bf16 %v32_v5 }
   0xe   :  { %384 = vtanh.f32 %v82_v17  ;;  %v110_v17 = vunpack.c.l.bf16 %v33_v10  ;;  %v111_v19 = vunpack.c.l.bf16 %v34_v13  ;;  %v116_v32 = vunpack.c.l.bf16 %v37_v25 }
   0xf   :  { %386 = vtanh.f32 %v83_v18  ;;  %v119_v39 = vunpack.c.h.bf16 %v37_v25 }
  0x10   :  { %388 = vtanh.f32 %v84_v20  ;;  %v36_v20 = vld [vmem:[%s998_s0 + $0xa8] sm:$0xff] }
  0x11   :  { %v365_v27 = vpop.eup %364  ;;  %390 = vtanh.f32 %v85_v22  ;;  %v112_v22 = vunpack.c.h.bf16 %v34_v13 }
  0x12   :  { %v367_v30 = vpop.eup %366  ;;  %264 = vst [vmem:[%s999_s1] sm:$0xff] %v365_v27  ;;  %392 = vtanh.f32 %v86_v23  ;;  %v114_v27 = vunpack.c.l.bf16 %v36_v20 }
  0x13   :  { %v369_v33 = vpop.eup %368  ;;  %265 = vst [vmem:[%s999_s1 + $0x8] sm:$0xff] %v367_v30  ;;  %394 = vtanh.f32 %v87_v24  ;;  %v113_v24 = vunpack.c.h.bf16 %v33_v10  ;;  %v115_v30 = vunpack.c.h.bf16 %v36_v20 }
  0x14   :  { %v371_v35 = vpop.eup %370  ;;  %266 = vst [vmem:[%s999_s1 + $0x10] sm:$0xff] %v369_v33  ;;  %396 = vtanh.f32 %v88_v26 }
  0x15   :  { %v373_v37 = vpop.eup %372  ;;  %267 = vst [vmem:[%s999_s1 + $0x18] sm:$0xff] %v371_v35  ;;  %398 = vtanh.f32 %v89_v28  ;;  %v38_v28 = vld [vmem:[%s998_s0 + $0xb4] sm:$0xff]  ;;  %v40_v35 = vld [vmem:[%s998_s0 + $0xc0] sm:$0xff] }
  0x16   :  { %v375_v40 = vpop.eup %374  ;;  %268 = vst [vmem:[%s999_s1 + $0x20] sm:$0xff] %v373_v37  ;;  %400 = vtanh.f32 %v90_v31  ;;  %v118_v37 = vunpack.c.h.bf16 %v38_v28 }
  0x17   :  { %v377_v42 = vpop.eup %376  ;;  %269 = vst [vmem:[%s999_s1 + $0x28] sm:$0xff] %v375_v40  ;;  %402 = vtanh.f32 %v91_v34  ;;  %v117_v34 = vunpack.c.l.bf16 %v38_v28  ;;  %v41_v40 = vld [vmem:[%s998_s0 + $0xc8] ss:$12 sps:$4 sm:$0xff]  }
  0x18   :  { %v379_v45 = vpop.eup %378  ;;  %270 = vst [vmem:[%s999_s1 + $0x30] sm:$0xff] %v377_v42  ;;  %404 = vtanh.f32 %v92_v36  ;;  %v120_v42 = vunpack.c.l.bf16 %v40_v35  ;;  %v122_v47 = vunpack.c.l.bf16 %v41_v40  ;;  %v125_v54 = vunpack.c.h.bf16 %v41_v40 }
  0x19   :  { %v381_v48 = vpop.eup %380  ;;  %271 = vst [vmem:[%s999_s1 + $0x38] sm:$0xff] %v379_v45  ;;  %406 = vtanh.f32 %v93_v38  ;;  %v121_v45 = vunpack.c.h.bf16 %v40_v35 }
  0x1a   :  { %v383_v50 = vpop.eup %382  ;;  %272 = vst [vmem:[%s999_s1 + $0x40] sm:$0xff] %v381_v48  ;;  %408 = vtanh.f32 %v94_v41 }
  0x1b   :  { %v385_v52 = vpop.eup %384  ;;  %273 = vst [vmem:[%s999_s1 + $0x48] sm:$0xff] %v383_v50  ;;  %410 = vtanh.f32 %v95_v43  ;;  %v42_v43 = vld [vmem:[%s998_s0 + $0xcc] sm:$0xff]  ;;  %v44_v50 = vld [vmem:[%s998_s0 + $0xd8] sm:$0xff] }
  0x1c   :  { %v387_v55 = vpop.eup %386  ;;  %274 = vst [vmem:[%s999_s1 + $0x50] sm:$0xff] %v385_v52  ;;  %412 = vtanh.f32 %v96_v46  ;;  %v124_v52 = vunpack.c.h.bf16 %v42_v43 }
  0x1d   :  { %v389_v57 = vpop.eup %388  ;;  %275 = vst [vmem:[%s999_s1 + $0x58] sm:$0xff] %v387_v55  ;;  %414 = vtanh.f32 %v97_v49  ;;  %v123_v49 = vunpack.c.l.bf16 %v42_v43  ;;  %v45_v55 = vld [vmem:[%s998_s0 + $0xe0] ss:$12 sps:$4 sm:$0xff]  }
  0x1e   :  { %v391_v60 = vpop.eup %390  ;;  %276 = vst [vmem:[%s999_s1 + $0x60] sm:$0xff] %v389_v57  ;;  %416 = vtanh.f32 %v98_v51  ;;  %v126_v57 = vunpack.c.l.bf16 %v44_v50  ;;  %v128_v62 = vunpack.c.l.bf16 %v45_v55  ;;  %v131_v5 = vunpack.c.h.bf16 %v45_v55 }
  0x1f   :  { %v393_v63 = vpop.eup %392  ;;  %277 = vst [vmem:[%s999_s1 + $0x68] sm:$0xff] %v391_v60  ;;  %418 = vtanh.f32 %v99_v53  ;;  %v127_v60 = vunpack.c.h.bf16 %v44_v50 }
  0x20   :  { %v395_v1 = vpop.eup %394  ;;  %278 = vst [vmem:[%s999_s1 + $0x70] sm:$0xff] %v393_v63  ;;  %420 = vtanh.f32 %v100_v56 }
  0x21   :  { %v397_v3 = vpop.eup %396  ;;  %279 = vst [vmem:[%s999_s1 + $0x78] sm:$0xff] %v395_v1  ;;  %422 = vtanh.f32 %v101_v58  ;;  %v46_v58 = vld [vmem:[%s998_s0 + $0xe4] sm:$0xff]  ;;  %v48_v1 = vld [vmem:[%s998_s0 + $0xf0] sm:$0xff] }
  0x22   :  { %v399_v6 = vpop.eup %398  ;;  %280 = vst [vmem:[%s999_s1 + $0x80] sm:$0xff] %v397_v3  ;;  %424 = vtanh.f32 %v102_v61  ;;  %v130_v3 = vunpack.c.h.bf16 %v46_v58 }
  0x23   :  { %v401_v8 = vpop.eup %400  ;;  %281 = vst [vmem:[%s999_s1 + $0x88] sm:$0xff] %v399_v6  ;;  %426 = vtanh.f32 %v103_v0  ;;  %v129_v0 = vunpack.c.l.bf16 %v46_v58  ;;  %v49_v6 = vld [vmem:[%s998_s0 + $0xf8] ss:$12 sps:$4 sm:$0xff]  }
  0x24   :  { %v403_v11 = vpop.eup %402  ;;  %282 = vst [vmem:[%s999_s1 + $0x90] sm:$0xff] %v401_v8  ;;  %428 = vtanh.f32 %v104_v2  ;;  %v132_v8 = vunpack.c.l.bf16 %v48_v1  ;;  %v134_v13 = vunpack.c.l.bf16 %v49_v6  ;;  %v137_v20 = vunpack.c.h.bf16 %v49_v6 }
  0x25   :  { %v405_v14 = vpop.eup %404  ;;  %283 = vst [vmem:[%s999_s1 + $0x98] sm:$0xff] %v403_v11  ;;  %430 = vtanh.f32 %v105_v4  ;;  %v133_v11 = vunpack.c.h.bf16 %v48_v1 }
  0x26   :  { %v407_v16 = vpop.eup %406  ;;  %284 = vst [vmem:[%s999_s1 + $0xa0] sm:$0xff] %v405_v14  ;;  %432 = vtanh.f32 %v106_v7 }
  0x27   :  { %v409_v18 = vpop.eup %408  ;;  %285 = vst [vmem:[%s999_s1 + $0xa8] sm:$0xff] %v407_v16  ;;  %434 = vtanh.f32 %v107_v9  ;;  %v50_v9 = vld [vmem:[%s998_s0 + $0xfc] sm:$0xff]  ;;  %v52_v16 = vld [vmem:[%s998_s0 + $0x108] sm:$0xff] }
  0x28   :  { %v411_v21 = vpop.eup %410  ;;  %286 = vst [vmem:[%s999_s1 + $0xb0] sm:$0xff] %v409_v18  ;;  %436 = vtanh.f32 %v108_v12  ;;  %v136_v18 = vunpack.c.h.bf16 %v50_v9 }
  0x29   :  { %v413_v23 = vpop.eup %412  ;;  %287 = vst [vmem:[%s999_s1 + $0xb8] sm:$0xff] %v411_v21  ;;  %438 = vtanh.f32 %v109_v15  ;;  %v135_v15 = vunpack.c.l.bf16 %v50_v9  ;;  %v53_v21 = vld [vmem:[%s998_s0 + $0x110] ss:$12 sps:$4 sm:$0xff]  }
  0x2a   :  { %v415_v26 = vpop.eup %414  ;;  %288 = vst [vmem:[%s999_s1 + $0xc0] sm:$0xff] %v413_v23  ;;  %440 = vtanh.f32 %v110_v17  ;;  %v138_v23 = vunpack.c.l.bf16 %v52_v16  ;;  %v140_v28 = vunpack.c.l.bf16 %v53_v21  ;;  %v143_v35 = vunpack.c.h.bf16 %v53_v21 }
  0x2b   :  { %v417_v29 = vpop.eup %416  ;;  %289 = vst [vmem:[%s999_s1 + $0xc8] sm:$0xff] %v415_v26  ;;  %442 = vtanh.f32 %v111_v19  ;;  %v139_v26 = vunpack.c.h.bf16 %v52_v16 }
  0x2c   :  { %v419_v31 = vpop.eup %418  ;;  %290 = vst [vmem:[%s999_s1 + $0xd0] sm:$0xff] %v417_v29  ;;  %444 = vtanh.f32 %v112_v22 }
  0x2d   :  { %v421_v33 = vpop.eup %420  ;;  %291 = vst [vmem:[%s999_s1 + $0xd8] sm:$0xff] %v419_v31  ;;  %446 = vtanh.f32 %v113_v24  ;;  %v54_v24 = vld [vmem:[%s998_s0 + $0x114] sm:$0xff]  ;;  %v56_v31 = vld [vmem:[%s998_s0 + $0x120] sm:$0xff] }
  0x2e   :  { %v423_v36 = vpop.eup %422  ;;  %292 = vst [vmem:[%s999_s1 + $0xe0] sm:$0xff] %v421_v33  ;;  %448 = vtanh.f32 %v114_v27  ;;  %v142_v33 = vunpack.c.h.bf16 %v54_v24 }
  0x2f   :  { %v425_v38 = vpop.eup %424  ;;  %293 = vst [vmem:[%s999_s1 + $0xe8] sm:$0xff] %v423_v36  ;;  %450 = vtanh.f32 %v115_v30  ;;  %v141_v30 = vunpack.c.l.bf16 %v54_v24  ;;  %v57_v36 = vld [vmem:[%s998_s0 + $0x128] ss:$12 sps:$4 sm:$0xff]  }
  0x30   :  { %v427_v41 = vpop.eup %426  ;;  %294 = vst [vmem:[%s999_s1 + $0xf0] sm:$0xff] %v425_v38  ;;  %452 = vtanh.f32 %v116_v32  ;;  %v144_v38 = vunpack.c.l.bf16 %v56_v31  ;;  %v146_v43 = vunpack.c.l.bf16 %v57_v36  ;;  %v149_v50 = vunpack.c.h.bf16 %v57_v36 }
  0x31   :  { %v429_v44 = vpop.eup %428  ;;  %295 = vst [vmem:[%s999_s1 + $0xf8] sm:$0xff] %v427_v41  ;;  %454 = vtanh.f32 %v117_v34  ;;  %v145_v41 = vunpack.c.h.bf16 %v56_v31 }
  0x32   :  { %v431_v46 = vpop.eup %430  ;;  %296 = vst [vmem:[%s999_s1 + $0x100] sm:$0xff] %v429_v44  ;;  %456 = vtanh.f32 %v118_v37 }
  0x33   :  { %v433_v48 = vpop.eup %432  ;;  %297 = vst [vmem:[%s999_s1 + $0x108] sm:$0xff] %v431_v46  ;;  %458 = vtanh.f32 %v119_v39  ;;  %v58_v39 = vld [vmem:[%s998_s0 + $0x12c] sm:$0xff]  ;;  %v60_v46 = vld [vmem:[%s998_s0 + $0x138] sm:$0xff] }
  0x34   :  { %v435_v51 = vpop.eup %434  ;;  %298 = vst [vmem:[%s999_s1 + $0x110] sm:$0xff] %v433_v48  ;;  %460 = vtanh.f32 %v120_v42  ;;  %v148_v48 = vunpack.c.h.bf16 %v58_v39 }
  0x35   :  { %v437_v53 = vpop.eup %436  ;;  %299 = vst [vmem:[%s999_s1 + $0x118] sm:$0xff] %v435_v51  ;;  %462 = vtanh.f32 %v121_v45  ;;  %v147_v45 = vunpack.c.l.bf16 %v58_v39  ;;  %v61_v51 = vld [vmem:[%s998_s0 + $0x140] ss:$12 sps:$4 sm:$0xff]  }
  0x36   :  { %v439_v56 = vpop.eup %438  ;;  %300 = vst [vmem:[%s999_s1 + $0x120] sm:$0xff] %v437_v53  ;;  %464 = vtanh.f32 %v122_v47  ;;  %v150_v53 = vunpack.c.l.bf16 %v60_v46  ;;  %v152_v58 = vunpack.c.l.bf16 %v61_v51  ;;  %v155_v1 = vunpack.c.h.bf16 %v61_v51 }
  0x37   :  { %v441_v59 = vpop.eup %440  ;;  %301 = vst [vmem:[%s999_s1 + $0x128] sm:$0xff] %v439_v56  ;;  %466 = vtanh.f32 %v123_v49  ;;  %v151_v56 = vunpack.c.h.bf16 %v60_v46 }
  0x38   :  { %v443_v61 = vpop.eup %442  ;;  %302 = vst [vmem:[%s999_s1 + $0x130] sm:$0xff] %v441_v59  ;;  %468 = vtanh.f32 %v124_v52 }
  0x39   :  { %v445_v63 = vpop.eup %444  ;;  %303 = vst [vmem:[%s999_s1 + $0x138] sm:$0xff] %v443_v61  ;;  %470 = vtanh.f32 %v125_v54  ;;  %v62_v54 = vld [vmem:[%s998_s0 + $0x144] sm:$0xff]  ;;  %v64_v61 = vld [vmem:[%s998_s0 + $0x150] sm:$0xff] }
  0x3a   :  { %v447_v2 = vpop.eup %446  ;;  %304 = vst [vmem:[%s999_s1 + $0x140] sm:$0xff] %v445_v63  ;;  %472 = vtanh.f32 %v126_v57  ;;  %v154_v63 = vunpack.c.h.bf16 %v62_v54 }
  0x3b   :  { %v449_v4 = vpop.eup %448  ;;  %305 = vst [vmem:[%s999_s1 + $0x148] sm:$0xff] %v447_v2  ;;  %474 = vtanh.f32 %v127_v60  ;;  %v153_v60 = vunpack.c.l.bf16 %v62_v54  ;;  %v65_v2 = vld [vmem:[%s998_s0 + $0x158] ss:$12 sps:$4 sm:$0xff]  }
  0x3c   :  { %v451_v7 = vpop.eup %450  ;;  %306 = vst [vmem:[%s999_s1 + $0x150] sm:$0xff] %v449_v4  ;;  %476 = vtanh.f32 %v128_v62  ;;  %v156_v4 = vunpack.c.l.bf16 %v64_v61  ;;  %v158_v9 = vunpack.c.l.bf16 %v65_v2  ;;  %v161_v16 = vunpack.c.h.bf16 %v65_v2 }
  0x3d   :  { %v453_v10 = vpop.eup %452  ;;  %307 = vst [vmem:[%s999_s1 + $0x158] sm:$0xff] %v451_v7  ;;  %478 = vtanh.f32 %v129_v0  ;;  %v157_v7 = vunpack.c.h.bf16 %v64_v61 }
  0x3e   :  { %v455_v12 = vpop.eup %454  ;;  %308 = vst [vmem:[%s999_s1 + $0x160] sm:$0xff] %v453_v10  ;;  %480 = vtanh.f32 %v130_v3 }
  0x3f   :  { %v457_v14 = vpop.eup %456  ;;  %309 = vst [vmem:[%s999_s1 + $0x168] sm:$0xff] %v455_v12  ;;  %482 = vtanh.f32 %v131_v5  ;;  %v66_v5 = vld [vmem:[%s998_s0 + $0x15c] sm:$0xff]  ;;  %v68_v12 = vld [vmem:[%s998_s0 + $0x168] sm:$0xff] }
  0x40   :  { %v459_v17 = vpop.eup %458  ;;  %310 = vst [vmem:[%s999_s1 + $0x170] sm:$0xff] %v457_v14  ;;  %484 = vtanh.f32 %v132_v8  ;;  %v160_v14 = vunpack.c.h.bf16 %v66_v5 }
  0x41   :  { %v461_v19 = vpop.eup %460  ;;  %311 = vst [vmem:[%s999_s1 + $0x178] sm:$0xff] %v459_v17  ;;  %486 = vtanh.f32 %v133_v11  ;;  %v159_v11 = vunpack.c.l.bf16 %v66_v5  ;;  %v69_v17 = vld [vmem:[%s998_s0 + $0x170] ss:$12 sps:$4 sm:$0xff]  }
  0x42   :  { %v463_v22 = vpop.eup %462  ;;  %312 = vst [vmem:[%s999_s1 + $0x180] sm:$0xff] %v461_v19  ;;  %488 = vtanh.f32 %v134_v13  ;;  %v162_v19 = vunpack.c.l.bf16 %v68_v12  ;;  %v164_v24 = vunpack.c.l.bf16 %v69_v17 }
  0x43   :  { %v465_v25 = vpop.eup %464  ;;  %313 = vst [vmem:[%s999_s1 + $0x188] sm:$0xff] %v463_v22  ;;  %490 = vtanh.f32 %v135_v15  ;;  %v163_v22 = vunpack.c.h.bf16 %v68_v12 }
  0x44   :  { %v467_v27 = vpop.eup %466  ;;  %314 = vst [vmem:[%s999_s1 + $0x190] sm:$0xff] %v465_v25  ;;  %492 = vtanh.f32 %v136_v18 }
  0x45   :  { %v469_v29 = vpop.eup %468  ;;  %315 = vst [vmem:[%s999_s1 + $0x198] sm:$0xff] %v467_v27  ;;  %494 = vtanh.f32 %v137_v20  ;;  %v70_v20 = vld [vmem:[%s998_s0 + $0x174] sm:$0xff] }
  0x46   :  { %v471_v32 = vpop.eup %470  ;;  %316 = vst [vmem:[%s999_s1 + $0x1a0] sm:$0xff] %v469_v29  ;;  %496 = vtanh.f32 %v138_v23 }
  0x47   :  { %v473_v34 = vpop.eup %472  ;;  %317 = vst [vmem:[%s999_s1 + $0x1a8] sm:$0xff] %v471_v32  ;;  %498 = vtanh.f32 %v139_v26  ;;  %v165_v26 = vunpack.c.l.bf16 %v70_v20 }
  0x48   :  { %v475_v37 = vpop.eup %474  ;;  %318 = vst [vmem:[%s999_s1 + $0x1b0] sm:$0xff] %v473_v34  ;;  %500 = vtanh.f32 %v140_v28  ;;  %v166_v28 = vunpack.c.h.bf16 %v70_v20 }
  0x49   :  { %v477_v40 = vpop.eup %476  ;;  %319 = vst [vmem:[%s999_s1 + $0x1b8] sm:$0xff] %v475_v37  ;;  %502 = vtanh.f32 %v141_v30  ;;  %v167_v30 = vunpack.c.h.bf16 %v69_v17 }
  0x4a   :  { %v479_v42 = vpop.eup %478  ;;  %320 = vst [vmem:[%s999_s1 + $0x1c0] sm:$0xff] %v477_v40  ;;  %504 = vtanh.f32 %v142_v33 }
  0x4b   :  { %v481_v44 = vpop.eup %480  ;;  %321 = vst [vmem:[%s999_s1 + $0x1c8] sm:$0xff] %v479_v42  ;;  %506 = vtanh.f32 %v143_v35 }
  0x4c   :  { %v483_v47 = vpop.eup %482  ;;  %322 = vst [vmem:[%s999_s1 + $0x1d0] sm:$0xff] %v481_v44  ;;  %508 = vtanh.f32 %v144_v38 }
  0x4d   :  { %v485_v49 = vpop.eup %484  ;;  %323 = vst [vmem:[%s999_s1 + $0x1d8] sm:$0xff] %v483_v47  ;;  %510 = vtanh.f32 %v145_v41 }
  0x4e   :  { %v487_v52 = vpop.eup %486  ;;  %324 = vst [vmem:[%s999_s1 + $0x1e0] sm:$0xff] %v485_v49  ;;  %512 = vtanh.f32 %v146_v43 }
  0x4f   :  { %v489_v55 = vpop.eup %488  ;;  %325 = vst [vmem:[%s999_s1 + $0x1e8] sm:$0xff] %v487_v52  ;;  %514 = vtanh.f32 %v147_v45 }
  0x50   :  { %v491_v57 = vpop.eup %490  ;;  %326 = vst [vmem:[%s999_s1 + $0x1f0] sm:$0xff] %v489_v55  ;;  %516 = vtanh.f32 %v148_v48 }
  0x51   :  { %v493_v59 = vpop.eup %492  ;;  %327 = vst [vmem:[%s999_s1 + $0x1f8] sm:$0xff] %v491_v57  ;;  %518 = vtanh.f32 %v149_v50 }
  0x52   :  { %v495_v62 = vpop.eup %494  ;;  %328 = vst [vmem:[%s999_s1 + $0x200] sm:$0xff] %v493_v59  ;;  %520 = vtanh.f32 %v150_v53 }
  0x53   :  { %v497_v0 = vpop.eup %496  ;;  %329 = vst [vmem:[%s999_s1 + $0x208] sm:$0xff] %v495_v62  ;;  %522 = vtanh.f32 %v151_v56 }
  0x54   :  { %v499_v3 = vpop.eup %498  ;;  %330 = vst [vmem:[%s999_s1 + $0x210] sm:$0xff] %v497_v0  ;;  %524 = vtanh.f32 %v152_v58 }
  0x55   :  { %v501_v6 = vpop.eup %500  ;;  %331 = vst [vmem:[%s999_s1 + $0x218] sm:$0xff] %v499_v3  ;;  %526 = vtanh.f32 %v153_v60 }
  0x56   :  { %v503_v8 = vpop.eup %502  ;;  %332 = vst [vmem:[%s999_s1 + $0x220] sm:$0xff] %v501_v6  ;;  %528 = vtanh.f32 %v154_v63 }
  0x57   :  { %v505_v10 = vpop.eup %504  ;;  %333 = vst [vmem:[%s999_s1 + $0x228] sm:$0xff] %v503_v8  ;;  %530 = vtanh.f32 %v155_v1 }
  0x58   :  { %v507_v13 = vpop.eup %506  ;;  %334 = vst [vmem:[%s999_s1 + $0x230] sm:$0xff] %v505_v10  ;;  %532 = vtanh.f32 %v156_v4 }
  0x59   :  { %v509_v15 = vpop.eup %508  ;;  %335 = vst [vmem:[%s999_s1 + $0x238] sm:$0xff] %v507_v13  ;;  %534 = vtanh.f32 %v157_v7 }
  0x5a   :  { %v511_v18 = vpop.eup %510  ;;  %336 = vst [vmem:[%s999_s1 + $0x240] sm:$0xff] %v509_v15  ;;  %536 = vtanh.f32 %v158_v9 }
  0x5b   :  { %v513_v21 = vpop.eup %512  ;;  %337 = vst [vmem:[%s999_s1 + $0x248] sm:$0xff] %v511_v18  ;;  %538 = vtanh.f32 %v159_v11 }
  0x5c   :  { %v515_v23 = vpop.eup %514  ;;  %338 = vst [vmem:[%s999_s1 + $0x250] sm:$0xff] %v513_v21  ;;  %540 = vtanh.f32 %v160_v14 }
  0x5d   :  { %v517_v25 = vpop.eup %516  ;;  %339 = vst [vmem:[%s999_s1 + $0x258] sm:$0xff] %v515_v23  ;;  %542 = vtanh.f32 %v161_v16 }
  0x5e   :  { %v519_v27 = vpop.eup %518  ;;  %340 = vst [vmem:[%s999_s1 + $0x260] sm:$0xff] %v517_v25  ;;  %544 = vtanh.f32 %v162_v19 }
  0x5f   :  { %v521_v29 = vpop.eup %520  ;;  %341 = vst [vmem:[%s999_s1 + $0x268] sm:$0xff] %v519_v27  ;;  %546 = vtanh.f32 %v163_v22 }
  0x60   :  { %v523_v31 = vpop.eup %522  ;;  %342 = vst [vmem:[%s999_s1 + $0x270] sm:$0xff] %v521_v29  ;;  %548 = vtanh.f32 %v164_v24 }
  0x61   :  { %v525_v32 = vpop.eup %524  ;;  %343 = vst [vmem:[%s999_s1 + $0x278] sm:$0xff] %v523_v31  ;;  %550 = vtanh.f32 %v165_v26 }
  0x62   :  { %v527_v33 = vpop.eup %526  ;;  %344 = vst [vmem:[%s999_s1 + $0x280] sm:$0xff] %v525_v32  ;;  %552 = vtanh.f32 %v166_v28 }
  0x63   :  { %v529_v34 = vpop.eup %528  ;;  %345 = vst [vmem:[%s999_s1 + $0x288] sm:$0xff] %v527_v33  ;;  %554 = vtanh.f32 %v167_v30 }
  0x64   :  { %v531_v35 = vpop.eup %530  ;;  %346 = vst [vmem:[%s999_s1 + $0x290] sm:$0xff] %v529_v34 }
  0x65   :  { %v533_v36 = vpop.eup %532  ;;  %347 = vst [vmem:[%s999_s1 + $0x298] sm:$0xff] %v531_v35 }
  0x66   :  { %v535_v37 = vpop.eup %534  ;;  %348 = vst [vmem:[%s999_s1 + $0x2a0] sm:$0xff] %v533_v36 }
  0x67   :  { %v537_v38 = vpop.eup %536  ;;  %349 = vst [vmem:[%s999_s1 + $0x2a8] sm:$0xff] %v535_v37 }
  0x68   :  { %v539_v39 = vpop.eup %538  ;;  %350 = vst [vmem:[%s999_s1 + $0x2b0] sm:$0xff] %v537_v38 }
  0x69   :  { %v541_v40 = vpop.eup %540  ;;  %351 = vst [vmem:[%s999_s1 + $0x2b8] sm:$0xff] %v539_v39 }
  0x6a   :  { %v543_v41 = vpop.eup %542  ;;  %352 = vst [vmem:[%s999_s1 + $0x2c0] sm:$0xff] %v541_v40 }
  0x6b   :  { %v545_v42 = vpop.eup %544  ;;  %353 = vst [vmem:[%s999_s1 + $0x2c8] sm:$0xff] %v543_v41 }
  0x6c   :  { %v547_v43 = vpop.eup %546  ;;  %354 = vst [vmem:[%s999_s1 + $0x2d0] sm:$0xff] %v545_v42 }
  0x6d   :  { %v549_v44 = vpop.eup %548  ;;  %355 = vst [vmem:[%s999_s1 + $0x2d8] sm:$0xff] %v547_v43 }
  0x6e   :  { %v551_v45 = vpop.eup %550  ;;  %356 = vst [vmem:[%s999_s1 + $0x2e0] sm:$0xff] %v549_v44 }
  0x6f   :  { %v553_v46 = vpop.eup %552  ;;  %357 = vst [vmem:[%s999_s1 + $0x2e8] sm:$0xff] %v551_v45 }
  0x70   :  { %v555_v47 = vpop.eup %554  ;;  %358 = vst [vmem:[%s999_s1 + $0x2f0] sm:$0xff] %v553_v46 }
  0x71   :  { %359 = vst [vmem:[%s999_s1 + $0x2f8] sm:$0xff] %v555_v47 }

</bundles_post_ra>
